<compile_context>
chip_gen: v5e
topology: v5e:2x2
jax: 0.10.0
libtpu: 0.0.40
codegen_flags: <defaults>
</compile_context>

<pallas_src>
import numpy as np
import jax
import jax.numpy as jnp
from jax import lax
from jax.experimental import pallas as pl
from jax.experimental.pallas import tpu as pltpu

SAMPLE_RATE = 16000
N_MELS = 40
N_FFT = 1024
HOP = 256
F_MIN = 0.0
F_MAX = 8000.0
N_FREQ = N_FFT // 2 + 1      # 513 (torchaudio / reference)
N_FREQ_K = N_FFT // 2        # 512 bins used in the kernel (Nyquist fbank row == 0)
MEL_PAD = 128                # lane-dense output width (>= N_MELS)
MAX_ROW_BLOCK = 512          # frames per grid step (multiple of 256 for v6e/v7x MXU)

assert N_MELS <= MEL_PAD, "mel mask / padding scheme assumes N_MELS <= MEL_PAD"


# ----------------------------- parameter setup (deterministic, in-script) ----
def _hz_to_mel(f):
    return 2595.0 * np.log10(1.0 + f / 700.0)


def _mel_to_hz(m):
    return 700.0 * (10.0 ** (m / 2595.0) - 1.0)


def make_mel_fb():
    """torchaudio.functional.melscale_fbanks (htk, norm=None) -> (N_FREQ, N_MELS)."""
    all_freqs = np.linspace(0.0, SAMPLE_RATE // 2, N_FREQ)
    m_pts = np.linspace(_hz_to_mel(F_MIN), _hz_to_mel(F_MAX), N_MELS + 2)
    f_pts = _mel_to_hz(m_pts)
    f_diff = f_pts[1:] - f_pts[:-1]
    slopes = f_pts[None, :] - all_freqs[:, None]          # (N_FREQ, N_MELS+2)
    down = -slopes[:, :-2] / f_diff[:-1]
    up = slopes[:, 2:] / f_diff[1:]
    fb = np.maximum(0.0, np.minimum(down, up))
    return fb.astype(np.float32)


def make_fb_padded():
    """Drop the (zero) Nyquist row and zero-pad mel columns to MEL_PAD -> (512, 128)."""
    fb = make_mel_fb()
    # Exactness of the Nyquist drop relies on f_max == sample_rate / 2.
    assert float(np.max(np.abs(fb[-1]))) < 1e-6, "Nyquist fbank row not ~0"
    fb_pad = np.zeros((N_FREQ_K, MEL_PAD), dtype=np.float32)
    fb_pad[:, :N_MELS] = fb[:N_FREQ_K]
    return fb_pad


def make_window():
    """torch.hann_window(N_FFT, periodic=True), float64."""
    n = np.arange(N_FFT, dtype=np.float64)
    return 0.5 - 0.5 * np.cos(2.0 * np.pi * n / N_FFT)


def make_dft_windowed():
    """Window-folded rFFT basis [cos | sin] -> (N_FFT, 2*N_FREQ_K) = (1024, 1024), f32.

    Sign of the imaginary part is irrelevant (power spectrum squares it).
    Cast to bf16 at the pallas_call boundary (MXU-native).
    """
    k = np.arange(N_FFT, dtype=np.float64)[:, None]
    f = np.arange(N_FREQ_K, dtype=np.float64)[None, :]
    ang = 2.0 * np.pi * k * f / N_FFT
    basis = np.concatenate([np.cos(ang), np.sin(ang)], axis=1)   # (1024, 1024)
    return (basis * make_window()[:, None]).astype(np.float32)


# ----------------------------------- Pallas kernel ----------------------------
def logmel_kernel(frames_ref, dft_ref, fb_ref, out_ref):
    # DFT GEMM: bf16 hi/lo split of the frames against the bf16 window-folded
    # [cos|sin] basis -> 2 native bf16 MXU passes, f32 accumulation.
    x = frames_ref[...]                                          # (RB, 1024) f32
    x_hi = x.astype(jnp.bfloat16)
    x_lo = (x - x_hi.astype(jnp.float32)).astype(jnp.bfloat16)   # residual mantissa bits
    basis = dft_ref[...]                                         # (1024, 1024) bf16
    y = jnp.dot(x_hi, basis, preferred_element_type=jnp.float32)
    y = y + jnp.dot(x_lo, basis, preferred_element_type=jnp.float32)   # (RB, 1024)

    re = y[:, :N_FREQ_K]                                         # lane-aligned split
    im = y[:, N_FREQ_K:]
    power = re * re + im * im                                    # (RB, 512)
    # Mel projection kept in f32 (1/16 of the DFT FLOPs; power has huge dynamic range).
    mel = jnp.dot(power, fb_ref[...], preferred_element_type=jnp.float32)  # (RB, 128)
    log_mel = jnp.log(mel + 1e-9)

    # Per-frame normalization over the mel dimension (PyTorch dim=1).
    # Only the first N_MELS lanes are real mel bins; mask the zero-padded columns
    # out of the statistics. torch.std default is unbiased (N-1).
    mask = lax.broadcasted_iota(jnp.int32, log_mel.shape, 1) < N_MELS
    mean = jnp.sum(jnp.where(mask, log_mel, 0.0), axis=-1, keepdims=True) / N_MELS
    centered = jnp.where(mask, log_mel - mean, 0.0)
    var = jnp.sum(centered * centered, axis=-1, keepdims=True) / (N_MELS - 1)
    std = jnp.sqrt(var)
    out_ref[...] = (log_mel - mean) / (std + 1e-9)   # padded columns sliced off in wrapper


# ------------------------------------ wrapper ---------------------------------
def _round_up(x, m):
    return ((x + m - 1) // m) * m


def log_mel_spectrogram(waveform):
    """waveform: (B, T) float32 -> (B, N_MELS, n_frames) float32."""
    B, T = waveform.shape
    pad = N_FFT // 2
    padded = jnp.pad(waveform, ((0, 0), (pad, pad)), mode="reflect")  # center=True
    n_frames = 1 + T // HOP

    # framing (glue): strided gather into (B*n_frames, N_FFT)
    # TODO(synk): build frames in-kernel from the padded waveform (4 hop-shifted
    # (RB,256)x(256,1024) partial matmuls, since N_FFT = 4*HOP) to avoid materializing
    # the 4x-overlapped frames array in HBM; biggest relative win on v5e.
    idx = jnp.arange(n_frames)[:, None] * HOP + jnp.arange(N_FFT)[None, :]
    frames = padded[:, idx].reshape(B * n_frames, N_FFT).astype(jnp.float32)

    rows = B * n_frames
    rows8 = _round_up(rows, 8)
    # Large inputs: rb = 512 (MXU-shaped M, amortizes per-step overhead).
    # Short inputs: split into >= 2 grid steps so both v7x TensorCores get work.
    rb = min(MAX_ROW_BLOCK, max(8, _round_up((rows8 + 1) // 2, 8)))
    rows_p = _round_up(rows8, rb)
    if rows_p != rows:
        frames = jnp.pad(frames, ((0, rows_p - rows), (0, 0)))

    dft = jnp.asarray(make_dft_windowed(), dtype=jnp.bfloat16)   # (1024, 1024) bf16
    fb = jnp.asarray(make_fb_padded())                           # (512, 128) f32

    # VMEM at rb=512: frames 2x2 MiB + basis 2x2 MiB + fbank/out ~1 MiB  ~= 9 MiB.
    out = pl.pallas_call(
        logmel_kernel,
        out_shape=jax.ShapeDtypeStruct((rows_p, MEL_PAD), jnp.float32),
        grid_spec=pltpu.PrefetchScalarGridSpec(
            num_scalar_prefetch=0,
            grid=(rows_p // rb,),
            in_specs=[
                pl.BlockSpec((rb, N_FFT), lambda i: (i, 0)),             # frames (f32)
                pl.BlockSpec((N_FFT, 2 * N_FREQ_K), lambda i: (0, 0)),   # DFT basis (invariant, bf16)
                pl.BlockSpec((N_FREQ_K, MEL_PAD), lambda i: (0, 0)),     # mel fbank (invariant)
            ],
            out_specs=pl.BlockSpec((rb, MEL_PAD), lambda i: (i, 0)),
        ),
        compiler_params=pltpu.CompilerParams(
            dimension_semantics=("parallel",),
            vmem_limit_bytes=32 * 1024 * 1024,
        ),
    )(frames, dft, fb)

    out = out[:rows, :N_MELS].reshape(B, n_frames, N_MELS)
    return jnp.transpose(out, (0, 2, 1))  # (B, N_MELS, n_frames)


# ------------------------------- reference (pure JAX) --------------------------
def log_mel_spectrogram_ref(waveform):
    B, T = waveform.shape
    pad = N_FFT // 2
    padded = jnp.pad(waveform, ((0, 0), (pad, pad)), mode="reflect")
    n_frames = 1 + T // HOP
    idx = jnp.arange(n_frames)[:, None] * HOP + jnp.arange(N_FFT)[None, :]
    frames = padded[:, idx] * jnp.asarray(make_window().astype(np.float32))[None, None, :]
    spec = jnp.abs(jnp.fft.rfft(frames, axis=-1)) ** 2            # (B, F, N_FREQ)
    mel = jnp.einsum("bfk,km->bfm", spec, jnp.asarray(make_mel_fb()))
    log_mel = jnp.log(mel + 1e-9)
    mean = jnp.mean(log_mel, axis=-1, keepdims=True)
    std = jnp.sqrt(
        jnp.sum((log_mel - mean) ** 2, axis=-1, keepdims=True) / (N_MELS - 1)
    )
    out = (log_mel - mean) / (std + 1e-9)
    return jnp.transpose(out, (0, 2, 1))


if __name__ == "__main__":
    key = jax.random.PRNGKey(0)
    B, T = 2, 1792  # -> 8 frames per batch element
    waveform = jax.random.normal(key, (B, T), dtype=jnp.float32)

    out = log_mel_spectrogram(waveform)
    out = jax.block_until_ready(out)

    ref = jax.block_until_ready(log_mel_spectrogram_ref(waveform))
    assert out.shape == (B, N_MELS, 1 + T // HOP), out.shape
    # Tolerance reflects the bf16 [cos|sin] basis (unit roundoff ~4e-3) propagating
    # through power -> log -> per-frame normalize; frame (LHS) precision is preserved
    # by the in-kernel hi/lo split, so observed error is a few 1e-3 on O(1) outputs.
    assert jnp.allclose(out, ref, rtol=5e-3, atol=1e-2), float(
        jnp.max(jnp.abs(out - ref))
    )
    print("KERNEL_OK")
</pallas_src>

<mosaic_0001>
module attributes {stable_mosaic.version = 11 : i64} {
  func.func @logmel_kernel(%arg0: i32, %arg1: memref<8x1024xf32, #tpu.memory_space<vmem>>, %arg2: memref<1024x1024xbf16, #tpu.memory_space<vmem>>, %arg3: memref<512x128xf32, #tpu.memory_space<vmem>>, %arg4: memref<8x128xf32, #tpu.memory_space<vmem>>) attributes {dimension_semantics = [#tpu.dimension_semantics<parallel>], iteration_bounds = array<i64: 2>, scalar_prefetch = 0 : i64, scratch_operands = 0 : i64, tpu.core_type = #tpu.core_type<tc>, window_params = [{transform_indices = @transform_0, window_bounds = array<i64: 8, 1024>}, {pipeline_mode = #tpu.pipeline_mode<synchronous>, transform_indices = @transform_1, window_bounds = array<i64: 1024, 1024>}, {pipeline_mode = #tpu.pipeline_mode<synchronous>, transform_indices = @transform_2, window_bounds = array<i64: 512, 128>}, {transform_indices = @transform_3, window_bounds = array<i64: 8, 128>}]} {
    %c0 = arith.constant 0 : index
    %c0_0 = arith.constant 0 : index
    %0 = vector.load %arg1[%c0, %c0_0] : memref<8x1024xf32, #tpu.memory_space<vmem>>, vector<8x1024xf32>
    %1 = arith.truncf %0 : vector<8x1024xf32> to vector<8x1024xbf16>
    %2 = arith.extf %1 : vector<8x1024xbf16> to vector<8x1024xf32>
    %3 = arith.subf %0, %2 : vector<8x1024xf32>
    %4 = arith.truncf %3 : vector<8x1024xf32> to vector<8x1024xbf16>
    %c0_1 = arith.constant 0 : index
    %c0_2 = arith.constant 0 : index
    %5 = vector.load %arg2[%c0_1, %c0_2] : memref<1024x1024xbf16, #tpu.memory_space<vmem>>, vector<1024x1024xbf16>
    %cst = arith.constant dense<0.000000e+00> : vector<8x1024xf32>
    %6 = tpu.matmul %1, %5, %cst {dimension_numbers = #tpu.dot_dimension_numbers<[1], [0], [0], [1], [0, 0, 1, 1], [], []>} : vector<8x1024xbf16>, vector<1024x1024xbf16>, vector<8x1024xf32> -> vector<8x1024xf32>
    %cst_3 = arith.constant dense<0.000000e+00> : vector<8x1024xf32>
    %7 = tpu.matmul %4, %5, %cst_3 {dimension_numbers = #tpu.dot_dimension_numbers<[1], [0], [0], [1], [0, 0, 1, 1], [], []>} : vector<8x1024xbf16>, vector<1024x1024xbf16>, vector<8x1024xf32> -> vector<8x1024xf32>
    %8 = arith.addf %6, %7 : vector<8x1024xf32>
    %9 = vector.extract_strided_slice %8 {offsets = [0, 0], sizes = [8, 512], strides = [1, 1]} : vector<8x1024xf32> to vector<8x512xf32>
    %10 = vector.extract_strided_slice %8 {offsets = [0, 512], sizes = [8, 512], strides = [1, 1]} : vector<8x1024xf32> to vector<8x512xf32>
    %11 = arith.mulf %9, %9 : vector<8x512xf32>
    %12 = arith.mulf %10, %10 : vector<8x512xf32>
    %13 = arith.addf %11, %12 : vector<8x512xf32>
    %c0_4 = arith.constant 0 : index
    %c0_5 = arith.constant 0 : index
    %14 = vector.load %arg3[%c0_4, %c0_5] : memref<512x128xf32, #tpu.memory_space<vmem>>, vector<512x128xf32>
    %cst_6 = arith.constant dense<0.000000e+00> : vector<8x128xf32>
    %15 = tpu.matmul %13, %14, %cst_6 {dimension_numbers = #tpu.dot_dimension_numbers<[1], [0], [0], [1], [0, 0, 1, 1], [], []>} : vector<8x512xf32>, vector<512x128xf32>, vector<8x128xf32> -> vector<8x128xf32>
    %cst_7 = arith.constant 9.99999971E-10 : f32
    %16 = vector.broadcast %cst_7 : f32 to vector<8x128xf32>
    %17 = arith.addf %15, %16 : vector<8x128xf32>
    %18 = math.log %17 : vector<8x128xf32>
    %19 = tpu.iota {dimensions = array<i32: 1>} : vector<8x128xi32>
    %c40_i32 = arith.constant 40 : i32
    %20 = vector.broadcast %c40_i32 : i32 to vector<8x128xi32>
    %21 = arith.cmpi slt, %19, %20 : vector<8x128xi32>
    %cst_8 = arith.constant 0.000000e+00 : f32
    %22 = vector.broadcast %cst_8 : f32 to vector<8x128xf32>
    %23 = arith.select %21, %18, %22 : vector<8x128xi1>, vector<8x128xf32>
    %cst_9 = arith.constant dense<0.000000e+00> : vector<8xf32>
    %24 = vector.multi_reduction <add>, %23, %cst_9 [1] : vector<8x128xf32> to vector<8xf32>
    %25 = vector.shape_cast %24 : vector<8xf32> to vector<8x1xf32>
    %cst_10 = arith.constant 4.000000e+01 : f32
    %26 = vector.broadcast %cst_10 : f32 to vector<8x1xf32>
    %27 = arith.divf %25, %26 : vector<8x1xf32>
    %28 = vector.broadcast %27 : vector<8x1xf32> to vector<8x128xf32>
    %29 = arith.subf %18, %28 : vector<8x128xf32>
    %cst_11 = arith.constant 0.000000e+00 : f32
    %30 = vector.broadcast %cst_11 : f32 to vector<8x128xf32>
    %31 = arith.select %21, %29, %30 : vector<8x128xi1>, vector<8x128xf32>
    %32 = arith.mulf %31, %31 : vector<8x128xf32>
    %cst_12 = arith.constant dense<0.000000e+00> : vector<8xf32>
    %33 = vector.multi_reduction <add>, %32, %cst_12 [1] : vector<8x128xf32> to vector<8xf32>
    %34 = vector.shape_cast %33 : vector<8xf32> to vector<8x1xf32>
    %cst_13 = arith.constant 3.900000e+01 : f32
    %35 = vector.broadcast %cst_13 : f32 to vector<8x1xf32>
    %36 = arith.divf %34, %35 : vector<8x1xf32>
    %37 = math.sqrt %36 : vector<8x1xf32>
    %38 = vector.broadcast %27 : vector<8x1xf32> to vector<8x128xf32>
    %39 = arith.subf %18, %38 : vector<8x128xf32>
    %cst_14 = arith.constant 9.99999971E-10 : f32
    %40 = vector.broadcast %cst_14 : f32 to vector<8x1xf32>
    %41 = arith.addf %37, %40 : vector<8x1xf32>
    %42 = vector.broadcast %41 : vector<8x1xf32> to vector<8x128xf32>
    %43 = arith.divf %39, %42 : vector<8x128xf32>
    %c0_15 = arith.constant 0 : index
    %c0_16 = arith.constant 0 : index
    %44 = vector.load %arg4[%c0_15, %c0_16] : memref<8x128xf32, #tpu.memory_space<vmem>>, vector<8x128xf32>
    tpu.vector_store %arg4[%c0_15, %c0_16], %43 {strides = array<i32>} : memref<8x128xf32, #tpu.memory_space<vmem>>, vector<8x128xf32>,
    return
  }
  func.func @transform_0(%arg0: i32) -> (i32, i32) {
    %c0_i32 = arith.constant 0 : i32
    %c0_i32_0 = arith.constant 0 : i32
    return %arg0, %c0_i32 : i32, i32
  }
  func.func @transform_1(%arg0: i32) -> (i32, i32) {
    %c0_i32 = arith.constant 0 : i32
    %c0_i32_0 = arith.constant 0 : i32
    %c0_i32_1 = arith.constant 0 : i32
    return %c0_i32, %c0_i32_0 : i32, i32
  }
  func.func @transform_2(%arg0: i32) -> (i32, i32) {
    %c0_i32 = arith.constant 0 : i32
    %c0_i32_0 = arith.constant 0 : i32
    %c0_i32_1 = arith.constant 0 : i32
    return %c0_i32, %c0_i32_0 : i32, i32
  }
  func.func @transform_3(%arg0: i32) -> (i32, i32) {
    %c0_i32 = arith.constant 0 : i32
    %c0_i32_0 = arith.constant 0 : i32
    return %arg0, %c0_i32 : i32, i32
  }
}

</mosaic_0001>

<bundles_post_ra>
// kernel: tpu_custom_call.1
= control target key start
LH: loop header
LB: loop body
LE: loop exit
PB: predicated region body
PF: predicated region fallthrough
CT: control target
= control target key end

     0   :  { %8 = vsyncpa [#allocation3], 0  ;;  %s10643_s0 = inlined_call_operand.hbm [shape: f32[16,1024], index: 0, kind: input, shape index: {}]   ;;  %s10644_s1 = inlined_call_operand.hbm [shape: bf16[1024,1024], index: 1, kind: input, shape index: {}]   ;;  %s10645_s2 = inlined_call_operand.hbm [shape: f32[512,128], index: 2, kind: input, shape index: {}]   ;;  %s10646_s3 = inlined_call_operand.hbm [shape: f32[16,128], index: 3, kind: output, shape index: {}]  }
   0x1   :  { %10 = vsyncpa [#allocation3 + $0x1], 0 }
   0x2   :  { %11 = vsyncpa [#allocation6], 0 }
   0x3   :  { %12 = vsyncpa [#allocation4], 0 }
   0x4   :  { %14 = vsyncpa [#allocation4 + $0x1], 0  ;;  %s8192_s12 = smov 0   ;;  %s8194_s13 = smov 0  }
   0x5   :  { %s8196_s14 = smov 0   ;;  %s8198_s15 = smov 0  }
   0x6 LB: > { %s130_s18 = sshll.u32 %s10644_s1, 4  ;;  %s8216_s19 = sadd.s32 4294967295, %s8162_s15   ;;  %s8162_s15 = sphi %s8198_s15, %s12079_s15   ;;  %s8158_s14 = sphi %s8196_s14, %s12078_s14   ;;  %s8154_s13 = sphi %s8194_s13, %s12077_s13   ;;  %s8150_s12 = sphi %s8192_s12, %s12076_s12   ;;  %s131_s18 = int_to_ptr.hbm [resolvable:$true] %s130_s18 }
   0x7   : > { %p5342_p0 = scmp.ge.s32.totalorder %s8162_s15, 1  ;;  %p41_p1 = scmp.eq.s32.totalorder %s8216_s19, 0 }
   0x8   : > { %p119_p2 = scmp.lt.s32.totalorder %s8162_s15, 3  ;;  %s8164_s21 = smov [#allocation5]  }
   0x9   : > { %s132_s22 = sshll.u32 %s8164_s21, 4  ;;  %s144_s25 = sshll.u32 %s10645_s2, 4  ;;  %s133_s22 = int_to_ptr.vmem [resolvable:$true] %s132_s22  ;;  %s145_s25 = int_to_ptr.hbm [resolvable:$true] %s144_s25 }
   0xa   : > { %p8221_p3 = pnand %p5342_p0, %p119_p2  ;;  %s8165_s26 = smov [#allocation7]  }
   0xb   : > { %s146_s27 = sshll.u32 %s8165_s26, 4  ;;  %s8166_s28 = smov 512   ;;  %s147_s27 = int_to_ptr.vmem [resolvable:$true] %s146_s27 }
   0xc   : > { %p7931_p4 = pneg %p8221_p3  ;;  %s8167_s29 = smov 32  }
   0xd   : > { %s8168_s30 = smov 128   ;;  %s8169_s4 = smov 8  }
   0xe   : > { %p7932_p6 = pnand %p7931_p4, %p41_p1  ;;  %s5341_s5 = sadd.s32 4294967294, %s8162_s15  }
   0xf   : > { %s8235_s6 = sadd.s32 1, %s8162_s15   ;;  %s27_s8 = sadd.s32 1, %s8158_s14 }
  0x10   : > { %7934 = dma.hbm_to_vmem [thread:$0]  (!%p7932_p6), %s131_s18, 65536, %s133_s22, [#allocation6], %s8166_s28, %s8166_s28, %s8167_s29  }
  0x11   : > { %7937 = dma.hbm_to_vmem [thread:$0]  (!%p7932_p6), %s145_s25, 8192, %s147_s27, [#allocation6], %s8168_s30, %s8168_s30, %s8169_s4  }
  0x12   : > { %s24_s7 = ssub.s32 %s8162_s15, %s8235_s6  ;;  %p34_p8 = scmp.ne.s32.totalorder %s8158_s14, %s8154_s13 }
  0x13   : > { %p25_p7 = scmp.eq.s32.totalorder %s24_s7, 0  ;;  %p35_p9 = scmp.eq.s32.totalorder %s8162_s15, 0 }
  0x14   : > { %p40_p10 = scmp.ne.s32.totalorder %s8154_s13, %s8150_s12  ;;  %p106_p13 = scmp.eq.s32.totalorder %s8216_s19, 1 }
  0x15   : > { %s8246_s9 = scalar_select %p25_p7, %s8158_s14, %s27_s8  }
  0x16   : > { %p8248_p11 = por %p35_p9, %p34_p8  ;;  %p8254_p12 = por %p41_p1, %p40_p10 }
  0x17   : > { %p112_p0 = scmp.eq.s32.totalorder %s5341_s5, 1  ;;  %p7948_p2 = scmp.lt.s32.totalorder %s8162_s15, 2 }
  0x18   : > { %s160_s16 = sand.u32 1, %s8158_s14   ;;  %p8261_p4 = por %p106_p13, %p34_p8 }
  0x19   : > { %p8265_p6 = por %p112_p0, %p40_p10  ;;  %s5346_s21 = sshll.u32 %s160_s16, 6 }
  0x1a   : > { %s7406_s22 = sshll.u32 %s8162_s15, 6  ;;  %s164_s26 = scalar_lea.vmem [#allocation2], %s5346_s21 }
  0x1b   : > { %s169_s25 = scalar_lea.hbm %s10643_s0, %s7406_s22  ;;  %s173_s27 = sshll.u32 %s164_s26, 4  ;;  %s174_s27 = int_to_ptr.vmem [resolvable:$true] %s173_s27 }
  0x1c   : > { %s171_s28 = sshll.u32 %s169_s25, 4  ;;  %p8275_p7 = pnand %p7948_p2, %p8248_p11  ;;  %s172_s28 = int_to_ptr.hbm [resolvable:$true] %s171_s28 }
  0x1d   : > { %s161_s30 = scalar_lea.sflag [#allocation3], %s160_s16  ;;  %s8062_s4 = sshra.s32 %s172_s28, 4  ;;  %s8063_s4 = int_to_ptr.hbm [resolvable:$true] %s8062_s4 }
  0x1e   : > { %s8064_s5 = scalar_lea.hbm %s8063_s4, 64  ;;  %p8066_p9 = pneg %p8275_p7 }
  0x1f   : > { %p8065_p8 = scmp.ne.s32.totalorder %s8063_s4, %s8064_s5  ;;  %s8069_s21 = scalar_lea.hbm %s10643_s0, 128 }
  0x20   : > { %p8070_p11 = scmp.lt.s32.totalorder %s8063_s4, %s10643_s0  ;;  %p8071_p0 = scmp.lt.s32.totalorder %s8069_s21, %s8064_s5 }
  0x21   : > { %p8067_p10 = pnand %p8066_p9, %p8065_p8 }
  0x22   : > { %p8072_p2 = por %p8071_p0, %p8070_p11 }
  0x23   : > { %p8068_p13 = pneg %p8067_p10 }
  0x25   : > { %p8073_p5 = pnand %p8072_p2, %p8068_p13 }
  0x27   : > { %8076 = shalt.err (!%p8073_p5)
}
  0x28   : > { %7941 = dma.hbm_to_vmem [thread:$0]  (!%p8275_p7), %s172_s28, 1024, %s174_s27, %s161_s30  }
  0x29   : > { %182 = sbr.rel (%p8221_p3) target bundleno = 2039 (0x7f7), region = 32 }
  0x2e   : > { %s8292_s16 = sand.u32 1, %s8154_s13  }
  0x2f   : > { %s5350_s23 = sshll.u32 %s8292_s16, 6  ;;  %s185_s24 = scalar_lea.sflag [#allocation3], %s8292_s16 }
  0x30   : > { %s8296_s25 = scalar_lea.vmem [#allocation2], %s5350_s23 }
  0x31   : > { %8137 = dma.done.wait (%p8254_p12), %s185_s24, 1024  }
  0x32   : > { %8139 = vsyncadd (%p8254_p12), %s185_s24, 4294966272 }
  0x33   : > { %8141 = dma.done.wait (%p41_p1), [#allocation6], 73728  }
  0x34   : > { %8143 = vsyncadd (%p41_p1), [#allocation6], 4294893568  ;;  %v5580_v0 = vld [vmem:[#allocation5 + $0x1c0] sm:$0xf]  ;;  %s5353_s20 = sshll.u32 %s8292_s16, 3  ;;  %s7403_s11 = sshll.u32 %s8216_s19, 3 }
  0x35   : > { %v7467_v1 = vld [vmem:[#allocation5 + $0x1dc] sm:$0xf0]  ;;  %s5247_s28 = scalar_lea.hbm %s10646_s3, %s7403_s11  ;;  %s221_s29 = scalar_lea.vmem [#allocation8], %s5353_s20 }
  0x36   : > { %v5836_v2 = vld [vmem:[#allocation5 + $0x3c0] sm:$0xf]  ;;  %v8306_v3 = vor.u32 %v7467_v1, %v5580_v0  ;;  %s5249_s30 = sshll.u32 %s221_s29, 4  ;;  %s5251_s4 = sshll.u32 %s5247_s28, 4  ;;  %s5250_s30 = int_to_ptr.vmem [resolvable:$true] %s5249_s30  ;;  %s5252_s4 = int_to_ptr.hbm [resolvable:$true] %s5251_s4 }
  0x37   : > { %v7531_v4 = vld [vmem:[#allocation5 + $0x3dc] sm:$0xf0]  ;;  %s5237_s19 = scalar_lea.sflag [#allocation4], %s8292_s16  ;;  %s8106_s5 = sshra.s32 %s5252_s4, 4  ;;  %s8107_s5 = int_to_ptr.hbm [resolvable:$true] %s8106_s5 }
  0x38   : > { %v6092_v5 = vld [vmem:[#allocation5 + $0x5c0] sm:$0xf]  ;;  %v8308_v7 = vor.u32 %v7531_v4, %v5836_v2  ;;  %3330 = vmatpush.bf16.msra.mxu0 %v8306_v3  ;;  %s8108_s7 = scalar_lea.hbm %s8107_s5, 8  ;;  %s8112_s22 = scalar_lea.hbm %s10646_s3, 16 }
  0x39   : > { %v7595_v6 = vld [vmem:[#allocation5 + $0x5dc] sm:$0xf0]  ;;  %p8109_p1 = scmp.ne.s32.totalorder %s8107_s5, %s8108_s7  ;;  %p8113_p12 = scmp.lt.s32.totalorder %s8107_s5, %s10646_s3 }
  0x3a   : > { %v8310_v8 = vor.u32 %v7595_v6, %v6092_v5  ;;  %v6348_v9 = vld [vmem:[#allocation5 + $0x7c0] sm:$0xf]  ;;  %3343 = vmatpush.bf16.msra.mxu1 %v8308_v7  ;;  %p8114_p7 = scmp.lt.s32.totalorder %s8112_s22, %s8108_s7 }
  0x3b   : > { %v7659_v10 = vld [vmem:[#allocation5 + $0x7dc] sm:$0xf0]  ;;  %p8110_p3 = pnand %p8109_p1, %p8261_p4 }
  0x3c   : > { %v5548_v11 = vld [vmem:[#allocation5 + $0x180] sm:$0xf]  ;;  %v8313_v12 = vor.u32 %v7659_v10, %v6348_v9  ;;  %3356 = vmatpush.bf16.msra.mxu2 %v8310_v8  ;;  %p8115_p8 = por %p8114_p7, %p8113_p12 }
  0x3d   : > { %v7459_v13 = vld [vmem:[#allocation5 + $0x19c] sm:$0xf0]  ;;  %p8111_p5 = pneg %p8110_p3 }
  0x3e   : > { %v5804_v14 = vld [vmem:[#allocation5 + $0x380] sm:$0xf]  ;;  %v8317_v16 = vor.u32 %v7459_v13, %v5548_v11  ;;  %3369 = vmatpush.bf16.msra.mxu3 %v8313_v12 }
  0x3f   : > { %v7523_v15 = vld [vmem:[#allocation5 + $0x39c] sm:$0xf0]  ;;  %p8116_p9 = pnand %p8115_p8, %p8111_p5 }
  0x40   : > { %v8319_v17 = vor.u32 %v7523_v15, %v5804_v14  ;;  %v6060_v18 = vld [vmem:[#allocation5 + $0x580] sm:$0xf]  ;;  %3331 = vmatpush.bf16.msra.mxu0 %v8317_v16 }
  0x41   : > { %v7587_v19 = vld [vmem:[#allocation5 + $0x59c] sm:$0xf0] }
  0x42   : > { %v6316_v20 = vld [vmem:[#allocation5 + $0x780] sm:$0xf]  ;;  %v8322_v21 = vor.u32 %v7587_v19, %v6060_v18  ;;  %3344 = vmatpush.bf16.msra.mxu1 %v8319_v17 }
  0x43   : > { %v7651_v22 = vld [vmem:[#allocation5 + $0x79c] sm:$0xf0] }
  0x44   : > { %v5516_v23 = vld [vmem:[#allocation5 + $0x140] sm:$0xf]  ;;  %v8324_v25 = vor.u32 %v7651_v22, %v6316_v20  ;;  %3357 = vmatpush.bf16.msra.mxu2 %v8322_v21 }
  0x45   : > { %v7451_v24 = vld [vmem:[#allocation5 + $0x15c] sm:$0xf0] }
  0x46   : > { %v5772_v26 = vld [vmem:[#allocation5 + $0x340] sm:$0xf]  ;;  %v8327_v29 = vor.u32 %v7451_v24, %v5516_v23  ;;  %3370 = vmatpush.bf16.msra.mxu3 %v8324_v25 }
  0x47   : > { %v7515_v27 = vld [vmem:[#allocation5 + $0x35c] sm:$0xf0] }
  0x48   : > { %v6028_v28 = vld [vmem:[#allocation5 + $0x540] sm:$0xf]  ;;  %v8331_v33 = vor.u32 %v7515_v27, %v5772_v26  ;;  %3332 = vmatpush.bf16.msra.mxu0 %v8327_v29 }
  0x49   : > { %v7579_v30 = vld [vmem:[#allocation5 + $0x55c] sm:$0xf0] }
  0x4a   : > { %v6284_v31 = vld [vmem:[#allocation5 + $0x740] sm:$0xf]  ;;  %v8333_v34 = vor.u32 %v7579_v30, %v6028_v28  ;;  %3345 = vmatpush.bf16.msra.mxu1 %v8331_v33 }
  0x4b   : > { %v7643_v32 = vld [vmem:[#allocation5 + $0x75c] sm:$0xf0] }
  0x4c   : > { %v5484_v35 = vld [vmem:[#allocation5 + $0x100] sm:$0xf]  ;;  %v8336_v38 = vor.u32 %v7643_v32, %v6284_v31  ;;  %3358 = vmatpush.bf16.msra.mxu2 %v8333_v34 }
  0x4d   : > { %v7443_v36 = vld [vmem:[#allocation5 + $0x11c] sm:$0xf0] }
  0x4e   : > { %v5740_v37 = vld [vmem:[#allocation5 + $0x300] sm:$0xf]  ;;  %v8339_v44 = vor.u32 %v7443_v36, %v5484_v35  ;;  %3371 = vmatpush.bf16.msra.mxu3 %v8336_v38 }
  0x4f   : > { %v7507_v39 = vld [vmem:[#allocation5 + $0x31c] sm:$0xf0] }
  0x50   : > { %v5996_v40 = vld [vmem:[#allocation5 + $0x500] sm:$0xf]  ;;  %v8343_v45 = vor.u32 %v7507_v39, %v5740_v37  ;;  %3333 = vmatpush.bf16.msra.mxu0 %v8339_v44 }
  0x51   : > { %v7571_v41 = vld [vmem:[#allocation5 + $0x51c] sm:$0xf0] }
  0x52   : > { %v6252_v42 = vld [vmem:[#allocation5 + $0x700] sm:$0xf]  ;;  %v8345_v46 = vor.u32 %v7571_v41, %v5996_v40  ;;  %3346 = vmatpush.bf16.msra.mxu1 %v8343_v45 }
  0x53   : > { %v7635_v43 = vld [vmem:[#allocation5 + $0x71c] sm:$0xf0] }
  0x54   : > { %v5452_v47 = vld [vmem:[#allocation5 + $0xc0] sm:$0xf]  ;;  %v8348_v50 = vor.u32 %v7635_v43, %v6252_v42  ;;  %3359 = vmatpush.bf16.msra.mxu2 %v8345_v46 }
  0x55   : > { %v7435_v48 = vld [vmem:[#allocation5 + $0xdc] sm:$0xf0] }
  0x56   : > { %v5708_v49 = vld [vmem:[#allocation5 + $0x2c0] sm:$0xf]  ;;  %v8351_v56 = vor.u32 %v7435_v48, %v5452_v47  ;;  %3372 = vmatpush.bf16.msra.mxu3 %v8348_v50 }
  0x57   : > { %v7499_v51 = vld [vmem:[#allocation5 + $0x2dc] sm:$0xf0] }
  0x58   : > { %v5964_v52 = vld [vmem:[#allocation5 + $0x4c0] sm:$0xf]  ;;  %v8355_v57 = vor.u32 %v7499_v51, %v5708_v49  ;;  %3334 = vmatpush.bf16.msra.mxu0 %v8351_v56 }
  0x59   : > { %v7563_v53 = vld [vmem:[#allocation5 + $0x4dc] sm:$0xf0] }
  0x5a   : > { %v6220_v54 = vld [vmem:[#allocation5 + $0x6c0] sm:$0xf]  ;;  %v8357_v58 = vor.u32 %v7563_v53, %v5964_v52  ;;  %3347 = vmatpush.bf16.msra.mxu1 %v8355_v57 }
  0x5b   : > { %v7627_v55 = vld [vmem:[#allocation5 + $0x6dc] sm:$0xf0] }
  0x5c   : > { %v5420_v59 = vld [vmem:[#allocation5 + $0x80] sm:$0xf]  ;;  %v8360_v62 = vor.u32 %v7627_v55, %v6220_v54  ;;  %3360 = vmatpush.bf16.msra.mxu2 %v8357_v58 }
  0x5d   : > { %v7427_v60 = vld [vmem:[#allocation5 + $0x9c] sm:$0xf0] }
  0x5e   : > { %v5676_v61 = vld [vmem:[#allocation5 + $0x280] sm:$0xf]  ;;  %v8363_v5 = vor.u32 %v7427_v60, %v5420_v59  ;;  %3373 = vmatpush.bf16.msra.mxu3 %v8360_v62 }
  0x5f   : > { %v7491_v63 = vld [vmem:[#allocation5 + $0x29c] sm:$0xf0] }
  0x60   : > { %v5932_v0 = vld [vmem:[#allocation5 + $0x480] sm:$0xf]  ;;  %v8367_v6 = vor.u32 %v7491_v63, %v5676_v61  ;;  %3335 = vmatpush.bf16.msra.mxu0 %v8363_v5 }
  0x61   : > { %v7555_v1 = vld [vmem:[#allocation5 + $0x49c] sm:$0xf0] }
  0x62   : > { %v6188_v2 = vld [vmem:[#allocation5 + $0x680] sm:$0xf]  ;;  %v8369_v9 = vor.u32 %v7555_v1, %v5932_v0  ;;  %3348 = vmatpush.bf16.msra.mxu1 %v8367_v6 }
  0x63   : > { %v7619_v4 = vld [vmem:[#allocation5 + $0x69c] sm:$0xf0] }
  0x64   : > { %v5388_v10 = vld [vmem:[#allocation5 + $0x40] sm:$0xf]  ;;  %v8372_v14 = vor.u32 %v7619_v4, %v6188_v2  ;;  %3361 = vmatpush.bf16.msra.mxu2 %v8369_v9 }
  0x65   : > { %v7419_v11 = vld [vmem:[#allocation5 + $0x5c] sm:$0xf0] }
  0x66   : > { %v5644_v13 = vld [vmem:[#allocation5 + $0x240] sm:$0xf]  ;;  %v8375_v23 = vor.u32 %v7419_v11, %v5388_v10  ;;  %3374 = vmatpush.bf16.msra.mxu3 %v8372_v14 }
  0x67   : > { %v7483_v15 = vld [vmem:[#allocation5 + $0x25c] sm:$0xf0] }
  0x68   : > { %v5900_v18 = vld [vmem:[#allocation5 + $0x440] sm:$0xf]  ;;  %v8379_v27 = vor.u32 %v7483_v15, %v5644_v13  ;;  %3336 = vmatpush.bf16.msra.mxu0 %v8375_v23 }
  0x69   : > { %v7547_v19 = vld [vmem:[#allocation5 + $0x45c] sm:$0xf0] }
  0x6a   : > { %v6156_v20 = vld [vmem:[#allocation5 + $0x640] sm:$0xf]  ;;  %11127 = vst [vmem:[#allocation12_spill] sm:$0xff] %v8379_v27  ;;  %v8381_v28 = vor.u32 %v7547_v19, %v5900_v18  ;;  %3349 = vmatpush.bf16.msra.mxu1 %v8379_v27 }
  0x6b   : > { %v7611_v22 = vld [vmem:[#allocation5 + $0x65c] sm:$0xf0] }
  0x6c   : > { %v5356_v24 = vld [vmem:[#allocation5] sm:$0xf]  ;;  %11128 = vst [vmem:[#allocation13_spill] sm:$0xff] %v8381_v28  ;;  %v8384_v35 = vor.u32 %v7611_v22, %v6156_v20  ;;  %3362 = vmatpush.bf16.msra.mxu2 %v8381_v28 }
  0x6d   : > { %v7411_v26 = vld [vmem:[#allocation5 + $0x1c] sm:$0xf0] }
  0x6e   : > { %v5612_v30 = vld [vmem:[#allocation5 + $0x200] sm:$0xf]  ;;  %11129 = vst [vmem:[#allocation14_spill] sm:$0xff] %v8384_v35  ;;  %v8387_v43 = vor.u32 %v7411_v26, %v5356_v24  ;;  %3375 = vmatpush.bf16.msra.mxu3 %v8384_v35  ;;  %v5838_v35 = vld [vmem:[#allocation5 + $0x3e0] sm:$0xf0] }
  0x6f   : > { %v7475_v31 = vld [vmem:[#allocation5 + $0x21c] sm:$0xf0] }
  0x70   : > { %v5868_v32 = vld [vmem:[#allocation5 + $0x400] sm:$0xf]  ;;  %11130 = vst [vmem:[#allocation15_spill] sm:$0xff] %v8387_v43  ;;  %v8391_v51 = vor.u32 %v7475_v31, %v5612_v30  ;;  %3337 = vmatpush.bf16.msra.mxu0 %v8387_v43  ;;  %v224_v31 = vld [vmem:[%s8296_s25 + $0x10] sm:$0xff] }
  0x71   : > { %v7539_v36 = vld [vmem:[#allocation5 + $0x41c] sm:$0xf0] }
  0x72   : > { %v6124_v37 = vld [vmem:[#allocation5 + $0x600] sm:$0xf]  ;;  %11131 = vst [vmem:[#allocation16_spill] sm:$0xff] %v8391_v51  ;;  %v8393_v52 = vor.u32 %v7539_v36, %v5868_v32  ;;  %3350 = vmatpush.bf16.msra.mxu1 %v8391_v51 }
  0x73   : > { %v7603_v39 = vld [vmem:[#allocation5 + $0x61c] sm:$0xf0] }
  0x74   : > { %v6604_v40 = vld [vmem:[#allocation5 + $0x9c0] sm:$0xf]  ;;  %11132 = vst [vmem:[#allocation17_spill] sm:$0xff] %v8393_v52  ;;  %v8396_v55 = vor.u32 %v7603_v39, %v6124_v37  ;;  %3363 = vmatpush.bf16.msra.mxu2 %v8393_v52  ;;  %v225_v39 = vld [vmem:[%s8296_s25 + $0x18] sm:$0xff] }
  0x75   : > { %v7723_v41 = vld [vmem:[#allocation5 + $0x9dc] sm:$0xf0] }
  0x76   : > { %v6860_v42 = vld [vmem:[#allocation5 + $0xbc0] sm:$0xf]  ;;  %11133 = vst [vmem:[#allocation18_spill] sm:$0xff] %v8396_v55  ;;  %v8398_v59 = vor.u32 %v7723_v41, %v6604_v40  ;;  %3376 = vmatpush.bf16.msra.mxu3 %v8396_v55 }
  0x77   : > { %v7787_v47 = vld [vmem:[#allocation5 + $0xbdc] sm:$0xf0] }
  0x78   : > { %v7116_v48 = vld [vmem:[#allocation5 + $0xdc0] sm:$0xf]  ;;  %11134 = vst [vmem:[#allocation19_spill] sm:$0xff] %v8398_v59  ;;  %v8400_v60 = vor.u32 %v7787_v47, %v6860_v42  ;;  %3382 = vmatpush.bf16.msrb.mxu0 %v8398_v59  ;;  %v8424_v42 = vpack.c.bf16 %v225_v39, %v224_v31 }
  0x79   : > { %v7851_v49 = vld [vmem:[#allocation5 + $0xddc] sm:$0xf0] }
  0x7a   : > { %v7372_v53 = vld [vmem:[#allocation5 + $0xfc0] sm:$0xf]  ;;  %11135 = vst [vmem:[#allocation20_spill] sm:$0xff] %v8400_v60  ;;  %v8402_v61 = vor.u32 %v7851_v49, %v7116_v48  ;;  %3395 = vmatpush.bf16.msrb.mxu1 %v8400_v60 }
  0x7b   : > { %v7915_v54 = vld [vmem:[#allocation5 + $0xfdc] sm:$0xf0]  ;;  %11142 = vst [vmem:[#allocation27_spill] sm:$0xff] %v8424_v42 }
  0x7c   : > { %11136 = vst [vmem:[#allocation21_spill] sm:$0xff] %v8402_v61  ;;  %v6572_v63 = vld [vmem:[#allocation5 + $0x980] sm:$0xf]  ;;  %v8405_v2 = vor.u32 %v7915_v54, %v7372_v53  ;;  %3408 = vmatpush.bf16.msrb.mxu2 %v8402_v61 }
  0x7d   : > { %v7715_v0 = vld [vmem:[#allocation5 + $0x99c] sm:$0xf0] }
  0x7e   : > { %v6828_v1 = vld [vmem:[#allocation5 + $0xb80] sm:$0xf]  ;;  %11137 = vst [vmem:[#allocation22_spill] sm:$0xff] %v8405_v2  ;;  %v8411_v18 = vor.u32 %v7715_v0, %v6572_v63  ;;  %3421 = vmatpush.bf16.msrb.mxu3 %v8405_v2 }
  0x7f   : > { %v7779_v4 = vld [vmem:[#allocation5 + $0xb9c] sm:$0xf0] }
  0x80   : > { %v7084_v10 = vld [vmem:[#allocation5 + $0xd80] sm:$0xf]  ;;  %11138 = vst [vmem:[#allocation23_spill] sm:$0xff] %v8411_v18  ;;  %v8415_v22 = vor.u32 %v7779_v4, %v6828_v1  ;;  %3383 = vmatpush.bf16.msrb.mxu0 %v8411_v18  ;;  %v236_v1 = vunpack.c.l.bf16 %v8424_v42 }
  0x81   : > { %v7843_v11 = vld [vmem:[#allocation5 + $0xd9c] sm:$0xf0] }
  0x82   : > { %v7340_v13 = vld [vmem:[#allocation5 + $0xf80] sm:$0xf]  ;;  %11139 = vst [vmem:[#allocation24_spill] sm:$0xff] %v8415_v22  ;;  %v8417_v24 = vor.u32 %v7843_v11, %v7084_v10  ;;  %3396 = vmatpush.bf16.msrb.mxu1 %v8415_v22  ;;  %v223_v10 = vld [vmem:[%s8296_s25 + $0x8] sm:$0xff]  ;;  %v237_v11 = vunpack.c.h.bf16 %v8424_v42  ;;  %v6094_v42 = vld [vmem:[#allocation5 + $0x5e0] sm:$0xf0] }
  0x83   : > { %v7907_v15 = vld [vmem:[#allocation5 + $0xf9c] sm:$0xf0] }
  0x84   : > { %v6540_v19 = vld [vmem:[#allocation5 + $0x940] sm:$0xf]  ;;  %11140 = vst [vmem:[#allocation25_spill] sm:$0xff] %v8417_v24  ;;  %v8421_v32 = vor.u32 %v7907_v15, %v7340_v13  ;;  %3409 = vmatpush.bf16.msrb.mxu2 %v8417_v24 }
  0x85   : > { %v7707_v20 = vld [vmem:[#allocation5 + $0x95c] sm:$0xf0] }
  0x86   : > { %v6796_v26 = vld [vmem:[#allocation5 + $0xb40] sm:$0xf]  ;;  %11141 = vst [vmem:[#allocation26_spill] sm:$0xff] %v8421_v32  ;;  %v8427_v47 = vor.u32 %v7707_v20, %v6540_v19  ;;  %3422 = vmatpush.bf16.msrb.mxu3 %v8421_v32 }
  0x87   : > { %v7771_v30 = vld [vmem:[#allocation5 + $0xb5c] sm:$0xf0] }
  0x88   : > { %v7052_v36 = vld [vmem:[#allocation5 + $0xd40] sm:$0xf]  ;;  %11143 = vst [vmem:[#allocation28_spill] sm:$0xff] %v8427_v47  ;;  %v8431_v54 = vor.u32 %v7771_v30, %v6796_v26  ;;  %v244_v30 = vsub.f32 %v224_v31, %v236_v1  ;;  %3384 = vmatpush.bf16.msrb.mxu0 %v8427_v47 }
  0x89   : > { %v7835_v37 = vld [vmem:[#allocation5 + $0xd5c] sm:$0xf0] }
  0x8a   : > { %v7308_v40 = vld [vmem:[#allocation5 + $0xf40] sm:$0xf]  ;;  %11144 = vst [vmem:[#allocation29_spill] sm:$0xff] %v8431_v54  ;;  %v8433_v63 = vor.u32 %v7835_v37, %v7052_v36  ;;  %v245_v36 = vsub.f32 %v225_v39, %v237_v11  ;;  %3397 = vmatpush.bf16.msrb.mxu1 %v8431_v54  ;;  %v8455_v39 = vpack.c.bf16 %v244_v30, %v244_v30 }
  0x8b   : > { %v7899_v41 = vld [vmem:[#allocation5 + $0xf5c] sm:$0xf0] }
  0x8c   : > { %v6508_v48 = vld [vmem:[#allocation5 + $0x900] sm:$0xf]  ;;  %11145 = vst [vmem:[#allocation30_spill] sm:$0xff] %v8433_v63  ;;  %v8440_v13 = vor.u32 %v7899_v41, %v7308_v40  ;;  %3410 = vmatpush.bf16.msrb.mxu2 %v8433_v63  ;;  %v8457_v1 = vpack.c.bf16 %v245_v36, %v245_v36 }
  0x8d   : > { %v7699_v49 = vld [vmem:[#allocation5 + $0x91c] sm:$0xf0]  ;;  %3364 = vmatmul.bf16.vlgmr.msra.gmra.mxu2 %v8455_v39 }
  0x8e   : > { %v6764_v53 = vld [vmem:[#allocation5 + $0xb00] sm:$0xf]  ;;  %11146 = vst [vmem:[#allocation31_spill] sm:$0xff] %v8440_v13  ;;  %v8445_v37 = vor.u32 %v7699_v49, %v6508_v48  ;;  %3423 = vmatpush.bf16.msrb.mxu3 %v8440_v13  ;;  %v227_v13 = vld [vmem:[%s8296_s25 + $0x28] sm:$0xff] }
  0x8f   : > { %v7763_v0 = vld [vmem:[#allocation5 + $0xb1c] sm:$0xf0]  ;;  %3377 = vmatmul.bf16.vlgmr.msra.gmra.mxu3 %v8457_v1 }
  0x90   : > { %v222_v4 = vld [vmem:[%s8296_s25] sm:$0xff]  ;;  %11147 = vst [vmem:[#allocation32_spill] sm:$0xff] %v8445_v37  ;;  %v8447_v22 = vor.u32 %v7763_v0, %v6764_v53  ;;  %3385 = vmatpush.bf16.msrb.mxu0 %v8445_v37 }
  0x91   : > { %v7020_v15 = vld [vmem:[#allocation5 + $0xd00] sm:$0xf]  ;;  %v8442_v20 = vpack.c.bf16 %v223_v10, %v222_v4 }
  0x92   : > { %v7827_v19 = vld [vmem:[#allocation5 + $0xd1c] sm:$0xf0]  ;;  %11148 = vst [vmem:[#allocation33_spill] sm:$0xff] %v8447_v22  ;;  %3398 = vmatpush.bf16.msrb.mxu1 %v8447_v22 }
  0x93   : > { %v7276_v24 = vld [vmem:[#allocation5 + $0xf00] sm:$0xf]  ;;  %v234_v18 = vunpack.c.l.bf16 %v8442_v20  ;;  %v235_v32 = vunpack.c.h.bf16 %v8442_v20  ;;  %v8453_v40 = vor.u32 %v7827_v19, %v7020_v15 }
  0x94   : > { %v7891_v26 = vld [vmem:[#allocation5 + $0xf1c] sm:$0xf0] }
  0x95   : > { %11149 = vst [vmem:[#allocation34_spill] sm:$0xff] %v8453_v40  ;;  %v6476_v41 = vld [vmem:[#allocation5 + $0x8c0] sm:$0xf]  ;;  %v8460_v48 = vor.u32 %v7891_v26, %v7276_v24  ;;  %v242_v11 = vsub.f32 %v222_v4, %v234_v18  ;;  %v243_v54 = vsub.f32 %v223_v10, %v235_v32  ;;  %3411 = vmatpush.bf16.msrb.mxu2 %v8453_v40 }
  0x96   : > { %v7691_v2 = vld [vmem:[#allocation5 + $0x8dc] sm:$0xf0] }
  0x97   : > { %v6732_v31 = vld [vmem:[#allocation5 + $0xac0] sm:$0xf]  ;;  %11150 = vst [vmem:[#allocation35_spill] sm:$0xff] %v8460_v48  ;;  %v8465_v15 = vor.u32 %v7691_v2, %v6476_v41  ;;  %v8467_v19 = vpack.c.bf16 %v242_v11, %v242_v11  ;;  %v8469_v30 = vpack.c.bf16 %v243_v54, %v243_v54  ;;  %3424 = vmatpush.bf16.msrb.mxu3 %v8460_v48  ;;  %v228_v11 = vld [vmem:[%s8296_s25 + $0x30] sm:$0xff] }
  0x98   : > { %v7755_v49 = vld [vmem:[#allocation5 + $0xadc] sm:$0xf0] }
  0x99   : > { %v6988_v53 = vld [vmem:[#allocation5 + $0xcc0] sm:$0xf]  ;;  %11151 = vst [vmem:[#allocation36_spill] sm:$0xff] %v8465_v15  ;;  %v8473_v18 = vor.u32 %v7755_v49, %v6732_v31  ;;  %3338 = vmatmul.bf16.vlgmr.msra.gmra.mxu0 %v8467_v19  ;;  %3351 = vmatmul.bf16.vlgmr.msra.gmra.mxu1 %v8469_v30 }
  0x9a   : > { %v7819_v0 = vld [vmem:[#allocation5 + $0xcdc] sm:$0xf0]  ;;  %3386 = vmatpush.bf16.msrb.mxu0 %v8465_v15 }
  0x9b   : > { %v7244_v47 = vld [vmem:[#allocation5 + $0xec0] sm:$0xf]  ;;  %11152 = vst [vmem:[#allocation37_spill] sm:$0xff] %v8473_v18  ;;  %v8475_v24 = vor.u32 %v7819_v0, %v6988_v53  ;;  %3399 = vmatpush.bf16.msrb.mxu1 %v8473_v18 }
  0x9c   : > { %v7883_v63 = vld [vmem:[#allocation5 + $0xedc] sm:$0xf0] }
  0x9d   : > { %11153 = vst [vmem:[#allocation38_spill] sm:$0xff] %v8475_v24  ;;  %v6444_v32 = vld [vmem:[#allocation5 + $0x880] sm:$0xf]  ;;  %v8478_v2 = vor.u32 %v7883_v63, %v7244_v47  ;;  %v229_v47 = vld [vmem:[%s8296_s25 + $0x38] sm:$0xff]  ;;  %3412 = vmatpush.bf16.msrb.mxu2 %v8475_v24 }
  0x9e   : > { %v7683_v4 = vld [vmem:[#allocation5 + $0x89c] sm:$0xf0]  ;;  %v8493_v22 = vpack.c.bf16 %v229_v47, %v228_v11 }
  0x9f   : > { %v6700_v10 = vld [vmem:[#allocation5 + $0xa80] sm:$0xf]  ;;  %11154 = vst [vmem:[#allocation39_spill] sm:$0xff] %v8478_v2  ;;  %v8483_v53 = vor.u32 %v7683_v4, %v6444_v32  ;;  %3425 = vmatpush.bf16.msrb.mxu3 %v8478_v2 }
  0xa0   : > { %v7747_v26 = vld [vmem:[#allocation5 + $0xa9c] sm:$0xf0]  ;;  %11158 = vst [vmem:[#allocation43_spill] sm:$0xff] %v8493_v22 }
  0xa1   : > { %v6956_v54 = vld [vmem:[#allocation5 + $0xc80] sm:$0xf]  ;;  %11155 = vst [vmem:[#allocation40_spill] sm:$0xff] %v8483_v53  ;;  %v8489_v63 = vor.u32 %v7747_v26, %v6700_v10  ;;  %3387 = vmatpush.bf16.msrb.mxu0 %v8483_v53 }
  0xa2   : > { %v7811_v36 = vld [vmem:[#allocation5 + $0xc9c] sm:$0xf0] }
  0xa3   : > { %v7212_v41 = vld [vmem:[#allocation5 + $0xe80] sm:$0xf]  ;;  %11156 = vst [vmem:[#allocation41_spill] sm:$0xff] %v8489_v63  ;;  %v8491_v48 = vor.u32 %v7811_v36, %v6956_v54  ;;  %v240_v36 = vunpack.c.l.bf16 %v8493_v22  ;;  %3400 = vmatpush.bf16.msrb.mxu1 %v8489_v63 }
  0xa4   : > { %v7875_v31 = vld [vmem:[#allocation5 + $0xe9c] sm:$0xf0] }
  0xa5   : > { %v6412_v49 = vld [vmem:[#allocation5 + $0x840] sm:$0xf]  ;;  %11157 = vst [vmem:[#allocation42_spill] sm:$0xff] %v8491_v48  ;;  %v8498_v32 = vor.u32 %v7875_v31, %v7212_v41  ;;  %3413 = vmatpush.bf16.msrb.mxu2 %v8491_v48 }
  0xa6   : > { %v7675_v0 = vld [vmem:[#allocation5 + $0x85c] sm:$0xf0] }
  0xa7   : > { %v6668_v40 = vld [vmem:[#allocation5 + $0xa40] sm:$0xf]  ;;  %11159 = vst [vmem:[#allocation44_spill] sm:$0xff] %v8498_v32  ;;  %v8503_v10 = vor.u32 %v7675_v0, %v6412_v49  ;;  %v241_v49 = vunpack.c.h.bf16 %v8493_v22  ;;  %3426 = vmatpush.bf16.msrb.mxu3 %v8498_v32  ;;  %v7591_v22 = vld [vmem:[#allocation5 + $0x5c4] sm:$0xf]  ;;  %v248_v32 = vsub.f32 %v228_v11, %v240_v36 }
  0xa8   : > { %v226_v37 = vld [vmem:[%s8296_s25 + $0x20] sm:$0xff]  ;;  %v8534_v11 = vor.u32 %v7591_v22, %v6094_v42 }
  0xa9   : > { %v7739_v4 = vld [vmem:[#allocation5 + $0xa5c] sm:$0xf0]  ;;  %v8500_v60 = vpack.c.bf16 %v227_v13, %v226_v37  ;;  %3388 = vmatpush.bf16.msrb.mxu0 %v8503_v10  ;;  %v249_v27 = vsub.f32 %v229_v47, %v241_v49  ;;  %v7455_v36 = vld [vmem:[#allocation5 + $0x184] sm:$0xf]  ;;  %v8539_v47 = vpack.c.bf16 %v248_v32, %v248_v32 }
  0xaa   : > { %v6924_v15 = vld [vmem:[#allocation5 + $0xc40] sm:$0xf]  ;;  %v8508_v41 = vor.u32 %v7739_v4, %v6668_v40  ;;  %v7463_v40 = vld [vmem:[#allocation5 + $0x1c4] sm:$0xf]  ;;  %11169 = vst [vmem:[#allocation54_spill] sm:$0xff] %v8534_v11 }
  0xab   : > { %v7803_v61 = vld [vmem:[#allocation5 + $0xc5c] sm:$0xf0]  ;;  %11160 = vst [vmem:[#allocation45_spill] sm:$0xff] %v8500_v60  ;;  %v238_v52 = vunpack.c.l.bf16 %v8500_v60  ;;  %v239_v48 = vunpack.c.h.bf16 %v8500_v60  ;;  %v5582_v4 = vld [vmem:[#allocation5 + $0x1e0] sm:$0xf0]  ;;  %v8545_v42 = vpack.c.bf16 %v249_v27, %v249_v27 }
  0xac   : > { %v7180_v18 = vld [vmem:[#allocation5 + $0xe40] sm:$0xf]  ;;  %11161 = vst [vmem:[#allocation46_spill] sm:$0xff] %v8508_v41  ;;  %v8510_v31 = vor.u32 %v7803_v61, %v6924_v15  ;;  %v7527_v61 = vld [vmem:[#allocation5 + $0x3c4] sm:$0xf]  ;;  %3401 = vmatpush.bf16.msrb.mxu1 %v8508_v41 }
  0xad   : > { %v7867_v24 = vld [vmem:[#allocation5 + $0xe5c] sm:$0xf0]  ;;  %v6350_v60 = vld [vmem:[#allocation5 + $0x7e0] sm:$0xf0]  ;;  %v246_v28 = vsub.f32 %v226_v37, %v238_v52 }
  0xae   : > { %v6380_v26 = vld [vmem:[#allocation5 + $0x800] sm:$0xf]  ;;  %11162 = vst [vmem:[#allocation47_spill] sm:$0xff] %v8510_v31  ;;  %v8515_v0 = vor.u32 %v7867_v24, %v7180_v18  ;;  %3414 = vmatpush.bf16.msrb.mxu2 %v8510_v31  ;;  %v7655_v24 = vld [vmem:[#allocation5 + $0x7c4] sm:$0xf] }
  0xaf   : > { %v7667_v54 = vld [vmem:[#allocation5 + $0x81c] sm:$0xf0]  ;;  %v5550_v41 = vld [vmem:[#allocation5 + $0x1a0] sm:$0xf0]  ;;  %v8543_v22 = vpack.c.bf16 %v246_v28, %v246_v28 }
  0xb0   : > { %v6636_v2 = vld [vmem:[#allocation5 + $0xa00] sm:$0xf]  ;;  %v8519_v15 = vor.u32 %v7667_v54, %v6380_v26  ;;  %3427 = vmatpush.bf16.msrb.mxu3 %v8515_v0  ;;  %v8532_v54 = vor.u32 %v7527_v61, %v5838_v35  ;;  %v7519_v31 = vld [vmem:[#allocation5 + $0x384] sm:$0xf] }
  0xb1   : > { %v7731_v59 = vld [vmem:[#allocation5 + $0xa1c] sm:$0xf0]  ;;  %v5806_v52 = vld [vmem:[#allocation5 + $0x3a0] sm:$0xf0] }
  0xb2   : > { %v6892_v55 = vld [vmem:[#allocation5 + $0xc00] sm:$0xf]  ;;  %11163 = vst [vmem:[#allocation48_spill] sm:$0xff] %v8519_v15  ;;  %v8521_v43 = vor.u32 %v7731_v59, %v6636_v2  ;;  %v8530_v59 = vor.u32 %v7463_v40, %v5582_v4  ;;  %v247_v2 = vsub.f32 %v227_v13, %v239_v48  ;;  %3389 = vmatpush.bf16.msrb.mxu0 %v8519_v15  ;;  %v7583_v37 = vld [vmem:[#allocation5 + $0x584] sm:$0xf] }
  0xb3   : > { %v7795_v53 = vld [vmem:[#allocation5 + $0xc1c] sm:$0xf0]  ;;  %11168 = vst [vmem:[#allocation53_spill] sm:$0xff] %v8532_v54  ;;  %v7647_v35 = vld [vmem:[#allocation5 + $0x784] sm:$0xf]  ;;  %v8555_v48 = vor.u32 %v7519_v31, %v5806_v52 }
  0xb4   : > { %v7148_v51 = vld [vmem:[#allocation5 + $0xe00] sm:$0xf]  ;;  %11164 = vst [vmem:[#allocation49_spill] sm:$0xff] %v8521_v43  ;;  %v8525_v18 = vor.u32 %v7795_v53, %v6892_v55  ;;  %v8537_v55 = vor.u32 %v7655_v24, %v6350_v60  ;;  %v6062_v53 = vld [vmem:[#allocation5 + $0x5a0] sm:$0xf0]  ;;  %3402 = vmatpush.bf16.msrb.mxu1 %v8521_v43  ;;  %v8549_v60 = vor.u32 %v7455_v36, %v5550_v41 }
  0xb5   : > { %v7859_v63 = vld [vmem:[#allocation5 + $0xe1c] sm:$0xf0]  ;;  %11167 = vst [vmem:[#allocation52_spill] sm:$0xff] %v8530_v59  ;;  %v8551_v13 = vpack.c.bf16 %v247_v2, %v247_v2  ;;  %v7447_v28 = vld [vmem:[#allocation5 + $0x144] sm:$0xf]  ;;  %3390 = vmatmul.bf16.vlgmr.msrb.gmra.mxu0 %v8543_v22 }
  0xb6   : > { %11165 = vst [vmem:[#allocation50_spill] sm:$0xff] %v8525_v18  ;;  %v8528_v26 = vor.u32 %v7859_v63, %v7148_v51  ;;  %3415 = vmatpush.bf16.msrb.mxu2 %v8525_v18  ;;  %v6318_v51 = vld [vmem:[#allocation5 + $0x7a0] sm:$0xf0]  ;;  %3434 = vmatpush.bf16.msra.mxu0 %v8530_v59  ;;  %v8557_v63 = vor.u32 %v7583_v37, %v6062_v53  ;;  %v5590_v43 = vld [vmem:[#allocation5 + $0x1e8] sm:$0xf0] }
  0xb7   : > { %11170 = vst [vmem:[#allocation55_spill] sm:$0xff] %v8537_v55  ;;  %v5518_v32 = vld [vmem:[#allocation5 + $0x160] sm:$0xf0]  ;;  %v8560_v49 = vor.u32 %v7647_v35, %v6318_v51  ;;  %3403 = vmatmul.bf16.vlgmr.msrb.gmra.mxu1 %v8551_v13 }
  0xb8   : > { %11166 = vst [vmem:[#allocation51_spill] sm:$0xff] %v8528_v26  ;;  %3428 = vmatpush.bf16.msrb.mxu3 %v8528_v26  ;;  %3447 = vmatpush.bf16.msra.mxu1 %v8532_v54  ;;  %v7511_v27 = vld [vmem:[#allocation5 + $0x344] sm:$0xf]  ;;  %v8566_v24 = vor.u32 %v7447_v28, %v5518_v32 }
  0xb9   : > { %11171 = vst [vmem:[#allocation56_spill] sm:$0xff] %v8549_v60  ;;  %3416 = vmatmul.bf16.vlgmr.msrb.gmra.mxu2 %v8539_v47  ;;  %v5774_v41 = vld [vmem:[#allocation5 + $0x360] sm:$0xf0] }
  0xba   : > { %3460 = vmatpush.bf16.msra.mxu2 %v8534_v11  ;;  %11172 = vst [vmem:[#allocation57_spill] sm:$0xff] %v8555_v48  ;;  %v7575_v40 = vld [vmem:[#allocation5 + $0x544] sm:$0xf]  ;;  %3435 = vmatpush.bf16.msra.mxu0 %v8549_v60  ;;  %v8571_v2 = vor.u32 %v7511_v27, %v5774_v41 }
  0xbb   : > { %11173 = vst [vmem:[#allocation58_spill] sm:$0xff] %v8557_v63  ;;  %v6030_v4 = vld [vmem:[#allocation5 + $0x560] sm:$0xf0]  ;;  %3429 = vmatmul.bf16.vlgmr.msrb.gmra.mxu3 %v8545_v42 }
  0xbc   : > { %3473 = vmatpush.bf16.msra.mxu3 %v8537_v55  ;;  %11174 = vst [vmem:[#allocation59_spill] sm:$0xff] %v8560_v49  ;;  %v7639_v31 = vld [vmem:[#allocation5 + $0x744] sm:$0xf]  ;;  %3448 = vmatpush.bf16.msra.mxu1 %v8555_v48  ;;  %v8573_v36 = vor.u32 %v7575_v40, %v6030_v4 }
  0xbd   : > { %v6286_v61 = vld [vmem:[#allocation5 + $0x760] sm:$0xf0]  ;;  %11175 = vst [vmem:[#allocation60_spill] sm:$0xff] %v8566_v24 }
  0xbe   : > { %3461 = vmatpush.bf16.msra.mxu2 %v8557_v63  ;;  %11176 = vst [vmem:[#allocation61_spill] sm:$0xff] %v8571_v2  ;;  %v7439_v52 = vld [vmem:[#allocation5 + $0x104] sm:$0xf]  ;;  %v8576_v35 = vor.u32 %v7639_v31, %v6286_v61  ;;  %3436 = vmatpush.bf16.msra.mxu0 %v8566_v24 }
  0xbf   : > { %11177 = vst [vmem:[#allocation62_spill] sm:$0xff] %v8573_v36  ;;  %v5486_v37 = vld [vmem:[#allocation5 + $0x120] sm:$0xf0] }
  0xc0   : > { %v7503_v53 = vld [vmem:[#allocation5 + $0x304] sm:$0xf]  ;;  %3474 = vmatpush.bf16.msra.mxu3 %v8560_v49  ;;  %11178 = vst [vmem:[#allocation63_spill] sm:$0xff] %v8576_v35  ;;  %v8579_v48 = vor.u32 %v7439_v52, %v5486_v37  ;;  %3449 = vmatpush.bf16.msra.mxu1 %v8571_v2 }
  0xc1   : > { %v5742_v51 = vld [vmem:[#allocation5 + $0x320] sm:$0xf0] }
  0xc2   : > { %v7567_v28 = vld [vmem:[#allocation5 + $0x504] sm:$0xf]  ;;  %11179 = vst [vmem:[#allocation64_spill] sm:$0xff] %v8579_v48  ;;  %3462 = vmatpush.bf16.msra.mxu2 %v8573_v36  ;;  %v8583_v27 = vor.u32 %v7503_v53, %v5742_v51  ;;  %3437 = vmatpush.bf16.msra.mxu0 %v8579_v48 }
  0xc3   : > { %v5998_v32 = vld [vmem:[#allocation5 + $0x520] sm:$0xf0] }
  0xc4   : > { %v7631_v60 = vld [vmem:[#allocation5 + $0x704] sm:$0xf]  ;;  %11180 = vst [vmem:[#allocation65_spill] sm:$0xff] %v8583_v27  ;;  %v8585_v41 = vor.u32 %v7567_v28, %v5998_v32  ;;  %3475 = vmatpush.bf16.msra.mxu3 %v8576_v35  ;;  %3450 = vmatpush.bf16.msra.mxu1 %v8583_v27 }
  0xc5   : > { %v6254_v55 = vld [vmem:[#allocation5 + $0x720] sm:$0xf0] }
  0xc6   : > { %11181 = vst [vmem:[#allocation66_spill] sm:$0xff] %v8585_v41  ;;  %v7431_v40 = vld [vmem:[#allocation5 + $0xc4] sm:$0xf]  ;;  %v8588_v61 = vor.u32 %v7631_v60, %v6254_v55  ;;  %3463 = vmatpush.bf16.msra.mxu2 %v8585_v41 }
  0xc7   : > { %v5454_v4 = vld [vmem:[#allocation5 + $0xe0] sm:$0xf0] }
  0xc8   : > { %v7495_v31 = vld [vmem:[#allocation5 + $0x2c4] sm:$0xf]  ;;  %11182 = vst [vmem:[#allocation67_spill] sm:$0xff] %v8588_v61  ;;  %v8591_v2 = vor.u32 %v7431_v40, %v5454_v4  ;;  %3476 = vmatpush.bf16.msra.mxu3 %v8588_v61 }
  0xc9   : > { %v5710_v49 = vld [vmem:[#allocation5 + $0x2e0] sm:$0xf0] }
  0xca   : > { %v7559_v63 = vld [vmem:[#allocation5 + $0x4c4] sm:$0xf]  ;;  %11183 = vst [vmem:[#allocation68_spill] sm:$0xff] %v8591_v2  ;;  %v8595_v53 = vor.u32 %v7495_v31, %v5710_v49  ;;  %3438 = vmatpush.bf16.msra.mxu0 %v8591_v2 }
  0xcb   : > { %v5966_v24 = vld [vmem:[#allocation5 + $0x4e0] sm:$0xf0] }
  0xcc   : > { %v7623_v52 = vld [vmem:[#allocation5 + $0x6c4] sm:$0xf]  ;;  %11184 = vst [vmem:[#allocation69_spill] sm:$0xff] %v8595_v53  ;;  %v8597_v51 = vor.u32 %v7559_v63, %v5966_v24  ;;  %3451 = vmatpush.bf16.msra.mxu1 %v8595_v53 }
  0xcd   : > { %v6222_v37 = vld [vmem:[#allocation5 + $0x6e0] sm:$0xf0] }
  0xce   : > { %11185 = vst [vmem:[#allocation70_spill] sm:$0xff] %v8597_v51  ;;  %v7423_v28 = vld [vmem:[#allocation5 + $0x84] sm:$0xf]  ;;  %v8600_v32 = vor.u32 %v7623_v52, %v6222_v37  ;;  %3464 = vmatpush.bf16.msra.mxu2 %v8597_v51 }
  0xcf   : > { %v5422_v55 = vld [vmem:[#allocation5 + $0xa0] sm:$0xf0] }
  0xd0   : > { %v7487_v60 = vld [vmem:[#allocation5 + $0x284] sm:$0xf]  ;;  %11186 = vst [vmem:[#allocation71_spill] sm:$0xff] %v8600_v32  ;;  %v8603_v27 = vor.u32 %v7423_v28, %v5422_v55  ;;  %3477 = vmatpush.bf16.msra.mxu3 %v8600_v32 }
  0xd1   : > { %v5678_v35 = vld [vmem:[#allocation5 + $0x2a0] sm:$0xf0] }
  0xd2   : > { %v7551_v36 = vld [vmem:[#allocation5 + $0x484] sm:$0xf]  ;;  %11187 = vst [vmem:[#allocation72_spill] sm:$0xff] %v8603_v27  ;;  %v8607_v63 = vor.u32 %v7487_v60, %v5678_v35  ;;  %3439 = vmatpush.bf16.msra.mxu0 %v8603_v27 }
  0xd3   : > { %v5934_v48 = vld [vmem:[#allocation5 + $0x4a0] sm:$0xf0] }
  0xd4   : > { %v7615_v40 = vld [vmem:[#allocation5 + $0x684] sm:$0xf]  ;;  %11188 = vst [vmem:[#allocation73_spill] sm:$0xff] %v8607_v63  ;;  %v8609_v49 = vor.u32 %v7551_v36, %v5934_v48  ;;  %3452 = vmatpush.bf16.msra.mxu1 %v8607_v63 }
  0xd5   : > { %v6190_v4 = vld [vmem:[#allocation5 + $0x6a0] sm:$0xf0] }
  0xd6   : > { %11189 = vst [vmem:[#allocation74_spill] sm:$0xff] %v8609_v49  ;;  %v7415_v24 = vld [vmem:[#allocation5 + $0x44] sm:$0xf]  ;;  %v8612_v37 = vor.u32 %v7615_v40, %v6190_v4  ;;  %3465 = vmatpush.bf16.msra.mxu2 %v8609_v49 }
  0xd7   : > { %v5390_v31 = vld [vmem:[#allocation5 + $0x60] sm:$0xf0] }
  0xd8   : > { %v7479_v52 = vld [vmem:[#allocation5 + $0x244] sm:$0xf]  ;;  %11190 = vst [vmem:[#allocation75_spill] sm:$0xff] %v8612_v37  ;;  %v8615_v53 = vor.u32 %v7415_v24, %v5390_v31  ;;  %3478 = vmatpush.bf16.msra.mxu3 %v8612_v37 }
  0xd9   : > { %v5646_v61 = vld [vmem:[#allocation5 + $0x260] sm:$0xf0] }
  0xda   : > { %v7543_v41 = vld [vmem:[#allocation5 + $0x444] sm:$0xf]  ;;  %11191 = vst [vmem:[#allocation76_spill] sm:$0xff] %v8615_v53  ;;  %v8619_v48 = vor.u32 %v7479_v52, %v5646_v61  ;;  %3440 = vmatpush.bf16.msra.mxu0 %v8615_v53 }
  0xdb   : > { %v5902_v2 = vld [vmem:[#allocation5 + $0x460] sm:$0xf0] }
  0xdc   : > { %v7607_v28 = vld [vmem:[#allocation5 + $0x644] sm:$0xf]  ;;  %11192 = vst [vmem:[#allocation77_spill] sm:$0xff] %v8619_v48  ;;  %v8621_v36 = vor.u32 %v7543_v41, %v5902_v2  ;;  %3453 = vmatpush.bf16.msra.mxu1 %v8619_v48 }
  0xdd   : > { %v6158_v55 = vld [vmem:[#allocation5 + $0x660] sm:$0xf0] }
  0xde   : > { %v7407_v35 = vld [vmem:[#allocation5 + $0x4] sm:$0xf]  ;;  %11193 = vst [vmem:[#allocation78_spill] sm:$0xff] %v8621_v36  ;;  %v8624_v51 = vor.u32 %v7607_v28, %v6158_v55  ;;  %3466 = vmatpush.bf16.msra.mxu2 %v8621_v36  ;;  %v5812_v36 = vld [vmem:[#allocation5 + $0x388] sm:$0xf] }
  0xdf   : > { %v5358_v60 = vld [vmem:[#allocation5 + $0x20] sm:$0xf0] }
  0xe0   : > { %v7471_v40 = vld [vmem:[#allocation5 + $0x204] sm:$0xf]  ;;  %11194 = vst [vmem:[#allocation79_spill] sm:$0xff] %v8624_v51  ;;  %v8627_v49 = vor.u32 %v7407_v35, %v5358_v60  ;;  %3479 = vmatpush.bf16.msra.mxu3 %v8624_v51  ;;  %v5556_v51 = vld [vmem:[#allocation5 + $0x188] sm:$0xf] }
  0xe1   : > { %v5614_v4 = vld [vmem:[#allocation5 + $0x220] sm:$0xf0] }
  0xe2   : > { %v7535_v32 = vld [vmem:[#allocation5 + $0x404] sm:$0xf]  ;;  %11195 = vst [vmem:[#allocation80_spill] sm:$0xff] %v8627_v49  ;;  %v8631_v52 = vor.u32 %v7471_v40, %v5614_v4  ;;  %3441 = vmatpush.bf16.msra.mxu0 %v8627_v49  ;;  %v5844_v49 = vld [vmem:[#allocation5 + $0x3c8] sm:$0xf] }
  0xe3   : > { %v5870_v27 = vld [vmem:[#allocation5 + $0x420] sm:$0xf0] }
  0xe4   : > { %v7599_v24 = vld [vmem:[#allocation5 + $0x604] sm:$0xf]  ;;  %11196 = vst [vmem:[#allocation81_spill] sm:$0xff] %v8631_v52  ;;  %v8633_v28 = vor.u32 %v7535_v32, %v5870_v27  ;;  %3454 = vmatpush.bf16.msra.mxu1 %v8631_v52  ;;  %v7468_v52 = vld [vmem:[#allocation5 + $0x1e4] sm:$0xf0] }
  0xe5   : > { %v6126_v31 = vld [vmem:[#allocation5 + $0x620] sm:$0xf0]  ;;  %3442 = vmatmul.bf16.vlgmr.msra.gmra.mxu0 %v8467_v19 }
  0xe6   : > { %v7719_v11 = vld [vmem:[#allocation5 + $0x9c4] sm:$0xf]  ;;  %11197 = vst [vmem:[#allocation82_spill] sm:$0xff] %v8633_v28  ;;  %v8636_v63 = vor.u32 %v7599_v24, %v6126_v31  ;;  %3467 = vmatpush.bf16.msra.mxu2 %v8633_v28  ;;  %v5588_v28 = vld [vmem:[#allocation5 + $0x1c8] sm:$0xf] }
  0xe7   : > { %v6606_v54 = vld [vmem:[#allocation5 + $0x9e0] sm:$0xf0]  ;;  %3455 = vmatmul.bf16.vlgmr.msra.gmra.mxu1 %v8469_v30 }
  0xe8   : > { %v7783_v59 = vld [vmem:[#allocation5 + $0xbc4] sm:$0xf]  ;;  %11198 = vst [vmem:[#allocation83_spill] sm:$0xff] %v8636_v63  ;;  %v8638_v53 = vor.u32 %v7719_v11, %v6606_v54  ;;  %3480 = vmatpush.bf16.msra.mxu3 %v8636_v63 }
  0xe9   : > { %v6862_v61 = vld [vmem:[#allocation5 + $0xbe0] sm:$0xf0]  ;;  %3468 = vmatmul.bf16.vlgmr.msra.gmra.mxu2 %v8455_v39 }
  0xea   : > { %v7847_v2 = vld [vmem:[#allocation5 + $0xdc4] sm:$0xf]  ;;  %11199 = vst [vmem:[#allocation84_spill] sm:$0xff] %v8638_v53  ;;  %v8640_v35 = vor.u32 %v7783_v59, %v6862_v61  ;;  %3486 = vmatpush.bf16.msrb.mxu0 %v8638_v53 }
  0xeb   : > { %v7118_v41 = vld [vmem:[#allocation5 + $0xde0] sm:$0xf0]  ;;  %3481 = vmatmul.bf16.vlgmr.msra.gmra.mxu3 %v8457_v1 }
  0xec   : > { %v7911_v55 = vld [vmem:[#allocation5 + $0xfc4] sm:$0xf]  ;;  %11200 = vst [vmem:[#allocation85_spill] sm:$0xff] %v8640_v35  ;;  %v8642_v60 = vor.u32 %v7847_v2, %v7118_v41  ;;  %3499 = vmatpush.bf16.msrb.mxu1 %v8640_v35 }
  0xed   : > { %v7374_v37 = vld [vmem:[#allocation5 + $0xfe0] sm:$0xf0] }
  0xee   : > { %11201 = vst [vmem:[#allocation86_spill] sm:$0xff] %v8642_v60  ;;  %v7711_v26 = vld [vmem:[#allocation5 + $0x984] sm:$0xf]  ;;  %v8645_v40 = vor.u32 %v7911_v55, %v7374_v37  ;;  %3512 = vmatpush.bf16.msrb.mxu2 %v8642_v60 }
  0xef   : > { %v6574_v48 = vld [vmem:[#allocation5 + $0x9a0] sm:$0xf0] }
  0xf0   : > { %v7775_v18 = vld [vmem:[#allocation5 + $0xb84] sm:$0xf]  ;;  %11202 = vst [vmem:[#allocation87_spill] sm:$0xff] %v8645_v40  ;;  %v8651_v59 = vor.u32 %v7711_v26, %v6574_v48  ;;  %3525 = vmatpush.bf16.msrb.mxu3 %v8645_v40 }
  0xf1   : > { %v6830_v27 = vld [vmem:[#allocation5 + $0xba0] sm:$0xf0] }
  0xf2   : > { %v7839_v32 = vld [vmem:[#allocation5 + $0xd84] sm:$0xf]  ;;  %11203 = vst [vmem:[#allocation88_spill] sm:$0xff] %v8651_v59  ;;  %v8655_v37 = vor.u32 %v7775_v18, %v6830_v27  ;;  %3487 = vmatpush.bf16.msrb.mxu0 %v8651_v59 }
  0xf3   : > { %v7086_v4 = vld [vmem:[#allocation5 + $0xda0] sm:$0xf0] }
  0xf4   : > { %v7903_v54 = vld [vmem:[#allocation5 + $0xf84] sm:$0xf]  ;;  %11204 = vst [vmem:[#allocation89_spill] sm:$0xff] %v8655_v37  ;;  %v8657_v24 = vor.u32 %v7839_v32, %v7086_v4  ;;  %3500 = vmatpush.bf16.msrb.mxu1 %v8655_v37 }
  0xf5   : > { %v7342_v11 = vld [vmem:[#allocation5 + $0xfa0] sm:$0xf0] }
  0xf6   : > { %11205 = vst [vmem:[#allocation90_spill] sm:$0xff] %v8657_v24  ;;  %v7703_v31 = vld [vmem:[#allocation5 + $0x944] sm:$0xf]  ;;  %v8660_v41 = vor.u32 %v7903_v54, %v7342_v11  ;;  %3513 = vmatpush.bf16.msrb.mxu2 %v8657_v24 }
  0xf7   : > { %v6542_v61 = vld [vmem:[#allocation5 + $0x960] sm:$0xf0] }
  0xf8   : > { %v7767_v2 = vld [vmem:[#allocation5 + $0xb44] sm:$0xf]  ;;  %11206 = vst [vmem:[#allocation91_spill] sm:$0xff] %v8660_v41  ;;  %v8666_v18 = vor.u32 %v7703_v31, %v6542_v61  ;;  %3526 = vmatpush.bf16.msrb.mxu3 %v8660_v41 }
  0xf9   : > { %v6798_v55 = vld [vmem:[#allocation5 + $0xb60] sm:$0xf0] }
  0xfa   : > { %v7831_v63 = vld [vmem:[#allocation5 + $0xd44] sm:$0xf]  ;;  %11207 = vst [vmem:[#allocation92_spill] sm:$0xff] %v8666_v18  ;;  %v8671_v27 = vor.u32 %v7767_v2, %v6798_v55  ;;  %3488 = vmatpush.bf16.msrb.mxu0 %v8666_v18 }
  0xfb   : > { %v7054_v53 = vld [vmem:[#allocation5 + $0xd60] sm:$0xf0] }
  0xfc   : > { %v7895_v26 = vld [vmem:[#allocation5 + $0xf44] sm:$0xf]  ;;  %11208 = vst [vmem:[#allocation93_spill] sm:$0xff] %v8671_v27  ;;  %v8673_v32 = vor.u32 %v7831_v63, %v7054_v53  ;;  %3501 = vmatpush.bf16.msrb.mxu1 %v8671_v27 }
  0xfd   : > { %v7310_v48 = vld [vmem:[#allocation5 + $0xf60] sm:$0xf0] }
  0xfe   : > { %11209 = vst [vmem:[#allocation94_spill] sm:$0xff] %v8673_v32  ;;  %v7695_v4 = vld [vmem:[#allocation5 + $0x904] sm:$0xf]  ;;  %v8676_v40 = vor.u32 %v7895_v26, %v7310_v48  ;;  %3514 = vmatpush.bf16.msrb.mxu2 %v8673_v32 }
  0xff   : > { %v6510_v54 = vld [vmem:[#allocation5 + $0x920] sm:$0xf0] }
 0x100   : > { %v7759_v11 = vld [vmem:[#allocation5 + $0xb04] sm:$0xf]  ;;  %11210 = vst [vmem:[#allocation95_spill] sm:$0xff] %v8676_v40  ;;  %v8679_v37 = vor.u32 %v7695_v4, %v6510_v54  ;;  %3527 = vmatpush.bf16.msrb.mxu3 %v8676_v40 }
 0x101   : > { %v6766_v59 = vld [vmem:[#allocation5 + $0xb20] sm:$0xf0] }
 0x102   : > { %v7823_v31 = vld [vmem:[#allocation5 + $0xd04] sm:$0xf]  ;;  %11211 = vst [vmem:[#allocation96_spill] sm:$0xff] %v8679_v37  ;;  %v8683_v53 = vor.u32 %v7759_v11, %v6766_v59  ;;  %3489 = vmatpush.bf16.msrb.mxu0 %v8679_v37 }
 0x103   : > { %v7022_v61 = vld [vmem:[#allocation5 + $0xd20] sm:$0xf0] }
 0x104   : > { %v7887_v60 = vld [vmem:[#allocation5 + $0xf04] sm:$0xf]  ;;  %11212 = vst [vmem:[#allocation97_spill] sm:$0xff] %v8683_v53  ;;  %v8685_v63 = vor.u32 %v7823_v31, %v7022_v61  ;;  %3502 = vmatpush.bf16.msrb.mxu1 %v8683_v53 }
 0x105   : > { %v7278_v35 = vld [vmem:[#allocation5 + $0xf20] sm:$0xf0] }
 0x106   : > { %11213 = vst [vmem:[#allocation98_spill] sm:$0xff] %v8685_v63  ;;  %v7687_v2 = vld [vmem:[#allocation5 + $0x8c4] sm:$0xf]  ;;  %v8688_v48 = vor.u32 %v7887_v60, %v7278_v35  ;;  %3515 = vmatpush.bf16.msrb.mxu2 %v8685_v63 }
 0x107   : > { %v6478_v55 = vld [vmem:[#allocation5 + $0x8e0] sm:$0xf0] }
 0x108   : > { %v7751_v26 = vld [vmem:[#allocation5 + $0xac4] sm:$0xf]  ;;  %11214 = vst [vmem:[#allocation99_spill] sm:$0xff] %v8688_v48  ;;  %v8691_v27 = vor.u32 %v7687_v2, %v6478_v55  ;;  %3528 = vmatpush.bf16.msrb.mxu3 %v8688_v48 }
 0x109   : > { %v6734_v41 = vld [vmem:[#allocation5 + $0xae0] sm:$0xf0] }
 0x10a   : > { %v7815_v24 = vld [vmem:[#allocation5 + $0xcc4] sm:$0xf]  ;;  %11215 = vst [vmem:[#allocation100_spill] sm:$0xff] %v8691_v27  ;;  %v8695_v59 = vor.u32 %v7751_v26, %v6734_v41  ;;  %3490 = vmatpush.bf16.msrb.mxu0 %v8691_v27 }
 0x10b   : > { %v6990_v18 = vld [vmem:[#allocation5 + $0xce0] sm:$0xf0] }
 0x10c   : > { %v7879_v4 = vld [vmem:[#allocation5 + $0xec4] sm:$0xf]  ;;  %11216 = vst [vmem:[#allocation101_spill] sm:$0xff] %v8695_v59  ;;  %v8697_v11 = vor.u32 %v7815_v24, %v6990_v18  ;;  %3503 = vmatpush.bf16.msrb.mxu1 %v8695_v59 }
 0x10d   : > { %v7246_v54 = vld [vmem:[#allocation5 + $0xee0] sm:$0xf0] }
 0x10e   : > { %11217 = vst [vmem:[#allocation102_spill] sm:$0xff] %v8697_v11  ;;  %v7679_v31 = vld [vmem:[#allocation5 + $0x884] sm:$0xf]  ;;  %v8700_v61 = vor.u32 %v7879_v4, %v7246_v54  ;;  %3516 = vmatpush.bf16.msrb.mxu2 %v8697_v11 }
 0x10f   : > { %v6446_v35 = vld [vmem:[#allocation5 + $0x8a0] sm:$0xf0] }
 0x110   : > { %v7743_v60 = vld [vmem:[#allocation5 + $0xa84] sm:$0xf]  ;;  %11218 = vst [vmem:[#allocation103_spill] sm:$0xff] %v8700_v61  ;;  %v8703_v53 = vor.u32 %v7679_v31, %v6446_v35  ;;  %3529 = vmatpush.bf16.msrb.mxu3 %v8700_v61 }
 0x111   : > { %v6702_v40 = vld [vmem:[#allocation5 + $0xaa0] sm:$0xf0] }
 0x112   : > { %v7807_v32 = vld [vmem:[#allocation5 + $0xc84] sm:$0xf]  ;;  %11219 = vst [vmem:[#allocation104_spill] sm:$0xff] %v8703_v53  ;;  %v8707_v24 = vor.u32 %v7743_v60, %v6702_v40  ;;  %3491 = vmatpush.bf16.msrb.mxu0 %v8703_v53 }
 0x113   : > { %v6958_v37 = vld [vmem:[#allocation5 + $0xca0] sm:$0xf0] }
 0x114   : > { %v7871_v2 = vld [vmem:[#allocation5 + $0xe84] sm:$0xf]  ;;  %11220 = vst [vmem:[#allocation105_spill] sm:$0xff] %v8707_v24  ;;  %v8709_v41 = vor.u32 %v7807_v32, %v6958_v37  ;;  %3504 = vmatpush.bf16.msrb.mxu1 %v8707_v24 }
 0x115   : > { %v7214_v55 = vld [vmem:[#allocation5 + $0xea0] sm:$0xf0] }
 0x116   : > { %11221 = vst [vmem:[#allocation106_spill] sm:$0xff] %v8709_v41  ;;  %v7671_v18 = vld [vmem:[#allocation5 + $0x844] sm:$0xf]  ;;  %v8712_v54 = vor.u32 %v7871_v2, %v7214_v55  ;;  %3517 = vmatpush.bf16.msrb.mxu2 %v8709_v41 }
 0x117   : > { %v6414_v26 = vld [vmem:[#allocation5 + $0x860] sm:$0xf0] }
 0x118   : > { %v7735_v4 = vld [vmem:[#allocation5 + $0xa44] sm:$0xf]  ;;  %11222 = vst [vmem:[#allocation107_spill] sm:$0xff] %v8712_v54  ;;  %v8715_v59 = vor.u32 %v7671_v18, %v6414_v26  ;;  %3530 = vmatpush.bf16.msrb.mxu3 %v8712_v54  ;;  %v7660_v54 = vld [vmem:[#allocation5 + $0x7e4] sm:$0xf0] }
 0x119   : > { %v6670_v48 = vld [vmem:[#allocation5 + $0xa60] sm:$0xf0] }
 0x11a   : > { %v7799_v63 = vld [vmem:[#allocation5 + $0xc44] sm:$0xf]  ;;  %11223 = vst [vmem:[#allocation108_spill] sm:$0xff] %v8715_v59  ;;  %v8719_v37 = vor.u32 %v7735_v4, %v6670_v48  ;;  %3492 = vmatpush.bf16.msrb.mxu0 %v8715_v59  ;;  %v7532_v48 = vld [vmem:[#allocation5 + $0x3e4] sm:$0xf0]  ;;  %v8738_v59 = vor.u32 %v7468_v52, %v5588_v28 }
 0x11b   : > { %v6926_v27 = vld [vmem:[#allocation5 + $0xc60] sm:$0xf0]  ;;  %v6324_v52 = vld [vmem:[#allocation5 + $0x788] sm:$0xf] }
 0x11c   : > { %v7863_v31 = vld [vmem:[#allocation5 + $0xe44] sm:$0xf]  ;;  %11224 = vst [vmem:[#allocation109_spill] sm:$0xff] %v8719_v37  ;;  %v8721_v32 = vor.u32 %v7799_v63, %v6926_v27  ;;  %v6100_v27 = vld [vmem:[#allocation5 + $0x5c8] sm:$0xf]  ;;  %3505 = vmatpush.bf16.msrb.mxu1 %v8719_v37 }
 0x11d   : > { %v7182_v35 = vld [vmem:[#allocation5 + $0xe60] sm:$0xf0]  ;;  %v7596_v63 = vld [vmem:[#allocation5 + $0x5e4] sm:$0xf0]  ;;  %11231 = vst [vmem:[#allocation116_spill] sm:$0xff] %v8738_v59 }
 0x11e   : > { %v7663_v40 = vld [vmem:[#allocation5 + $0x804] sm:$0xf]  ;;  %11225 = vst [vmem:[#allocation110_spill] sm:$0xff] %v8721_v32  ;;  %v8724_v11 = vor.u32 %v7863_v31, %v7182_v35  ;;  %3518 = vmatpush.bf16.msrb.mxu2 %v8721_v32  ;;  %v6356_v35 = vld [vmem:[#allocation5 + $0x7c8] sm:$0xf] }
 0x11f   : > { %v6382_v60 = vld [vmem:[#allocation5 + $0x820] sm:$0xf0]  ;;  %v7460_v37 = vld [vmem:[#allocation5 + $0x1a4] sm:$0xf0] }
 0x120   : > { %v7727_v2 = vld [vmem:[#allocation5 + $0xa04] sm:$0xf]  ;;  %11226 = vst [vmem:[#allocation111_spill] sm:$0xff] %v8724_v11  ;;  %v8727_v41 = vor.u32 %v7663_v40, %v6382_v60  ;;  %3531 = vmatpush.bf16.msrb.mxu3 %v8724_v11  ;;  %v8740_v40 = vor.u32 %v7532_v48, %v5844_v49  ;;  %v8742_v60 = vor.u32 %v7596_v63, %v6100_v27  ;;  %v7652_v28 = vld [vmem:[#allocation5 + $0x7a4] sm:$0xf0] }
 0x121   : > { %v6638_v55 = vld [vmem:[#allocation5 + $0xa20] sm:$0xf0]  ;;  %v8751_v49 = vor.u32 %v7460_v37, %v5556_v51  ;;  %v7452_v48 = vld [vmem:[#allocation5 + $0x164] sm:$0xf0]  ;;  %v8760_v63 = vor.u32 %v7652_v28, %v6324_v52 }
 0x122   : > { %v7791_v61 = vld [vmem:[#allocation5 + $0xc04] sm:$0xf]  ;;  %11227 = vst [vmem:[#allocation112_spill] sm:$0xff] %v8727_v41  ;;  %v8731_v4 = vor.u32 %v7727_v2, %v6638_v55  ;;  %3493 = vmatpush.bf16.msrb.mxu0 %v8727_v41  ;;  %v8745_v2 = vor.u32 %v7660_v54, %v6356_v35  ;;  %v7588_v55 = vld [vmem:[#allocation5 + $0x5a4] sm:$0xf0] }
 0x123   : > { %v6894_v53 = vld [vmem:[#allocation5 + $0xc20] sm:$0xf0]  ;;  %11232 = vst [vmem:[#allocation117_spill] sm:$0xff] %v8740_v40  ;;  %v5780_v27 = vld [vmem:[#allocation5 + $0x348] sm:$0xf] }
 0x124   : > { %v7855_v18 = vld [vmem:[#allocation5 + $0xe04] sm:$0xf]  ;;  %11228 = vst [vmem:[#allocation113_spill] sm:$0xff] %v8731_v4  ;;  %v8733_v31 = vor.u32 %v7791_v61, %v6894_v53  ;;  %v7524_v53 = vld [vmem:[#allocation5 + $0x3a4] sm:$0xf0]  ;;  %3506 = vmatpush.bf16.msrb.mxu1 %v8731_v4 }
 0x125   : > { %v7150_v26 = vld [vmem:[#allocation5 + $0xe20] sm:$0xf0]  ;;  %11233 = vst [vmem:[#allocation118_spill] sm:$0xff] %v8742_v60  ;;  %v6068_v61 = vld [vmem:[#allocation5 + $0x588] sm:$0xf]  ;;  %v8755_v54 = vor.u32 %v7524_v53, %v5812_v36  ;;  %3494 = vmatmul.bf16.vlgmr.msrb.gmra.mxu0 %v8543_v22 }
 0x126   : > { %11229 = vst [vmem:[#allocation114_spill] sm:$0xff] %v8733_v31  ;;  %v8736_v24 = vor.u32 %v7855_v18, %v7150_v26  ;;  %3519 = vmatpush.bf16.msrb.mxu2 %v8733_v31  ;;  %3538 = vmatpush.bf16.msra.mxu0 %v8738_v59  ;;  %v8757_v18 = vor.u32 %v7588_v55, %v6068_v61  ;;  %v5524_v26 = vld [vmem:[#allocation5 + $0x148] sm:$0xf] }
 0x127   : > { %11234 = vst [vmem:[#allocation119_spill] sm:$0xff] %v8745_v2  ;;  %v7516_v35 = vld [vmem:[#allocation5 + $0x364] sm:$0xf0]  ;;  %v8766_v61 = vor.u32 %v7452_v48, %v5524_v26  ;;  %3507 = vmatmul.bf16.vlgmr.msrb.gmra.mxu1 %v8551_v13 }
 0x128   : > { %11230 = vst [vmem:[#allocation115_spill] sm:$0xff] %v8736_v24  ;;  %3532 = vmatpush.bf16.msrb.mxu3 %v8736_v24  ;;  %3551 = vmatpush.bf16.msra.mxu1 %v8740_v40  ;;  %v6036_v51 = vld [vmem:[#allocation5 + $0x548] sm:$0xf]  ;;  %v8771_v55 = vor.u32 %v7516_v35, %v5780_v27 }
 0x129   : > { %11235 = vst [vmem:[#allocation120_spill] sm:$0xff] %v8751_v49  ;;  %3520 = vmatmul.bf16.vlgmr.msrb.gmra.mxu2 %v8539_v47  ;;  %v7580_v37 = vld [vmem:[#allocation5 + $0x564] sm:$0xf0] }
 0x12a   : > { %3564 = vmatpush.bf16.msra.mxu2 %v8742_v60  ;;  %11236 = vst [vmem:[#allocation121_spill] sm:$0xff] %v8755_v54  ;;  %v6292_v36 = vld [vmem:[#allocation5 + $0x748] sm:$0xf]  ;;  %3539 = vmatpush.bf16.msra.mxu0 %v8751_v49  ;;  %v8773_v52 = vor.u32 %v7580_v37, %v6036_v51 }
 0x12b   : > { %11237 = vst [vmem:[#allocation122_spill] sm:$0xff] %v8757_v18  ;;  %3533 = vmatmul.bf16.vlgmr.msrb.gmra.mxu3 %v8545_v42  ;;  %v7644_v53 = vld [vmem:[#allocation5 + $0x764] sm:$0xf0] }
 0x12c   : > { %3577 = vmatpush.bf16.msra.mxu3 %v8745_v2  ;;  %11238 = vst [vmem:[#allocation123_spill] sm:$0xff] %v8760_v63  ;;  %3552 = vmatpush.bf16.msra.mxu1 %v8755_v54  ;;  %v5492_v28 = vld [vmem:[#allocation5 + $0x108] sm:$0xf]  ;;  %v8776_v40 = vor.u32 %v7644_v53, %v6292_v36 }
 0x12d   : > { %11239 = vst [vmem:[#allocation124_spill] sm:$0xff] %v8766_v61  ;;  %v7444_v2 = vld [vmem:[#allocation5 + $0x124] sm:$0xf0] }
 0x12e   : > { %3565 = vmatpush.bf16.msra.mxu2 %v8757_v18  ;;  %11240 = vst [vmem:[#allocation125_spill] sm:$0xff] %v8771_v55  ;;  %v5748_v60 = vld [vmem:[#allocation5 + $0x308] sm:$0xf]  ;;  %3540 = vmatpush.bf16.msra.mxu0 %v8766_v61  ;;  %v8779_v54 = vor.u32 %v7444_v2, %v5492_v28 }
 0x12f   : > { %11241 = vst [vmem:[#allocation126_spill] sm:$0xff] %v8773_v52  ;;  %v7508_v49 = vld [vmem:[#allocation5 + $0x324] sm:$0xf0] }
 0x130   : > { %3578 = vmatpush.bf16.msra.mxu3 %v8760_v63  ;;  %11242 = vst [vmem:[#allocation127_spill] sm:$0xff] %v8776_v40  ;;  %v6004_v26 = vld [vmem:[#allocation5 + $0x508] sm:$0xf]  ;;  %3553 = vmatpush.bf16.msra.mxu1 %v8771_v55  ;;  %v8783_v27 = vor.u32 %v7508_v49, %v5748_v60 }
 0x131   : > { %v7572_v48 = vld [vmem:[#allocation5 + $0x524] sm:$0xf0]  ;;  %11243 = vst [vmem:[#allocation128_spill] sm:$0xff] %v8779_v54 }
 0x132   : > { %v6260_v59 = vld [vmem:[#allocation5 + $0x708] sm:$0xf]  ;;  %3566 = vmatpush.bf16.msra.mxu2 %v8773_v52  ;;  %11244 = vst [vmem:[#allocation129_spill] sm:$0xff] %v8783_v27  ;;  %v8785_v35 = vor.u32 %v7572_v48, %v6004_v26  ;;  %3541 = vmatpush.bf16.msra.mxu0 %v8779_v54 }
 0x133   : > { %v7636_v24 = vld [vmem:[#allocation5 + $0x724] sm:$0xf0] }
 0x134   : > { %11245 = vst [vmem:[#allocation130_spill] sm:$0xff] %v8785_v35  ;;  %v5460_v51 = vld [vmem:[#allocation5 + $0xc8] sm:$0xf]  ;;  %3579 = vmatpush.bf16.msra.mxu3 %v8776_v40  ;;  %v8788_v53 = vor.u32 %v7636_v24, %v6260_v59  ;;  %3554 = vmatpush.bf16.msra.mxu1 %v8783_v27 }
 0x135   : > { %v7436_v37 = vld [vmem:[#allocation5 + $0xe4] sm:$0xf0] }
 0x136   : > { %v5716_v36 = vld [vmem:[#allocation5 + $0x2c8] sm:$0xf]  ;;  %11246 = vst [vmem:[#allocation131_spill] sm:$0xff] %v8788_v53  ;;  %v8791_v55 = vor.u32 %v7436_v37, %v5460_v51  ;;  %3567 = vmatpush.bf16.msra.mxu2 %v8785_v35 }
 0x137   : > { %v7500_v63 = vld [vmem:[#allocation5 + $0x2e4] sm:$0xf0] }
 0x138   : > { %v5972_v18 = vld [vmem:[#allocation5 + $0x4c8] sm:$0xf]  ;;  %11247 = vst [vmem:[#allocation132_spill] sm:$0xff] %v8791_v55  ;;  %v8795_v60 = vor.u32 %v7500_v63, %v5716_v36  ;;  %3580 = vmatpush.bf16.msra.mxu3 %v8788_v53  ;;  %3542 = vmatpush.bf16.msra.mxu0 %v8791_v55 }
 0x139   : > { %v7564_v61 = vld [vmem:[#allocation5 + $0x4e4] sm:$0xf0] }
 0x13a   : > { %v6228_v2 = vld [vmem:[#allocation5 + $0x6c8] sm:$0xf]  ;;  %11248 = vst [vmem:[#allocation133_spill] sm:$0xff] %v8795_v60  ;;  %v8797_v49 = vor.u32 %v7564_v61, %v5972_v18  ;;  %3555 = vmatpush.bf16.msra.mxu1 %v8795_v60 }
 0x13b   : > { %v7628_v28 = vld [vmem:[#allocation5 + $0x6e4] sm:$0xf0] }
 0x13c   : > { %11249 = vst [vmem:[#allocation134_spill] sm:$0xff] %v8797_v49  ;;  %v5428_v26 = vld [vmem:[#allocation5 + $0x88] sm:$0xf]  ;;  %v8800_v48 = vor.u32 %v7628_v28, %v6228_v2  ;;  %3568 = vmatpush.bf16.msra.mxu2 %v8797_v49 }
 0x13d   : > { %v7428_v59 = vld [vmem:[#allocation5 + $0xa4] sm:$0xf0] }
 0x13e   : > { %v5684_v24 = vld [vmem:[#allocation5 + $0x288] sm:$0xf]  ;;  %11250 = vst [vmem:[#allocation135_spill] sm:$0xff] %v8800_v48  ;;  %v8803_v27 = vor.u32 %v7428_v59, %v5428_v26  ;;  %3581 = vmatpush.bf16.msra.mxu3 %v8800_v48 }
 0x13f   : > { %v7492_v40 = vld [vmem:[#allocation5 + $0x2a4] sm:$0xf0] }
 0x140   : > { %v5940_v52 = vld [vmem:[#allocation5 + $0x488] sm:$0xf]  ;;  %11251 = vst [vmem:[#allocation136_spill] sm:$0xff] %v8803_v27  ;;  %v8807_v18 = vor.u32 %v7492_v40, %v5684_v24  ;;  %3543 = vmatpush.bf16.msra.mxu0 %v8803_v27 }
 0x141   : > { %v7556_v54 = vld [vmem:[#allocation5 + $0x4a4] sm:$0xf0] }
 0x142   : > { %v6196_v51 = vld [vmem:[#allocation5 + $0x688] sm:$0xf]  ;;  %11252 = vst [vmem:[#allocation137_spill] sm:$0xff] %v8807_v18  ;;  %v8809_v63 = vor.u32 %v7556_v54, %v5940_v52  ;;  %3556 = vmatpush.bf16.msra.mxu1 %v8807_v18 }
 0x143   : > { %v7620_v37 = vld [vmem:[#allocation5 + $0x6a4] sm:$0xf0] }
 0x144   : > { %11253 = vst [vmem:[#allocation138_spill] sm:$0xff] %v8809_v63  ;;  %v5396_v61 = vld [vmem:[#allocation5 + $0x48] sm:$0xf]  ;;  %v8812_v28 = vor.u32 %v7620_v37, %v6196_v51  ;;  %3569 = vmatpush.bf16.msra.mxu2 %v8809_v63 }
 0x145   : > { %v7420_v36 = vld [vmem:[#allocation5 + $0x64] sm:$0xf0] }
 0x146   : > { %v5652_v2 = vld [vmem:[#allocation5 + $0x248] sm:$0xf]  ;;  %11254 = vst [vmem:[#allocation139_spill] sm:$0xff] %v8812_v28  ;;  %v8815_v60 = vor.u32 %v7420_v36, %v5396_v61  ;;  %3582 = vmatpush.bf16.msra.mxu3 %v8812_v28 }
 0x147   : > { %v7484_v53 = vld [vmem:[#allocation5 + $0x264] sm:$0xf0] }
 0x148   : > { %v5908_v35 = vld [vmem:[#allocation5 + $0x448] sm:$0xf]  ;;  %11255 = vst [vmem:[#allocation140_spill] sm:$0xff] %v8815_v60  ;;  %v8819_v54 = vor.u32 %v7484_v53, %v5652_v2  ;;  %3544 = vmatpush.bf16.msra.mxu0 %v8815_v60 }
 0x149   : > { %v7548_v55 = vld [vmem:[#allocation5 + $0x464] sm:$0xf0] }
 0x14a   : > { %v6164_v26 = vld [vmem:[#allocation5 + $0x648] sm:$0xf]  ;;  %11256 = vst [vmem:[#allocation141_spill] sm:$0xff] %v8819_v54  ;;  %v8821_v52 = vor.u32 %v7548_v55, %v5908_v35  ;;  %3557 = vmatpush.bf16.msra.mxu1 %v8819_v54 }
 0x14b   : > { %v7612_v59 = vld [vmem:[#allocation5 + $0x664] sm:$0xf0] }
 0x14c   : > { %v5364_v40 = vld [vmem:[#allocation5 + $0x8] sm:$0xf]  ;;  %11257 = vst [vmem:[#allocation142_spill] sm:$0xff] %v8821_v52  ;;  %v8824_v49 = vor.u32 %v7612_v59, %v6164_v26  ;;  %3570 = vmatpush.bf16.msra.mxu2 %v8821_v52  ;;  %v3378_v52 = vpop.f32.mrf.mxu3 }
 0x14d   : > { %v7412_v24 = vld [vmem:[#allocation5 + $0x24] sm:$0xf0] }
 0x14e   : > { %v5620_v51 = vld [vmem:[#allocation5 + $0x208] sm:$0xf]  ;;  %11258 = vst [vmem:[#allocation143_spill] sm:$0xff] %v8824_v49  ;;  %v8827_v63 = vor.u32 %v7412_v24, %v5364_v40  ;;  %3583 = vmatpush.bf16.msra.mxu3 %v8824_v49  ;;  %v3365_v49 = vpop.f32.mrf.mxu2 }
 0x14f   : > { %v7476_v37 = vld [vmem:[#allocation5 + $0x224] sm:$0xf0] }
 0x150   : > { %v5876_v48 = vld [vmem:[#allocation5 + $0x408] sm:$0xf]  ;;  %11259 = vst [vmem:[#allocation144_spill] sm:$0xff] %v8827_v63  ;;  %v8831_v2 = vor.u32 %v7476_v37, %v5620_v51  ;;  %3545 = vmatpush.bf16.msra.mxu0 %v8827_v63 }
 0x151   : > { %v7540_v27 = vld [vmem:[#allocation5 + $0x424] sm:$0xf0] }
 0x152   : > { %v6132_v61 = vld [vmem:[#allocation5 + $0x608] sm:$0xf]  ;;  %11260 = vst [vmem:[#allocation145_spill] sm:$0xff] %v8831_v2  ;;  %v8833_v26 = vor.u32 %v7540_v27, %v5876_v48  ;;  %3558 = vmatpush.bf16.msra.mxu1 %v8831_v2 }
 0x153   : > { %v7604_v36 = vld [vmem:[#allocation5 + $0x624] sm:$0xf0]  ;;  %3546 = vmatmul.bf16.vlgmr.msra.gmra.mxu0 %v8467_v19 }
 0x154   : > { %v6612_v31 = vld [vmem:[#allocation5 + $0x9c8] sm:$0xf]  ;;  %11261 = vst [vmem:[#allocation146_spill] sm:$0xff] %v8833_v26  ;;  %v8836_v18 = vor.u32 %v7604_v36, %v6132_v61  ;;  %3571 = vmatpush.bf16.msra.mxu2 %v8833_v26  ;;  %v3339_v26 = vpop.f32.mrf.mxu0 }
 0x155   : > { %v7724_v4 = vld [vmem:[#allocation5 + $0x9e4] sm:$0xf0]  ;;  %3559 = vmatmul.bf16.vlgmr.msra.gmra.mxu1 %v8469_v30 }
 0x156   : > { %v6868_v41 = vld [vmem:[#allocation5 + $0xbc8] sm:$0xf]  ;;  %11262 = vst [vmem:[#allocation147_spill] sm:$0xff] %v8836_v18  ;;  %v8838_v60 = vor.u32 %v7724_v4, %v6612_v31  ;;  %3584 = vmatpush.bf16.msra.mxu3 %v8836_v18 }
 0x157   : > { %v7788_v53 = vld [vmem:[#allocation5 + $0xbe4] sm:$0xf0]  ;;  %3572 = vmatmul.bf16.vlgmr.msra.gmra.mxu2 %v8455_v39 }
 0x158   : > { %v7124_v55 = vld [vmem:[#allocation5 + $0xdc8] sm:$0xf]  ;;  %11263 = vst [vmem:[#allocation148_spill] sm:$0xff] %v8838_v60  ;;  %v8840_v40 = vor.u32 %v7788_v53, %v6868_v41  ;;  %3590 = vmatpush.bf16.msrb.mxu0 %v8838_v60 }
 0x159   : > { %v7852_v35 = vld [vmem:[#allocation5 + $0xde4] sm:$0xf0]  ;;  %3585 = vmatmul.bf16.vlgmr.msra.gmra.mxu3 %v8457_v1 }
 0x15a   : > { %v7380_v59 = vld [vmem:[#allocation5 + $0xfc8] sm:$0xf]  ;;  %11264 = vst [vmem:[#allocation149_spill] sm:$0xff] %v8840_v40  ;;  %v8842_v24 = vor.u32 %v7852_v35, %v7124_v55  ;;  %3603 = vmatpush.bf16.msrb.mxu1 %v8840_v40 }
 0x15b   : > { %v7916_v28 = vld [vmem:[#allocation5 + $0xfe4] sm:$0xf0] }
 0x15c   : > { %11265 = vst [vmem:[#allocation150_spill] sm:$0xff] %v8842_v24  ;;  %v6580_v11 = vld [vmem:[#allocation5 + $0x988] sm:$0xf]  ;;  %v8845_v51 = vor.u32 %v7916_v28, %v7380_v59  ;;  %3616 = vmatpush.bf16.msrb.mxu2 %v8842_v24 }
 0x15d   : > { %v7716_v54 = vld [vmem:[#allocation5 + $0x9a4] sm:$0xf0] }
 0x15e   : > { %v6836_v32 = vld [vmem:[#allocation5 + $0xb88] sm:$0xf]  ;;  %11266 = vst [vmem:[#allocation151_spill] sm:$0xff] %v8845_v51  ;;  %v8851_v41 = vor.u32 %v7716_v54, %v6580_v11  ;;  %3629 = vmatpush.bf16.msrb.mxu3 %v8845_v51 }
 0x15f   : > { %v7780_v27 = vld [vmem:[#allocation5 + $0xba4] sm:$0xf0] }
 0x160   : > { %v7092_v48 = vld [vmem:[#allocation5 + $0xd88] sm:$0xf]  ;;  %11267 = vst [vmem:[#allocation152_spill] sm:$0xff] %v8851_v41  ;;  %v8855_v28 = vor.u32 %v7780_v27, %v6836_v32  ;;  %3591 = vmatpush.bf16.msrb.mxu0 %v8851_v41 }
 0x161   : > { %v7844_v37 = vld [vmem:[#allocation5 + $0xda4] sm:$0xf0] }
 0x162   : > { %v7348_v4 = vld [vmem:[#allocation5 + $0xf88] sm:$0xf]  ;;  %11268 = vst [vmem:[#allocation153_spill] sm:$0xff] %v8855_v28  ;;  %v8857_v61 = vor.u32 %v7844_v37, %v7092_v48  ;;  %3604 = vmatpush.bf16.msrb.mxu1 %v8855_v28 }
 0x163   : > { %v7908_v31 = vld [vmem:[#allocation5 + $0xfa4] sm:$0xf0] }
 0x164   : > { %11269 = vst [vmem:[#allocation154_spill] sm:$0xff] %v8857_v61  ;;  %v6548_v36 = vld [vmem:[#allocation5 + $0x948] sm:$0xf]  ;;  %v8860_v35 = vor.u32 %v7908_v31, %v7348_v4  ;;  %3617 = vmatpush.bf16.msrb.mxu2 %v8857_v61 }
 0x165   : > { %v7708_v53 = vld [vmem:[#allocation5 + $0x964] sm:$0xf0] }
 0x166   : > { %v6804_v55 = vld [vmem:[#allocation5 + $0xb48] sm:$0xf]  ;;  %11270 = vst [vmem:[#allocation155_spill] sm:$0xff] %v8860_v35  ;;  %v8866_v32 = vor.u32 %v7708_v53, %v6548_v36  ;;  %3630 = vmatpush.bf16.msrb.mxu3 %v8860_v35 }
 0x167   : > { %v7772_v59 = vld [vmem:[#allocation5 + $0xb64] sm:$0xf0] }
 0x168   : > { %v7060_v18 = vld [vmem:[#allocation5 + $0xd48] sm:$0xf]  ;;  %11271 = vst [vmem:[#allocation156_spill] sm:$0xff] %v8866_v32  ;;  %v8871_v27 = vor.u32 %v7772_v59, %v6804_v55  ;;  %3592 = vmatpush.bf16.msrb.mxu0 %v8866_v32 }
 0x169   : > { %v7836_v60 = vld [vmem:[#allocation5 + $0xd64] sm:$0xf0] }
 0x16a   : > { %v7316_v11 = vld [vmem:[#allocation5 + $0xf48] sm:$0xf]  ;;  %11272 = vst [vmem:[#allocation157_spill] sm:$0xff] %v8871_v27  ;;  %v8873_v48 = vor.u32 %v7836_v60, %v7060_v18  ;;  %3605 = vmatpush.bf16.msrb.mxu1 %v8871_v27 }
 0x16b   : > { %v7900_v54 = vld [vmem:[#allocation5 + $0xf64] sm:$0xf0] }
 0x16c   : > { %11273 = vst [vmem:[#allocation158_spill] sm:$0xff] %v8873_v48  ;;  %v6516_v37 = vld [vmem:[#allocation5 + $0x908] sm:$0xf]  ;;  %v8876_v51 = vor.u32 %v7900_v54, %v7316_v11  ;;  %3618 = vmatpush.bf16.msrb.mxu2 %v8873_v48 }
 0x16d   : > { %v7700_v4 = vld [vmem:[#allocation5 + $0x924] sm:$0xf0] }
 0x16e   : > { %v6772_v31 = vld [vmem:[#allocation5 + $0xb08] sm:$0xf]  ;;  %11274 = vst [vmem:[#allocation159_spill] sm:$0xff] %v8876_v51  ;;  %v8879_v28 = vor.u32 %v7700_v4, %v6516_v37  ;;  %3631 = vmatpush.bf16.msrb.mxu3 %v8876_v51 }
 0x16f   : > { %v7764_v41 = vld [vmem:[#allocation5 + $0xb24] sm:$0xf0] }
 0x170   : > { %v7028_v36 = vld [vmem:[#allocation5 + $0xd08] sm:$0xf]  ;;  %11275 = vst [vmem:[#allocation160_spill] sm:$0xff] %v8879_v28  ;;  %v8883_v60 = vor.u32 %v7764_v41, %v6772_v31  ;;  %3593 = vmatpush.bf16.msrb.mxu0 %v8879_v28 }
 0x171   : > { %v7828_v53 = vld [vmem:[#allocation5 + $0xd24] sm:$0xf0] }
 0x172   : > { %v7284_v24 = vld [vmem:[#allocation5 + $0xf08] sm:$0xf]  ;;  %11276 = vst [vmem:[#allocation161_spill] sm:$0xff] %v8883_v60  ;;  %v8885_v18 = vor.u32 %v7828_v53, %v7028_v36  ;;  %3606 = vmatpush.bf16.msrb.mxu1 %v8883_v60 }
 0x173   : > { %v7892_v40 = vld [vmem:[#allocation5 + $0xf24] sm:$0xf0] }
 0x174   : > { %11277 = vst [vmem:[#allocation162_spill] sm:$0xff] %v8885_v18  ;;  %v6484_v55 = vld [vmem:[#allocation5 + $0x8c8] sm:$0xf]  ;;  %v8888_v54 = vor.u32 %v7892_v40, %v7284_v24  ;;  %3619 = vmatpush.bf16.msrb.mxu2 %v8885_v18 }
 0x175   : > { %v7692_v59 = vld [vmem:[#allocation5 + $0x8e4] sm:$0xf0] }
 0x176   : > { %v6740_v11 = vld [vmem:[#allocation5 + $0xac8] sm:$0xf]  ;;  %11278 = vst [vmem:[#allocation163_spill] sm:$0xff] %v8888_v54  ;;  %v8891_v27 = vor.u32 %v7692_v59, %v6484_v55  ;;  %3632 = vmatpush.bf16.msrb.mxu3 %v8888_v54 }
 0x177   : > { %v7756_v35 = vld [vmem:[#allocation5 + $0xae4] sm:$0xf0] }
 0x178   : > { %v6996_v61 = vld [vmem:[#allocation5 + $0xcc8] sm:$0xf]  ;;  %11279 = vst [vmem:[#allocation164_spill] sm:$0xff] %v8891_v27  ;;  %v8895_v41 = vor.u32 %v7756_v35, %v6740_v11  ;;  %3594 = vmatpush.bf16.msrb.mxu0 %v8891_v27 }
 0x179   : > { %v7820_v32 = vld [vmem:[#allocation5 + $0xce4] sm:$0xf0] }
 0x17a   : > { %v7252_v37 = vld [vmem:[#allocation5 + $0xec8] sm:$0xf]  ;;  %11280 = vst [vmem:[#allocation165_spill] sm:$0xff] %v8895_v41  ;;  %v8897_v31 = vor.u32 %v7820_v32, %v6996_v61  ;;  %3607 = vmatpush.bf16.msrb.mxu1 %v8895_v41 }
 0x17b   : > { %v7884_v4 = vld [vmem:[#allocation5 + $0xee4] sm:$0xf0] }
 0x17c   : > { %11281 = vst [vmem:[#allocation166_spill] sm:$0xff] %v8897_v31  ;;  %v6452_v36 = vld [vmem:[#allocation5 + $0x888] sm:$0xf]  ;;  %v8900_v53 = vor.u32 %v7884_v4, %v7252_v37  ;;  %3620 = vmatpush.bf16.msrb.mxu2 %v8897_v31 }
 0x17d   : > { %v7684_v40 = vld [vmem:[#allocation5 + $0x8a4] sm:$0xf0] }
 0x17e   : > { %v6708_v24 = vld [vmem:[#allocation5 + $0xa88] sm:$0xf]  ;;  %11282 = vst [vmem:[#allocation167_spill] sm:$0xff] %v8900_v53  ;;  %v8903_v60 = vor.u32 %v7684_v40, %v6452_v36  ;;  %3633 = vmatpush.bf16.msrb.mxu3 %v8900_v53 }
 0x17f   : > { %v7748_v51 = vld [vmem:[#allocation5 + $0xaa4] sm:$0xf0] }
 0x180   : > { %v6964_v48 = vld [vmem:[#allocation5 + $0xc88] sm:$0xf]  ;;  %11283 = vst [vmem:[#allocation168_spill] sm:$0xff] %v8903_v60  ;;  %v8907_v61 = vor.u32 %v7748_v51, %v6708_v24  ;;  %3595 = vmatpush.bf16.msrb.mxu0 %v8903_v60 }
 0x181   : > { %v7812_v28 = vld [vmem:[#allocation5 + $0xca4] sm:$0xf0] }
 0x182   : > { %v7220_v55 = vld [vmem:[#allocation5 + $0xe88] sm:$0xf]  ;;  %11284 = vst [vmem:[#allocation169_spill] sm:$0xff] %v8907_v61  ;;  %v8909_v35 = vor.u32 %v7812_v28, %v6964_v48  ;;  %v3352_v48 = vpop.f32.mrf.mxu1  ;;  %3608 = vmatpush.bf16.msrb.mxu1 %v8907_v61  ;;  %v7464_v61 = vld [vmem:[#allocation5 + $0x1cc] sm:$0xf] }
 0x183   : > { %v7876_v59 = vld [vmem:[#allocation5 + $0xea4] sm:$0xf0]  ;;  %v3353_v2 = vadd.f32 %v3352_v48, %v3339_v26  ;;  %v6102_v26 = vld [vmem:[#allocation5 + $0x5e8] sm:$0xf0] }
 0x184   : > { %11285 = vst [vmem:[#allocation170_spill] sm:$0xff] %v8909_v35  ;;  %v6420_v32 = vld [vmem:[#allocation5 + $0x848] sm:$0xf]  ;;  %v8912_v4 = vor.u32 %v7876_v59, %v7220_v55  ;;  %3621 = vmatpush.bf16.msrb.mxu2 %v8909_v35  ;;  %v7528_v35 = vld [vmem:[#allocation5 + $0x3cc] sm:$0xf] }
 0x185   : > { %v7676_v11 = vld [vmem:[#allocation5 + $0x864] sm:$0xf0]  ;;  %v7656_v48 = vld [vmem:[#allocation5 + $0x7cc] sm:$0xf] }
 0x186   : > { %v6676_v37 = vld [vmem:[#allocation5 + $0xa48] sm:$0xf]  ;;  %11286 = vst [vmem:[#allocation171_spill] sm:$0xff] %v8912_v4  ;;  %v8915_v31 = vor.u32 %v7676_v11, %v6420_v32  ;;  %3634 = vmatpush.bf16.msrb.mxu3 %v8912_v4  ;;  %v6358_v4 = vld [vmem:[#allocation5 + $0x7e8] sm:$0xf0] }
 0x187   : > { %v7740_v54 = vld [vmem:[#allocation5 + $0xa64] sm:$0xf0] }
 0x188   : > { %v6932_v18 = vld [vmem:[#allocation5 + $0xc48] sm:$0xf]  ;;  %11287 = vst [vmem:[#allocation172_spill] sm:$0xff] %v8915_v31  ;;  %v8919_v24 = vor.u32 %v7740_v54, %v6676_v37  ;;  %v3366_v54 = vadd.f32 %v3365_v49, %v3353_v2  ;;  %3596 = vmatpush.bf16.msrb.mxu0 %v8915_v31  ;;  %v7592_v37 = vld [vmem:[#allocation5 + $0x5cc] sm:$0xf]  ;;  %v8940_v2 = vor.u32 %v7464_v61, %v5590_v43 }
 0x189   : > { %v7804_v27 = vld [vmem:[#allocation5 + $0xc64] sm:$0xf0]  ;;  %v7648_v43 = vld [vmem:[#allocation5 + $0x78c] sm:$0xf]  ;;  %v5820_v31 = vld [vmem:[#allocation5 + $0x390] sm:$0xf] }
 0x18a   : > { %v7188_v36 = vld [vmem:[#allocation5 + $0xe48] sm:$0xf]  ;;  %11288 = vst [vmem:[#allocation173_spill] sm:$0xff] %v8919_v24  ;;  %v8921_v55 = vor.u32 %v7804_v27, %v6932_v18  ;;  %v5846_v18 = vld [vmem:[#allocation5 + $0x3e8] sm:$0xf0]  ;;  %3609 = vmatpush.bf16.msrb.mxu1 %v8919_v24  ;;  %v8935_v15 = vadd.f32 %v3378_v52, %v3366_v54 }
 0x18b   : > { %v7868_v40 = vld [vmem:[#allocation5 + $0xe64] sm:$0xf0]  ;;  %11295 = vst [vmem:[#allocation180_spill] sm:$0xff] %v8940_v2  ;;  %v7456_v24 = vld [vmem:[#allocation5 + $0x18c] sm:$0xf] }
 0x18c   : > { %v6388_v51 = vld [vmem:[#allocation5 + $0x808] sm:$0xf]  ;;  %11289 = vst [vmem:[#allocation174_spill] sm:$0xff] %v8921_v55  ;;  %v8924_v60 = vor.u32 %v7868_v40, %v7188_v36  ;;  %3622 = vmatpush.bf16.msrb.mxu2 %v8921_v55  ;;  %v5558_v55 = vld [vmem:[#allocation5 + $0x1a8] sm:$0xf0] }
 0x18d   : > { %v7668_v28 = vld [vmem:[#allocation5 + $0x824] sm:$0xf0]  ;;  %v5814_v52 = vld [vmem:[#allocation5 + $0x3a8] sm:$0xf0]  ;;  %v8953_v61 = vor.u32 %v7456_v24, %v5558_v55 }
 0x18e   : > { %v6644_v59 = vld [vmem:[#allocation5 + $0xa08] sm:$0xf]  ;;  %11290 = vst [vmem:[#allocation175_spill] sm:$0xff] %v8924_v60  ;;  %v8927_v27 = vor.u32 %v7668_v28, %v6388_v51  ;;  %3635 = vmatpush.bf16.msrb.mxu3 %v8924_v60  ;;  %v8942_v51 = vor.u32 %v7528_v35, %v5846_v18  ;;  %v8944_v28 = vor.u32 %v7592_v37, %v6102_v26  ;;  %v6070_v54 = vld [vmem:[#allocation5 + $0x5a8] sm:$0xf0]  ;;  %v3354_v60 = vpop.f32.mrf.mxu1  ;;  %v3367_v35 = vpop.f32.mrf.mxu2 }
 0x18f   : > { %v7732_v53 = vld [vmem:[#allocation5 + $0xa24] sm:$0xf0]  ;;  %11299 = vst [vmem:[#allocation184_spill] sm:$0xff] %v8953_v61  ;;  %v7448_v18 = vld [vmem:[#allocation5 + $0x14c] sm:$0xf] }
 0x190   : > { %v6900_v41 = vld [vmem:[#allocation5 + $0xc08] sm:$0xf]  ;;  %11291 = vst [vmem:[#allocation176_spill] sm:$0xff] %v8927_v27  ;;  %v8931_v36 = vor.u32 %v7732_v53, %v6644_v59  ;;  %v7520_v53 = vld [vmem:[#allocation5 + $0x38c] sm:$0xf]  ;;  %v3341_v59 = vpop.f32.mrf.mxu0  ;;  %3597 = vmatpush.bf16.msrb.mxu0 %v8927_v27 }
 0x191   : > { %v7796_v32 = vld [vmem:[#allocation5 + $0xc24] sm:$0xf0]  ;;  %11296 = vst [vmem:[#allocation181_spill] sm:$0xff] %v8942_v51  ;;  %v5526_v37 = vld [vmem:[#allocation5 + $0x168] sm:$0xf0] }
 0x192   : > { %v7156_v11 = vld [vmem:[#allocation5 + $0xe08] sm:$0xf]  ;;  %11292 = vst [vmem:[#allocation177_spill] sm:$0xff] %v8931_v36  ;;  %v8933_v40 = vor.u32 %v7796_v32, %v6900_v41  ;;  %v8947_v41 = vor.u32 %v7656_v48, %v6358_v4  ;;  %v7584_v32 = vld [vmem:[#allocation5 + $0x58c] sm:$0xf]  ;;  %3610 = vmatpush.bf16.msrb.mxu1 %v8931_v36  ;;  %v8957_v4 = vor.u32 %v7520_v53, %v5814_v52 }
 0x193   : > { %v7860_v63 = vld [vmem:[#allocation5 + $0xe24] sm:$0xf0]  ;;  %11297 = vst [vmem:[#allocation182_spill] sm:$0xff] %v8944_v28  ;;  %v8959_v60 = vor.u32 %v7584_v32, %v6070_v54  ;;  %v7512_v26 = vld [vmem:[#allocation5 + $0x34c] sm:$0xf]  ;;  %3598 = vmatmul.bf16.vlgmr.msrb.gmra.mxu0 %v8543_v22  ;;  %v8968_v32 = vor.u32 %v7448_v18, %v5526_v37 }
 0x194   : > { %11293 = vst [vmem:[#allocation178_spill] sm:$0xff] %v8933_v40  ;;  %v8938_v49 = vor.u32 %v7860_v63, %v7156_v11  ;;  %3623 = vmatpush.bf16.msrb.mxu2 %v8933_v40  ;;  %v6326_v63 = vld [vmem:[#allocation5 + $0x7a8] sm:$0xf0]  ;;  %3642 = vmatpush.bf16.msra.mxu0 %v8940_v2  ;;  %v3380_v11 = vpop.f32.mrf.mxu3 }
 0x195   : > { %11298 = vst [vmem:[#allocation183_spill] sm:$0xff] %v8947_v41  ;;  %v8962_v48 = vor.u32 %v7648_v43, %v6326_v63  ;;  %v5782_v24 = vld [vmem:[#allocation5 + $0x368] sm:$0xf0]  ;;  %3611 = vmatmul.bf16.vlgmr.msrb.gmra.mxu1 %v8551_v13 }
 0x196   : > { %11294 = vst [vmem:[#allocation179_spill] sm:$0xff] %v8938_v49  ;;  %3636 = vmatpush.bf16.msrb.mxu3 %v8938_v49  ;;  %3655 = vmatpush.bf16.msra.mxu1 %v8942_v51  ;;  %v7576_v55 = vld [vmem:[#allocation5 + $0x54c] sm:$0xf]  ;;  %v8973_v54 = vor.u32 %v7512_v26, %v5782_v24 }
 0x197   : > { %11300 = vst [vmem:[#allocation185_spill] sm:$0xff] %v8957_v4  ;;  %3624 = vmatmul.bf16.vlgmr.msrb.gmra.mxu2 %v8539_v47  ;;  %v6038_v59 = vld [vmem:[#allocation5 + $0x568] sm:$0xf0] }
 0x198   : > { %3668 = vmatpush.bf16.msra.mxu2 %v8944_v28  ;;  %11301 = vst [vmem:[#allocation186_spill] sm:$0xff] %v8959_v60  ;;  %v7640_v53 = vld [vmem:[#allocation5 + $0x74c] sm:$0xf]  ;;  %3643 = vmatpush.bf16.msra.mxu0 %v8953_v61  ;;  %v8975_v43 = vor.u32 %v7576_v55, %v6038_v59  ;;  %v3391_v26 = vpop.f32.mrf.mxu0 }
 0x199   : > { %11302 = vst [vmem:[#allocation187_spill] sm:$0xff] %v8962_v48  ;;  %3637 = vmatmul.bf16.vlgmr.msrb.gmra.mxu3 %v8545_v42  ;;  %v6294_v52 = vld [vmem:[#allocation5 + $0x768] sm:$0xf0] }
 0x19a   : > { %3681 = vmatpush.bf16.msra.mxu3 %v8947_v41  ;;  %11303 = vst [vmem:[#allocation188_spill] sm:$0xff] %v8968_v32  ;;  %3656 = vmatpush.bf16.msra.mxu1 %v8957_v4  ;;  %v7440_v63 = vld [vmem:[#allocation5 + $0x10c] sm:$0xf]  ;;  %v8978_v41 = vor.u32 %v7640_v53, %v6294_v52 }
 0x19b   : > { %11304 = vst [vmem:[#allocation189_spill] sm:$0xff] %v8973_v54  ;;  %v5494_v35 = vld [vmem:[#allocation5 + $0x128] sm:$0xf0] }
 0x19c   : > { %3669 = vmatpush.bf16.msra.mxu2 %v8959_v60  ;;  %11305 = vst [vmem:[#allocation190_spill] sm:$0xff] %v8975_v43  ;;  %v7504_v11 = vld [vmem:[#allocation5 + $0x30c] sm:$0xf]  ;;  %3644 = vmatpush.bf16.msra.mxu0 %v8968_v32  ;;  %v8981_v4 = vor.u32 %v7440_v63, %v5494_v35  ;;  %v3404_v60 = vpop.f32.mrf.mxu1 }
 0x19d   : > { %11306 = vst [vmem:[#allocation191_spill] sm:$0xff] %v8978_v41  ;;  %v5750_v61 = vld [vmem:[#allocation5 + $0x328] sm:$0xf0] }
 0x19e   : > { %3682 = vmatpush.bf16.msra.mxu3 %v8962_v48  ;;  %v7568_v18 = vld [vmem:[#allocation5 + $0x50c] sm:$0xf]  ;;  %11307 = vst [vmem:[#allocation192_spill] sm:$0xff] %v8981_v4  ;;  %3657 = vmatpush.bf16.msra.mxu1 %v8973_v54  ;;  %v8985_v24 = vor.u32 %v7504_v11, %v5750_v61  ;;  %v3392_v48 = vadd.f32 %v3391_v26, %v8935_v15 }
 0x19f   : > { %v6006_v37 = vld [vmem:[#allocation5 + $0x528] sm:$0xf0] }
 0x1a0   : > { %v7632_v28 = vld [vmem:[#allocation5 + $0x70c] sm:$0xf]  ;;  %3670 = vmatpush.bf16.msra.mxu2 %v8975_v43  ;;  %11308 = vst [vmem:[#allocation193_spill] sm:$0xff] %v8985_v24  ;;  %v8987_v55 = vor.u32 %v7568_v18, %v6006_v37  ;;  %v3405_v43 = vadd.f32 %v3404_v60, %v3392_v48  ;;  %3645 = vmatpush.bf16.msra.mxu0 %v8981_v4  ;;  %v3417_v37 = vpop.f32.mrf.mxu2  ;;  %v3430_v4 = vpop.f32.mrf.mxu3 }
 0x1a1   : > { %v6262_v51 = vld [vmem:[#allocation5 + $0x728] sm:$0xf0] }
 0x1a2   : > { %11309 = vst [vmem:[#allocation194_spill] sm:$0xff] %v8987_v55  ;;  %v7432_v59 = vld [vmem:[#allocation5 + $0xcc] sm:$0xf]  ;;  %3683 = vmatpush.bf16.msra.mxu3 %v8978_v41  ;;  %v8991_v32 = vor.u32 %v7632_v28, %v6262_v51  ;;  %3658 = vmatpush.bf16.msra.mxu1 %v8985_v24 }
 0x1a3   : > { %v5462_v53 = vld [vmem:[#allocation5 + $0xe8] sm:$0xf0] }
 0x1a4   : > { %v7496_v52 = vld [vmem:[#allocation5 + $0x2cc] sm:$0xf]  ;;  %11310 = vst [vmem:[#allocation195_spill] sm:$0xff] %v8991_v32  ;;  %v8994_v61 = vor.u32 %v7432_v59, %v5462_v53  ;;  %3671 = vmatpush.bf16.msra.mxu2 %v8987_v55  ;;  %v3418_v53 = vadd.f32 %v3417_v37, %v3405_v43 }
 0x1a5   : > { %v5718_v63 = vld [vmem:[#allocation5 + $0x2e8] sm:$0xf0] }
 0x1a6   : > { %v7560_v35 = vld [vmem:[#allocation5 + $0x4cc] sm:$0xf]  ;;  %11311 = vst [vmem:[#allocation196_spill] sm:$0xff] %v8994_v61  ;;  %v8998_v15 = vor.u32 %v7496_v52, %v5718_v63  ;;  %3684 = vmatpush.bf16.msra.mxu3 %v8991_v32  ;;  %3646 = vmatpush.bf16.msra.mxu0 %v8994_v61  ;;  %v3393_v63 = vpop.f32.mrf.mxu0  ;;  %v3406_v32 = vpop.f32.mrf.mxu1 }
 0x1a7   : > { %v5974_v2 = vld [vmem:[#allocation5 + $0x4e8] sm:$0xf0] }
 0x1a8   : > { %v7624_v54 = vld [vmem:[#allocation5 + $0x6cc] sm:$0xf]  ;;  %11312 = vst [vmem:[#allocation197_spill] sm:$0xff] %v8998_v15  ;;  %v9000_v11 = vor.u32 %v7560_v35, %v5974_v2  ;;  %v9008_v2 = vadd.f32 %v3430_v4, %v3418_v53  ;;  %3659 = vmatpush.bf16.msra.mxu1 %v8998_v15  ;;  %v3432_v55 = vpop.f32.mrf.mxu3 }
 0x1a9   : > { %v6230_v49 = vld [vmem:[#allocation5 + $0x6e8] sm:$0xf0] }
 0x1aa   : > { %11313 = vst [vmem:[#allocation198_spill] sm:$0xff] %v9000_v11  ;;  %v7424_v51 = vld [vmem:[#allocation5 + $0x8c] sm:$0xf]  ;;  %v9003_v26 = vor.u32 %v7624_v54, %v6230_v49  ;;  %3672 = vmatpush.bf16.msra.mxu2 %v9000_v11 }
 0x1ab   : > { %v5430_v28 = vld [vmem:[#allocation5 + $0xa8] sm:$0xf0] }
 0x1ac   : > { %v7488_v18 = vld [vmem:[#allocation5 + $0x28c] sm:$0xf]  ;;  %11314 = vst [vmem:[#allocation199_spill] sm:$0xff] %v9003_v26  ;;  %v9006_v52 = vor.u32 %v7424_v51, %v5430_v28  ;;  %3685 = vmatpush.bf16.msra.mxu3 %v9003_v26  ;;  %v3419_v26 = vpop.f32.mrf.mxu2 }
 0x1ad   : > { %v5686_v60 = vld [vmem:[#allocation5 + $0x2a8] sm:$0xf0] }
 0x1ae   : > { %v7552_v48 = vld [vmem:[#allocation5 + $0x48c] sm:$0xf]  ;;  %11315 = vst [vmem:[#allocation200_spill] sm:$0xff] %v9006_v52  ;;  %v9012_v49 = vor.u32 %v7488_v18, %v5686_v60  ;;  %3647 = vmatpush.bf16.msra.mxu0 %v9006_v52 }
 0x1af   : > { %v5942_v59 = vld [vmem:[#allocation5 + $0x4a8] sm:$0xf0] }
 0x1b0   : > { %v7616_v24 = vld [vmem:[#allocation5 + $0x68c] sm:$0xf]  ;;  %11316 = vst [vmem:[#allocation201_spill] sm:$0xff] %v9012_v49  ;;  %v9014_v54 = vor.u32 %v7552_v48, %v5942_v59  ;;  %3660 = vmatpush.bf16.msra.mxu1 %v9012_v49 }
 0x1b1   : > { %v6198_v41 = vld [vmem:[#allocation5 + $0x6a8] sm:$0xf0] }
 0x1b2   : > { %11317 = vst [vmem:[#allocation202_spill] sm:$0xff] %v9014_v54  ;;  %v7416_v35 = vld [vmem:[#allocation5 + $0x4c] sm:$0xf]  ;;  %v9017_v61 = vor.u32 %v7616_v24, %v6198_v41  ;;  %3673 = vmatpush.bf16.msra.mxu2 %v9014_v54 }
 0x1b3   : > { %v5398_v43 = vld [vmem:[#allocation5 + $0x68] sm:$0xf0] }
 0x1b4   : > { %v7480_v37 = vld [vmem:[#allocation5 + $0x24c] sm:$0xf]  ;;  %11318 = vst [vmem:[#allocation203_spill] sm:$0xff] %v9017_v61  ;;  %v9020_v11 = vor.u32 %v7416_v35, %v5398_v43  ;;  %3686 = vmatpush.bf16.msra.mxu3 %v9017_v61 }
 0x1b5   : > { %v5654_v51 = vld [vmem:[#allocation5 + $0x268] sm:$0xf0] }
 0x1b6   : > { %v7544_v4 = vld [vmem:[#allocation5 + $0x44c] sm:$0xf]  ;;  %11319 = vst [vmem:[#allocation204_spill] sm:$0xff] %v9020_v11  ;;  %v9024_v32 = vor.u32 %v7480_v37, %v5654_v51  ;;  %3648 = vmatpush.bf16.msra.mxu0 %v9020_v11 }
 0x1b7   : > { %v5910_v28 = vld [vmem:[#allocation5 + $0x468] sm:$0xf0] }
 0x1b8   : > { %v7608_v53 = vld [vmem:[#allocation5 + $0x64c] sm:$0xf]  ;;  %11320 = vst [vmem:[#allocation205_spill] sm:$0xff] %v9024_v32  ;;  %v9026_v48 = vor.u32 %v7544_v4, %v5910_v28  ;;  %3661 = vmatpush.bf16.msra.mxu1 %v9024_v32 }
 0x1b9   : > { %v6166_v63 = vld [vmem:[#allocation5 + $0x668] sm:$0xf0] }
 0x1ba   : > { %v7408_v18 = vld [vmem:[#allocation5 + $0xc] sm:$0xf]  ;;  %11321 = vst [vmem:[#allocation206_spill] sm:$0xff] %v9026_v48  ;;  %v9029_v15 = vor.u32 %v7608_v53, %v6166_v63  ;;  %3674 = vmatpush.bf16.msra.mxu2 %v9026_v48  ;;  %v5852_v48 = vld [vmem:[#allocation5 + $0x3d0] sm:$0xf] }
 0x1bb   : > { %v5366_v60 = vld [vmem:[#allocation5 + $0x28] sm:$0xf0] }
 0x1bc   : > { %v7472_v41 = vld [vmem:[#allocation5 + $0x20c] sm:$0xf]  ;;  %11322 = vst [vmem:[#allocation207_spill] sm:$0xff] %v9029_v15  ;;  %v9032_v37 = vor.u32 %v7408_v18, %v5366_v60  ;;  %3687 = vmatpush.bf16.msra.mxu3 %v9029_v15  ;;  %v5596_v15 = vld [vmem:[#allocation5 + $0x1d0] sm:$0xf] }
 0x1bd   : > { %v5622_v24 = vld [vmem:[#allocation5 + $0x228] sm:$0xf0] }
 0x1be   : > { %v7536_v59 = vld [vmem:[#allocation5 + $0x40c] sm:$0xf]  ;;  %11323 = vst [vmem:[#allocation208_spill] sm:$0xff] %v9032_v37  ;;  %v9036_v26 = vor.u32 %v7472_v41, %v5622_v24  ;;  %3649 = vmatpush.bf16.msra.mxu0 %v9032_v37 }
 0x1bf   : > { %v5878_v35 = vld [vmem:[#allocation5 + $0x428] sm:$0xf0] }
 0x1c0   : > { %v7600_v43 = vld [vmem:[#allocation5 + $0x60c] sm:$0xf]  ;;  %11324 = vst [vmem:[#allocation209_spill] sm:$0xff] %v9036_v26  ;;  %v9038_v53 = vor.u32 %v7536_v59, %v5878_v35  ;;  %3662 = vmatpush.bf16.msra.mxu1 %v9036_v26 }
 0x1c1   : > { %v6134_v52 = vld [vmem:[#allocation5 + $0x628] sm:$0xf0]  ;;  %3650 = vmatmul.bf16.vlgmr.msra.gmra.mxu0 %v8467_v19 }
 0x1c2   : > { %v7720_v40 = vld [vmem:[#allocation5 + $0x9cc] sm:$0xf]  ;;  %11325 = vst [vmem:[#allocation210_spill] sm:$0xff] %v9038_v53  ;;  %v9041_v61 = vor.u32 %v7600_v43, %v6134_v52  ;;  %3675 = vmatpush.bf16.msra.mxu2 %v9038_v53 }
 0x1c3   : > { %v6614_v49 = vld [vmem:[#allocation5 + $0x9e8] sm:$0xf0]  ;;  %3663 = vmatmul.bf16.vlgmr.msra.gmra.mxu1 %v8469_v30 }
 0x1c4   : > { %v7784_v36 = vld [vmem:[#allocation5 + $0xbcc] sm:$0xf]  ;;  %11326 = vst [vmem:[#allocation211_spill] sm:$0xff] %v9041_v61  ;;  %v9043_v11 = vor.u32 %v7720_v40, %v6614_v49  ;;  %3688 = vmatpush.bf16.msra.mxu3 %v9041_v61 }
 0x1c5   : > { %v6870_v51 = vld [vmem:[#allocation5 + $0xbe8] sm:$0xf0]  ;;  %3676 = vmatmul.bf16.vlgmr.msra.gmra.mxu2 %v8455_v39 }
 0x1c6   : > { %v7848_v4 = vld [vmem:[#allocation5 + $0xdcc] sm:$0xf]  ;;  %11327 = vst [vmem:[#allocation212_spill] sm:$0xff] %v9043_v11  ;;  %v9045_v18 = vor.u32 %v7784_v36, %v6870_v51  ;;  %3694 = vmatpush.bf16.msrb.mxu0 %v9043_v11 }
 0x1c7   : > { %v7126_v28 = vld [vmem:[#allocation5 + $0xde8] sm:$0xf0]  ;;  %3689 = vmatmul.bf16.vlgmr.msra.gmra.mxu3 %v8457_v1 }
 0x1c8   : > { %v7912_v63 = vld [vmem:[#allocation5 + $0xfcc] sm:$0xf]  ;;  %11328 = vst [vmem:[#allocation213_spill] sm:$0xff] %v9045_v18  ;;  %v9047_v60 = vor.u32 %v7848_v4, %v7126_v28  ;;  %3707 = vmatpush.bf16.msrb.mxu1 %v9045_v18 }
 0x1c9   : > { %v7382_v55 = vld [vmem:[#allocation5 + $0xfe8] sm:$0xf0] }
 0x1ca   : > { %11329 = vst [vmem:[#allocation214_spill] sm:$0xff] %v9047_v60  ;;  %v7712_v54 = vld [vmem:[#allocation5 + $0x98c] sm:$0xf]  ;;  %v9050_v41 = vor.u32 %v7912_v63, %v7382_v55  ;;  %3720 = vmatpush.bf16.msrb.mxu2 %v9047_v60 }
 0x1cb   : > { %v6582_v32 = vld [vmem:[#allocation5 + $0x9a8] sm:$0xf0] }
 0x1cc   : > { %v7776_v27 = vld [vmem:[#allocation5 + $0xb8c] sm:$0xf]  ;;  %11330 = vst [vmem:[#allocation215_spill] sm:$0xff] %v9050_v41  ;;  %v9056_v36 = vor.u32 %v7712_v54, %v6582_v32  ;;  %3733 = vmatpush.bf16.msrb.mxu3 %v9050_v41 }
 0x1cd   : > { %v6838_v24 = vld [vmem:[#allocation5 + $0xba8] sm:$0xf0] }
 0x1ce   : > { %v7840_v59 = vld [vmem:[#allocation5 + $0xd8c] sm:$0xf]  ;;  %11331 = vst [vmem:[#allocation216_spill] sm:$0xff] %v9056_v36  ;;  %v9060_v49 = vor.u32 %v7776_v27, %v6838_v24  ;;  %3695 = vmatpush.bf16.msrb.mxu0 %v9056_v36 }
 0x1cf   : > { %v7094_v35 = vld [vmem:[#allocation5 + $0xda8] sm:$0xf0] }
 0x1d0   : > { %v7904_v40 = vld [vmem:[#allocation5 + $0xf8c] sm:$0xf]  ;;  %11332 = vst [vmem:[#allocation217_spill] sm:$0xff] %v9060_v49  ;;  %v9062_v43 = vor.u32 %v7840_v59, %v7094_v35  ;;  %3708 = vmatpush.bf16.msrb.mxu1 %v9060_v49 }
 0x1d1   : > { %v7350_v52 = vld [vmem:[#allocation5 + $0xfa8] sm:$0xf0] }
 0x1d2   : > { %11333 = vst [vmem:[#allocation218_spill] sm:$0xff] %v9062_v43  ;;  %v7704_v51 = vld [vmem:[#allocation5 + $0x94c] sm:$0xf]  ;;  %v9065_v63 = vor.u32 %v7904_v40, %v7350_v52  ;;  %3721 = vmatpush.bf16.msrb.mxu2 %v9062_v43 }
 0x1d3   : > { %v6550_v4 = vld [vmem:[#allocation5 + $0x968] sm:$0xf0] }
 0x1d4   : > { %v7768_v28 = vld [vmem:[#allocation5 + $0xb4c] sm:$0xf]  ;;  %11334 = vst [vmem:[#allocation219_spill] sm:$0xff] %v9065_v63  ;;  %v9071_v27 = vor.u32 %v7704_v51, %v6550_v4  ;;  %3734 = vmatpush.bf16.msrb.mxu3 %v9065_v63  ;;  %v3456_v63 = vpop.f32.mrf.mxu1 }
 0x1d5   : > { %v6806_v55 = vld [vmem:[#allocation5 + $0xb68] sm:$0xf0] }
 0x1d6   : > { %v7832_v61 = vld [vmem:[#allocation5 + $0xd4c] sm:$0xf]  ;;  %11335 = vst [vmem:[#allocation220_spill] sm:$0xff] %v9071_v27  ;;  %v9076_v24 = vor.u32 %v7768_v28, %v6806_v55  ;;  %3696 = vmatpush.bf16.msrb.mxu0 %v9071_v27  ;;  %v3443_v28 = vpop.f32.mrf.mxu0 }
 0x1d7   : > { %v7062_v11 = vld [vmem:[#allocation5 + $0xd68] sm:$0xf0]  ;;  %v3457_v53 = vadd.f32 %v3456_v63, %v3443_v28 }
 0x1d8   : > { %v7896_v54 = vld [vmem:[#allocation5 + $0xf4c] sm:$0xf]  ;;  %11336 = vst [vmem:[#allocation221_spill] sm:$0xff] %v9076_v24  ;;  %v9078_v59 = vor.u32 %v7832_v61, %v7062_v11  ;;  %3709 = vmatpush.bf16.msrb.mxu1 %v9076_v24 }
 0x1d9   : > { %v7318_v32 = vld [vmem:[#allocation5 + $0xf68] sm:$0xf0] }
 0x1da   : > { %11337 = vst [vmem:[#allocation222_spill] sm:$0xff] %v9078_v59  ;;  %v7696_v35 = vld [vmem:[#allocation5 + $0x90c] sm:$0xf]  ;;  %v9081_v41 = vor.u32 %v7896_v54, %v7318_v32  ;;  %3722 = vmatpush.bf16.msrb.mxu2 %v9078_v59  ;;  %v3482_v59 = vpop.f32.mrf.mxu3 }
 0x1db   : > { %v6518_v40 = vld [vmem:[#allocation5 + $0x928] sm:$0xf0] }
 0x1dc   : > { %v7760_v52 = vld [vmem:[#allocation5 + $0xb0c] sm:$0xf]  ;;  %11338 = vst [vmem:[#allocation223_spill] sm:$0xff] %v9081_v41  ;;  %v9084_v49 = vor.u32 %v7696_v35, %v6518_v40  ;;  %3735 = vmatpush.bf16.msrb.mxu3 %v9081_v41  ;;  %v3469_v41 = vpop.f32.mrf.mxu2 }
 0x1dd   : > { %v6774_v36 = vld [vmem:[#allocation5 + $0xb28] sm:$0xf0] }
 0x1de   : > { %v7824_v51 = vld [vmem:[#allocation5 + $0xd0c] sm:$0xf]  ;;  %11339 = vst [vmem:[#allocation224_spill] sm:$0xff] %v9084_v49  ;;  %v9088_v61 = vor.u32 %v7760_v52, %v6774_v36  ;;  %3697 = vmatpush.bf16.msrb.mxu0 %v9084_v49 }
 0x1df   : > { %v7030_v4 = vld [vmem:[#allocation5 + $0xd28] sm:$0xf0] }
 0x1e0   : > { %v7888_v60 = vld [vmem:[#allocation5 + $0xf0c] sm:$0xf]  ;;  %11340 = vst [vmem:[#allocation225_spill] sm:$0xff] %v9088_v61  ;;  %v9090_v11 = vor.u32 %v7824_v51, %v7030_v4  ;;  %3710 = vmatpush.bf16.msrb.mxu1 %v9088_v61 }
 0x1e1   : > { %v7286_v18 = vld [vmem:[#allocation5 + $0xf28] sm:$0xf0] }
 0x1e2   : > { %11341 = vst [vmem:[#allocation226_spill] sm:$0xff] %v9090_v11  ;;  %v7688_v55 = vld [vmem:[#allocation5 + $0x8cc] sm:$0xf]  ;;  %v9093_v43 = vor.u32 %v7888_v60, %v7286_v18  ;;  %3723 = vmatpush.bf16.msrb.mxu2 %v9090_v11  ;;  %v3484_v11 = vpop.f32.mrf.mxu3 }
 0x1e3   : > { %v6486_v54 = vld [vmem:[#allocation5 + $0x8e8] sm:$0xf0]  ;;  %v7661_v11 = vld [vmem:[#allocation5 + $0x7ec] sm:$0xf0] }
 0x1e4   : > { %v7752_v32 = vld [vmem:[#allocation5 + $0xacc] sm:$0xf]  ;;  %11342 = vst [vmem:[#allocation227_spill] sm:$0xff] %v9093_v43  ;;  %v9096_v36 = vor.u32 %v7688_v55, %v6486_v54  ;;  %3736 = vmatpush.bf16.msrb.mxu3 %v9093_v43  ;;  %v3470_v54 = vadd.f32 %v3469_v41, %v3457_v53  ;;  %v3458_v43 = vpop.f32.mrf.mxu1 }
 0x1e5   : > { %v6742_v27 = vld [vmem:[#allocation5 + $0xae8] sm:$0xf0] }
 0x1e6   : > { %v7816_v35 = vld [vmem:[#allocation5 + $0xccc] sm:$0xf]  ;;  %11343 = vst [vmem:[#allocation228_spill] sm:$0xff] %v9096_v36  ;;  %v9100_v52 = vor.u32 %v7752_v32, %v6742_v27  ;;  %3698 = vmatpush.bf16.msrb.mxu0 %v9096_v36  ;;  %v9110_v32 = vadd.f32 %v3482_v59, %v3470_v54 }
 0x1e7   : > { %v6998_v40 = vld [vmem:[#allocation5 + $0xce8] sm:$0xf0] }
 0x1e8   : > { %v7880_v26 = vld [vmem:[#allocation5 + $0xecc] sm:$0xf]  ;;  %11344 = vst [vmem:[#allocation229_spill] sm:$0xff] %v9100_v52  ;;  %v9102_v51 = vor.u32 %v7816_v35, %v6998_v40  ;;  %v3445_v35 = vpop.f32.mrf.mxu0  ;;  %3711 = vmatpush.bf16.msrb.mxu1 %v9100_v52 }
 0x1e9   : > { %v7254_v24 = vld [vmem:[#allocation5 + $0xee8] sm:$0xf0] }
 0x1ea   : > { %11345 = vst [vmem:[#allocation230_spill] sm:$0xff] %v9102_v51  ;;  %v7680_v18 = vld [vmem:[#allocation5 + $0x88c] sm:$0xf]  ;;  %v9105_v63 = vor.u32 %v7880_v26, %v7254_v24  ;;  %3724 = vmatpush.bf16.msrb.mxu2 %v9102_v51 }
 0x1eb   : > { %v6454_v60 = vld [vmem:[#allocation5 + $0x8a8] sm:$0xf0] }
 0x1ec   : > { %v7744_v4 = vld [vmem:[#allocation5 + $0xa8c] sm:$0xf]  ;;  %11346 = vst [vmem:[#allocation231_spill] sm:$0xff] %v9105_v63  ;;  %v9108_v27 = vor.u32 %v7680_v18, %v6454_v60  ;;  %3737 = vmatpush.bf16.msrb.mxu3 %v9105_v63  ;;  %v3471_v63 = vpop.f32.mrf.mxu2 }
 0x1ed   : > { %v6710_v28 = vld [vmem:[#allocation5 + $0xaa8] sm:$0xf0] }
 0x1ee   : > { %v7808_v49 = vld [vmem:[#allocation5 + $0xc8c] sm:$0xf]  ;;  %11347 = vst [vmem:[#allocation232_spill] sm:$0xff] %v9108_v27  ;;  %v9114_v26 = vor.u32 %v7744_v4, %v6710_v28  ;;  %3699 = vmatpush.bf16.msrb.mxu0 %v9108_v27 }
 0x1ef   : > { %v6966_v55 = vld [vmem:[#allocation5 + $0xca8] sm:$0xf0] }
 0x1f0   : > { %v7872_v61 = vld [vmem:[#allocation5 + $0xe8c] sm:$0xf]  ;;  %11348 = vst [vmem:[#allocation233_spill] sm:$0xff] %v9114_v26  ;;  %v9116_v24 = vor.u32 %v7808_v49, %v6966_v55  ;;  %3712 = vmatpush.bf16.msrb.mxu1 %v9114_v26  ;;  %v7469_v26 = vld [vmem:[#allocation5 + $0x1ec] sm:$0xf0] }
 0x1f1   : > { %v7222_v37 = vld [vmem:[#allocation5 + $0xea8] sm:$0xf0] }
 0x1f2   : > { %11349 = vst [vmem:[#allocation234_spill] sm:$0xff] %v9116_v24  ;;  %v7672_v40 = vld [vmem:[#allocation5 + $0x84c] sm:$0xf]  ;;  %v9119_v36 = vor.u32 %v7872_v61, %v7222_v37  ;;  %3725 = vmatpush.bf16.msrb.mxu2 %v9116_v24  ;;  %v5564_v24 = vld [vmem:[#allocation5 + $0x190] sm:$0xf] }
 0x1f3   : > { %v6422_v53 = vld [vmem:[#allocation5 + $0x868] sm:$0xf0] }
 0x1f4   : > { %v7736_v41 = vld [vmem:[#allocation5 + $0xa4c] sm:$0xf]  ;;  %11350 = vst [vmem:[#allocation235_spill] sm:$0xff] %v9119_v36  ;;  %v9122_v51 = vor.u32 %v7672_v40, %v6422_v53  ;;  %3738 = vmatpush.bf16.msrb.mxu3 %v9119_v36 }
 0x1f5   : > { %v6678_v18 = vld [vmem:[#allocation5 + $0xa68] sm:$0xf0] }
 0x1f6   : > { %v7800_v59 = vld [vmem:[#allocation5 + $0xc4c] sm:$0xf]  ;;  %11351 = vst [vmem:[#allocation236_spill] sm:$0xff] %v9122_v51  ;;  %v9126_v43 = vor.u32 %v7736_v41, %v6678_v18  ;;  %3700 = vmatpush.bf16.msrb.mxu0 %v9122_v51  ;;  %v7533_v18 = vld [vmem:[#allocation5 + $0x3ec] sm:$0xf0]  ;;  %v9145_v51 = vor.u32 %v7469_v26, %v5596_v15 }
 0x1f7   : > { %v6934_v60 = vld [vmem:[#allocation5 + $0xc68] sm:$0xf0]  ;;  %v6332_v15 = vld [vmem:[#allocation5 + $0x790] sm:$0xf] }
 0x1f8   : > { %v7864_v54 = vld [vmem:[#allocation5 + $0xe4c] sm:$0xf]  ;;  %11352 = vst [vmem:[#allocation237_spill] sm:$0xff] %v9126_v43  ;;  %v9128_v28 = vor.u32 %v7800_v59, %v6934_v60  ;;  %v6108_v59 = vld [vmem:[#allocation5 + $0x5d0] sm:$0xf]  ;;  %3713 = vmatpush.bf16.msrb.mxu1 %v9126_v43 }
 0x1f9   : > { %v7190_v35 = vld [vmem:[#allocation5 + $0xe68] sm:$0xf0]  ;;  %v7597_v60 = vld [vmem:[#allocation5 + $0x5ec] sm:$0xf0]  ;;  %11359 = vst [vmem:[#allocation244_spill] sm:$0xff] %v9145_v51 }
 0x1fa   : > { %v7664_v4 = vld [vmem:[#allocation5 + $0x80c] sm:$0xf]  ;;  %11353 = vst [vmem:[#allocation238_spill] sm:$0xff] %v9128_v28  ;;  %v9131_v52 = vor.u32 %v7864_v54, %v7190_v35  ;;  %3726 = vmatpush.bf16.msrb.mxu2 %v9128_v28  ;;  %v6364_v35 = vld [vmem:[#allocation5 + $0x7d0] sm:$0xf] }
 0x1fb   : > { %v6390_v49 = vld [vmem:[#allocation5 + $0x828] sm:$0xf0]  ;;  %v7461_v43 = vld [vmem:[#allocation5 + $0x1ac] sm:$0xf0] }
 0x1fc   : > { %v7728_v37 = vld [vmem:[#allocation5 + $0xa0c] sm:$0xf]  ;;  %11354 = vst [vmem:[#allocation239_spill] sm:$0xff] %v9131_v52  ;;  %v9134_v41 = vor.u32 %v7664_v4, %v6390_v49  ;;  %3739 = vmatpush.bf16.msrb.mxu3 %v9131_v52  ;;  %v9147_v4 = vor.u32 %v7533_v18, %v5852_v48  ;;  %v9149_v49 = vor.u32 %v7597_v60, %v6108_v59  ;;  %v5532_v18 = vld [vmem:[#allocation5 + $0x150] sm:$0xf] }
 0x1fd   : > { %v6646_v61 = vld [vmem:[#allocation5 + $0xa28] sm:$0xf0]  ;;  %v9158_v48 = vor.u32 %v7461_v43, %v5564_v24  ;;  %v7453_v59 = vld [vmem:[#allocation5 + $0x16c] sm:$0xf0] }
 0x1fe   : > { %v7792_v55 = vld [vmem:[#allocation5 + $0xc0c] sm:$0xf]  ;;  %11355 = vst [vmem:[#allocation240_spill] sm:$0xff] %v9134_v41  ;;  %v9138_v63 = vor.u32 %v7728_v37, %v6646_v61  ;;  %3701 = vmatpush.bf16.msrb.mxu0 %v9134_v41  ;;  %v9152_v37 = vor.u32 %v7661_v11, %v6364_v35  ;;  %v7525_v61 = vld [vmem:[#allocation5 + $0x3ac] sm:$0xf0] }
 0x1ff   : > { %v6902_v40 = vld [vmem:[#allocation5 + $0xc28] sm:$0xf0]  ;;  %11360 = vst [vmem:[#allocation245_spill] sm:$0xff] %v9147_v4  ;;  %v9162_v26 = vor.u32 %v7525_v61, %v5820_v31  ;;  %v5788_v60 = vld [vmem:[#allocation5 + $0x350] sm:$0xf] }
 0x200   : > { %v7856_v53 = vld [vmem:[#allocation5 + $0xe0c] sm:$0xf]  ;;  %11356 = vst [vmem:[#allocation241_spill] sm:$0xff] %v9138_v63  ;;  %v9140_v54 = vor.u32 %v7792_v55, %v6902_v40  ;;  %v6076_v55 = vld [vmem:[#allocation5 + $0x590] sm:$0xf]  ;;  %3714 = vmatpush.bf16.msrb.mxu1 %v9138_v63 }
 0x201   : > { %v7158_v27 = vld [vmem:[#allocation5 + $0xe28] sm:$0xf0]  ;;  %11361 = vst [vmem:[#allocation246_spill] sm:$0xff] %v9149_v49  ;;  %v7589_v40 = vld [vmem:[#allocation5 + $0x5ac] sm:$0xf0]  ;;  %3702 = vmatmul.bf16.vlgmr.msrb.gmra.mxu0 %v8543_v22 }
 0x202   : > { %11357 = vst [vmem:[#allocation242_spill] sm:$0xff] %v9140_v54  ;;  %v9143_v36 = vor.u32 %v7856_v53, %v7158_v27  ;;  %3727 = vmatpush.bf16.msrb.mxu2 %v9140_v54  ;;  %v7653_v27 = vld [vmem:[#allocation5 + $0x7ac] sm:$0xf0]  ;;  %3746 = vmatpush.bf16.msra.mxu0 %v9145_v51  ;;  %v9164_v53 = vor.u32 %v7589_v40, %v6076_v55 }
 0x203   : > { %11362 = vst [vmem:[#allocation247_spill] sm:$0xff] %v9152_v37  ;;  %v9167_v35 = vor.u32 %v7653_v27, %v6332_v15  ;;  %v7517_v11 = vld [vmem:[#allocation5 + $0x36c] sm:$0xf0]  ;;  %v9173_v55 = vor.u32 %v7453_v59, %v5532_v18  ;;  %3715 = vmatmul.bf16.vlgmr.msrb.gmra.mxu1 %v8551_v13 }
 0x204   : > { %11358 = vst [vmem:[#allocation243_spill] sm:$0xff] %v9143_v36  ;;  %3740 = vmatpush.bf16.msrb.mxu3 %v9143_v36  ;;  %3759 = vmatpush.bf16.msra.mxu1 %v9147_v4  ;;  %v6044_v24 = vld [vmem:[#allocation5 + $0x550] sm:$0xf]  ;;  %v9178_v40 = vor.u32 %v7517_v11, %v5788_v60  ;;  %v3495_v60 = vpop.f32.mrf.mxu0 }
 0x205   : > { %11363 = vst [vmem:[#allocation248_spill] sm:$0xff] %v9158_v48  ;;  %3728 = vmatmul.bf16.vlgmr.msrb.gmra.mxu2 %v8539_v47  ;;  %v7581_v43 = vld [vmem:[#allocation5 + $0x56c] sm:$0xf0] }
 0x206   : > { %3772 = vmatpush.bf16.msra.mxu2 %v9149_v49  ;;  %11364 = vst [vmem:[#allocation249_spill] sm:$0xff] %v9162_v26  ;;  %v6300_v31 = vld [vmem:[#allocation5 + $0x750] sm:$0xf]  ;;  %3747 = vmatpush.bf16.msra.mxu0 %v9158_v48  ;;  %v9180_v15 = vor.u32 %v7581_v43, %v6044_v24 }
 0x207   : > { %11365 = vst [vmem:[#allocation250_spill] sm:$0xff] %v9164_v53  ;;  %3741 = vmatmul.bf16.vlgmr.msrb.gmra.mxu3 %v8545_v42  ;;  %v7645_v61 = vld [vmem:[#allocation5 + $0x76c] sm:$0xf0] }
 0x208   : > { %3785 = vmatpush.bf16.msra.mxu3 %v9152_v37  ;;  %11366 = vst [vmem:[#allocation251_spill] sm:$0xff] %v9167_v35  ;;  %3760 = vmatpush.bf16.msra.mxu1 %v9162_v26  ;;  %v5500_v27 = vld [vmem:[#allocation5 + $0x110] sm:$0xf]  ;;  %v9183_v4 = vor.u32 %v7645_v61, %v6300_v31 }
 0x209   : > { %11367 = vst [vmem:[#allocation252_spill] sm:$0xff] %v9173_v55  ;;  %v7445_v37 = vld [vmem:[#allocation5 + $0x12c] sm:$0xf0] }
 0x20a   : > { %3773 = vmatpush.bf16.msra.mxu2 %v9164_v53  ;;  %11368 = vst [vmem:[#allocation253_spill] sm:$0xff] %v9178_v40  ;;  %v5756_v49 = vld [vmem:[#allocation5 + $0x310] sm:$0xf]  ;;  %3748 = vmatpush.bf16.msra.mxu0 %v9173_v55  ;;  %v9186_v26 = vor.u32 %v7445_v37, %v5500_v27  ;;  %v3508_v53 = vpop.f32.mrf.mxu1 }
 0x20b   : > { %11369 = vst [vmem:[#allocation254_spill] sm:$0xff] %v9180_v15  ;;  %v7509_v48 = vld [vmem:[#allocation5 + $0x32c] sm:$0xf0] }
 0x20c   : > { %3786 = vmatpush.bf16.msra.mxu3 %v9167_v35  ;;  %11370 = vst [vmem:[#allocation255_spill] sm:$0xff] %v9183_v4  ;;  %v6012_v18 = vld [vmem:[#allocation5 + $0x510] sm:$0xf]  ;;  %3761 = vmatpush.bf16.msra.mxu1 %v9178_v40  ;;  %v9190_v11 = vor.u32 %v7509_v48, %v5756_v49  ;;  %v3496_v35 = vadd.f32 %v3495_v60, %v9110_v32 }
 0x20d   : > { %v7573_v59 = vld [vmem:[#allocation5 + $0x52c] sm:$0xf0]  ;;  %11371 = vst [vmem:[#allocation256_spill] sm:$0xff] %v9186_v26 }
 0x20e   : > { %v6268_v51 = vld [vmem:[#allocation5 + $0x710] sm:$0xf]  ;;  %3774 = vmatpush.bf16.msra.mxu2 %v9180_v15  ;;  %11372 = vst [vmem:[#allocation257_spill] sm:$0xff] %v9190_v11  ;;  %v9192_v24 = vor.u32 %v7573_v59, %v6012_v18  ;;  %v3509_v15 = vadd.f32 %v3508_v53, %v3496_v35  ;;  %3749 = vmatpush.bf16.msra.mxu0 %v9186_v26  ;;  %v3521_v59 = vpop.f32.mrf.mxu2  ;;  %v3534_v26 = vpop.f32.mrf.mxu3 }
 0x20f   : > { %v7637_v36 = vld [vmem:[#allocation5 + $0x72c] sm:$0xf0] }
 0x210   : > { %11373 = vst [vmem:[#allocation258_spill] sm:$0xff] %v9192_v24  ;;  %v5468_v43 = vld [vmem:[#allocation5 + $0xd0] sm:$0xf]  ;;  %3787 = vmatpush.bf16.msra.mxu3 %v9183_v4  ;;  %v9196_v55 = vor.u32 %v7637_v36, %v6268_v51  ;;  %3762 = vmatpush.bf16.msra.mxu1 %v9190_v11 }
 0x211   : > { %v7437_v31 = vld [vmem:[#allocation5 + $0xec] sm:$0xf0] }
 0x212   : > { %v5724_v61 = vld [vmem:[#allocation5 + $0x2d0] sm:$0xf]  ;;  %11374 = vst [vmem:[#allocation259_spill] sm:$0xff] %v9196_v55  ;;  %v9199_v49 = vor.u32 %v7437_v31, %v5468_v43  ;;  %3775 = vmatpush.bf16.msra.mxu2 %v9192_v24  ;;  %v3522_v31 = vadd.f32 %v3521_v59, %v3509_v15 }
 0x213   : > { %v7501_v37 = vld [vmem:[#allocation5 + $0x2ec] sm:$0xf0] }
 0x214   : > { %v5980_v27 = vld [vmem:[#allocation5 + $0x4d0] sm:$0xf]  ;;  %11375 = vst [vmem:[#allocation260_spill] sm:$0xff] %v9199_v49  ;;  %v9203_v32 = vor.u32 %v7501_v37, %v5724_v61  ;;  %3788 = vmatpush.bf16.msra.mxu3 %v9196_v55  ;;  %3750 = vmatpush.bf16.msra.mxu0 %v9199_v49  ;;  %v3497_v37 = vpop.f32.mrf.mxu0  ;;  %v3510_v55 = vpop.f32.mrf.mxu1 }
 0x215   : > { %v7565_v54 = vld [vmem:[#allocation5 + $0x4ec] sm:$0xf0] }
 0x216   : > { %v6236_v40 = vld [vmem:[#allocation5 + $0x6d0] sm:$0xf]  ;;  %11376 = vst [vmem:[#allocation261_spill] sm:$0xff] %v9203_v32  ;;  %v9205_v48 = vor.u32 %v7565_v54, %v5980_v27  ;;  %v9213_v54 = vadd.f32 %v3534_v26, %v3522_v31  ;;  %3763 = vmatpush.bf16.msra.mxu1 %v9203_v32  ;;  %v3536_v24 = vpop.f32.mrf.mxu3 }
 0x217   : > { %v7629_v63 = vld [vmem:[#allocation5 + $0x6ec] sm:$0xf0] }
 0x218   : > { %11377 = vst [vmem:[#allocation262_spill] sm:$0xff] %v9205_v48  ;;  %v5436_v36 = vld [vmem:[#allocation5 + $0x90] sm:$0xf]  ;;  %v9208_v60 = vor.u32 %v7629_v63, %v6236_v40  ;;  %3776 = vmatpush.bf16.msra.mxu2 %v9205_v48 }
 0x219   : > { %v7429_v51 = vld [vmem:[#allocation5 + $0xac] sm:$0xf0]  ;;  %11380 = vst [vmem:[#allocation265_spill] sm:$0xff] %v9213_v54  ;;  %v7521_v54 = vld [vmem:[#allocation5 + $0x394] sm:$0xf] }
 0x21a   : > { %v5692_v18 = vld [vmem:[#allocation5 + $0x290] sm:$0xf]  ;;  %11378 = vst [vmem:[#allocation263_spill] sm:$0xff] %v9208_v60  ;;  %v9211_v61 = vor.u32 %v7429_v51, %v5436_v36  ;;  %3789 = vmatpush.bf16.msra.mxu3 %v9208_v60  ;;  %v3523_v60 = vpop.f32.mrf.mxu2 }
 0x21b   : > { %v7493_v53 = vld [vmem:[#allocation5 + $0x2ac] sm:$0xf0] }
 0x21c   : > { %v5948_v35 = vld [vmem:[#allocation5 + $0x490] sm:$0xf]  ;;  %11379 = vst [vmem:[#allocation264_spill] sm:$0xff] %v9211_v61  ;;  %v9217_v63 = vor.u32 %v7493_v53, %v5692_v18  ;;  %3751 = vmatpush.bf16.msra.mxu0 %v9211_v61 }
 0x21d   : > { %v7557_v43 = vld [vmem:[#allocation5 + $0x4ac] sm:$0xf0] }
 0x21e   : > { %v6204_v11 = vld [vmem:[#allocation5 + $0x690] sm:$0xf]  ;;  %11381 = vst [vmem:[#allocation266_spill] sm:$0xff] %v9217_v63  ;;  %v9219_v40 = vor.u32 %v7557_v43, %v5948_v35  ;;  %3764 = vmatpush.bf16.msra.mxu1 %v9217_v63 }
 0x21f   : > { %v7621_v4 = vld [vmem:[#allocation5 + $0x6ac] sm:$0xf0] }
 0x220   : > { %11382 = vst [vmem:[#allocation267_spill] sm:$0xff] %v9219_v40  ;;  %v5404_v27 = vld [vmem:[#allocation5 + $0x50] sm:$0xf]  ;;  %v9222_v49 = vor.u32 %v7621_v4, %v6204_v11  ;;  %3777 = vmatpush.bf16.msra.mxu2 %v9219_v40 }
 0x221   : > { %v7421_v15 = vld [vmem:[#allocation5 + $0x6c] sm:$0xf0] }
 0x222   : > { %v5660_v59 = vld [vmem:[#allocation5 + $0x250] sm:$0xf]  ;;  %11383 = vst [vmem:[#allocation268_spill] sm:$0xff] %v9222_v49  ;;  %v9225_v48 = vor.u32 %v7421_v15, %v5404_v27  ;;  %3790 = vmatpush.bf16.msra.mxu3 %v9222_v49 }
 0x223   : > { %v7485_v36 = vld [vmem:[#allocation5 + $0x26c] sm:$0xf0] }
 0x224   : > { %v5916_v26 = vld [vmem:[#allocation5 + $0x450] sm:$0xf]  ;;  %11384 = vst [vmem:[#allocation269_spill] sm:$0xff] %v9225_v48  ;;  %v9229_v55 = vor.u32 %v7485_v36, %v5660_v59  ;;  %3752 = vmatpush.bf16.msra.mxu0 %v9225_v48 }
 0x225   : > { %v7549_v51 = vld [vmem:[#allocation5 + $0x46c] sm:$0xf0] }
 0x226   : > { %v6172_v31 = vld [vmem:[#allocation5 + $0x650] sm:$0xf]  ;;  %11385 = vst [vmem:[#allocation270_spill] sm:$0xff] %v9229_v55  ;;  %v9231_v35 = vor.u32 %v7549_v51, %v5916_v26  ;;  %3765 = vmatpush.bf16.msra.mxu1 %v9229_v55 }
 0x227   : > { %v7613_v37 = vld [vmem:[#allocation5 + $0x66c] sm:$0xf0] }
 0x228   : > { %v5372_v18 = vld [vmem:[#allocation5 + $0x10] sm:$0xf]  ;;  %11386 = vst [vmem:[#allocation271_spill] sm:$0xff] %v9231_v35  ;;  %v9234_v32 = vor.u32 %v7613_v37, %v6172_v31  ;;  %3778 = vmatpush.bf16.msra.mxu2 %v9231_v35  ;;  %v7529_v35 = vld [vmem:[#allocation5 + $0x3d4] sm:$0xf] }
 0x229   : > { %v7413_v53 = vld [vmem:[#allocation5 + $0x2c] sm:$0xf0] }
 0x22a   : > { %v5628_v4 = vld [vmem:[#allocation5 + $0x210] sm:$0xf]  ;;  %11387 = vst [vmem:[#allocation272_spill] sm:$0xff] %v9234_v32  ;;  %v9237_v59 = vor.u32 %v7413_v53, %v5372_v18  ;;  %3791 = vmatpush.bf16.msra.mxu3 %v9234_v32  ;;  %v7465_v32 = vld [vmem:[#allocation5 + $0x1d4] sm:$0xf] }
 0x22b   : > { %v7477_v11 = vld [vmem:[#allocation5 + $0x22c] sm:$0xf0] }
 0x22c   : > { %v5884_v43 = vld [vmem:[#allocation5 + $0x410] sm:$0xf]  ;;  %11388 = vst [vmem:[#allocation273_spill] sm:$0xff] %v9237_v59  ;;  %v9241_v60 = vor.u32 %v7477_v11, %v5628_v4  ;;  %3753 = vmatpush.bf16.msra.mxu0 %v9237_v59 }
 0x22d   : > { %v7541_v27 = vld [vmem:[#allocation5 + $0x42c] sm:$0xf0] }
 0x22e   : > { %v6140_v15 = vld [vmem:[#allocation5 + $0x610] sm:$0xf]  ;;  %11389 = vst [vmem:[#allocation274_spill] sm:$0xff] %v9241_v60  ;;  %v9243_v31 = vor.u32 %v7541_v27, %v5884_v43  ;;  %3766 = vmatpush.bf16.msra.mxu1 %v9241_v60 }
 0x22f   : > { %v7605_v61 = vld [vmem:[#allocation5 + $0x62c] sm:$0xf0]  ;;  %3754 = vmatmul.bf16.vlgmr.msra.gmra.mxu0 %v8467_v19 }
 0x230   : > { %v6620_v41 = vld [vmem:[#allocation5 + $0x9d0] sm:$0xf]  ;;  %11390 = vst [vmem:[#allocation275_spill] sm:$0xff] %v9243_v31  ;;  %v9246_v49 = vor.u32 %v7605_v61, %v6140_v15  ;;  %3779 = vmatpush.bf16.msra.mxu2 %v9243_v31 }
 0x231   : > { %v7725_v63 = vld [vmem:[#allocation5 + $0x9ec] sm:$0xf0]  ;;  %3767 = vmatmul.bf16.vlgmr.msra.gmra.mxu1 %v8469_v30 }
 0x232   : > { %v6876_v52 = vld [vmem:[#allocation5 + $0xbd0] sm:$0xf]  ;;  %11391 = vst [vmem:[#allocation276_spill] sm:$0xff] %v9246_v49  ;;  %v9248_v48 = vor.u32 %v7725_v63, %v6620_v41  ;;  %3792 = vmatpush.bf16.msra.mxu3 %v9246_v49 }
 0x233   : > { %v7789_v36 = vld [vmem:[#allocation5 + $0xbec] sm:$0xf0]  ;;  %3780 = vmatmul.bf16.vlgmr.msra.gmra.mxu2 %v8455_v39 }
 0x234   : > { %v7132_v26 = vld [vmem:[#allocation5 + $0xdd0] sm:$0xf]  ;;  %11392 = vst [vmem:[#allocation277_spill] sm:$0xff] %v9248_v48  ;;  %v9250_v18 = vor.u32 %v7789_v36, %v6876_v52  ;;  %3798 = vmatpush.bf16.msrb.mxu0 %v9248_v48 }
 0x235   : > { %v7853_v51 = vld [vmem:[#allocation5 + $0xdec] sm:$0xf0]  ;;  %3793 = vmatmul.bf16.vlgmr.msra.gmra.mxu3 %v8457_v1 }
 0x236   : > { %v7388_v37 = vld [vmem:[#allocation5 + $0xfd0] sm:$0xf]  ;;  %11393 = vst [vmem:[#allocation278_spill] sm:$0xff] %v9250_v18  ;;  %v9252_v53 = vor.u32 %v7853_v51, %v7132_v26  ;;  %3811 = vmatpush.bf16.msrb.mxu1 %v9250_v18 }
 0x237   : > { %v7917_v24 = vld [vmem:[#allocation5 + $0xfec] sm:$0xf0] }
 0x238   : > { %11394 = vst [vmem:[#allocation279_spill] sm:$0xff] %v9252_v53  ;;  %v6588_v40 = vld [vmem:[#allocation5 + $0x990] sm:$0xf]  ;;  %v9255_v4 = vor.u32 %v7917_v24, %v7388_v37  ;;  %3824 = vmatpush.bf16.msrb.mxu2 %v9252_v53 }
 0x239   : > { %v7717_v55 = vld [vmem:[#allocation5 + $0x9ac] sm:$0xf0] }
 0x23a   : > { %v6844_v28 = vld [vmem:[#allocation5 + $0xb90] sm:$0xf]  ;;  %11395 = vst [vmem:[#allocation280_spill] sm:$0xff] %v9255_v4  ;;  %v9261_v52 = vor.u32 %v7717_v55, %v6588_v40  ;;  %3837 = vmatpush.bf16.msrb.mxu3 %v9255_v4 }
 0x23b   : > { %v7781_v11 = vld [vmem:[#allocation5 + $0xbac] sm:$0xf0] }
 0x23c   : > { %v7100_v43 = vld [vmem:[#allocation5 + $0xd90] sm:$0xf]  ;;  %11396 = vst [vmem:[#allocation281_spill] sm:$0xff] %v9261_v52  ;;  %v9265_v63 = vor.u32 %v7781_v11, %v6844_v28  ;;  %3799 = vmatpush.bf16.msrb.mxu0 %v9261_v52 }
 0x23d   : > { %v7845_v27 = vld [vmem:[#allocation5 + $0xdac] sm:$0xf0] }
 0x23e   : > { %v7356_v41 = vld [vmem:[#allocation5 + $0xf90] sm:$0xf]  ;;  %11397 = vst [vmem:[#allocation282_spill] sm:$0xff] %v9265_v63  ;;  %v9267_v15 = vor.u32 %v7845_v27, %v7100_v43  ;;  %3812 = vmatpush.bf16.msrb.mxu1 %v9265_v63 }
 0x23f   : > { %v7909_v61 = vld [vmem:[#allocation5 + $0xfac] sm:$0xf0] }
 0x240   : > { %11398 = vst [vmem:[#allocation283_spill] sm:$0xff] %v9267_v15  ;;  %v6556_v36 = vld [vmem:[#allocation5 + $0x950] sm:$0xf]  ;;  %v9270_v37 = vor.u32 %v7909_v61, %v7356_v41  ;;  %3825 = vmatpush.bf16.msrb.mxu2 %v9267_v15 }
 0x241   : > { %v7709_v26 = vld [vmem:[#allocation5 + $0x96c] sm:$0xf0] }
 0x242   : > { %v6812_v51 = vld [vmem:[#allocation5 + $0xb50] sm:$0xf]  ;;  %11399 = vst [vmem:[#allocation284_spill] sm:$0xff] %v9270_v37  ;;  %v9276_v28 = vor.u32 %v7709_v26, %v6556_v36  ;;  %3838 = vmatpush.bf16.msrb.mxu3 %v9270_v37  ;;  %v3560_v37 = vpop.f32.mrf.mxu1 }
 0x243   : > { %v7773_v24 = vld [vmem:[#allocation5 + $0xb6c] sm:$0xf0] }
 0x244   : > { %v7068_v49 = vld [vmem:[#allocation5 + $0xd50] sm:$0xf]  ;;  %11400 = vst [vmem:[#allocation285_spill] sm:$0xff] %v9276_v28  ;;  %v9281_v11 = vor.u32 %v7773_v24, %v6812_v51  ;;  %3800 = vmatpush.bf16.msrb.mxu0 %v9276_v28  ;;  %v3547_v51 = vpop.f32.mrf.mxu0 }
 0x245   : > { %v7837_v48 = vld [vmem:[#allocation5 + $0xd6c] sm:$0xf0]  ;;  %v3561_v31 = vadd.f32 %v3560_v37, %v3547_v51 }
 0x246   : > { %v7324_v40 = vld [vmem:[#allocation5 + $0xf50] sm:$0xf]  ;;  %11401 = vst [vmem:[#allocation286_spill] sm:$0xff] %v9281_v11  ;;  %v9283_v43 = vor.u32 %v7837_v48, %v7068_v49  ;;  %3813 = vmatpush.bf16.msrb.mxu1 %v9281_v11 }
 0x247   : > { %v7901_v55 = vld [vmem:[#allocation5 + $0xf6c] sm:$0xf0] }
 0x248   : > { %11402 = vst [vmem:[#allocation287_spill] sm:$0xff] %v9283_v43  ;;  %v6524_v27 = vld [vmem:[#allocation5 + $0x910] sm:$0xf]  ;;  %v9286_v4 = vor.u32 %v7901_v55, %v7324_v40  ;;  %3826 = vmatpush.bf16.msrb.mxu2 %v9283_v43  ;;  %v3586_v43 = vpop.f32.mrf.mxu3 }
 0x249   : > { %v7701_v41 = vld [vmem:[#allocation5 + $0x92c] sm:$0xf0] }
 0x24a   : > { %v6780_v61 = vld [vmem:[#allocation5 + $0xb10] sm:$0xf]  ;;  %11403 = vst [vmem:[#allocation288_spill] sm:$0xff] %v9286_v4  ;;  %v9289_v63 = vor.u32 %v7701_v41, %v6524_v27  ;;  %3839 = vmatpush.bf16.msrb.mxu3 %v9286_v4  ;;  %v3573_v4 = vpop.f32.mrf.mxu2 }
 0x24b   : > { %v7765_v52 = vld [vmem:[#allocation5 + $0xb2c] sm:$0xf0] }
 0x24c   : > { %v7036_v36 = vld [vmem:[#allocation5 + $0xd10] sm:$0xf]  ;;  %11404 = vst [vmem:[#allocation289_spill] sm:$0xff] %v9289_v63  ;;  %v9293_v49 = vor.u32 %v7765_v52, %v6780_v61  ;;  %3801 = vmatpush.bf16.msrb.mxu0 %v9289_v63 }
 0x24d   : > { %v7829_v26 = vld [vmem:[#allocation5 + $0xd2c] sm:$0xf0] }
 0x24e   : > { %v7292_v53 = vld [vmem:[#allocation5 + $0xf10] sm:$0xf]  ;;  %11405 = vst [vmem:[#allocation290_spill] sm:$0xff] %v9293_v49  ;;  %v9295_v48 = vor.u32 %v7829_v26, %v7036_v36  ;;  %3814 = vmatpush.bf16.msrb.mxu1 %v9293_v49 }
 0x24f   : > { %v7893_v18 = vld [vmem:[#allocation5 + $0xf2c] sm:$0xf0] }
 0x250   : > { %11406 = vst [vmem:[#allocation291_spill] sm:$0xff] %v9295_v48  ;;  %v6492_v24 = vld [vmem:[#allocation5 + $0x8d0] sm:$0xf]  ;;  %v9298_v15 = vor.u32 %v7893_v18, %v7292_v53  ;;  %3827 = vmatpush.bf16.msrb.mxu2 %v9295_v48  ;;  %v3588_v48 = vpop.f32.mrf.mxu3 }
 0x251   : > { %v7693_v40 = vld [vmem:[#allocation5 + $0x8ec] sm:$0xf0]  ;;  %v6366_v48 = vld [vmem:[#allocation5 + $0x7f0] sm:$0xf0] }
 0x252   : > { %v6748_v55 = vld [vmem:[#allocation5 + $0xad0] sm:$0xf]  ;;  %11407 = vst [vmem:[#allocation292_spill] sm:$0xff] %v9298_v15  ;;  %v9301_v52 = vor.u32 %v7693_v40, %v6492_v24  ;;  %3840 = vmatpush.bf16.msrb.mxu3 %v9298_v15  ;;  %v3574_v40 = vadd.f32 %v3573_v4, %v3561_v31  ;;  %v3562_v15 = vpop.f32.mrf.mxu1 }
 0x253   : > { %v7757_v28 = vld [vmem:[#allocation5 + $0xaec] sm:$0xf0] }
 0x254   : > { %v7004_v27 = vld [vmem:[#allocation5 + $0xcd0] sm:$0xf]  ;;  %11408 = vst [vmem:[#allocation293_spill] sm:$0xff] %v9301_v52  ;;  %v9305_v61 = vor.u32 %v7757_v28, %v6748_v55  ;;  %3802 = vmatpush.bf16.msrb.mxu0 %v9301_v52  ;;  %v9315_v55 = vadd.f32 %v3586_v43, %v3574_v40 }
 0x255   : > { %v7821_v41 = vld [vmem:[#allocation5 + $0xcec] sm:$0xf0] }
 0x256   : > { %v7260_v60 = vld [vmem:[#allocation5 + $0xed0] sm:$0xf]  ;;  %11409 = vst [vmem:[#allocation294_spill] sm:$0xff] %v9305_v61  ;;  %v9307_v36 = vor.u32 %v7821_v41, %v7004_v27  ;;  %v3549_v27 = vpop.f32.mrf.mxu0  ;;  %3815 = vmatpush.bf16.msrb.mxu1 %v9305_v61 }
 0x257   : > { %v7885_v11 = vld [vmem:[#allocation5 + $0xeec] sm:$0xf0] }
 0x258   : > { %11410 = vst [vmem:[#allocation295_spill] sm:$0xff] %v9307_v36  ;;  %v6460_v18 = vld [vmem:[#allocation5 + $0x890] sm:$0xf]  ;;  %v9310_v37 = vor.u32 %v7885_v11, %v7260_v60  ;;  %3828 = vmatpush.bf16.msrb.mxu2 %v9307_v36 }
 0x259   : > { %v7685_v53 = vld [vmem:[#allocation5 + $0x8ac] sm:$0xf0] }
 0x25a   : > { %v6716_v26 = vld [vmem:[#allocation5 + $0xa90] sm:$0xf]  ;;  %11411 = vst [vmem:[#allocation296_spill] sm:$0xff] %v9310_v37  ;;  %v9313_v28 = vor.u32 %v7685_v53, %v6460_v18  ;;  %3841 = vmatpush.bf16.msrb.mxu3 %v9310_v37  ;;  %v3575_v37 = vpop.f32.mrf.mxu2 }
 0x25b   : > { %v7749_v51 = vld [vmem:[#allocation5 + $0xaac] sm:$0xf0] }
 0x25c   : > { %v6972_v63 = vld [vmem:[#allocation5 + $0xc90] sm:$0xf]  ;;  %11412 = vst [vmem:[#allocation297_spill] sm:$0xff] %v9313_v28  ;;  %v9319_v60 = vor.u32 %v7749_v51, %v6716_v26  ;;  %3803 = vmatpush.bf16.msrb.mxu0 %v9313_v28 }
 0x25d   : > { %v7813_v24 = vld [vmem:[#allocation5 + $0xcac] sm:$0xf0] }
 0x25e   : > { %v7228_v49 = vld [vmem:[#allocation5 + $0xe90] sm:$0xf]  ;;  %11413 = vst [vmem:[#allocation298_spill] sm:$0xff] %v9319_v60  ;;  %v9321_v11 = vor.u32 %v7813_v24, %v6972_v63  ;;  %3816 = vmatpush.bf16.msrb.mxu1 %v9319_v60  ;;  %v5598_v60 = vld [vmem:[#allocation5 + $0x1f0] sm:$0xf0] }
 0x25f   : > { %v7877_v59 = vld [vmem:[#allocation5 + $0xeac] sm:$0xf0] }
 0x260   : > { %11414 = vst [vmem:[#allocation299_spill] sm:$0xff] %v9321_v11  ;;  %v6428_v41 = vld [vmem:[#allocation5 + $0x850] sm:$0xf]  ;;  %v9324_v52 = vor.u32 %v7877_v59, %v7228_v49  ;;  %3829 = vmatpush.bf16.msrb.mxu2 %v9321_v11  ;;  %v7457_v11 = vld [vmem:[#allocation5 + $0x194] sm:$0xf] }
 0x261   : > { %v7677_v31 = vld [vmem:[#allocation5 + $0x86c] sm:$0xf0] }
 0x262   : > { %v6684_v4 = vld [vmem:[#allocation5 + $0xa50] sm:$0xf]  ;;  %11415 = vst [vmem:[#allocation300_spill] sm:$0xff] %v9324_v52  ;;  %v9327_v36 = vor.u32 %v7677_v31, %v6428_v41  ;;  %3842 = vmatpush.bf16.msrb.mxu3 %v9324_v52 }
 0x263   : > { %v7741_v18 = vld [vmem:[#allocation5 + $0xa6c] sm:$0xf0] }
 0x264   : > { %v6940_v43 = vld [vmem:[#allocation5 + $0xc50] sm:$0xf]  ;;  %11416 = vst [vmem:[#allocation301_spill] sm:$0xff] %v9327_v36  ;;  %v9331_v15 = vor.u32 %v7741_v18, %v6684_v4  ;;  %3804 = vmatpush.bf16.msrb.mxu0 %v9327_v36  ;;  %v5854_v18 = vld [vmem:[#allocation5 + $0x3f0] sm:$0xf0]  ;;  %v9350_v36 = vor.u32 %v7465_v32, %v5598_v60 }
 0x265   : > { %v7805_v53 = vld [vmem:[#allocation5 + $0xc6c] sm:$0xf0]  ;;  %v7649_v32 = vld [vmem:[#allocation5 + $0x794] sm:$0xf] }
 0x266   : > { %v7196_v40 = vld [vmem:[#allocation5 + $0xe50] sm:$0xf]  ;;  %11417 = vst [vmem:[#allocation302_spill] sm:$0xff] %v9331_v15  ;;  %v9333_v51 = vor.u32 %v7805_v53, %v6940_v43  ;;  %v7593_v43 = vld [vmem:[#allocation5 + $0x5d4] sm:$0xf]  ;;  %3817 = vmatpush.bf16.msrb.mxu1 %v9331_v15 }
 0x267   : > { %v7869_v27 = vld [vmem:[#allocation5 + $0xe6c] sm:$0xf0]  ;;  %v6110_v53 = vld [vmem:[#allocation5 + $0x5f0] sm:$0xf0]  ;;  %11424 = vst [vmem:[#allocation309_spill] sm:$0xff] %v9350_v36 }
 0x268   : > { %v6396_v26 = vld [vmem:[#allocation5 + $0x810] sm:$0xf]  ;;  %11418 = vst [vmem:[#allocation303_spill] sm:$0xff] %v9333_v51  ;;  %v9336_v61 = vor.u32 %v7869_v27, %v7196_v40  ;;  %3830 = vmatpush.bf16.msrb.mxu2 %v9333_v51  ;;  %v7657_v27 = vld [vmem:[#allocation5 + $0x7d4] sm:$0xf] }
 0x269   : > { %v7669_v63 = vld [vmem:[#allocation5 + $0x82c] sm:$0xf0]  ;;  %v5566_v15 = vld [vmem:[#allocation5 + $0x1b0] sm:$0xf0]  ;;  %v5828_v51 = vld [vmem:[#allocation5 + $0x398] sm:$0xf] }
 0x26a   : > { %v6652_v59 = vld [vmem:[#allocation5 + $0xa10] sm:$0xf]  ;;  %11419 = vst [vmem:[#allocation304_spill] sm:$0xff] %v9336_v61  ;;  %v9339_v4 = vor.u32 %v7669_v63, %v6396_v26  ;;  %3843 = vmatpush.bf16.msrb.mxu3 %v9336_v61  ;;  %v9352_v26 = vor.u32 %v7529_v35, %v5854_v18  ;;  %v9354_v63 = vor.u32 %v7593_v43, %v6110_v53  ;;  %v7449_v18 = vld [vmem:[#allocation5 + $0x154] sm:$0xf] }
 0x26b   : > { %v7733_v49 = vld [vmem:[#allocation5 + $0xa2c] sm:$0xf0]  ;;  %v9363_v35 = vor.u32 %v7457_v11, %v5566_v15  ;;  %v5534_v43 = vld [vmem:[#allocation5 + $0x170] sm:$0xf0] }
 0x26c   : > { %v6908_v24 = vld [vmem:[#allocation5 + $0xc10] sm:$0xf]  ;;  %11420 = vst [vmem:[#allocation305_spill] sm:$0xff] %v9339_v4  ;;  %v9343_v37 = vor.u32 %v7733_v49, %v6652_v59  ;;  %3805 = vmatpush.bf16.msrb.mxu0 %v9339_v4  ;;  %v9357_v59 = vor.u32 %v7657_v27, %v6366_v48  ;;  %v5822_v49 = vld [vmem:[#allocation5 + $0x3b0] sm:$0xf0] }
 0x26d   : > { %v7797_v41 = vld [vmem:[#allocation5 + $0xc2c] sm:$0xf0]  ;;  %11425 = vst [vmem:[#allocation310_spill] sm:$0xff] %v9352_v26  ;;  %v9367_v60 = vor.u32 %v7521_v54, %v5822_v49  ;;  %v7513_v53 = vld [vmem:[#allocation5 + $0x354] sm:$0xf] }
 0x26e   : > { %v7164_v31 = vld [vmem:[#allocation5 + $0xe10] sm:$0xf]  ;;  %11421 = vst [vmem:[#allocation306_spill] sm:$0xff] %v9343_v37  ;;  %v9345_v40 = vor.u32 %v7797_v41, %v6908_v24  ;;  %v7585_v24 = vld [vmem:[#allocation5 + $0x594] sm:$0xf]  ;;  %3818 = vmatpush.bf16.msrb.mxu1 %v9343_v37 }
 0x26f   : > { %v7861_v28 = vld [vmem:[#allocation5 + $0xe2c] sm:$0xf0]  ;;  %11426 = vst [vmem:[#allocation311_spill] sm:$0xff] %v9354_v63  ;;  %v6078_v41 = vld [vmem:[#allocation5 + $0x5b0] sm:$0xf0]  ;;  %3806 = vmatmul.bf16.vlgmr.msrb.gmra.mxu0 %v8543_v22 }
 0x270   : > { %11422 = vst [vmem:[#allocation307_spill] sm:$0xff] %v9345_v40  ;;  %v9348_v52 = vor.u32 %v7861_v28, %v7164_v31  ;;  %3831 = vmatpush.bf16.msrb.mxu2 %v9345_v40  ;;  %v6334_v28 = vld [vmem:[#allocation5 + $0x7b0] sm:$0xf0]  ;;  %3850 = vmatpush.bf16.msra.mxu0 %v9350_v36  ;;  %v9369_v31 = vor.u32 %v7585_v24, %v6078_v41 }
 0x271   : > { %11427 = vst [vmem:[#allocation312_spill] sm:$0xff] %v9357_v59  ;;  %v9372_v27 = vor.u32 %v7649_v32, %v6334_v28  ;;  %v5790_v48 = vld [vmem:[#allocation5 + $0x370] sm:$0xf0]  ;;  %v9378_v24 = vor.u32 %v7449_v18, %v5534_v43  ;;  %3819 = vmatmul.bf16.vlgmr.msrb.gmra.mxu1 %v8551_v13 }
 0x272   : > { %11423 = vst [vmem:[#allocation308_spill] sm:$0xff] %v9348_v52  ;;  %3844 = vmatpush.bf16.msrb.mxu3 %v9348_v52  ;;  %3863 = vmatpush.bf16.msra.mxu1 %v9352_v26  ;;  %v7577_v11 = vld [vmem:[#allocation5 + $0x554] sm:$0xf]  ;;  %v9383_v41 = vor.u32 %v7513_v53, %v5790_v48  ;;  %v3599_v53 = vpop.f32.mrf.mxu0 }
 0x273   : > { %11428 = vst [vmem:[#allocation313_spill] sm:$0xff] %v9363_v35  ;;  %3832 = vmatmul.bf16.vlgmr.msrb.gmra.mxu2 %v8539_v47  ;;  %v6046_v15 = vld [vmem:[#allocation5 + $0x570] sm:$0xf0] }
 0x274   : > { %3876 = vmatpush.bf16.msra.mxu2 %v9354_v63  ;;  %11429 = vst [vmem:[#allocation314_spill] sm:$0xff] %v9367_v60  ;;  %v7641_v54 = vld [vmem:[#allocation5 + $0x754] sm:$0xf]  ;;  %3851 = vmatpush.bf16.msra.mxu0 %v9363_v35  ;;  %v9385_v32 = vor.u32 %v7577_v11, %v6046_v15 }
 0x275   : > { %11430 = vst [vmem:[#allocation315_spill] sm:$0xff] %v9369_v31  ;;  %3845 = vmatmul.bf16.vlgmr.msrb.gmra.mxu3 %v8545_v42  ;;  %v6302_v49 = vld [vmem:[#allocation5 + $0x770] sm:$0xf0] }
 0x276   : > { %3889 = vmatpush.bf16.msra.mxu3 %v9357_v59  ;;  %11431 = vst [vmem:[#allocation316_spill] sm:$0xff] %v9372_v27  ;;  %3864 = vmatpush.bf16.msra.mxu1 %v9367_v60  ;;  %v7441_v28 = vld [vmem:[#allocation5 + $0x114] sm:$0xf]  ;;  %v9388_v26 = vor.u32 %v7641_v54, %v6302_v49 }
 0x277   : > { %11432 = vst [vmem:[#allocation317_spill] sm:$0xff] %v9378_v24  ;;  %v5502_v59 = vld [vmem:[#allocation5 + $0x130] sm:$0xf0] }
 0x278   : > { %3877 = vmatpush.bf16.msra.mxu2 %v9369_v31  ;;  %11433 = vst [vmem:[#allocation318_spill] sm:$0xff] %v9383_v41  ;;  %v7505_v63 = vld [vmem:[#allocation5 + $0x314] sm:$0xf]  ;;  %3852 = vmatpush.bf16.msra.mxu0 %v9378_v24  ;;  %v9391_v60 = vor.u32 %v7441_v28, %v5502_v59  ;;  %v3612_v31 = vpop.f32.mrf.mxu1 }
 0x279   : > { %11434 = vst [vmem:[#allocation319_spill] sm:$0xff] %v9385_v32  ;;  %v5758_v35 = vld [vmem:[#allocation5 + $0x330] sm:$0xf0] }
 0x27a   : > { %3890 = vmatpush.bf16.msra.mxu3 %v9372_v27  ;;  %11435 = vst [vmem:[#allocation320_spill] sm:$0xff] %v9388_v26  ;;  %v7569_v18 = vld [vmem:[#allocation5 + $0x514] sm:$0xf]  ;;  %3865 = vmatpush.bf16.msra.mxu1 %v9383_v41  ;;  %v9395_v48 = vor.u32 %v7505_v63, %v5758_v35  ;;  %v3600_v27 = vadd.f32 %v3599_v53, %v9315_v55 }
 0x27b   : > { %v6014_v43 = vld [vmem:[#allocation5 + $0x530] sm:$0xf0]  ;;  %11436 = vst [vmem:[#allocation321_spill] sm:$0xff] %v9391_v60 }
 0x27c   : > { %v7633_v36 = vld [vmem:[#allocation5 + $0x714] sm:$0xf]  ;;  %3878 = vmatpush.bf16.msra.mxu2 %v9385_v32  ;;  %11437 = vst [vmem:[#allocation322_spill] sm:$0xff] %v9395_v48  ;;  %v9397_v11 = vor.u32 %v7569_v18, %v6014_v43  ;;  %v3613_v32 = vadd.f32 %v3612_v31, %v3600_v27  ;;  %3853 = vmatpush.bf16.msra.mxu0 %v9391_v60  ;;  %v3625_v43 = vpop.f32.mrf.mxu2  ;;  %v3638_v60 = vpop.f32.mrf.mxu3 }
 0x27d   : > { %v6270_v52 = vld [vmem:[#allocation5 + $0x730] sm:$0xf0] }
 0x27e   : > { %11438 = vst [vmem:[#allocation323_spill] sm:$0xff] %v9397_v11  ;;  %v7433_v15 = vld [vmem:[#allocation5 + $0xd4] sm:$0xf]  ;;  %3891 = vmatpush.bf16.msra.mxu3 %v9388_v26  ;;  %v9401_v24 = vor.u32 %v7633_v36, %v6270_v52  ;;  %3866 = vmatpush.bf16.msra.mxu1 %v9395_v48 }
 0x27f   : > { %v5470_v54 = vld [vmem:[#allocation5 + $0xf0] sm:$0xf0] }
 0x280   : > { %v7497_v49 = vld [vmem:[#allocation5 + $0x2d4] sm:$0xf]  ;;  %11439 = vst [vmem:[#allocation324_spill] sm:$0xff] %v9401_v24  ;;  %v9404_v63 = vor.u32 %v7433_v15, %v5470_v54  ;;  %3879 = vmatpush.bf16.msra.mxu2 %v9397_v11  ;;  %v3626_v54 = vadd.f32 %v3625_v43, %v3613_v32 }
 0x281   : > { %v5726_v59 = vld [vmem:[#allocation5 + $0x2f0] sm:$0xf0] }
 0x282   : > { %v7561_v28 = vld [vmem:[#allocation5 + $0x4d4] sm:$0xf]  ;;  %11440 = vst [vmem:[#allocation325_spill] sm:$0xff] %v9404_v63  ;;  %v9408_v55 = vor.u32 %v7497_v49, %v5726_v59  ;;  %3892 = vmatpush.bf16.msra.mxu3 %v9401_v24  ;;  %3854 = vmatpush.bf16.msra.mxu0 %v9404_v63  ;;  %v3601_v59 = vpop.f32.mrf.mxu0  ;;  %v3614_v24 = vpop.f32.mrf.mxu1 }
 0x283   : > { %v5982_v40 = vld [vmem:[#allocation5 + $0x4f0] sm:$0xf0] }
 0x284   : > { %v7625_v41 = vld [vmem:[#allocation5 + $0x6d4] sm:$0xf]  ;;  %11441 = vst [vmem:[#allocation326_spill] sm:$0xff] %v9408_v55  ;;  %v9410_v35 = vor.u32 %v7561_v28, %v5982_v40  ;;  %v9418_v40 = vadd.f32 %v3638_v60, %v3626_v54  ;;  %3867 = vmatpush.bf16.msra.mxu1 %v9408_v55  ;;  %v3640_v11 = vpop.f32.mrf.mxu3 }
 0x285   : > { %v6238_v37 = vld [vmem:[#allocation5 + $0x6f0] sm:$0xf0] }
 0x286   : > { %11442 = vst [vmem:[#allocation327_spill] sm:$0xff] %v9410_v35  ;;  %v7425_v52 = vld [vmem:[#allocation5 + $0x94] sm:$0xf]  ;;  %v9413_v53 = vor.u32 %v7625_v41, %v6238_v37  ;;  %3880 = vmatpush.bf16.msra.mxu2 %v9410_v35 }
 0x287   : > { %v5438_v36 = vld [vmem:[#allocation5 + $0xb0] sm:$0xf0]  ;;  %11445 = vst [vmem:[#allocation330_spill] sm:$0xff] %v9418_v40 }
 0x288   : > { %v7489_v18 = vld [vmem:[#allocation5 + $0x294] sm:$0xf]  ;;  %11443 = vst [vmem:[#allocation328_spill] sm:$0xff] %v9413_v53  ;;  %v9416_v49 = vor.u32 %v7425_v52, %v5438_v36  ;;  %3893 = vmatpush.bf16.msra.mxu3 %v9413_v53  ;;  %v3627_v53 = vpop.f32.mrf.mxu2 }
 0x289   : > { %v5694_v31 = vld [vmem:[#allocation5 + $0x2b0] sm:$0xf0] }
 0x28a   : > { %v7553_v27 = vld [vmem:[#allocation5 + $0x494] sm:$0xf]  ;;  %11444 = vst [vmem:[#allocation329_spill] sm:$0xff] %v9416_v49  ;;  %v9422_v37 = vor.u32 %v7489_v18, %v5694_v31  ;;  %3855 = vmatpush.bf16.msra.mxu0 %v9416_v49 }
 0x28b   : > { %v5950_v15 = vld [vmem:[#allocation5 + $0x4b0] sm:$0xf0] }
 0x28c   : > { %v7617_v48 = vld [vmem:[#allocation5 + $0x694] sm:$0xf]  ;;  %11446 = vst [vmem:[#allocation331_spill] sm:$0xff] %v9422_v37  ;;  %v9424_v41 = vor.u32 %v7553_v27, %v5950_v15  ;;  %3868 = vmatpush.bf16.msra.mxu1 %v9422_v37 }
 0x28d   : > { %v6206_v26 = vld [vmem:[#allocation5 + $0x6b0] sm:$0xf0] }
 0x28e   : > { %11447 = vst [vmem:[#allocation332_spill] sm:$0xff] %v9424_v41  ;;  %v7417_v28 = vld [vmem:[#allocation5 + $0x54] sm:$0xf]  ;;  %v9427_v63 = vor.u32 %v7617_v48, %v6206_v26  ;;  %3881 = vmatpush.bf16.msra.mxu2 %v9424_v41 }
 0x28f   : > { %v5406_v32 = vld [vmem:[#allocation5 + $0x70] sm:$0xf0] }
 0x290   : > { %v7481_v43 = vld [vmem:[#allocation5 + $0x254] sm:$0xf]  ;;  %11448 = vst [vmem:[#allocation333_spill] sm:$0xff] %v9427_v63  ;;  %v9430_v35 = vor.u32 %v7417_v28, %v5406_v32  ;;  %3894 = vmatpush.bf16.msra.mxu3 %v9427_v63 }
 0x291   : > { %v5662_v52 = vld [vmem:[#allocation5 + $0x270] sm:$0xf0] }
 0x292   : > { %v7545_v60 = vld [vmem:[#allocation5 + $0x454] sm:$0xf]  ;;  %11449 = vst [vmem:[#allocation334_spill] sm:$0xff] %v9430_v35  ;;  %v9434_v24 = vor.u32 %v7481_v43, %v5662_v52  ;;  %3856 = vmatpush.bf16.msra.mxu0 %v9430_v35 }
 0x293   : > { %v5918_v36 = vld [vmem:[#allocation5 + $0x470] sm:$0xf0] }
 0x294   : > { %v7609_v54 = vld [vmem:[#allocation5 + $0x654] sm:$0xf]  ;;  %11450 = vst [vmem:[#allocation335_spill] sm:$0xff] %v9434_v24  ;;  %v9436_v27 = vor.u32 %v7545_v60, %v5918_v36  ;;  %3869 = vmatpush.bf16.msra.mxu1 %v9434_v24 }
 0x295   : > { %v6174_v59 = vld [vmem:[#allocation5 + $0x670] sm:$0xf0] }
 0x296   : > { %v7409_v18 = vld [vmem:[#allocation5 + $0x14] sm:$0xf]  ;;  %11451 = vst [vmem:[#allocation336_spill] sm:$0xff] %v9436_v27  ;;  %v9439_v55 = vor.u32 %v7609_v54, %v6174_v59  ;;  %3882 = vmatpush.bf16.msra.mxu2 %v9436_v27  ;;  %v5860_v27 = vld [vmem:[#allocation5 + $0x3d8] sm:$0xf] }
 0x297   : > { %v5374_v31 = vld [vmem:[#allocation5 + $0x30] sm:$0xf0] }
 0x298   : > { %v7473_v26 = vld [vmem:[#allocation5 + $0x214] sm:$0xf]  ;;  %11452 = vst [vmem:[#allocation337_spill] sm:$0xff] %v9439_v55  ;;  %v9442_v43 = vor.u32 %v7409_v18, %v5374_v31  ;;  %3895 = vmatpush.bf16.msra.mxu3 %v9439_v55  ;;  %v5604_v55 = vld [vmem:[#allocation5 + $0x1d8] sm:$0xf] }
 0x299   : > { %v5630_v48 = vld [vmem:[#allocation5 + $0x230] sm:$0xf0] }
 0x29a   : > { %v7537_v15 = vld [vmem:[#allocation5 + $0x414] sm:$0xf]  ;;  %11453 = vst [vmem:[#allocation338_spill] sm:$0xff] %v9442_v43  ;;  %v9446_v53 = vor.u32 %v7473_v26, %v5630_v48  ;;  %3857 = vmatpush.bf16.msra.mxu0 %v9442_v43 }
 0x29b   : > { %v5886_v28 = vld [vmem:[#allocation5 + $0x430] sm:$0xf0] }
 0x29c   : > { %v7601_v32 = vld [vmem:[#allocation5 + $0x614] sm:$0xf]  ;;  %11454 = vst [vmem:[#allocation339_spill] sm:$0xff] %v9446_v53  ;;  %v9448_v54 = vor.u32 %v7537_v15, %v5886_v28  ;;  %3870 = vmatpush.bf16.msra.mxu1 %v9446_v53 }
 0x29d   : > { %v6142_v49 = vld [vmem:[#allocation5 + $0x630] sm:$0xf0]  ;;  %3858 = vmatmul.bf16.vlgmr.msra.gmra.mxu0 %v8467_v19 }
 0x29e   : > { %v7721_v4 = vld [vmem:[#allocation5 + $0x9d4] sm:$0xf]  ;;  %11455 = vst [vmem:[#allocation340_spill] sm:$0xff] %v9448_v54  ;;  %v9451_v63 = vor.u32 %v7601_v32, %v6142_v49  ;;  %3883 = vmatpush.bf16.msra.mxu2 %v9448_v54 }
 0x29f   : > { %v6622_v37 = vld [vmem:[#allocation5 + $0x9f0] sm:$0xf0]  ;;  %3871 = vmatmul.bf16.vlgmr.msra.gmra.mxu1 %v8469_v30 }
 0x2a0   : > { %v7785_v61 = vld [vmem:[#allocation5 + $0xbd4] sm:$0xf]  ;;  %11456 = vst [vmem:[#allocation341_spill] sm:$0xff] %v9451_v63  ;;  %v9453_v35 = vor.u32 %v7721_v4, %v6622_v37  ;;  %3896 = vmatpush.bf16.msra.mxu3 %v9451_v63 }
 0x2a1   : > { %v6878_v52 = vld [vmem:[#allocation5 + $0xbf0] sm:$0xf0]  ;;  %3884 = vmatmul.bf16.vlgmr.msra.gmra.mxu2 %v8455_v39 }
 0x2a2   : > { %v7849_v60 = vld [vmem:[#allocation5 + $0xdd4] sm:$0xf]  ;;  %11457 = vst [vmem:[#allocation342_spill] sm:$0xff] %v9453_v35  ;;  %v9455_v18 = vor.u32 %v7785_v61, %v6878_v52  ;;  %3902 = vmatpush.bf16.msrb.mxu0 %v9453_v35 }
 0x2a3   : > { %v7134_v36 = vld [vmem:[#allocation5 + $0xdf0] sm:$0xf0]  ;;  %3897 = vmatmul.bf16.vlgmr.msra.gmra.mxu3 %v8457_v1 }
 0x2a4   : > { %v7913_v59 = vld [vmem:[#allocation5 + $0xfd4] sm:$0xf]  ;;  %11458 = vst [vmem:[#allocation343_spill] sm:$0xff] %v9455_v18  ;;  %v9457_v31 = vor.u32 %v7849_v60, %v7134_v36  ;;  %3915 = vmatpush.bf16.msrb.mxu1 %v9455_v18 }
 0x2a5   : > { %v7390_v11 = vld [vmem:[#allocation5 + $0xff0] sm:$0xf0] }
 0x2a6   : > { %11459 = vst [vmem:[#allocation344_spill] sm:$0xff] %v9457_v31  ;;  %v7713_v41 = vld [vmem:[#allocation5 + $0x994] sm:$0xf]  ;;  %v9460_v26 = vor.u32 %v7913_v59, %v7390_v11  ;;  %3928 = vmatpush.bf16.msrb.mxu2 %v9457_v31 }
 0x2a7   : > { %v6590_v24 = vld [vmem:[#allocation5 + $0x9b0] sm:$0xf0] }
 0x2a8   : > { %v7777_v40 = vld [vmem:[#allocation5 + $0xb94] sm:$0xf]  ;;  %11460 = vst [vmem:[#allocation345_spill] sm:$0xff] %v9460_v26  ;;  %v9466_v61 = vor.u32 %v7713_v41, %v6590_v24  ;;  %3941 = vmatpush.bf16.msrb.mxu3 %v9460_v26 }
 0x2a9   : > { %v6846_v48 = vld [vmem:[#allocation5 + $0xbb0] sm:$0xf0] }
 0x2aa   : > { %v7841_v15 = vld [vmem:[#allocation5 + $0xd94] sm:$0xf]  ;;  %11461 = vst [vmem:[#allocation346_spill] sm:$0xff] %v9466_v61  ;;  %v9470_v37 = vor.u32 %v7777_v40, %v6846_v48  ;;  %3903 = vmatpush.bf16.msrb.mxu0 %v9466_v61 }
 0x2ab   : > { %v7102_v28 = vld [vmem:[#allocation5 + $0xdb0] sm:$0xf0] }
 0x2ac   : > { %v7905_v4 = vld [vmem:[#allocation5 + $0xf94] sm:$0xf]  ;;  %11462 = vst [vmem:[#allocation347_spill] sm:$0xff] %v9470_v37  ;;  %v9472_v32 = vor.u32 %v7841_v15, %v7102_v28  ;;  %3916 = vmatpush.bf16.msrb.mxu1 %v9470_v37 }
 0x2ad   : > { %v7358_v49 = vld [vmem:[#allocation5 + $0xfb0] sm:$0xf0] }
 0x2ae   : > { %11463 = vst [vmem:[#allocation348_spill] sm:$0xff] %v9472_v32  ;;  %v7705_v52 = vld [vmem:[#allocation5 + $0x954] sm:$0xf]  ;;  %v9475_v59 = vor.u32 %v7905_v4, %v7358_v49  ;;  %3929 = vmatpush.bf16.msrb.mxu2 %v9472_v32 }
 0x2af   : > { %v6558_v60 = vld [vmem:[#allocation5 + $0x970] sm:$0xf0] }
 0x2b0   : > { %v7769_v36 = vld [vmem:[#allocation5 + $0xb54] sm:$0xf]  ;;  %11464 = vst [vmem:[#allocation349_spill] sm:$0xff] %v9475_v59  ;;  %v9481_v40 = vor.u32 %v7705_v52, %v6558_v60  ;;  %3942 = vmatpush.bf16.msrb.mxu3 %v9475_v59  ;;  %v3664_v59 = vpop.f32.mrf.mxu1 }
 0x2b1   : > { %v6814_v11 = vld [vmem:[#allocation5 + $0xb70] sm:$0xf0] }
 0x2b2   : > { %v7833_v63 = vld [vmem:[#allocation5 + $0xd54] sm:$0xf]  ;;  %11465 = vst [vmem:[#allocation350_spill] sm:$0xff] %v9481_v40  ;;  %v9486_v48 = vor.u32 %v7769_v36, %v6814_v11  ;;  %3904 = vmatpush.bf16.msrb.mxu0 %v9481_v40  ;;  %v3651_v36 = vpop.f32.mrf.mxu0 }
 0x2b3   : > { %v7070_v35 = vld [vmem:[#allocation5 + $0xd70] sm:$0xf0]  ;;  %v3665_v54 = vadd.f32 %v3664_v59, %v3651_v36 }
 0x2b4   : > { %v7897_v41 = vld [vmem:[#allocation5 + $0xf54] sm:$0xf]  ;;  %11466 = vst [vmem:[#allocation351_spill] sm:$0xff] %v9486_v48  ;;  %v9488_v15 = vor.u32 %v7833_v63, %v7070_v35  ;;  %3917 = vmatpush.bf16.msrb.mxu1 %v9486_v48 }
 0x2b5   : > { %v7326_v24 = vld [vmem:[#allocation5 + $0xf70] sm:$0xf0] }
 0x2b6   : > { %11467 = vst [vmem:[#allocation352_spill] sm:$0xff] %v9488_v15  ;;  %v7697_v28 = vld [vmem:[#allocation5 + $0x914] sm:$0xf]  ;;  %v9491_v26 = vor.u32 %v7897_v41, %v7326_v24  ;;  %3930 = vmatpush.bf16.msrb.mxu2 %v9488_v15  ;;  %v3690_v15 = vpop.f32.mrf.mxu3 }
 0x2b7   : > { %v6526_v4 = vld [vmem:[#allocation5 + $0x930] sm:$0xf0] }
 0x2b8   : > { %v7761_v49 = vld [vmem:[#allocation5 + $0xb14] sm:$0xf]  ;;  %11468 = vst [vmem:[#allocation353_spill] sm:$0xff] %v9491_v26  ;;  %v9494_v37 = vor.u32 %v7697_v28, %v6526_v4  ;;  %3943 = vmatpush.bf16.msrb.mxu3 %v9491_v26  ;;  %v3677_v26 = vpop.f32.mrf.mxu2 }
 0x2b9   : > { %v6782_v61 = vld [vmem:[#allocation5 + $0xb30] sm:$0xf0] }
 0x2ba   : > { %v7825_v52 = vld [vmem:[#allocation5 + $0xd14] sm:$0xf]  ;;  %11469 = vst [vmem:[#allocation354_spill] sm:$0xff] %v9494_v37  ;;  %v9498_v63 = vor.u32 %v7761_v49, %v6782_v61  ;;  %3905 = vmatpush.bf16.msrb.mxu0 %v9494_v37 }
 0x2bb   : > { %v7038_v60 = vld [vmem:[#allocation5 + $0xd30] sm:$0xf0] }
 0x2bc   : > { %v7889_v31 = vld [vmem:[#allocation5 + $0xf14] sm:$0xf]  ;;  %11470 = vst [vmem:[#allocation355_spill] sm:$0xff] %v9498_v63  ;;  %v9500_v35 = vor.u32 %v7825_v52, %v7038_v60  ;;  %3918 = vmatpush.bf16.msrb.mxu1 %v9498_v63 }
 0x2bd   : > { %v7294_v18 = vld [vmem:[#allocation5 + $0xf30] sm:$0xf0] }
 0x2be   : > { %11471 = vst [vmem:[#allocation356_spill] sm:$0xff] %v9500_v35  ;;  %v7689_v11 = vld [vmem:[#allocation5 + $0x8d4] sm:$0xf]  ;;  %v9503_v32 = vor.u32 %v7889_v31, %v7294_v18  ;;  %3931 = vmatpush.bf16.msrb.mxu2 %v9500_v35  ;;  %v3692_v35 = vpop.f32.mrf.mxu3 }
 0x2bf   : > { %v6494_v41 = vld [vmem:[#allocation5 + $0x8f0] sm:$0xf0]  ;;  %v7662_v35 = vld [vmem:[#allocation5 + $0x7f4] sm:$0xf0] }
 0x2c0   : > { %v7753_v24 = vld [vmem:[#allocation5 + $0xad4] sm:$0xf]  ;;  %11472 = vst [vmem:[#allocation357_spill] sm:$0xff] %v9503_v32  ;;  %v9506_v61 = vor.u32 %v7689_v11, %v6494_v41  ;;  %3944 = vmatpush.bf16.msrb.mxu3 %v9503_v32  ;;  %v3678_v41 = vadd.f32 %v3677_v26, %v3665_v54  ;;  %v3666_v32 = vpop.f32.mrf.mxu1 }
 0x2c1   : > { %v6750_v40 = vld [vmem:[#allocation5 + $0xaf0] sm:$0xf0] }
 0x2c2   : > { %v7817_v28 = vld [vmem:[#allocation5 + $0xcd4] sm:$0xf]  ;;  %11473 = vst [vmem:[#allocation358_spill] sm:$0xff] %v9506_v61  ;;  %v9510_v49 = vor.u32 %v7753_v24, %v6750_v40  ;;  %3906 = vmatpush.bf16.msrb.mxu0 %v9506_v61  ;;  %v9520_v24 = vadd.f32 %v3690_v15, %v3678_v41 }
 0x2c3   : > { %v7006_v4 = vld [vmem:[#allocation5 + $0xcf0] sm:$0xf0] }
 0x2c4   : > { %v7881_v53 = vld [vmem:[#allocation5 + $0xed4] sm:$0xf]  ;;  %11474 = vst [vmem:[#allocation359_spill] sm:$0xff] %v9510_v49  ;;  %v9512_v52 = vor.u32 %v7817_v28, %v7006_v4  ;;  %v3653_v28 = vpop.f32.mrf.mxu0  ;;  %3919 = vmatpush.bf16.msrb.mxu1 %v9510_v49 }
 0x2c5   : > { %v7262_v48 = vld [vmem:[#allocation5 + $0xef0] sm:$0xf0] }
 0x2c6   : > { %11475 = vst [vmem:[#allocation360_spill] sm:$0xff] %v9512_v52  ;;  %v7681_v18 = vld [vmem:[#allocation5 + $0x894] sm:$0xf]  ;;  %v9515_v59 = vor.u32 %v7881_v53, %v7262_v48  ;;  %3932 = vmatpush.bf16.msrb.mxu2 %v9512_v52 }
 0x2c7   : > { %v6462_v31 = vld [vmem:[#allocation5 + $0x8b0] sm:$0xf0] }
 0x2c8   : > { %v7745_v60 = vld [vmem:[#allocation5 + $0xa94] sm:$0xf]  ;;  %11476 = vst [vmem:[#allocation361_spill] sm:$0xff] %v9515_v59  ;;  %v9518_v40 = vor.u32 %v7681_v18, %v6462_v31  ;;  %3945 = vmatpush.bf16.msrb.mxu3 %v9515_v59  ;;  %v3679_v59 = vpop.f32.mrf.mxu2 }
 0x2c9   : > { %v6718_v36 = vld [vmem:[#allocation5 + $0xab0] sm:$0xf0] }
 0x2ca   : > { %v7809_v37 = vld [vmem:[#allocation5 + $0xc94] sm:$0xf]  ;;  %11477 = vst [vmem:[#allocation362_spill] sm:$0xff] %v9518_v40  ;;  %v9524_v53 = vor.u32 %v7745_v60, %v6718_v36  ;;  %3907 = vmatpush.bf16.msrb.mxu0 %v9518_v40 }
 0x2cb   : > { %v6974_v11 = vld [vmem:[#allocation5 + $0xcb0] sm:$0xf0] }
 0x2cc   : > { %v7873_v63 = vld [vmem:[#allocation5 + $0xe94] sm:$0xf]  ;;  %11478 = vst [vmem:[#allocation363_spill] sm:$0xff] %v9524_v53  ;;  %v9526_v48 = vor.u32 %v7809_v37, %v6974_v11  ;;  %3920 = vmatpush.bf16.msrb.mxu1 %v9524_v53  ;;  %v7470_v53 = vld [vmem:[#allocation5 + $0x1f4] sm:$0xf0] }
 0x2cd   : > { %v7230_v43 = vld [vmem:[#allocation5 + $0xeb0] sm:$0xf0] }
 0x2ce   : > { %11479 = vst [vmem:[#allocation364_spill] sm:$0xff] %v9526_v48  ;;  %v7673_v4 = vld [vmem:[#allocation5 + $0x854] sm:$0xf]  ;;  %v9529_v61 = vor.u32 %v7873_v63, %v7230_v43  ;;  %3933 = vmatpush.bf16.msrb.mxu2 %v9526_v48  ;;  %v5572_v48 = vld [vmem:[#allocation5 + $0x198] sm:$0xf] }
 0x2cf   : > { %v6430_v54 = vld [vmem:[#allocation5 + $0x870] sm:$0xf0] }
 0x2d0   : > { %v7737_v26 = vld [vmem:[#allocation5 + $0xa54] sm:$0xf]  ;;  %11480 = vst [vmem:[#allocation365_spill] sm:$0xff] %v9529_v61  ;;  %v9532_v52 = vor.u32 %v7673_v4, %v6430_v54  ;;  %3946 = vmatpush.bf16.msrb.mxu3 %v9529_v61 }
 0x2d1   : > { %v6686_v18 = vld [vmem:[#allocation5 + $0xa70] sm:$0xf0] }
 0x2d2   : > { %v7801_v15 = vld [vmem:[#allocation5 + $0xc54] sm:$0xf]  ;;  %11481 = vst [vmem:[#allocation366_spill] sm:$0xff] %v9532_v52  ;;  %v9536_v32 = vor.u32 %v7737_v26, %v6686_v18  ;;  %3908 = vmatpush.bf16.msrb.mxu0 %v9532_v52  ;;  %v7534_v18 = vld [vmem:[#allocation5 + $0x3f4] sm:$0xf0]  ;;  %v9555_v52 = vor.u32 %v7470_v53, %v5604_v55 }
 0x2d3   : > { %v6942_v31 = vld [vmem:[#allocation5 + $0xc70] sm:$0xf0]  ;;  %v6340_v55 = vld [vmem:[#allocation5 + $0x798] sm:$0xf] }
 0x2d4   : > { %v7865_v41 = vld [vmem:[#allocation5 + $0xe54] sm:$0xf]  ;;  %11482 = vst [vmem:[#allocation367_spill] sm:$0xff] %v9536_v32  ;;  %v9538_v36 = vor.u32 %v7801_v15, %v6942_v31  ;;  %v6116_v15 = vld [vmem:[#allocation5 + $0x5d8] sm:$0xf]  ;;  %3921 = vmatpush.bf16.msrb.mxu1 %v9536_v32 }
 0x2d5   : > { %v7198_v28 = vld [vmem:[#allocation5 + $0xe70] sm:$0xf0]  ;;  %v7598_v31 = vld [vmem:[#allocation5 + $0x5f4] sm:$0xf0]  ;;  %11489 = vst [vmem:[#allocation374_spill] sm:$0xff] %v9555_v52 }
 0x2d6   : > { %v7665_v60 = vld [vmem:[#allocation5 + $0x814] sm:$0xf]  ;;  %11483 = vst [vmem:[#allocation368_spill] sm:$0xff] %v9538_v36  ;;  %v9541_v49 = vor.u32 %v7865_v41, %v7198_v28  ;;  %3934 = vmatpush.bf16.msrb.mxu2 %v9538_v36  ;;  %v6372_v28 = vld [vmem:[#allocation5 + $0x7d8] sm:$0xf] }
 0x2d7   : > { %v6398_v37 = vld [vmem:[#allocation5 + $0x830] sm:$0xf0]  ;;  %v7462_v32 = vld [vmem:[#allocation5 + $0x1b4] sm:$0xf0] }
 0x2d8   : > { %v7729_v43 = vld [vmem:[#allocation5 + $0xa14] sm:$0xf]  ;;  %11484 = vst [vmem:[#allocation369_spill] sm:$0xff] %v9541_v49  ;;  %v9544_v26 = vor.u32 %v7665_v60, %v6398_v37  ;;  %3947 = vmatpush.bf16.msrb.mxu3 %v9541_v49  ;;  %v9557_v60 = vor.u32 %v7534_v18, %v5860_v27  ;;  %v9559_v37 = vor.u32 %v7598_v31, %v6116_v15  ;;  %v5540_v18 = vld [vmem:[#allocation5 + $0x158] sm:$0xf] }
 0x2d9   : > { %v6654_v63 = vld [vmem:[#allocation5 + $0xa30] sm:$0xf0]  ;;  %v9568_v27 = vor.u32 %v7462_v32, %v5572_v48  ;;  %v7454_v15 = vld [vmem:[#allocation5 + $0x174] sm:$0xf0] }
 0x2da   : > { %v7793_v11 = vld [vmem:[#allocation5 + $0xc14] sm:$0xf]  ;;  %11485 = vst [vmem:[#allocation370_spill] sm:$0xff] %v9544_v26  ;;  %v9548_v59 = vor.u32 %v7729_v43, %v6654_v63  ;;  %3909 = vmatpush.bf16.msrb.mxu0 %v9544_v26  ;;  %v9562_v43 = vor.u32 %v7662_v35, %v6372_v28  ;;  %v7526_v63 = vld [vmem:[#allocation5 + $0x3b4] sm:$0xf0] }
 0x2db   : > { %v6910_v4 = vld [vmem:[#allocation5 + $0xc30] sm:$0xf0]  ;;  %11490 = vst [vmem:[#allocation375_spill] sm:$0xff] %v9557_v60  ;;  %v9572_v53 = vor.u32 %v7526_v63, %v5828_v51  ;;  %v5796_v31 = vld [vmem:[#allocation5 + $0x358] sm:$0xf] }
 0x2dc   : > { %v7857_v54 = vld [vmem:[#allocation5 + $0xe14] sm:$0xf]  ;;  %11486 = vst [vmem:[#allocation371_spill] sm:$0xff] %v9548_v59  ;;  %v9550_v41 = vor.u32 %v7793_v11, %v6910_v4  ;;  %v6084_v11 = vld [vmem:[#allocation5 + $0x598] sm:$0xf]  ;;  %3922 = vmatpush.bf16.msrb.mxu1 %v9548_v59 }
 0x2dd   : > { %v7166_v40 = vld [vmem:[#allocation5 + $0xe30] sm:$0xf0]  ;;  %11491 = vst [vmem:[#allocation376_spill] sm:$0xff] %v9559_v37  ;;  %v7590_v4 = vld [vmem:[#allocation5 + $0x5b4] sm:$0xf0]  ;;  %3910 = vmatmul.bf16.vlgmr.msrb.gmra.mxu0 %v8543_v22 }
 0x2de   : > { %11487 = vst [vmem:[#allocation372_spill] sm:$0xff] %v9550_v41  ;;  %v9553_v61 = vor.u32 %v7857_v54, %v7166_v40  ;;  %3935 = vmatpush.bf16.msrb.mxu2 %v9550_v41  ;;  %v7654_v40 = vld [vmem:[#allocation5 + $0x7b4] sm:$0xf0]  ;;  %3954 = vmatpush.bf16.msra.mxu0 %v9555_v52  ;;  %v9574_v54 = vor.u32 %v7590_v4, %v6084_v11 }
 0x2df   : > { %11492 = vst [vmem:[#allocation377_spill] sm:$0xff] %v9562_v43  ;;  %v9577_v28 = vor.u32 %v7654_v40, %v6340_v55  ;;  %v7518_v35 = vld [vmem:[#allocation5 + $0x374] sm:$0xf0]  ;;  %v9583_v11 = vor.u32 %v7454_v15, %v5540_v18  ;;  %3923 = vmatmul.bf16.vlgmr.msrb.gmra.mxu1 %v8551_v13 }
 0x2e0   : > { %11488 = vst [vmem:[#allocation373_spill] sm:$0xff] %v9553_v61  ;;  %3948 = vmatpush.bf16.msrb.mxu3 %v9553_v61  ;;  %3967 = vmatpush.bf16.msra.mxu1 %v9557_v60  ;;  %v6052_v48 = vld [vmem:[#allocation5 + $0x558] sm:$0xf]  ;;  %v9588_v4 = vor.u32 %v7518_v35, %v5796_v31  ;;  %v3703_v31 = vpop.f32.mrf.mxu0 }
 0x2e1   : > { %11493 = vst [vmem:[#allocation378_spill] sm:$0xff] %v9568_v27  ;;  %3936 = vmatmul.bf16.vlgmr.msrb.gmra.mxu2 %v8539_v47  ;;  %v7582_v32 = vld [vmem:[#allocation5 + $0x574] sm:$0xf0] }
 0x2e2   : > { %3980 = vmatpush.bf16.msra.mxu2 %v9559_v37  ;;  %11494 = vst [vmem:[#allocation379_spill] sm:$0xff] %v9572_v53  ;;  %v6308_v51 = vld [vmem:[#allocation5 + $0x758] sm:$0xf]  ;;  %3955 = vmatpush.bf16.msra.mxu0 %v9568_v27  ;;  %v9590_v55 = vor.u32 %v7582_v32, %v6052_v48 }
 0x2e3   : > { %11495 = vst [vmem:[#allocation380_spill] sm:$0xff] %v9574_v54  ;;  %3949 = vmatmul.bf16.vlgmr.msrb.gmra.mxu3 %v8545_v42  ;;  %v7646_v63 = vld [vmem:[#allocation5 + $0x774] sm:$0xf0] }
 0x2e4   : > { %3993 = vmatpush.bf16.msra.mxu3 %v9562_v43  ;;  %11496 = vst [vmem:[#allocation381_spill] sm:$0xff] %v9577_v28  ;;  %3968 = vmatpush.bf16.msra.mxu1 %v9572_v53  ;;  %v5508_v40 = vld [vmem:[#allocation5 + $0x118] sm:$0xf]  ;;  %v9593_v60 = vor.u32 %v7646_v63, %v6308_v51 }
 0x2e5   : > { %11497 = vst [vmem:[#allocation382_spill] sm:$0xff] %v9583_v11  ;;  %v7446_v43 = vld [vmem:[#allocation5 + $0x134] sm:$0xf0] }
 0x2e6   : > { %3981 = vmatpush.bf16.msra.mxu2 %v9574_v54  ;;  %11498 = vst [vmem:[#allocation383_spill] sm:$0xff] %v9588_v4  ;;  %v5764_v37 = vld [vmem:[#allocation5 + $0x318] sm:$0xf]  ;;  %3956 = vmatpush.bf16.msra.mxu0 %v9583_v11  ;;  %v9596_v53 = vor.u32 %v7446_v43, %v5508_v40  ;;  %v3716_v54 = vpop.f32.mrf.mxu1 }
 0x2e7   : > { %11499 = vst [vmem:[#allocation384_spill] sm:$0xff] %v9590_v55  ;;  %v7510_v27 = vld [vmem:[#allocation5 + $0x334] sm:$0xf0] }
 0x2e8   : > { %3994 = vmatpush.bf16.msra.mxu3 %v9577_v28  ;;  %11500 = vst [vmem:[#allocation385_spill] sm:$0xff] %v9593_v60  ;;  %v6020_v18 = vld [vmem:[#allocation5 + $0x518] sm:$0xf]  ;;  %3969 = vmatpush.bf16.msra.mxu1 %v9588_v4  ;;  %v9600_v35 = vor.u32 %v7510_v27, %v5764_v37  ;;  %v3704_v28 = vadd.f32 %v3703_v31, %v9520_v24 }
 0x2e9   : > { %v7574_v15 = vld [vmem:[#allocation5 + $0x534] sm:$0xf0]  ;;  %11501 = vst [vmem:[#allocation386_spill] sm:$0xff] %v9596_v53 }
 0x2ea   : > { %v6276_v52 = vld [vmem:[#allocation5 + $0x718] sm:$0xf]  ;;  %3982 = vmatpush.bf16.msra.mxu2 %v9590_v55  ;;  %11502 = vst [vmem:[#allocation387_spill] sm:$0xff] %v9600_v35  ;;  %v9602_v48 = vor.u32 %v7574_v15, %v6020_v18  ;;  %v3717_v55 = vadd.f32 %v3716_v54, %v3704_v28  ;;  %3957 = vmatpush.bf16.msra.mxu0 %v9596_v53  ;;  %v3729_v15 = vpop.f32.mrf.mxu2  ;;  %v3742_v53 = vpop.f32.mrf.mxu3 }
 0x2eb   : > { %v7638_v61 = vld [vmem:[#allocation5 + $0x734] sm:$0xf0] }
 0x2ec   : > { %11503 = vst [vmem:[#allocation388_spill] sm:$0xff] %v9602_v48  ;;  %v5476_v32 = vld [vmem:[#allocation5 + $0xd8] sm:$0xf]  ;;  %3995 = vmatpush.bf16.msra.mxu3 %v9593_v60  ;;  %v9606_v11 = vor.u32 %v7638_v61, %v6276_v52  ;;  %3970 = vmatpush.bf16.msra.mxu1 %v9600_v35 }
 0x2ed   : > { %v7438_v51 = vld [vmem:[#allocation5 + $0xf4] sm:$0xf0] }
 0x2ee   : > { %v5732_v63 = vld [vmem:[#allocation5 + $0x2d8] sm:$0xf]  ;;  %11504 = vst [vmem:[#allocation389_spill] sm:$0xff] %v9606_v11  ;;  %v9609_v37 = vor.u32 %v7438_v51, %v5476_v32  ;;  %3983 = vmatpush.bf16.msra.mxu2 %v9602_v48  ;;  %v3730_v51 = vadd.f32 %v3729_v15, %v3717_v55 }
 0x2ef   : > { %v7502_v43 = vld [vmem:[#allocation5 + $0x2f4] sm:$0xf0] }
 0x2f0   : > { %v5988_v40 = vld [vmem:[#allocation5 + $0x4d8] sm:$0xf]  ;;  %11505 = vst [vmem:[#allocation390_spill] sm:$0xff] %v9609_v37  ;;  %v9613_v24 = vor.u32 %v7502_v43, %v5732_v63  ;;  %3996 = vmatpush.bf16.msra.mxu3 %v9606_v11  ;;  %3958 = vmatpush.bf16.msra.mxu0 %v9609_v37  ;;  %v3705_v43 = vpop.f32.mrf.mxu0  ;;  %v3718_v11 = vpop.f32.mrf.mxu1 }
 0x2f1   : > { %v7566_v41 = vld [vmem:[#allocation5 + $0x4f4] sm:$0xf0] }
 0x2f2   : > { %v6244_v4 = vld [vmem:[#allocation5 + $0x6d8] sm:$0xf]  ;;  %11506 = vst [vmem:[#allocation391_spill] sm:$0xff] %v9613_v24  ;;  %v9615_v27 = vor.u32 %v7566_v41, %v5988_v40  ;;  %v9623_v41 = vadd.f32 %v3742_v53, %v3730_v51  ;;  %3971 = vmatpush.bf16.msra.mxu1 %v9613_v24  ;;  %v3744_v48 = vpop.f32.mrf.mxu3 }
 0x2f3   : > { %v7630_v59 = vld [vmem:[#allocation5 + $0x6f4] sm:$0xf0] }
 0x2f4   : > { %11507 = vst [vmem:[#allocation392_spill] sm:$0xff] %v9615_v27  ;;  %v5444_v61 = vld [vmem:[#allocation5 + $0x98] sm:$0xf]  ;;  %v9618_v31 = vor.u32 %v7630_v59, %v6244_v4  ;;  %3984 = vmatpush.bf16.msra.mxu2 %v9615_v27 }
 0x2f5   : > { %v7430_v52 = vld [vmem:[#allocation5 + $0xb4] sm:$0xf0]  ;;  %11510 = vst [vmem:[#allocation395_spill] sm:$0xff] %v9623_v41  ;;  %v7522_v41 = vld [vmem:[#allocation5 + $0x39c] sm:$0xf] }
 0x2f6   : > { %v5700_v18 = vld [vmem:[#allocation5 + $0x298] sm:$0xf]  ;;  %11508 = vst [vmem:[#allocation393_spill] sm:$0xff] %v9618_v31  ;;  %v9621_v63 = vor.u32 %v7430_v52, %v5444_v61  ;;  %3997 = vmatpush.bf16.msra.mxu3 %v9618_v31  ;;  %v3731_v31 = vpop.f32.mrf.mxu2 }
 0x2f7   : > { %v7494_v54 = vld [vmem:[#allocation5 + $0x2b4] sm:$0xf0] }
 0x2f8   : > { %v5956_v28 = vld [vmem:[#allocation5 + $0x498] sm:$0xf]  ;;  %11509 = vst [vmem:[#allocation394_spill] sm:$0xff] %v9621_v63  ;;  %v9627_v59 = vor.u32 %v7494_v54, %v5700_v18  ;;  %3959 = vmatpush.bf16.msra.mxu0 %v9621_v63 }
 0x2f9   : > { %v7558_v32 = vld [vmem:[#allocation5 + $0x4b4] sm:$0xf0] }
 0x2fa   : > { %v6212_v35 = vld [vmem:[#allocation5 + $0x698] sm:$0xf]  ;;  %11511 = vst [vmem:[#allocation396_spill] sm:$0xff] %v9627_v59  ;;  %v9629_v4 = vor.u32 %v7558_v32, %v5956_v28  ;;  %3972 = vmatpush.bf16.msra.mxu1 %v9627_v59 }
 0x2fb   : > { %v7622_v60 = vld [vmem:[#allocation5 + $0x6b4] sm:$0xf0] }
 0x2fc   : > { %11512 = vst [vmem:[#allocation397_spill] sm:$0xff] %v9629_v4  ;;  %v5412_v40 = vld [vmem:[#allocation5 + $0x58] sm:$0xf]  ;;  %v9632_v37 = vor.u32 %v7622_v60, %v6212_v35  ;;  %3985 = vmatpush.bf16.msra.mxu2 %v9629_v4 }
 0x2fd   : > { %v7422_v55 = vld [vmem:[#allocation5 + $0x74] sm:$0xf0] }
 0x2fe   : > { %v5668_v15 = vld [vmem:[#allocation5 + $0x258] sm:$0xf]  ;;  %11513 = vst [vmem:[#allocation398_spill] sm:$0xff] %v9632_v37  ;;  %v9635_v27 = vor.u32 %v7422_v55, %v5412_v40  ;;  %3998 = vmatpush.bf16.msra.mxu3 %v9632_v37 }
 0x2ff   : > { %v7486_v61 = vld [vmem:[#allocation5 + $0x274] sm:$0xf0] }
 0x300   : > { %v5924_v53 = vld [vmem:[#allocation5 + $0x458] sm:$0xf]  ;;  %11514 = vst [vmem:[#allocation399_spill] sm:$0xff] %v9635_v27  ;;  %v9639_v11 = vor.u32 %v7486_v61, %v5668_v15  ;;  %3960 = vmatpush.bf16.msra.mxu0 %v9635_v27 }
 0x301   : > { %v7550_v52 = vld [vmem:[#allocation5 + $0x474] sm:$0xf0] }
 0x302   : > { %v6180_v51 = vld [vmem:[#allocation5 + $0x658] sm:$0xf]  ;;  %11515 = vst [vmem:[#allocation400_spill] sm:$0xff] %v9639_v11  ;;  %v9641_v28 = vor.u32 %v7550_v52, %v5924_v53  ;;  %3973 = vmatpush.bf16.msra.mxu1 %v9639_v11 }
 0x303   : > { %v7614_v43 = vld [vmem:[#allocation5 + $0x674] sm:$0xf0] }
 0x304   : > { %v5380_v18 = vld [vmem:[#allocation5 + $0x18] sm:$0xf]  ;;  %11516 = vst [vmem:[#allocation401_spill] sm:$0xff] %v9641_v28  ;;  %v9644_v24 = vor.u32 %v7614_v43, %v6180_v51  ;;  %3986 = vmatpush.bf16.msra.mxu2 %v9641_v28  ;;  %v7530_v28 = vld [vmem:[#allocation5 + $0x3dc] sm:$0xf] }
 0x305   : > { %v7414_v54 = vld [vmem:[#allocation5 + $0x34] sm:$0xf0] }
 0x306   : > { %v5636_v60 = vld [vmem:[#allocation5 + $0x218] sm:$0xf]  ;;  %11517 = vst [vmem:[#allocation402_spill] sm:$0xff] %v9644_v24  ;;  %v9647_v15 = vor.u32 %v7414_v54, %v5380_v18  ;;  %3999 = vmatpush.bf16.msra.mxu3 %v9644_v24  ;;  %v7466_v24 = vld [vmem:[#allocation5 + $0x1dc] sm:$0xf] }
 0x307   : > { %v7478_v35 = vld [vmem:[#allocation5 + $0x234] sm:$0xf0] }
 0x308   : > { %v5892_v32 = vld [vmem:[#allocation5 + $0x418] sm:$0xf]  ;;  %11518 = vst [vmem:[#allocation403_spill] sm:$0xff] %v9647_v15  ;;  %v9651_v31 = vor.u32 %v7478_v35, %v5636_v60  ;;  %3961 = vmatpush.bf16.msra.mxu0 %v9647_v15 }
 0x309   : > { %v7542_v40 = vld [vmem:[#allocation5 + $0x434] sm:$0xf0] }
 0x30a   : > { %v6148_v55 = vld [vmem:[#allocation5 + $0x618] sm:$0xf]  ;;  %11519 = vst [vmem:[#allocation404_spill] sm:$0xff] %v9651_v31  ;;  %v9653_v51 = vor.u32 %v7542_v40, %v5892_v32  ;;  %3974 = vmatpush.bf16.msra.mxu1 %v9651_v31 }
 0x30b   : > { %v7606_v63 = vld [vmem:[#allocation5 + $0x634] sm:$0xf0]  ;;  %3962 = vmatmul.bf16.vlgmr.msra.gmra.mxu0 %v8467_v19 }
 0x30c   : > { %v6628_v26 = vld [vmem:[#allocation5 + $0x9d8] sm:$0xf]  ;;  %11520 = vst [vmem:[#allocation405_spill] sm:$0xff] %v9653_v51  ;;  %v9656_v37 = vor.u32 %v7606_v63, %v6148_v55  ;;  %3987 = vmatpush.bf16.msra.mxu2 %v9653_v51 }
 0x30d   : > { %v7726_v59 = vld [vmem:[#allocation5 + $0x9f4] sm:$0xf0]  ;;  %3975 = vmatmul.bf16.vlgmr.msra.gmra.mxu1 %v8469_v30 }
 0x30e   : > { %v6884_v49 = vld [vmem:[#allocation5 + $0xbd8] sm:$0xf]  ;;  %11521 = vst [vmem:[#allocation406_spill] sm:$0xff] %v9656_v37  ;;  %v9658_v27 = vor.u32 %v7726_v59, %v6628_v26  ;;  %4000 = vmatpush.bf16.msra.mxu3 %v9656_v37 }
 0x30f   : > { %v7790_v61 = vld [vmem:[#allocation5 + $0xbf4] sm:$0xf0]  ;;  %3988 = vmatmul.bf16.vlgmr.msra.gmra.mxu2 %v8455_v39 }
 0x310   : > { %v7140_v53 = vld [vmem:[#allocation5 + $0xdd8] sm:$0xf]  ;;  %11522 = vst [vmem:[#allocation407_spill] sm:$0xff] %v9658_v27  ;;  %v9660_v18 = vor.u32 %v7790_v61, %v6884_v49  ;;  %4006 = vmatpush.bf16.msrb.mxu0 %v9658_v27 }
 0x311   : > { %v7854_v52 = vld [vmem:[#allocation5 + $0xdf4] sm:$0xf0]  ;;  %4001 = vmatmul.bf16.vlgmr.msra.gmra.mxu3 %v8457_v1 }
 0x312   : > { %v7396_v43 = vld [vmem:[#allocation5 + $0xfd8] sm:$0xf]  ;;  %11523 = vst [vmem:[#allocation408_spill] sm:$0xff] %v9660_v18  ;;  %v9662_v54 = vor.u32 %v7854_v52, %v7140_v53  ;;  %4019 = vmatpush.bf16.msrb.mxu1 %v9660_v18 }
 0x313   : > { %v7918_v48 = vld [vmem:[#allocation5 + $0xff4] sm:$0xf0] }
 0x314   : > { %11524 = vst [vmem:[#allocation409_spill] sm:$0xff] %v9662_v54  ;;  %v6596_v4 = vld [vmem:[#allocation5 + $0x998] sm:$0xf]  ;;  %v9665_v60 = vor.u32 %v7918_v48, %v7396_v43  ;;  %4032 = vmatpush.bf16.msrb.mxu2 %v9662_v54 }
 0x315   : > { %v7718_v11 = vld [vmem:[#allocation5 + $0x9b4] sm:$0xf0] }
 0x316   : > { %v6852_v36 = vld [vmem:[#allocation5 + $0xb98] sm:$0xf]  ;;  %11525 = vst [vmem:[#allocation410_spill] sm:$0xff] %v9665_v60  ;;  %v9671_v49 = vor.u32 %v7718_v11, %v6596_v4  ;;  %4045 = vmatpush.bf16.msrb.mxu3 %v9665_v60 }
 0x317   : > { %v7782_v35 = vld [vmem:[#allocation5 + $0xbb4] sm:$0xf0] }
 0x318   : > { %v7108_v32 = vld [vmem:[#allocation5 + $0xd98] sm:$0xf]  ;;  %11526 = vst [vmem:[#allocation411_spill] sm:$0xff] %v9671_v49  ;;  %v9675_v59 = vor.u32 %v7782_v35, %v6852_v36  ;;  %4007 = vmatpush.bf16.msrb.mxu0 %v9671_v49 }
 0x319   : > { %v7846_v40 = vld [vmem:[#allocation5 + $0xdb4] sm:$0xf0] }
 0x31a   : > { %v7364_v26 = vld [vmem:[#allocation5 + $0xf98] sm:$0xf]  ;;  %11527 = vst [vmem:[#allocation412_spill] sm:$0xff] %v9675_v59  ;;  %v9677_v55 = vor.u32 %v7846_v40, %v7108_v32  ;;  %4020 = vmatpush.bf16.msrb.mxu1 %v9675_v59 }
 0x31b   : > { %v7910_v63 = vld [vmem:[#allocation5 + $0xfb4] sm:$0xf0] }
 0x31c   : > { %11528 = vst [vmem:[#allocation413_spill] sm:$0xff] %v9677_v55  ;;  %v6564_v61 = vld [vmem:[#allocation5 + $0x958] sm:$0xf]  ;;  %v9680_v43 = vor.u32 %v7910_v63, %v7364_v26  ;;  %4033 = vmatpush.bf16.msrb.mxu2 %v9677_v55 }
 0x31d   : > { %v7710_v53 = vld [vmem:[#allocation5 + $0x974] sm:$0xf0] }
 0x31e   : > { %v6820_v52 = vld [vmem:[#allocation5 + $0xb58] sm:$0xf]  ;;  %11529 = vst [vmem:[#allocation414_spill] sm:$0xff] %v9680_v43  ;;  %v9686_v36 = vor.u32 %v7710_v53, %v6564_v61  ;;  %4046 = vmatpush.bf16.msrb.mxu3 %v9680_v43  ;;  %v3768_v43 = vpop.f32.mrf.mxu1 }
 0x31f   : > { %v7774_v48 = vld [vmem:[#allocation5 + $0xb74] sm:$0xf0] }
 0x320   : > { %v7076_v37 = vld [vmem:[#allocation5 + $0xd58] sm:$0xf]  ;;  %11530 = vst [vmem:[#allocation415_spill] sm:$0xff] %v9686_v36  ;;  %v9691_v35 = vor.u32 %v7774_v48, %v6820_v52  ;;  %4008 = vmatpush.bf16.msrb.mxu0 %v9686_v36  ;;  %v3755_v52 = vpop.f32.mrf.mxu0 }
 0x321   : > { %v7838_v27 = vld [vmem:[#allocation5 + $0xd74] sm:$0xf0]  ;;  %v3769_v51 = vadd.f32 %v3768_v43, %v3755_v52 }
 0x322   : > { %v7332_v4 = vld [vmem:[#allocation5 + $0xf58] sm:$0xf]  ;;  %11531 = vst [vmem:[#allocation416_spill] sm:$0xff] %v9691_v35  ;;  %v9693_v32 = vor.u32 %v7838_v27, %v7076_v37  ;;  %4021 = vmatpush.bf16.msrb.mxu1 %v9691_v35 }
 0x323   : > { %v7902_v11 = vld [vmem:[#allocation5 + $0xf74] sm:$0xf0] }
 0x324   : > { %11532 = vst [vmem:[#allocation417_spill] sm:$0xff] %v9693_v32  ;;  %v6532_v40 = vld [vmem:[#allocation5 + $0x918] sm:$0xf]  ;;  %v9696_v60 = vor.u32 %v7902_v11, %v7332_v4  ;;  %4034 = vmatpush.bf16.msrb.mxu2 %v9693_v32  ;;  %v3794_v32 = vpop.f32.mrf.mxu3 }
 0x325   : > { %v7702_v26 = vld [vmem:[#allocation5 + $0x934] sm:$0xf0] }
 0x326   : > { %v6788_v63 = vld [vmem:[#allocation5 + $0xb18] sm:$0xf]  ;;  %11533 = vst [vmem:[#allocation418_spill] sm:$0xff] %v9696_v60  ;;  %v9699_v59 = vor.u32 %v7702_v26, %v6532_v40  ;;  %4047 = vmatpush.bf16.msrb.mxu3 %v9696_v60  ;;  %v3781_v60 = vpop.f32.mrf.mxu2 }
 0x327   : > { %v7766_v49 = vld [vmem:[#allocation5 + $0xb34] sm:$0xf0] }
 0x328   : > { %v7044_v61 = vld [vmem:[#allocation5 + $0xd18] sm:$0xf]  ;;  %11534 = vst [vmem:[#allocation419_spill] sm:$0xff] %v9699_v59  ;;  %v9703_v37 = vor.u32 %v7766_v49, %v6788_v63  ;;  %4009 = vmatpush.bf16.msrb.mxu0 %v9699_v59 }
 0x329   : > { %v7830_v53 = vld [vmem:[#allocation5 + $0xd34] sm:$0xf0] }
 0x32a   : > { %v7300_v54 = vld [vmem:[#allocation5 + $0xf18] sm:$0xf]  ;;  %11535 = vst [vmem:[#allocation420_spill] sm:$0xff] %v9703_v37  ;;  %v9705_v27 = vor.u32 %v7830_v53, %v7044_v61  ;;  %4022 = vmatpush.bf16.msrb.mxu1 %v9703_v37 }
 0x32b   : > { %v7894_v18 = vld [vmem:[#allocation5 + $0xf34] sm:$0xf0] }
 0x32c   : > { %11536 = vst [vmem:[#allocation421_spill] sm:$0xff] %v9705_v27  ;;  %v6500_v48 = vld [vmem:[#allocation5 + $0x8d8] sm:$0xf]  ;;  %v9708_v55 = vor.u32 %v7894_v18, %v7300_v54  ;;  %4035 = vmatpush.bf16.msrb.mxu2 %v9705_v27  ;;  %v3796_v27 = vpop.f32.mrf.mxu3 }
 0x32d   : > { %v7694_v4 = vld [vmem:[#allocation5 + $0x8f4] sm:$0xf0]  ;;  %v6374_v27 = vld [vmem:[#allocation5 + $0x7f8] sm:$0xf0] }
 0x32e   : > { %v6756_v11 = vld [vmem:[#allocation5 + $0xad8] sm:$0xf]  ;;  %11537 = vst [vmem:[#allocation422_spill] sm:$0xff] %v9708_v55  ;;  %v9711_v49 = vor.u32 %v7694_v4, %v6500_v48  ;;  %4048 = vmatpush.bf16.msrb.mxu3 %v9708_v55  ;;  %v3782_v4 = vadd.f32 %v3781_v60, %v3769_v51  ;;  %v3770_v55 = vpop.f32.mrf.mxu1 }
 0x32f   : > { %v7758_v36 = vld [vmem:[#allocation5 + $0xaf4] sm:$0xf0] }
 0x330   : > { %v7012_v40 = vld [vmem:[#allocation5 + $0xcd8] sm:$0xf]  ;;  %11538 = vst [vmem:[#allocation423_spill] sm:$0xff] %v9711_v49  ;;  %v9715_v63 = vor.u32 %v7758_v36, %v6756_v11  ;;  %4010 = vmatpush.bf16.msrb.mxu0 %v9711_v49  ;;  %v9725_v11 = vadd.f32 %v3794_v32, %v3782_v4 }
 0x331   : > { %v7822_v26 = vld [vmem:[#allocation5 + $0xcf4] sm:$0xf0] }
 0x332   : > { %v7268_v31 = vld [vmem:[#allocation5 + $0xed8] sm:$0xf]  ;;  %11539 = vst [vmem:[#allocation424_spill] sm:$0xff] %v9715_v63  ;;  %v9717_v61 = vor.u32 %v7822_v26, %v7012_v40  ;;  %v3757_v40 = vpop.f32.mrf.mxu0  ;;  %4023 = vmatpush.bf16.msrb.mxu1 %v9715_v63 }
 0x333   : > { %v7886_v35 = vld [vmem:[#allocation5 + $0xef4] sm:$0xf0] }
 0x334   : > { %11540 = vst [vmem:[#allocation425_spill] sm:$0xff] %v9717_v61  ;;  %v6468_v18 = vld [vmem:[#allocation5 + $0x898] sm:$0xf]  ;;  %v9720_v43 = vor.u32 %v7886_v35, %v7268_v31  ;;  %4036 = vmatpush.bf16.msrb.mxu2 %v9717_v61 }
 0x335   : > { %v7686_v54 = vld [vmem:[#allocation5 + $0x8b4] sm:$0xf0] }
 0x336   : > { %v6724_v53 = vld [vmem:[#allocation5 + $0xa98] sm:$0xf]  ;;  %11541 = vst [vmem:[#allocation426_spill] sm:$0xff] %v9720_v43  ;;  %v9723_v36 = vor.u32 %v7686_v54, %v6468_v18  ;;  %4049 = vmatpush.bf16.msrb.mxu3 %v9720_v43  ;;  %v3783_v43 = vpop.f32.mrf.mxu2 }
 0x337   : > { %v7750_v52 = vld [vmem:[#allocation5 + $0xab4] sm:$0xf0] }
 0x338   : > { %v6980_v59 = vld [vmem:[#allocation5 + $0xc98] sm:$0xf]  ;;  %11542 = vst [vmem:[#allocation427_spill] sm:$0xff] %v9723_v36  ;;  %v9729_v31 = vor.u32 %v7750_v52, %v6724_v53  ;;  %4011 = vmatpush.bf16.msrb.mxu0 %v9723_v36 }
 0x339   : > { %v7814_v48 = vld [vmem:[#allocation5 + $0xcb4] sm:$0xf0] }
 0x33a   : > { %v7236_v37 = vld [vmem:[#allocation5 + $0xe98] sm:$0xf]  ;;  %11543 = vst [vmem:[#allocation428_spill] sm:$0xff] %v9729_v31  ;;  %v9731_v35 = vor.u32 %v7814_v48, %v6980_v59  ;;  %4024 = vmatpush.bf16.msrb.mxu1 %v9729_v31  ;;  %v5606_v31 = vld [vmem:[#allocation5 + $0x1f8] sm:$0xf0] }
 0x33b   : > { %v7878_v15 = vld [vmem:[#allocation5 + $0xeb4] sm:$0xf0] }
 0x33c   : > { %11544 = vst [vmem:[#allocation429_spill] sm:$0xff] %v9731_v35  ;;  %v6436_v26 = vld [vmem:[#allocation5 + $0x858] sm:$0xf]  ;;  %v9734_v49 = vor.u32 %v7878_v15, %v7236_v37  ;;  %4037 = vmatpush.bf16.msrb.mxu2 %v9731_v35  ;;  %v7458_v35 = vld [vmem:[#allocation5 + $0x19c] sm:$0xf] }
 0x33d   : > { %v7678_v51 = vld [vmem:[#allocation5 + $0x874] sm:$0xf0] }
 0x33e   : > { %v6692_v60 = vld [vmem:[#allocation5 + $0xa58] sm:$0xf]  ;;  %11545 = vst [vmem:[#allocation430_spill] sm:$0xff] %v9734_v49  ;;  %v9737_v61 = vor.u32 %v7678_v51, %v6436_v26  ;;  %4050 = vmatpush.bf16.msrb.mxu3 %v9734_v49 }
 0x33f   : > { %v7742_v18 = vld [vmem:[#allocation5 + $0xa74] sm:$0xf0] }
 0x340   : > { %v6948_v32 = vld [vmem:[#allocation5 + $0xc58] sm:$0xf]  ;;  %11546 = vst [vmem:[#allocation431_spill] sm:$0xff] %v9737_v61  ;;  %v9741_v55 = vor.u32 %v7742_v18, %v6692_v60  ;;  %4012 = vmatpush.bf16.msrb.mxu0 %v9737_v61  ;;  %v5862_v18 = vld [vmem:[#allocation5 + $0x3f8] sm:$0xf0]  ;;  %v9760_v61 = vor.u32 %v7466_v24, %v5606_v31 }
 0x341   : > { %v7806_v54 = vld [vmem:[#allocation5 + $0xc74] sm:$0xf0]  ;;  %v7650_v24 = vld [vmem:[#allocation5 + $0x79c] sm:$0xf] }
 0x342   : > { %v7204_v4 = vld [vmem:[#allocation5 + $0xe58] sm:$0xf]  ;;  %11547 = vst [vmem:[#allocation432_spill] sm:$0xff] %v9741_v55  ;;  %v9743_v52 = vor.u32 %v7806_v54, %v6948_v32  ;;  %v7594_v32 = vld [vmem:[#allocation5 + $0x5dc] sm:$0xf]  ;;  %4025 = vmatpush.bf16.msrb.mxu1 %v9741_v55 }
 0x343   : > { %v7870_v40 = vld [vmem:[#allocation5 + $0xe74] sm:$0xf0]  ;;  %v6118_v54 = vld [vmem:[#allocation5 + $0x5f8] sm:$0xf0]  ;;  %11554 = vst [vmem:[#allocation439_spill] sm:$0xff] %v9760_v61 }
 0x344   : > { %v6404_v53 = vld [vmem:[#allocation5 + $0x818] sm:$0xf]  ;;  %11548 = vst [vmem:[#allocation433_spill] sm:$0xff] %v9743_v52  ;;  %v9746_v63 = vor.u32 %v7870_v40, %v7204_v4  ;;  %4038 = vmatpush.bf16.msrb.mxu2 %v9743_v52  ;;  %v7658_v40 = vld [vmem:[#allocation5 + $0x7dc] sm:$0xf] }
 0x345   : > { %v7670_v59 = vld [vmem:[#allocation5 + $0x834] sm:$0xf0]  ;;  %v5574_v55 = vld [vmem:[#allocation5 + $0x1b8] sm:$0xf0] }
 0x346   : > { %v6660_v15 = vld [vmem:[#allocation5 + $0xa18] sm:$0xf]  ;;  %11549 = vst [vmem:[#allocation434_spill] sm:$0xff] %v9746_v63  ;;  %v9749_v60 = vor.u32 %v7670_v59, %v6404_v53  ;;  %4051 = vmatpush.bf16.msrb.mxu3 %v9746_v63  ;;  %v9762_v53 = vor.u32 %v7530_v28, %v5862_v18  ;;  %v9764_v59 = vor.u32 %v7594_v32, %v6118_v54  ;;  %v7450_v18 = vld [vmem:[#allocation5 + $0x15c] sm:$0xf] }
 0x347   : > { %v7734_v37 = vld [vmem:[#allocation5 + $0xa34] sm:$0xf0]  ;;  %v9773_v28 = vor.u32 %v7458_v35, %v5574_v55  ;;  %v5542_v32 = vld [vmem:[#allocation5 + $0x178] sm:$0xf0] }
 0x348   : > { %v6916_v48 = vld [vmem:[#allocation5 + $0xc18] sm:$0xf]  ;;  %11550 = vst [vmem:[#allocation435_spill] sm:$0xff] %v9749_v60  ;;  %v9753_v43 = vor.u32 %v7734_v37, %v6660_v15  ;;  %4013 = vmatpush.bf16.msrb.mxu0 %v9749_v60  ;;  %v9767_v15 = vor.u32 %v7658_v40, %v6374_v27  ;;  %v5830_v37 = vld [vmem:[#allocation5 + $0x3b8] sm:$0xf0] }
 0x349   : > { %v7798_v26 = vld [vmem:[#allocation5 + $0xc34] sm:$0xf0]  ;;  %11555 = vst [vmem:[#allocation440_spill] sm:$0xff] %v9762_v53  ;;  %v9777_v31 = vor.u32 %v7522_v41, %v5830_v37  ;;  %v7514_v54 = vld [vmem:[#allocation5 + $0x35c] sm:$0xf] }
 0x34a   : > { %v7172_v51 = vld [vmem:[#allocation5 + $0xe18] sm:$0xf]  ;;  %11551 = vst [vmem:[#allocation436_spill] sm:$0xff] %v9753_v43  ;;  %v9755_v4 = vor.u32 %v7798_v26, %v6916_v48  ;;  %v7586_v48 = vld [vmem:[#allocation5 + $0x59c] sm:$0xf]  ;;  %4026 = vmatpush.bf16.msrb.mxu1 %v9753_v43 }
 0x34b   : > { %v7862_v36 = vld [vmem:[#allocation5 + $0xe34] sm:$0xf0]  ;;  %11556 = vst [vmem:[#allocation441_spill] sm:$0xff] %v9764_v59  ;;  %v6086_v26 = vld [vmem:[#allocation5 + $0x5b8] sm:$0xf0]  ;;  %4014 = vmatmul.bf16.vlgmr.msrb.gmra.mxu0 %v8543_v22 }
 0x34c   : > { %11552 = vst [vmem:[#allocation437_spill] sm:$0xff] %v9755_v4  ;;  %v9758_v49 = vor.u32 %v7862_v36, %v7172_v51  ;;  %4039 = vmatpush.bf16.msrb.mxu2 %v9755_v4  ;;  %v6342_v36 = vld [vmem:[#allocation5 + $0x7b8] sm:$0xf0]  ;;  %4058 = vmatpush.bf16.msra.mxu0 %v9760_v61  ;;  %v9779_v51 = vor.u32 %v7586_v48, %v6086_v26 }
 0x34d   : > { %11557 = vst [vmem:[#allocation442_spill] sm:$0xff] %v9767_v15  ;;  %v9782_v40 = vor.u32 %v7650_v24, %v6342_v36  ;;  %v5798_v27 = vld [vmem:[#allocation5 + $0x378] sm:$0xf0]  ;;  %v9788_v48 = vor.u32 %v7450_v18, %v5542_v32  ;;  %4027 = vmatmul.bf16.vlgmr.msrb.gmra.mxu1 %v8551_v13 }
 0x34e   : > { %11553 = vst [vmem:[#allocation438_spill] sm:$0xff] %v9758_v49  ;;  %4052 = vmatpush.bf16.msrb.mxu3 %v9758_v49  ;;  %4071 = vmatpush.bf16.msra.mxu1 %v9762_v53  ;;  %v7578_v35 = vld [vmem:[#allocation5 + $0x55c] sm:$0xf]  ;;  %v9793_v26 = vor.u32 %v7514_v54, %v5798_v27  ;;  %v3807_v54 = vpop.f32.mrf.mxu0 }
 0x34f   : > { %11558 = vst [vmem:[#allocation443_spill] sm:$0xff] %v9773_v28  ;;  %4040 = vmatmul.bf16.vlgmr.msrb.gmra.mxu2 %v8539_v47  ;;  %v6054_v55 = vld [vmem:[#allocation5 + $0x578] sm:$0xf0] }
 0x350   : > { %4084 = vmatpush.bf16.msra.mxu2 %v9764_v59  ;;  %11559 = vst [vmem:[#allocation444_spill] sm:$0xff] %v9777_v31  ;;  %v7642_v41 = vld [vmem:[#allocation5 + $0x75c] sm:$0xf]  ;;  %4059 = vmatpush.bf16.msra.mxu0 %v9773_v28  ;;  %v9795_v24 = vor.u32 %v7578_v35, %v6054_v55 }
 0x351   : > { %11560 = vst [vmem:[#allocation445_spill] sm:$0xff] %v9779_v51  ;;  %4053 = vmatmul.bf16.vlgmr.msrb.gmra.mxu3 %v8545_v42  ;;  %v6310_v37 = vld [vmem:[#allocation5 + $0x778] sm:$0xf0] }
 0x352   : > { %4097 = vmatpush.bf16.msra.mxu3 %v9767_v15  ;;  %11561 = vst [vmem:[#allocation446_spill] sm:$0xff] %v9782_v40  ;;  %4072 = vmatpush.bf16.msra.mxu1 %v9777_v31  ;;  %v7442_v36 = vld [vmem:[#allocation5 + $0x11c] sm:$0xf]  ;;  %v9798_v53 = vor.u32 %v7642_v41, %v6310_v37 }
 0x353   : > { %11562 = vst [vmem:[#allocation447_spill] sm:$0xff] %v9788_v48  ;;  %v5510_v15 = vld [vmem:[#allocation5 + $0x138] sm:$0xf0] }
 0x354   : > { %4085 = vmatpush.bf16.msra.mxu2 %v9779_v51  ;;  %11563 = vst [vmem:[#allocation448_spill] sm:$0xff] %v9793_v26  ;;  %v7506_v59 = vld [vmem:[#allocation5 + $0x31c] sm:$0xf]  ;;  %4060 = vmatpush.bf16.msra.mxu0 %v9788_v48  ;;  %v9801_v31 = vor.u32 %v7442_v36, %v5510_v15  ;;  %v3820_v51 = vpop.f32.mrf.mxu1 }
 0x355   : > { %11564 = vst [vmem:[#allocation449_spill] sm:$0xff] %v9795_v24  ;;  %v5766_v28 = vld [vmem:[#allocation5 + $0x338] sm:$0xf0] }
 0x356   : > { %4098 = vmatpush.bf16.msra.mxu3 %v9782_v40  ;;  %11565 = vst [vmem:[#allocation450_spill] sm:$0xff] %v9798_v53  ;;  %v7570_v18 = vld [vmem:[#allocation5 + $0x51c] sm:$0xf]  ;;  %4073 = vmatpush.bf16.msra.mxu1 %v9793_v26  ;;  %v9805_v27 = vor.u32 %v7506_v59, %v5766_v28  ;;  %v3808_v40 = vadd.f32 %v3807_v54, %v9725_v11 }
 0x357   : > { %v6022_v32 = vld [vmem:[#allocation5 + $0x538] sm:$0xf0]  ;;  %11566 = vst [vmem:[#allocation451_spill] sm:$0xff] %v9801_v31 }
 0x358   : > { %v7634_v61 = vld [vmem:[#allocation5 + $0x71c] sm:$0xf]  ;;  %4086 = vmatpush.bf16.msra.mxu2 %v9795_v24  ;;  %11567 = vst [vmem:[#allocation452_spill] sm:$0xff] %v9805_v27  ;;  %v9807_v35 = vor.u32 %v7570_v18, %v6022_v32  ;;  %v3821_v24 = vadd.f32 %v3820_v51, %v3808_v40  ;;  %4061 = vmatpush.bf16.msra.mxu0 %v9801_v31  ;;  %v3833_v32 = vpop.f32.mrf.mxu2  ;;  %v3846_v31 = vpop.f32.mrf.mxu3 }
 0x359   : > { %v6278_v49 = vld [vmem:[#allocation5 + $0x738] sm:$0xf0] }
 0x35a   : > { %11568 = vst [vmem:[#allocation453_spill] sm:$0xff] %v9807_v35  ;;  %v7434_v55 = vld [vmem:[#allocation5 + $0xdc] sm:$0xf]  ;;  %4099 = vmatpush.bf16.msra.mxu3 %v9798_v53  ;;  %v9811_v48 = vor.u32 %v7634_v61, %v6278_v49  ;;  %4074 = vmatpush.bf16.msra.mxu1 %v9805_v27 }
 0x35b   : > { %v5478_v41 = vld [vmem:[#allocation5 + $0xf8] sm:$0xf0] }
 0x35c   : > { %v7498_v37 = vld [vmem:[#allocation5 + $0x2dc] sm:$0xf]  ;;  %11569 = vst [vmem:[#allocation454_spill] sm:$0xff] %v9811_v48  ;;  %v9814_v59 = vor.u32 %v7434_v55, %v5478_v41  ;;  %4087 = vmatpush.bf16.msra.mxu2 %v9807_v35  ;;  %v3834_v41 = vadd.f32 %v3833_v32, %v3821_v24 }
 0x35d   : > { %v5734_v15 = vld [vmem:[#allocation5 + $0x2f8] sm:$0xf0] }
 0x35e   : > { %v7562_v36 = vld [vmem:[#allocation5 + $0x4dc] sm:$0xf]  ;;  %11570 = vst [vmem:[#allocation455_spill] sm:$0xff] %v9814_v59  ;;  %v9818_v11 = vor.u32 %v7498_v37, %v5734_v15  ;;  %4100 = vmatpush.bf16.msra.mxu3 %v9811_v48  ;;  %4062 = vmatpush.bf16.msra.mxu0 %v9814_v59  ;;  %v3809_v15 = vpop.f32.mrf.mxu0  ;;  %v3822_v48 = vpop.f32.mrf.mxu1 }
 0x35f   : > { %v5990_v4 = vld [vmem:[#allocation5 + $0x4f8] sm:$0xf0] }
 0x360   : > { %v7626_v26 = vld [vmem:[#allocation5 + $0x6dc] sm:$0xf]  ;;  %11571 = vst [vmem:[#allocation456_spill] sm:$0xff] %v9818_v11  ;;  %v9820_v28 = vor.u32 %v7562_v36, %v5990_v4  ;;  %v9828_v4 = vadd.f32 %v3846_v31, %v3834_v41  ;;  %4075 = vmatpush.bf16.msra.mxu1 %v9818_v11  ;;  %v3848_v35 = vpop.f32.mrf.mxu3 }
 0x361   : > { %v6246_v43 = vld [vmem:[#allocation5 + $0x6f8] sm:$0xf0] }
 0x362   : > { %11572 = vst [vmem:[#allocation457_spill] sm:$0xff] %v9820_v28  ;;  %v7426_v49 = vld [vmem:[#allocation5 + $0x9c] sm:$0xf]  ;;  %v9823_v54 = vor.u32 %v7626_v26, %v6246_v43  ;;  %4088 = vmatpush.bf16.msra.mxu2 %v9820_v28 }
 0x363   : > { %v5446_v61 = vld [vmem:[#allocation5 + $0xb8] sm:$0xf0] }
 0x364   : > { %v7490_v18 = vld [vmem:[#allocation5 + $0x29c] sm:$0xf]  ;;  %11573 = vst [vmem:[#allocation458_spill] sm:$0xff] %v9823_v54  ;;  %v9826_v37 = vor.u32 %v7426_v49, %v5446_v61  ;;  %4101 = vmatpush.bf16.msra.mxu3 %v9823_v54  ;;  %v3835_v54 = vpop.f32.mrf.mxu2 }
 0x365   : > { %v5702_v51 = vld [vmem:[#allocation5 + $0x2b8] sm:$0xf0] }
 0x366   : > { %v7554_v40 = vld [vmem:[#allocation5 + $0x49c] sm:$0xf]  ;;  %11574 = vst [vmem:[#allocation459_spill] sm:$0xff] %v9826_v37  ;;  %v9832_v43 = vor.u32 %v7490_v18, %v5702_v51  ;;  %4063 = vmatpush.bf16.msra.mxu0 %v9826_v37 }
 0x367   : > { %v5958_v55 = vld [vmem:[#allocation5 + $0x4b8] sm:$0xf0] }
 0x368   : > { %v7618_v27 = vld [vmem:[#allocation5 + $0x69c] sm:$0xf]  ;;  %11575 = vst [vmem:[#allocation460_spill] sm:$0xff] %v9832_v43  ;;  %v9834_v26 = vor.u32 %v7554_v40, %v5958_v55  ;;  %4076 = vmatpush.bf16.msra.mxu1 %v9832_v43 }
 0x369   : > { %v6214_v53 = vld [vmem:[#allocation5 + $0x6b8] sm:$0xf0] }
 0x36a   : > { %11576 = vst [vmem:[#allocation461_spill] sm:$0xff] %v9834_v26  ;;  %v7418_v36 = vld [vmem:[#allocation5 + $0x5c] sm:$0xf]  ;;  %v9837_v59 = vor.u32 %v7618_v27, %v6214_v53  ;;  %4089 = vmatpush.bf16.msra.mxu2 %v9834_v26 }
 0x36b   : > { %v5414_v24 = vld [vmem:[#allocation5 + $0x78] sm:$0xf0] }
 0x36c   : > { %v7482_v32 = vld [vmem:[#allocation5 + $0x25c] sm:$0xf]  ;;  %11577 = vst [vmem:[#allocation462_spill] sm:$0xff] %v9837_v59  ;;  %v9840_v28 = vor.u32 %v7418_v36, %v5414_v24  ;;  %4102 = vmatpush.bf16.msra.mxu3 %v9837_v59 }
 0x36d   : > { %v5670_v49 = vld [vmem:[#allocation5 + $0x278] sm:$0xf0] }
 0x36e   : > { %v7546_v31 = vld [vmem:[#allocation5 + $0x45c] sm:$0xf]  ;;  %11578 = vst [vmem:[#allocation463_spill] sm:$0xff] %v9840_v28  ;;  %v9844_v48 = vor.u32 %v7482_v32, %v5670_v49  ;;  %4064 = vmatpush.bf16.msra.mxu0 %v9840_v28 }
 0x36f   : > { %v5926_v61 = vld [vmem:[#allocation5 + $0x478] sm:$0xf0] }
 0x370   : > { %v7610_v41 = vld [vmem:[#allocation5 + $0x65c] sm:$0xf]  ;;  %11579 = vst [vmem:[#allocation464_spill] sm:$0xff] %v9844_v48  ;;  %v9846_v40 = vor.u32 %v7546_v31, %v5926_v61  ;;  %4077 = vmatpush.bf16.msra.mxu1 %v9844_v48 }
 0x371   : > { %v6182_v15 = vld [vmem:[#allocation5 + $0x678] sm:$0xf0] }
 0x372   : > { %v7410_v18 = vld [vmem:[#allocation5 + $0x1c] sm:$0xf]  ;;  %v9849_v11 = vor.u32 %v7610_v41, %v6182_v15  ;;  %4090 = vmatpush.bf16.msra.mxu2 %v9846_v40 }
 0x373   : > { %v5382_v51 = vld [vmem:[#allocation5 + $0x38] sm:$0xf0] }
 0x374   : > { %v7474_v53 = vld [vmem:[#allocation5 + $0x21c] sm:$0xf]  ;;  %v9852_v32 = vor.u32 %v7410_v18, %v5382_v51  ;;  %4103 = vmatpush.bf16.msra.mxu3 %v9849_v11 }
 0x375   : > { %v5638_v27 = vld [vmem:[#allocation5 + $0x238] sm:$0xf0] }
 0x376   : > { %v7538_v55 = vld [vmem:[#allocation5 + $0x41c] sm:$0xf]  ;;  %v9856_v54 = vor.u32 %v7474_v53, %v5638_v27  ;;  %4065 = vmatpush.bf16.msra.mxu0 %v9852_v32 }
 0x377   : > { %v5894_v36 = vld [vmem:[#allocation5 + $0x438] sm:$0xf0] }
 0x378   : > { %v7602_v24 = vld [vmem:[#allocation5 + $0x61c] sm:$0xf]  ;;  %v9858_v41 = vor.u32 %v7538_v55, %v5894_v36  ;;  %4078 = vmatpush.bf16.msra.mxu1 %v9856_v54 }
 0x379   : > { %v6150_v37 = vld [vmem:[#allocation5 + $0x638] sm:$0xf0]  ;;  %4066 = vmatmul.bf16.vlgmr.msra.gmra.mxu0 %v8467_v19 }
 0x37a   : > { %v7722_v60 = vld [vmem:[#allocation5 + $0x9dc] sm:$0xf]  ;;  %v9861_v59 = vor.u32 %v7602_v24, %v6150_v37  ;;  %4091 = vmatpush.bf16.msra.mxu2 %v9858_v41 }
 0x37b   : > { %v6630_v43 = vld [vmem:[#allocation5 + $0x9f8] sm:$0xf0]  ;;  %4079 = vmatmul.bf16.vlgmr.msra.gmra.mxu1 %v8469_v30 }
 0x37c   : > { %v7786_v63 = vld [vmem:[#allocation5 + $0xbdc] sm:$0xf]  ;;  %11580 = vst [vmem:[#allocation465_spill] sm:$0xff] %v9861_v59  ;;  %v9863_v28 = vor.u32 %v7722_v60, %v6630_v43  ;;  %4104 = vmatpush.bf16.msra.mxu3 %v9861_v59 }
 0x37d   : > { %v6886_v49 = vld [vmem:[#allocation5 + $0xbf8] sm:$0xf0]  ;;  %4092 = vmatmul.bf16.vlgmr.msra.gmra.mxu2 %v8455_v39 }
 0x37e   : > { %v7850_v31 = vld [vmem:[#allocation5 + $0xddc] sm:$0xf]  ;;  %11581 = vst [vmem:[#allocation466_spill] sm:$0xff] %v9863_v28  ;;  %v9865_v18 = vor.u32 %v7786_v63, %v6886_v49  ;;  %4110 = vmatpush.bf16.msrb.mxu0 %v9863_v28 }
 0x37f   : > { %v7142_v61 = vld [vmem:[#allocation5 + $0xdf8] sm:$0xf0]  ;;  %4105 = vmatmul.bf16.vlgmr.msra.gmra.mxu3 %v8457_v1 }
 0x380   : > { %v7914_v15 = vld [vmem:[#allocation5 + $0xfdc] sm:$0xf]  ;;  %v9867_v51 = vor.u32 %v7850_v31, %v7142_v61  ;;  %4123 = vmatpush.bf16.msrb.mxu1 %v9865_v18 }
 0x381   : > { %v7398_v35 = vld [vmem:[#allocation5 + $0xff8] sm:$0xf0] }
 0x382   : > { %11582 = vst [vmem:[#allocation467_spill] sm:$0xff] %v9867_v51  ;;  %v7714_v26 = vld [vmem:[#allocation5 + $0x99c] sm:$0xf]  ;;  %v9870_v53 = vor.u32 %v7914_v15, %v7398_v35  ;;  %4136 = vmatpush.bf16.msrb.mxu2 %v9867_v51 }
 0x383   : > { %v6598_v48 = vld [vmem:[#allocation5 + $0x9b8] sm:$0xf0] }
 0x384   : > { %v7778_v52 = vld [vmem:[#allocation5 + $0xb9c] sm:$0xf]  ;;  %11583 = vst [vmem:[#allocation468_spill] sm:$0xff] %v9870_v53  ;;  %v9876_v63 = vor.u32 %v7714_v26, %v6598_v48  ;;  %4149 = vmatpush.bf16.msrb.mxu3 %v9870_v53 }
 0x385   : > { %v6854_v27 = vld [vmem:[#allocation5 + $0xbb8] sm:$0xf0] }
 0x386   : > { %v7842_v55 = vld [vmem:[#allocation5 + $0xd9c] sm:$0xf]  ;;  %11584 = vst [vmem:[#allocation469_spill] sm:$0xff] %v9876_v63  ;;  %v9880_v43 = vor.u32 %v7778_v52, %v6854_v27  ;;  %4111 = vmatpush.bf16.msrb.mxu0 %v9876_v63 }
 0x387   : > { %v7110_v36 = vld [vmem:[#allocation5 + $0xdb8] sm:$0xf0] }
 0x388   : > { %v7906_v60 = vld [vmem:[#allocation5 + $0xf9c] sm:$0xf]  ;;  %11585 = vst [vmem:[#allocation470_spill] sm:$0xff] %v9880_v43  ;;  %v9882_v24 = vor.u32 %v7842_v55, %v7110_v36  ;;  %4124 = vmatpush.bf16.msrb.mxu1 %v9880_v43 }
 0x389   : > { %v7366_v37 = vld [vmem:[#allocation5 + $0xfb8] sm:$0xf0] }
 0x38a   : > { %11586 = vst [vmem:[#allocation471_spill] sm:$0xff] %v9882_v24  ;;  %v7706_v49 = vld [vmem:[#allocation5 + $0x95c] sm:$0xf]  ;;  %v9885_v15 = vor.u32 %v7906_v60, %v7366_v37  ;;  %4137 = vmatpush.bf16.msrb.mxu2 %v9882_v24 }
 0x38b   : > { %v6566_v31 = vld [vmem:[#allocation5 + $0x978] sm:$0xf0] }
 0x38c   : > { %v7770_v61 = vld [vmem:[#allocation5 + $0xb5c] sm:$0xf]  ;;  %11587 = vst [vmem:[#allocation472_spill] sm:$0xff] %v9885_v15  ;;  %v9891_v52 = vor.u32 %v7706_v49, %v6566_v31  ;;  %4150 = vmatpush.bf16.msrb.mxu3 %v9885_v15  ;;  %v3872_v15 = vpop.f32.mrf.mxu1 }
 0x38d   : > { %v6822_v35 = vld [vmem:[#allocation5 + $0xb78] sm:$0xf0] }
 0x38e   : > { %v7834_v59 = vld [vmem:[#allocation5 + $0xd5c] sm:$0xf]  ;;  %11588 = vst [vmem:[#allocation473_spill] sm:$0xff] %v9891_v52  ;;  %v9896_v27 = vor.u32 %v7770_v61, %v6822_v35  ;;  %4112 = vmatpush.bf16.msrb.mxu0 %v9891_v52  ;;  %v3859_v61 = vpop.f32.mrf.mxu0 }
 0x38f   : > { %v7078_v28 = vld [vmem:[#allocation5 + $0xd78] sm:$0xf0]  ;;  %v3873_v63 = vadd.f32 %v3872_v15, %v3859_v61 }
 0x390   : > { %v7898_v26 = vld [vmem:[#allocation5 + $0xf5c] sm:$0xf]  ;;  %11589 = vst [vmem:[#allocation474_spill] sm:$0xff] %v9896_v27  ;;  %v9898_v55 = vor.u32 %v7834_v59, %v7078_v28  ;;  %4125 = vmatpush.bf16.msrb.mxu1 %v9896_v27 }
 0x391   : > { %v7334_v48 = vld [vmem:[#allocation5 + $0xf78] sm:$0xf0] }
 0x392   : > { %11590 = vst [vmem:[#allocation475_spill] sm:$0xff] %v9898_v55  ;;  %v7698_v39 = vld [vmem:[#allocation5 + $0x91c] sm:$0xf]  ;;  %v9901_v1 = vor.u32 %v7898_v26, %v7334_v48  ;;  %4138 = vmatpush.bf16.msrb.mxu2 %v9898_v55  ;;  %v3898_v55 = vpop.f32.mrf.mxu3 }
 0x393   : > { %v6534_v36 = vld [vmem:[#allocation5 + $0x938] sm:$0xf0] }
 0x394   : > { %v7762_v60 = vld [vmem:[#allocation5 + $0xb1c] sm:$0xf]  ;;  %11591 = vst [vmem:[#allocation476_spill] sm:$0xff] %v9901_v1  ;;  %v9904_v43 = vor.u32 %v7698_v39, %v6534_v36  ;;  %4151 = vmatpush.bf16.msrb.mxu3 %v9901_v1  ;;  %v3885_v1 = vpop.f32.mrf.mxu2 }
 0x395   : > { %v6790_v19 = vld [vmem:[#allocation5 + $0xb38] sm:$0xf0] }
 0x396   : > { %v7826_v37 = vld [vmem:[#allocation5 + $0xd1c] sm:$0xf]  ;;  %11592 = vst [vmem:[#allocation477_spill] sm:$0xff] %v9904_v43  ;;  %v9908_v59 = vor.u32 %v7762_v60, %v6790_v19  ;;  %4113 = vmatpush.bf16.msrb.mxu0 %v9904_v43 }
 0x397   : > { %v7046_v49 = vld [vmem:[#allocation5 + $0xd38] sm:$0xf0] }
 0x398   : > { %v7890_v31 = vld [vmem:[#allocation5 + $0xf1c] sm:$0xf]  ;;  %11593 = vst [vmem:[#allocation478_spill] sm:$0xff] %v9908_v59  ;;  %v9910_v28 = vor.u32 %v7826_v37, %v7046_v49  ;;  %4126 = vmatpush.bf16.msrb.mxu1 %v9908_v59 }
 0x399   : > { %v7302_v30 = vld [vmem:[#allocation5 + $0xf38] sm:$0xf0] }
 0x39a   : > { %v7690_v35 = vld [vmem:[#allocation5 + $0x8dc] sm:$0xf]  ;;  %v9913_v24 = vor.u32 %v7890_v31, %v7302_v30  ;;  %4139 = vmatpush.bf16.msrb.mxu2 %v9910_v28 }
 0x39b   : > { %v6502_v26 = vld [vmem:[#allocation5 + $0x8f8] sm:$0xf0] }
 0x39c   : > { %v7754_v48 = vld [vmem:[#allocation5 + $0xadc] sm:$0xf]  ;;  %11594 = vst [vmem:[#allocation479_spill] sm:$0xff] %v9913_v24  ;;  %v9916_v60 = vor.u32 %v7690_v35, %v6502_v26  ;;  %4152 = vmatpush.bf16.msrb.mxu3 %v9913_v24  ;;  %v3886_v26 = vadd.f32 %v3885_v1, %v3873_v63  ;;  %v3874_v24 = vpop.f32.mrf.mxu1 }
 0x39d   : > { %v6758_v52 = vld [vmem:[#allocation5 + $0xaf8] sm:$0xf0] }
 0x39e   : > { %v7818_v39 = vld [vmem:[#allocation5 + $0xcdc] sm:$0xf]  ;;  %11595 = vst [vmem:[#allocation480_spill] sm:$0xff] %v9916_v60  ;;  %v9920_v19 = vor.u32 %v7754_v48, %v6758_v52  ;;  %4114 = vmatpush.bf16.msrb.mxu0 %v9916_v60  ;;  %v9930_v48 = vadd.f32 %v3898_v55, %v3886_v26 }
 0x39f   : > { %v7014_v36 = vld [vmem:[#allocation5 + $0xcf8] sm:$0xf0] }
 0x3a0   : > { %v7882_v53 = vld [vmem:[#allocation5 + $0xedc] sm:$0xf]  ;;  %11596 = vst [vmem:[#allocation481_spill] sm:$0xff] %v9920_v19  ;;  %v9922_v37 = vor.u32 %v7818_v39, %v7014_v36  ;;  %v3861_v39 = vpop.f32.mrf.mxu0  ;;  %4127 = vmatpush.bf16.msrb.mxu1 %v9920_v19 }
 0x3a1   : > { %v7270_v27 = vld [vmem:[#allocation5 + $0xef8] sm:$0xf0] }
 0x3a2   : > { %11597 = vst [vmem:[#allocation482_spill] sm:$0xff] %v9922_v37  ;;  %v7682_v49 = vld [vmem:[#allocation5 + $0x89c] sm:$0xf]  ;;  %v9925_v15 = vor.u32 %v7882_v53, %v7270_v27  ;;  %4140 = vmatpush.bf16.msrb.mxu2 %v9922_v37 }
 0x3a3   : > { %v6470_v31 = vld [vmem:[#allocation5 + $0x8b8] sm:$0xf0] }
 0x3a4   : > { %v7746_v30 = vld [vmem:[#allocation5 + $0xa9c] sm:$0xf]  ;;  %11598 = vst [vmem:[#allocation483_spill] sm:$0xff] %v9925_v15  ;;  %v9928_v52 = vor.u32 %v7682_v49, %v6470_v31  ;;  %4153 = vmatpush.bf16.msrb.mxu3 %v9925_v15 }
 0x3a5   : > { %v6726_v61 = vld [vmem:[#allocation5 + $0xab8] sm:$0xf0] }
 0x3a6   : > { %v7810_v43 = vld [vmem:[#allocation5 + $0xc9c] sm:$0xf]  ;;  %11599 = vst [vmem:[#allocation484_spill] sm:$0xff] %v9928_v52  ;;  %v9934_v53 = vor.u32 %v7746_v30, %v6726_v61  ;;  %4115 = vmatpush.bf16.msrb.mxu0 %v9928_v52  ;;  %v3887_v61 = vpop.f32.mrf.mxu2 }
 0x3a7   : > { %v6982_v35 = vld [vmem:[#allocation5 + $0xcb8] sm:$0xf0] }
 0x3a8   : > { %v7874_v59 = vld [vmem:[#allocation5 + $0xe9c] sm:$0xf]  ;;  %11600 = vst [vmem:[#allocation485_spill] sm:$0xff] %v9934_v53  ;;  %v9936_v27 = vor.u32 %v7810_v43, %v6982_v35  ;;  %4128 = vmatpush.bf16.msrb.mxu1 %v9934_v53 }
 0x3a9   : > { %v7238_v51 = vld [vmem:[#allocation5 + $0xeb8] sm:$0xf0] }
 0x3aa   : > { %v7674_v36 = vld [vmem:[#allocation5 + $0x85c] sm:$0xf]  ;;  %v9939_v60 = vor.u32 %v7874_v59, %v7238_v51  ;;  %4141 = vmatpush.bf16.msrb.mxu2 %v9936_v27 }
 0x3ab   : > { %v6438_v63 = vld [vmem:[#allocation5 + $0x878] sm:$0xf0] }
 0x3ac   : > { %v7738_v1 = vld [vmem:[#allocation5 + $0xa5c] sm:$0xf]  ;;  %v9942_v37 = vor.u32 %v7674_v36, %v6438_v63  ;;  %4154 = vmatpush.bf16.msrb.mxu3 %v9939_v60  ;;  %v3900_v63 = vpop.f32.mrf.mxu3 }
 0x3ad   : > { %v6694_v49 = vld [vmem:[#allocation5 + $0xa78] sm:$0xf0] }
 0x3ae   : > { %v7802_v55 = vld [vmem:[#allocation5 + $0xc5c] sm:$0xf]  ;;  %v9946_v43 = vor.u32 %v7738_v1, %v6694_v49  ;;  %4116 = vmatpush.bf16.msrb.mxu0 %v9942_v37 }
 0x3af   : > { %v6950_v31 = vld [vmem:[#allocation5 + $0xc78] sm:$0xf0] }
 0x3b0   : > { %v7866_v26 = vld [vmem:[#allocation5 + $0xe5c] sm:$0xf]  ;;  %v9948_v24 = vor.u32 %v7802_v55, %v6950_v31  ;;  %4129 = vmatpush.bf16.msrb.mxu1 %v9946_v43 }
 0x3b1   : > { %v7206_v39 = vld [vmem:[#allocation5 + $0xe78] sm:$0xf0] }
 0x3b2   : > { %v7666_v30 = vld [vmem:[#allocation5 + $0x81c] sm:$0xf]  ;;  %v9951_v35 = vor.u32 %v7866_v26, %v7206_v39  ;;  %4142 = vmatpush.bf16.msrb.mxu2 %v9948_v24  ;;  %v11616_v26 = vld [vmem:[#allocation26_spill] sm:$0xff]  ;;  %v11617_v39 = vld [vmem:[#allocation28_spill] sm:$0xff] }
 0x3b3   : > { %v6406_v51 = vld [vmem:[#allocation5 + $0x838] sm:$0xf0] }
 0x3b4   : > { %v7730_v59 = vld [vmem:[#allocation5 + $0xa1c] sm:$0xf]  ;;  %v9954_v1 = vor.u32 %v7666_v30, %v6406_v51  ;;  %4155 = vmatpush.bf16.msrb.mxu3 %v9951_v35 }
 0x3b5   : > { %v6662_v15 = vld [vmem:[#allocation5 + $0xa38] sm:$0xf0] }
 0x3b6   : > { %v7794_v52 = vld [vmem:[#allocation5 + $0xc1c] sm:$0xf]  ;;  %v9958_v49 = vor.u32 %v7730_v59, %v6662_v15  ;;  %4117 = vmatpush.bf16.msrb.mxu0 %v9954_v1  ;;  %v11612_v15 = vld [vmem:[#allocation22_spill] sm:$0xff] }
 0x3b7   : > { %v6918_v36 = vld [vmem:[#allocation5 + $0xc38] sm:$0xf0]  ;;  %v11619_v59 = vld [vmem:[#allocation30_spill] sm:$0xff] }
 0x3b8   : > { %v7858_v19 = vld [vmem:[#allocation5 + $0xe1c] sm:$0xf]  ;;  %v9960_v55 = vor.u32 %v7794_v52, %v6918_v36  ;;  %4130 = vmatpush.bf16.msrb.mxu1 %v9958_v49  ;;  %v11613_v52 = vld [vmem:[#allocation23_spill] sm:$0xff] }
 0x3b9   : > { %v7174_v53 = vld [vmem:[#allocation5 + $0xe38] sm:$0xf0]  ;;  %4118 = vmatmul.bf16.vlgmr.msrb.gmra.mxu0 %v8543_v22  ;;  %v11608_v22 = vld [vmem:[#allocation18_spill] sm:$0xff]  ;;  %v11620_v36 = vld [vmem:[#allocation31_spill] sm:$0xff] }
 0x3ba   : > { %v9963_v31 = vor.u32 %v7858_v19, %v7174_v53  ;;  %4143 = vmatpush.bf16.msrb.mxu2 %v9960_v55  ;;  %4190 = vmatpush.bf16.msra.mxu0 %v8306_v3  ;;  %v3911_v3 = vpop.f32.mrf.mxu0  ;;  %v11611_v19 = vld [vmem:[#allocation21_spill] sm:$0xff] }
 0x3bb   : > { %4131 = vmatmul.bf16.vlgmr.msrb.gmra.mxu1 %v8551_v13  ;;  %v11610_v13 = vld [vmem:[#allocation20_spill] sm:$0xff]  ;;  %v11615_v53 = vld [vmem:[#allocation25_spill] sm:$0xff] }
 0x3bc   : > { %4156 = vmatpush.bf16.msrb.mxu3 %v9963_v31  ;;  %4203 = vmatpush.bf16.msra.mxu1 %v8308_v7  ;;  %v3912_v7 = vadd.f32 %v3911_v3, %v9930_v48  ;;  %v11614_v48 = vld [vmem:[#allocation24_spill] sm:$0xff]  ;;  %v11618_v51 = vld [vmem:[#allocation29_spill] sm:$0xff] }
 0x3bd   : > { %4144 = vmatmul.bf16.vlgmr.msrb.gmra.mxu2 %v8539_v47  ;;  %v11621_v3 = vld [vmem:[#allocation32_spill] sm:$0xff] }
 0x3be   : > { %4216 = vmatpush.bf16.msra.mxu2 %v8310_v8  ;;  %4191 = vmatpush.bf16.msra.mxu0 %v8317_v16  ;;  %v3924_v8 = vpop.f32.mrf.mxu1  ;;  %v3937_v16 = vpop.f32.mrf.mxu2 }
 0x3bf   : > { %4157 = vmatmul.bf16.vlgmr.msrb.gmra.mxu3 %v8545_v42  ;;  %v11609_v42 = vld [vmem:[#allocation19_spill] sm:$0xff] }
 0x3c0   : > { %4229 = vmatpush.bf16.msra.mxu3 %v8313_v12  ;;  %4204 = vmatpush.bf16.msra.mxu1 %v8319_v17  ;;  %v3925_v12 = vadd.f32 %v3924_v8, %v3912_v7  ;;  %v11622_v7 = vld [vmem:[#allocation33_spill] sm:$0xff]  ;;  %v11623_v8 = vld [vmem:[#allocation34_spill] sm:$0xff] }
 0x3c2   : > { %4217 = vmatpush.bf16.msra.mxu2 %v8322_v21  ;;  %4192 = vmatpush.bf16.msra.mxu0 %v8327_v29  ;;  %v3938_v17 = vadd.f32 %v3937_v16, %v3925_v12  ;;  %v3950_v21 = vpop.f32.mrf.mxu3  ;;  %v3913_v29 = vpop.f32.mrf.mxu0  ;;  %v11624_v16 = vld [vmem:[#allocation35_spill] sm:$0xff] }
 0x3c3   : > { %v11625_v29 = vld [vmem:[#allocation36_spill] sm:$0xff] }
 0x3c4   : > { %4230 = vmatpush.bf16.msra.mxu3 %v8324_v25  ;;  %4205 = vmatpush.bf16.msra.mxu1 %v8331_v33  ;;  %v9991_v25 = vadd.f32 %v3950_v21, %v3938_v17 }
 0x3c6   : > { %4218 = vmatpush.bf16.msra.mxu2 %v8333_v34  ;;  %4193 = vmatpush.bf16.msra.mxu0 %v8339_v44  ;;  %v3926_v33 = vpop.f32.mrf.mxu1  ;;  %v3939_v34 = vpop.f32.mrf.mxu2  ;;  %v4166_v44 = vunpack.c.l.b16 %v8442_v20 }
 0x3c8   : > { %4231 = vmatpush.bf16.msra.mxu3 %v8336_v38  ;;  %4206 = vmatpush.bf16.msra.mxu1 %v8343_v45  ;;  %v11601_v45 = vld [vmem:[#allocation12_spill] sm:$0xff] }
 0x3ca   : > { %4219 = vmatpush.bf16.msra.mxu2 %v8345_v46  ;;  %4194 = vmatpush.bf16.msra.mxu0 %v8351_v56  ;;  %v3952_v38 = vpop.f32.mrf.mxu3  ;;  %v11602_v46 = vld [vmem:[#allocation13_spill] sm:$0xff]  ;;  %v3963_v30 = vpop.f32.mrf.mxu0 }
 0x3cb   : > { %v11626_v38 = vld [vmem:[#allocation37_spill] sm:$0xff] }
 0x3cc   : > { %4232 = vmatpush.bf16.msra.mxu3 %v8348_v50  ;;  %4207 = vmatpush.bf16.msra.mxu1 %v8355_v57  ;;  %v11603_v50 = vld [vmem:[#allocation27_spill] sm:$0xff]  ;;  %v4167_v57 = vunpack.c.h.b16 %v8442_v20 }
 0x3cd   : > { %v4168_v56 = vunpack.c.l.b16 %v11603_v50 }
 0x3ce   : > { %4220 = vmatpush.bf16.msra.mxu2 %v8357_v58  ;;  %4195 = vmatpush.bf16.msra.mxu0 %v8363_v5  ;;  %v11604_v58 = vld [vmem:[#allocation14_spill] sm:$0xff]  ;;  %v11605_v5 = vld [vmem:[#allocation15_spill] sm:$0xff]  ;;  %v10015_v47 = vpack.c.b16 %v4167_v57, %v4167_v57  ;;  %v3976_v61 = vpop.f32.mrf.mxu1  ;;  %v3989_v12 = vpop.f32.mrf.mxu2 }
 0x3cf   : > { %v3977_v63 = vadd.f32 %v3976_v61, %v3963_v30  ;;  %v11631_v57 = vld [vmem:[#allocation42_spill] sm:$0xff] }
 0x3d0   : > { %4233 = vmatpush.bf16.msra.mxu3 %v8360_v62  ;;  %4208 = vmatpush.bf16.msra.mxu1 %v8367_v6  ;;  %v4169_v62 = vunpack.c.h.b16 %v11603_v50  ;;  %v10009_v6 = vpack.c.b16 %v4166_v44, %v4166_v44  ;;  %v11627_v44 = vld [vmem:[#allocation38_spill] sm:$0xff]  ;;  %v11629_v50 = vld [vmem:[#allocation40_spill] sm:$0xff] }
 0x3d1   : > { %v3990_v17 = vadd.f32 %v3989_v12, %v3977_v63  ;;  %v11644_v63 = vld [vmem:[#allocation55_spill] sm:$0xff] }
 0x3d2   : > { %4221 = vmatpush.bf16.msra.mxu2 %v8369_v9  ;;  %4196 = vmatpush.bf16.msra.mxu0 %v8375_v23  ;;  %v11606_v9 = vld [vmem:[#allocation16_spill] sm:$0xff]  ;;  %v10013_v23 = vpack.c.b16 %v4168_v56, %v4168_v56  ;;  %v10019_v20 = vpack.c.b16 %v4169_v62, %v4169_v62  ;;  %v4002_v21 = vpop.f32.mrf.mxu3  ;;  %v3965_v34 = vpop.f32.mrf.mxu0  ;;  %v11630_v56 = vld [vmem:[#allocation41_spill] sm:$0xff]  ;;  %v11648_v12 = vld [vmem:[#allocation59_spill] sm:$0xff] }
 0x3d3   : > { %v4003_v33 = vadd.f32 %v4002_v21, %v3990_v17  ;;  %v11632_v62 = vld [vmem:[#allocation44_spill] sm:$0xff]  ;;  %v11650_v21 = vld [vmem:[#allocation61_spill] sm:$0xff] }
 0x3d4   : > { %4234 = vmatpush.bf16.msra.mxu3 %v8372_v14  ;;  %4209 = vmatpush.bf16.msra.mxu1 %v11601_v45  ;;  %v11607_v14 = vld [vmem:[#allocation17_spill] sm:$0xff] }
 0x3d6   : > { %4222 = vmatpush.bf16.msra.mxu2 %v11602_v46  ;;  %4197 = vmatpush.bf16.msra.mxu0 %v11605_v5  ;;  %v3978_v45 = vpop.f32.mrf.mxu1  ;;  %v11628_v46 = vld [vmem:[#allocation39_spill] sm:$0xff] }
 0x3d8   : > { %4235 = vmatpush.bf16.msra.mxu3 %v11604_v58  ;;  %4210 = vmatpush.bf16.msra.mxu1 %v11606_v9  ;;  %v3991_v58 = vpop.f32.mrf.mxu2  ;;  %v11633_v9 = vld [vmem:[#allocation45_spill] sm:$0xff] }
 0x3d9   : > { %4198 = vmatmul.bf16.vlgmr.msra.gmra.mxu0 %v10009_v6  ;;  %v11656_v58 = vld [vmem:[#allocation67_spill] sm:$0xff] }
 0x3da   : > { %4223 = vmatpush.bf16.msra.mxu2 %v11607_v14  ;;  %4242 = vmatpush.bf16.msrb.mxu0 %v11609_v42  ;;  %v4004_v5 = vpop.f32.mrf.mxu3  ;;  %v4170_v14 = vunpack.c.l.b16 %v11633_v9  ;;  %v11635_v42 = vld [vmem:[#allocation47_spill] sm:$0xff]  ;;  %v4015_v17 = vpop.f32.mrf.mxu0 }
 0x3db   : > { %4211 = vmatmul.bf16.vlgmr.msra.gmra.mxu1 %v10015_v47  ;;  %v4016_v34 = vadd.f32 %v4015_v17, %v4003_v33  ;;  %v11674_v17 = vld [vmem:[#allocation85_spill] sm:$0xff] }
 0x3dc   : > { %4236 = vmatpush.bf16.msra.mxu3 %v11608_v22  ;;  %4255 = vmatpush.bf16.msrb.mxu1 %v11610_v13  ;;  %v11634_v22 = vld [vmem:[#allocation46_spill] sm:$0xff]  ;;  %v11636_v13 = vld [vmem:[#allocation43_spill] sm:$0xff] }
 0x3dd   : > { %4224 = vmatmul.bf16.vlgmr.msra.gmra.mxu2 %v10013_v23 }
 0x3de   : > { %4268 = vmatpush.bf16.msrb.mxu2 %v11611_v19  ;;  %4243 = vmatpush.bf16.msrb.mxu0 %v11613_v52  ;;  %v4172_v19 = vunpack.c.l.b16 %v11636_v13  ;;  %v4173_v52 = vunpack.c.h.b16 %v11636_v13 }
 0x3df   : > { %4237 = vmatmul.bf16.vlgmr.msra.gmra.mxu3 %v10019_v20 }
 0x3e0   : > { %4281 = vmatpush.bf16.msrb.mxu3 %v11612_v15  ;;  %4256 = vmatpush.bf16.msrb.mxu1 %v11614_v48  ;;  %v4171_v15 = vunpack.c.h.b16 %v11633_v9  ;;  %v11637_v48 = vld [vmem:[#allocation48_spill] sm:$0xff]  ;;  %v10067_v61 = vpack.c.b16 %v4173_v52, %v4173_v52  ;;  %v11662_v52 = vld [vmem:[#allocation73_spill] sm:$0xff] }
 0x3e1   : > { %v11657_v9 = vld [vmem:[#allocation68_spill] sm:$0xff] }
 0x3e2   : > { %4269 = vmatpush.bf16.msrb.mxu2 %v11615_v53  ;;  %4244 = vmatpush.bf16.msrb.mxu0 %v11617_v39  ;;  %v10057_v53 = vpack.c.b16 %v4170_v14, %v4170_v14  ;;  %v10061_v39 = vpack.c.b16 %v4172_v19, %v4172_v19  ;;  %v10063_v30 = vpack.c.b16 %v4171_v15, %v4171_v15  ;;  %v4054_v5 = vpop.f32.mrf.mxu3  ;;  %v4017_v33 = vpop.f32.mrf.mxu0  ;;  %v11660_v19 = vld [vmem:[#allocation71_spill] sm:$0xff]  ;;  %v11661_v15 = vld [vmem:[#allocation72_spill] sm:$0xff] }
 0x3e3   : > { %v11686_v33 = vld [vmem:[#allocation97_spill] sm:$0xff] }
 0x3e4   : > { %4282 = vmatpush.bf16.msrb.mxu3 %v11616_v26  ;;  %4257 = vmatpush.bf16.msrb.mxu1 %v11618_v51  ;;  %v11638_v26 = vld [vmem:[#allocation49_spill] sm:$0xff]  ;;  %v11640_v51 = vld [vmem:[#allocation51_spill] sm:$0xff] }
 0x3e6   : > { %4270 = vmatpush.bf16.msrb.mxu2 %v11619_v59  ;;  %4245 = vmatpush.bf16.msrb.mxu0 %v11621_v3  ;;  %v11641_v59 = vld [vmem:[#allocation52_spill] sm:$0xff] }
 0x3e7   : > { %v11645_v3 = vld [vmem:[#allocation56_spill] sm:$0xff] }
 0x3e8   : > { %4283 = vmatpush.bf16.msrb.mxu3 %v11620_v36  ;;  %4258 = vmatpush.bf16.msrb.mxu1 %v11622_v7  ;;  %v11643_v36 = vld [vmem:[#allocation54_spill] sm:$0xff]  ;;  %v11646_v7 = vld [vmem:[#allocation57_spill] sm:$0xff] }
 0x3ea   : > { %4271 = vmatpush.bf16.msrb.mxu2 %v11623_v8  ;;  %4246 = vmatpush.bf16.msrb.mxu0 %v11625_v29  ;;  %v11647_v8 = vld [vmem:[#allocation58_spill] sm:$0xff] }
 0x3eb   : > { %v11651_v29 = vld [vmem:[#allocation62_spill] sm:$0xff] }
 0x3ec   : > { %4284 = vmatpush.bf16.msrb.mxu3 %v11624_v16  ;;  %4259 = vmatpush.bf16.msrb.mxu1 %v11626_v38  ;;  %v11649_v16 = vld [vmem:[#allocation60_spill] sm:$0xff]  ;;  %v4028_v38 = vpop.f32.mrf.mxu1 }
 0x3ed   : > { %v4029_v45 = vadd.f32 %v4028_v38, %v4016_v34  ;;  %v11677_v34 = vld [vmem:[#allocation88_spill] sm:$0xff]  ;;  %v11678_v38 = vld [vmem:[#allocation89_spill] sm:$0xff] }
 0x3ee   : > { %4272 = vmatpush.bf16.msrb.mxu2 %v11627_v44  ;;  %4247 = vmatpush.bf16.msrb.mxu0 %v11629_v50  ;;  %v11652_v44 = vld [vmem:[#allocation63_spill] sm:$0xff]  ;;  %v11654_v50 = vld [vmem:[#allocation65_spill] sm:$0xff] }
 0x3f0   : > { %4285 = vmatpush.bf16.msrb.mxu3 %v11628_v46  ;;  %4260 = vmatpush.bf16.msrb.mxu1 %v11630_v56  ;;  %v11653_v46 = vld [vmem:[#allocation64_spill] sm:$0xff]  ;;  %v11655_v56 = vld [vmem:[#allocation66_spill] sm:$0xff] }
 0x3f2   : > { %4273 = vmatpush.bf16.msrb.mxu2 %v11631_v57  ;;  %4248 = vmatpush.bf16.msrb.mxu0 %v8503_v10  ;;  %v11639_v10 = vld [vmem:[#allocation50_spill] sm:$0xff]  ;;  %v4041_v57 = vpop.f32.mrf.mxu2 }
 0x3f4   : > { %4286 = vmatpush.bf16.msrb.mxu3 %v11632_v62  ;;  %4261 = vmatpush.bf16.msrb.mxu1 %v11634_v22  ;;  %v4042_v62 = vadd.f32 %v4041_v57, %v4029_v45  ;;  %v11658_v22 = vld [vmem:[#allocation69_spill] sm:$0xff]  ;;  %v4030_v13 = vpop.f32.mrf.mxu1  ;;  %v11680_v45 = vld [vmem:[#allocation91_spill] sm:$0xff]  ;;  %v11683_v57 = vld [vmem:[#allocation94_spill] sm:$0xff] }
 0x3f5   : > { %v11688_v13 = vld [vmem:[#allocation99_spill] sm:$0xff] }
 0x3f6   : > { %4274 = vmatpush.bf16.msrb.mxu2 %v11635_v42  ;;  %4249 = vmatpush.bf16.msrb.mxu0 %v11637_v48  ;;  %v10089_v14 = vadd.f32 %v4054_v5, %v4042_v62  ;;  %v11659_v42 = vld [vmem:[#allocation70_spill] sm:$0xff]  ;;  %v11684_v62 = vld [vmem:[#allocation95_spill] sm:$0xff] }
 0x3f7   : > { %v11663_v48 = vld [vmem:[#allocation74_spill] sm:$0xff] }
 0x3f8   : > { %4287 = vmatpush.bf16.msrb.mxu3 %v8515_v0  ;;  %4262 = vmatpush.bf16.msrb.mxu1 %v11638_v26  ;;  %v11642_v0 = vld [vmem:[#allocation53_spill] sm:$0xff] }
 0x3f9   : > { %4250 = vmatmul.bf16.vlgmr.msrb.gmra.mxu0 %v10057_v53 }
 0x3fa   : > { %4275 = vmatpush.bf16.msrb.mxu2 %v11639_v10  ;;  %4294 = vmatpush.bf16.msra.mxu0 %v11641_v59  ;;  %v4043_v26 = vpop.f32.mrf.mxu2  ;;  %v11664_v10 = vld [vmem:[#allocation75_spill] sm:$0xff]  ;;  %v11665_v59 = vld [vmem:[#allocation76_spill] sm:$0xff] }
 0x3fb   : > { %4263 = vmatmul.bf16.vlgmr.msrb.gmra.mxu1 %v10063_v30 }
 0x3fc   : > { %4288 = vmatpush.bf16.msrb.mxu3 %v11640_v51  ;;  %4307 = vmatpush.bf16.msra.mxu1 %v11642_v0  ;;  %v4056_v51 = vpop.f32.mrf.mxu3  ;;  %v11666_v0 = vld [vmem:[#allocation77_spill] sm:$0xff] }
 0x3fd   : > { %4276 = vmatmul.bf16.vlgmr.msrb.gmra.mxu2 %v10061_v39  ;;  %v11691_v51 = vld [vmem:[#allocation102_spill] sm:$0xff] }
 0x3fe   : > { %4320 = vmatpush.bf16.msra.mxu2 %v11643_v36  ;;  %4295 = vmatpush.bf16.msra.mxu0 %v11645_v3  ;;  %v11667_v36 = vld [vmem:[#allocation78_spill] sm:$0xff]  ;;  %v11669_v3 = vld [vmem:[#allocation80_spill] sm:$0xff] }
 0x3ff   : > { %4289 = vmatmul.bf16.vlgmr.msrb.gmra.mxu3 %v10067_v61 }
 0x400   : > { %4333 = vmatpush.bf16.msra.mxu3 %v11644_v63  ;;  %4308 = vmatpush.bf16.msra.mxu1 %v11646_v7  ;;  %v11668_v63 = vld [vmem:[#allocation79_spill] sm:$0xff]  ;;  %v11670_v7 = vld [vmem:[#allocation81_spill] sm:$0xff] }
 0x402   : > { %4321 = vmatpush.bf16.msra.mxu2 %v11647_v8  ;;  %4296 = vmatpush.bf16.msra.mxu0 %v11649_v16  ;;  %v11671_v8 = vld [vmem:[#allocation82_spill] sm:$0xff]  ;;  %v11673_v16 = vld [vmem:[#allocation84_spill] sm:$0xff] }
 0x404   : > { %4334 = vmatpush.bf16.msra.mxu3 %v11648_v12  ;;  %4309 = vmatpush.bf16.msra.mxu1 %v11650_v21  ;;  %v11672_v12 = vld [vmem:[#allocation83_spill] sm:$0xff]  ;;  %v11675_v21 = vld [vmem:[#allocation86_spill] sm:$0xff] }
 0x406   : > { %4322 = vmatpush.bf16.msra.mxu2 %v11651_v29  ;;  %4297 = vmatpush.bf16.msra.mxu0 %v11653_v46  ;;  %v11676_v29 = vld [vmem:[#allocation87_spill] sm:$0xff]  ;;  %v11681_v46 = vld [vmem:[#allocation92_spill] sm:$0xff] }
 0x408   : > { %4335 = vmatpush.bf16.msra.mxu3 %v11652_v44  ;;  %4310 = vmatpush.bf16.msra.mxu1 %v11654_v50  ;;  %v11679_v44 = vld [vmem:[#allocation90_spill] sm:$0xff]  ;;  %v4067_v50 = vpop.f32.mrf.mxu0 }
 0x40a   : > { %4323 = vmatpush.bf16.msra.mxu2 %v11655_v56  ;;  %4298 = vmatpush.bf16.msra.mxu0 %v11657_v9  ;;  %v11682_v56 = vld [vmem:[#allocation93_spill] sm:$0xff]  ;;  %v11685_v9 = vld [vmem:[#allocation96_spill] sm:$0xff] }
 0x40c   : > { %4336 = vmatpush.bf16.msra.mxu3 %v11656_v58  ;;  %4311 = vmatpush.bf16.msra.mxu1 %v11658_v22  ;;  %v4080_v58 = vpop.f32.mrf.mxu1  ;;  %v11687_v22 = vld [vmem:[#allocation98_spill] sm:$0xff] }
 0x40d   : > { %v4081_v5 = vadd.f32 %v4080_v58, %v4067_v50  ;;  %v11706_v50 = vld [vmem:[#allocation117_spill] sm:$0xff]  ;;  %v11709_v58 = vld [vmem:[#allocation120_spill] sm:$0xff] }
 0x40e   : > { %4324 = vmatpush.bf16.msra.mxu2 %v11659_v42  ;;  %4299 = vmatpush.bf16.msra.mxu0 %v11661_v15  ;;  %v4093_v42 = vpop.f32.mrf.mxu2  ;;  %v4106_v15 = vpop.f32.mrf.mxu3 }
 0x410   : > { %4337 = vmatpush.bf16.msra.mxu3 %v11660_v19  ;;  %4312 = vmatpush.bf16.msra.mxu1 %v11662_v52  ;;  %v4094_v19 = vadd.f32 %v4093_v42, %v4081_v5  ;;  %v11689_v52 = vld [vmem:[#allocation100_spill] sm:$0xff]  ;;  %v4069_v26 = vpop.f32.mrf.mxu0  ;;  %v11711_v5 = vld [vmem:[#allocation122_spill] sm:$0xff]  ;;  %v11714_v42 = vld [vmem:[#allocation125_spill] sm:$0xff] }
 0x412   : > { %4325 = vmatpush.bf16.msra.mxu2 %v11663_v48  ;;  %4300 = vmatpush.bf16.msra.mxu0 %v11665_v59  ;;  %v4107_v48 = vadd.f32 %v4106_v15, %v4094_v19 }
 0x414   : > { %4338 = vmatpush.bf16.msra.mxu3 %v11664_v10  ;;  %4313 = vmatpush.bf16.msra.mxu1 %v11666_v0  ;;  %v11690_v10 = vld [vmem:[#allocation101_spill] sm:$0xff]  ;;  %v4082_v59 = vpop.f32.mrf.mxu1  ;;  %v11692_v0 = vld [vmem:[#allocation103_spill] sm:$0xff] }
 0x415   : > { %v11719_v59 = vld [vmem:[#allocation130_spill] sm:$0xff] }
 0x416   : > { %4326 = vmatpush.bf16.msra.mxu2 %v11667_v36  ;;  %4301 = vmatpush.bf16.msra.mxu0 %v11669_v3  ;;  %v11693_v36 = vld [vmem:[#allocation104_spill] sm:$0xff]  ;;  %v11695_v3 = vld [vmem:[#allocation106_spill] sm:$0xff] }
 0x418   : > { %4339 = vmatpush.bf16.msra.mxu3 %v11668_v63  ;;  %4314 = vmatpush.bf16.msra.mxu1 %v11670_v7  ;;  %v11694_v63 = vld [vmem:[#allocation105_spill] sm:$0xff]  ;;  %v4095_v7 = vpop.f32.mrf.mxu2 }
 0x419   : > { %4302 = vmatmul.bf16.vlgmr.msra.gmra.mxu0 %v10009_v6  ;;  %v11721_v7 = vld [vmem:[#allocation132_spill] sm:$0xff] }
 0x41a   : > { %4327 = vmatpush.bf16.msra.mxu2 %v11671_v8  ;;  %4346 = vmatpush.bf16.msrb.mxu0 %v11673_v16  ;;  %v11696_v8 = vld [vmem:[#allocation107_spill] sm:$0xff]  ;;  %v11697_v16 = vld [vmem:[#allocation108_spill] sm:$0xff] }
 0x41b   : > { %4315 = vmatmul.bf16.vlgmr.msra.gmra.mxu1 %v10015_v47 }
 0x41c   : > { %4340 = vmatpush.bf16.msra.mxu3 %v11672_v12  ;;  %4359 = vmatpush.bf16.msrb.mxu1 %v11674_v17  ;;  %v4108_v12 = vpop.f32.mrf.mxu3  ;;  %v11698_v17 = vld [vmem:[#allocation109_spill] sm:$0xff] }
 0x41d   : > { %4328 = vmatmul.bf16.vlgmr.msra.gmra.mxu2 %v10013_v23  ;;  %v11722_v12 = vld [vmem:[#allocation133_spill] sm:$0xff] }
 0x41e   : > { %4372 = vmatpush.bf16.msrb.mxu2 %v11675_v21  ;;  %4347 = vmatpush.bf16.msrb.mxu0 %v11677_v34  ;;  %v11699_v21 = vld [vmem:[#allocation110_spill] sm:$0xff]  ;;  %v11701_v34 = vld [vmem:[#allocation112_spill] sm:$0xff] }
 0x41f   : > { %4341 = vmatmul.bf16.vlgmr.msra.gmra.mxu3 %v10019_v20 }
 0x420   : > { %4385 = vmatpush.bf16.msrb.mxu3 %v11676_v29  ;;  %4360 = vmatpush.bf16.msrb.mxu1 %v11678_v38  ;;  %v11700_v29 = vld [vmem:[#allocation111_spill] sm:$0xff]  ;;  %v11702_v38 = vld [vmem:[#allocation113_spill] sm:$0xff] }
 0x422   : > { %4373 = vmatpush.bf16.msrb.mxu2 %v11679_v44  ;;  %4348 = vmatpush.bf16.msrb.mxu0 %v11681_v46  ;;  %v11703_v44 = vld [vmem:[#allocation114_spill] sm:$0xff]  ;;  %v11705_v46 = vld [vmem:[#allocation116_spill] sm:$0xff] }
 0x424   : > { %4386 = vmatpush.bf16.msrb.mxu3 %v11680_v45  ;;  %4361 = vmatpush.bf16.msrb.mxu1 %v11682_v56  ;;  %v11704_v45 = vld [vmem:[#allocation115_spill] sm:$0xff]  ;;  %v11707_v56 = vld [vmem:[#allocation118_spill] sm:$0xff] }
 0x426   : > { %4374 = vmatpush.bf16.msrb.mxu2 %v11683_v57  ;;  %4349 = vmatpush.bf16.msrb.mxu0 %v11685_v9  ;;  %v11708_v57 = vld [vmem:[#allocation119_spill] sm:$0xff] }
 0x427   : > { %v11712_v9 = vld [vmem:[#allocation123_spill] sm:$0xff] }
 0x428   : > { %4387 = vmatpush.bf16.msrb.mxu3 %v11684_v62  ;;  %4362 = vmatpush.bf16.msrb.mxu1 %v11686_v33  ;;  %v11710_v62 = vld [vmem:[#allocation121_spill] sm:$0xff]  ;;  %v11713_v33 = vld [vmem:[#allocation124_spill] sm:$0xff] }
 0x42a   : > { %4375 = vmatpush.bf16.msrb.mxu2 %v11687_v22  ;;  %4350 = vmatpush.bf16.msrb.mxu0 %v11689_v52  ;;  %v11716_v52 = vld [vmem:[#allocation127_spill] sm:$0xff] }
 0x42c   : > { %4388 = vmatpush.bf16.msrb.mxu3 %v11688_v13  ;;  %4363 = vmatpush.bf16.msrb.mxu1 %v11690_v10  ;;  %v11715_v13 = vld [vmem:[#allocation126_spill] sm:$0xff]  ;;  %v11717_v10 = vld [vmem:[#allocation128_spill] sm:$0xff] }
 0x42e   : > { %4376 = vmatpush.bf16.msrb.mxu2 %v11691_v51  ;;  %4351 = vmatpush.bf16.msrb.mxu0 %v11693_v36  ;;  %v11718_v51 = vld [vmem:[#allocation129_spill] sm:$0xff]  ;;  %v11720_v36 = vld [vmem:[#allocation131_spill] sm:$0xff] }
 0x430   : > { %4389 = vmatpush.bf16.msrb.mxu3 %v11692_v0  ;;  %4364 = vmatpush.bf16.msrb.mxu1 %v11694_v63 }
 0x432   : > { %4377 = vmatpush.bf16.msrb.mxu2 %v11695_v3  ;;  %4352 = vmatpush.bf16.msrb.mxu0 %v11697_v16  ;;  %v11723_v16 = vld [vmem:[#allocation134_spill] sm:$0xff] }
 0x434   : > { %4390 = vmatpush.bf16.msrb.mxu3 %v11696_v8  ;;  %4365 = vmatpush.bf16.msrb.mxu1 %v11698_v17 }
 0x436   : > { %4378 = vmatpush.bf16.msrb.mxu2 %v11699_v21  ;;  %4353 = vmatpush.bf16.msrb.mxu0 %v11701_v34  ;;  %v4119_v22 = vpop.f32.mrf.mxu0  ;;  %v11724_v21 = vld [vmem:[#allocation135_spill] sm:$0xff]  ;;  %v11726_v34 = vld [vmem:[#allocation137_spill] sm:$0xff] }
 0x437   : > { %v4120_v19 = vadd.f32 %v4119_v22, %v4107_v48  ;;  %v11737_v22 = vld [vmem:[#allocation148_spill] sm:$0xff] }
 0x438   : > { %4391 = vmatpush.bf16.msrb.mxu3 %v11700_v29  ;;  %4366 = vmatpush.bf16.msrb.mxu1 %v11702_v38  ;;  %v4132_v15 = vpop.f32.mrf.mxu1  ;;  %v11725_v29 = vld [vmem:[#allocation136_spill] sm:$0xff]  ;;  %v11727_v38 = vld [vmem:[#allocation138_spill] sm:$0xff] }
 0x439   : > { %4354 = vmatmul.bf16.vlgmr.msrb.gmra.mxu0 %v10057_v53  ;;  %v4133_v26 = vadd.f32 %v4132_v15, %v4120_v19  ;;  %v11740_v19 = vld [vmem:[#allocation151_spill] sm:$0xff]  ;;  %v11741_v15 = vld [vmem:[#allocation152_spill] sm:$0xff] }
 0x43a   : > { %4379 = vmatpush.bf16.msrb.mxu2 %v11703_v44  ;;  %4398 = vmatpush.bf16.msra.mxu0 %v11705_v46 }
 0x43b   : > { %4367 = vmatmul.bf16.vlgmr.msrb.gmra.mxu1 %v10063_v30 }
 0x43c   : > { %4392 = vmatpush.bf16.msrb.mxu3 %v11704_v45  ;;  %4411 = vmatpush.bf16.msra.mxu1 %v11706_v50  ;;  %v11728_v45 = vld [vmem:[#allocation139_spill] sm:$0xff]  ;;  %v11729_v50 = vld [vmem:[#allocation140_spill] sm:$0xff] }
 0x43d   : > { %4380 = vmatmul.bf16.vlgmr.msrb.gmra.mxu2 %v10061_v39 }
 0x43e   : > { %4424 = vmatpush.bf16.msra.mxu2 %v11707_v56  ;;  %4399 = vmatpush.bf16.msra.mxu0 %v11709_v58  ;;  %v4121_v48 = vpop.f32.mrf.mxu0  ;;  %v11730_v56 = vld [vmem:[#allocation141_spill] sm:$0xff]  ;;  %v11732_v58 = vld [vmem:[#allocation143_spill] sm:$0xff] }
 0x43f   : > { %4393 = vmatmul.bf16.vlgmr.msrb.gmra.mxu3 %v10067_v61 }
 0x440   : > { %4437 = vmatpush.bf16.msra.mxu3 %v11708_v57  ;;  %4412 = vmatpush.bf16.msra.mxu1 %v11710_v62  ;;  %v4145_v0 = vpop.f32.mrf.mxu2  ;;  %v4134_v17 = vpop.f32.mrf.mxu1  ;;  %v11731_v57 = vld [vmem:[#allocation142_spill] sm:$0xff]  ;;  %v11733_v62 = vld [vmem:[#allocation144_spill] sm:$0xff] }
 0x441   : > { %v4146_v63 = vadd.f32 %v4145_v0, %v4133_v26  ;;  %v11743_v26 = vld [vmem:[#allocation154_spill] sm:$0xff] }
 0x442   : > { %4425 = vmatpush.bf16.msra.mxu2 %v11711_v5  ;;  %4400 = vmatpush.bf16.msra.mxu0 %v11713_v33  ;;  %v4158_v3 = vpop.f32.mrf.mxu3  ;;  %v11734_v5 = vld [vmem:[#allocation145_spill] sm:$0xff]  ;;  %v11736_v33 = vld [vmem:[#allocation147_spill] sm:$0xff]  ;;  %v11751_v17 = vld [vmem:[#allocation162_spill] sm:$0xff] }
 0x443   : > { %v10163_v8 = vadd.f32 %v4158_v3, %v4146_v63  ;;  %v11746_v63 = vld [vmem:[#allocation157_spill] sm:$0xff]  ;;  %v11747_v3 = vld [vmem:[#allocation158_spill] sm:$0xff] }
 0x444   : > { %4438 = vmatpush.bf16.msra.mxu3 %v11712_v9  ;;  %4413 = vmatpush.bf16.msra.mxu1 %v11714_v42  ;;  %v11735_v9 = vld [vmem:[#allocation146_spill] sm:$0xff]  ;;  %v11738_v42 = vld [vmem:[#allocation149_spill] sm:$0xff] }
 0x446   : > { %4426 = vmatpush.bf16.msra.mxu2 %v11715_v13  ;;  %4401 = vmatpush.bf16.msra.mxu0 %v11717_v10  ;;  %v11739_v13 = vld [vmem:[#allocation150_spill] sm:$0xff]  ;;  %v11744_v10 = vld [vmem:[#allocation155_spill] sm:$0xff] }
 0x448   : > { %4439 = vmatpush.bf16.msra.mxu3 %v11716_v52  ;;  %4414 = vmatpush.bf16.msra.mxu1 %v11718_v51  ;;  %v4147_v44 = vpop.f32.mrf.mxu2  ;;  %v11742_v52 = vld [vmem:[#allocation153_spill] sm:$0xff] }
 0x449   : > { %v11753_v44 = vld [vmem:[#allocation164_spill] sm:$0xff] }
 0x44a   : > { %4427 = vmatpush.bf16.msra.mxu2 %v11719_v59  ;;  %4402 = vmatpush.bf16.msra.mxu0 %v11721_v7  ;;  %v4160_v46 = vpop.f32.mrf.mxu3  ;;  %v11745_v59 = vld [vmem:[#allocation156_spill] sm:$0xff]  ;;  %v11748_v7 = vld [vmem:[#allocation159_spill] sm:$0xff] }
 0x44b   : > { %v11754_v46 = vld [vmem:[#allocation165_spill] sm:$0xff] }
 0x44c   : > { %4440 = vmatpush.bf16.msra.mxu3 %v11720_v36  ;;  %4415 = vmatpush.bf16.msra.mxu1 %v11722_v12  ;;  %v11749_v12 = vld [vmem:[#allocation160_spill] sm:$0xff] }
 0x44e   : > { %4428 = vmatpush.bf16.msra.mxu2 %v11723_v16  ;;  %4403 = vmatpush.bf16.msra.mxu0 %v11725_v29  ;;  %v11750_v16 = vld [vmem:[#allocation161_spill] sm:$0xff] }
 0x450   : > { %4441 = vmatpush.bf16.msra.mxu3 %v11724_v21  ;;  %4416 = vmatpush.bf16.msra.mxu1 %v11726_v34  ;;  %v11752_v21 = vld [vmem:[#allocation163_spill] sm:$0xff] }
 0x452   : > { %4429 = vmatpush.bf16.msra.mxu2 %v11727_v38  ;;  %4404 = vmatpush.bf16.msra.mxu0 %v11729_v50  ;;  %v11755_v50 = vld [vmem:[#allocation166_spill] sm:$0xff] }
 0x454   : > { %4442 = vmatpush.bf16.msra.mxu3 %v11728_v45  ;;  %4417 = vmatpush.bf16.msra.mxu1 %v11730_v56 }
 0x456   : > { %4430 = vmatpush.bf16.msra.mxu2 %v11731_v57  ;;  %4405 = vmatpush.bf16.msra.mxu0 %v11733_v62  ;;  %v4199_v51 = vpop.f32.mrf.mxu0  ;;  %v11756_v57 = vld [vmem:[#allocation167_spill] sm:$0xff]  ;;  %v11758_v62 = vld [vmem:[#allocation169_spill] sm:$0xff] }
 0x457   : > { %v4200_v0 = vadd.f32 %v4199_v51, %v9008_v2  ;;  %v11768_v51 = vld [vmem:[#allocation179_spill] sm:$0xff] }
 0x458   : > { %4443 = vmatpush.bf16.msra.mxu3 %v11732_v58  ;;  %4418 = vmatpush.bf16.msra.mxu1 %v11734_v5  ;;  %v4212_v36 = vpop.f32.mrf.mxu1  ;;  %v11757_v58 = vld [vmem:[#allocation168_spill] sm:$0xff]  ;;  %v11759_v5 = vld [vmem:[#allocation170_spill] sm:$0xff] }
 0x459   : > { %4406 = vmatmul.bf16.vlgmr.msra.gmra.mxu0 %v10009_v6  ;;  %v4213_v48 = vadd.f32 %v4212_v36, %v4200_v0  ;;  %v11770_v0 = vld [vmem:[#allocation181_spill] sm:$0xff]  ;;  %v11771_v36 = vld [vmem:[#allocation182_spill] sm:$0xff] }
 0x45a   : > { %4431 = vmatpush.bf16.msra.mxu2 %v11735_v9  ;;  %4450 = vmatpush.bf16.msrb.mxu0 %v11737_v22  ;;  %v11760_v9 = vld [vmem:[#allocation171_spill] sm:$0xff] }
 0x45b   : > { %4419 = vmatmul.bf16.vlgmr.msra.gmra.mxu1 %v10015_v47 }
 0x45c   : > { %4444 = vmatpush.bf16.msra.mxu3 %v11736_v33  ;;  %4463 = vmatpush.bf16.msrb.mxu1 %v11738_v42  ;;  %v11761_v42 = vld [vmem:[#allocation172_spill] sm:$0xff] }
 0x45d   : > { %4432 = vmatmul.bf16.vlgmr.msra.gmra.mxu2 %v10013_v23 }
 0x45e   : > { %4476 = vmatpush.bf16.msrb.mxu2 %v11739_v13  ;;  %4451 = vmatpush.bf16.msrb.mxu0 %v11741_v15  ;;  %v4201_v2 = vpop.f32.mrf.mxu0  ;;  %v11762_v13 = vld [vmem:[#allocation173_spill] sm:$0xff]  ;;  %v11764_v15 = vld [vmem:[#allocation175_spill] sm:$0xff] }
 0x45f   : > { %4445 = vmatmul.bf16.vlgmr.msra.gmra.mxu3 %v10019_v20  ;;  %v11780_v2 = vld [vmem:[#allocation191_spill] sm:$0xff] }
 0x460   : > { %4489 = vmatpush.bf16.msrb.mxu3 %v11740_v19  ;;  %4464 = vmatpush.bf16.msrb.mxu1 %v11742_v52  ;;  %v4225_v29 = vpop.f32.mrf.mxu2  ;;  %v4214_v45 = vpop.f32.mrf.mxu1  ;;  %v11763_v19 = vld [vmem:[#allocation174_spill] sm:$0xff]  ;;  %v11765_v52 = vld [vmem:[#allocation176_spill] sm:$0xff] }
 0x461   : > { %v4226_v34 = vadd.f32 %v4225_v29, %v4213_v48  ;;  %v11775_v48 = vld [vmem:[#allocation186_spill] sm:$0xff]  ;;  %v11781_v45 = vld [vmem:[#allocation192_spill] sm:$0xff] }
 0x462   : > { %4477 = vmatpush.bf16.msrb.mxu2 %v11743_v26  ;;  %4452 = vmatpush.bf16.msrb.mxu0 %v11745_v59  ;;  %v4238_v38 = vpop.f32.mrf.mxu3  ;;  %v11766_v26 = vld [vmem:[#allocation177_spill] sm:$0xff]  ;;  %v11769_v59 = vld [vmem:[#allocation180_spill] sm:$0xff] }
 0x463   : > { %v4239_v56 = vadd.f32 %v4238_v38, %v4226_v34  ;;  %v11778_v34 = vld [vmem:[#allocation189_spill] sm:$0xff]  ;;  %v11779_v38 = vld [vmem:[#allocation190_spill] sm:$0xff] }
 0x464   : > { %4490 = vmatpush.bf16.msrb.mxu3 %v11744_v10  ;;  %4465 = vmatpush.bf16.msrb.mxu1 %v11746_v63  ;;  %v11767_v10 = vld [vmem:[#allocation178_spill] sm:$0xff]  ;;  %v11772_v63 = vld [vmem:[#allocation183_spill] sm:$0xff] }
 0x466   : > { %4478 = vmatpush.bf16.msrb.mxu2 %v11747_v3  ;;  %4453 = vmatpush.bf16.msrb.mxu0 %v11749_v12  ;;  %v11773_v3 = vld [vmem:[#allocation184_spill] sm:$0xff]  ;;  %v11776_v12 = vld [vmem:[#allocation187_spill] sm:$0xff] }
 0x468   : > { %4491 = vmatpush.bf16.msrb.mxu3 %v11748_v7  ;;  %4466 = vmatpush.bf16.msrb.mxu1 %v11750_v16  ;;  %v4227_v33 = vpop.f32.mrf.mxu2  ;;  %v11774_v7 = vld [vmem:[#allocation185_spill] sm:$0xff] }
 0x46a   : > { %4479 = vmatpush.bf16.msrb.mxu2 %v11751_v17  ;;  %4454 = vmatpush.bf16.msrb.mxu0 %v11753_v44  ;;  %v4240_v22 = vpop.f32.mrf.mxu3  ;;  %v11777_v17 = vld [vmem:[#allocation188_spill] sm:$0xff] }
 0x46b   : > { %v11786_v22 = vld [vmem:[#allocation197_spill] sm:$0xff] }
 0x46c   : > { %4492 = vmatpush.bf16.msrb.mxu3 %v11752_v21  ;;  %4467 = vmatpush.bf16.msrb.mxu1 %v11754_v46  ;;  %v11782_v46 = vld [vmem:[#allocation193_spill] sm:$0xff] }
 0x46e   : > { %4480 = vmatpush.bf16.msrb.mxu2 %v11755_v50  ;;  %4455 = vmatpush.bf16.msrb.mxu0 %v11757_v58  ;;  %v11783_v50 = vld [vmem:[#allocation194_spill] sm:$0xff] }
 0x470   : > { %4493 = vmatpush.bf16.msrb.mxu3 %v11756_v57  ;;  %4468 = vmatpush.bf16.msrb.mxu1 %v11758_v62  ;;  %v11784_v57 = vld [vmem:[#allocation195_spill] sm:$0xff] }
 0x472   : > { %4481 = vmatpush.bf16.msrb.mxu2 %v11759_v5  ;;  %4456 = vmatpush.bf16.msrb.mxu0 %v11761_v42  ;;  %v11787_v42 = vld [vmem:[#allocation198_spill] sm:$0xff] }
 0x474   : > { %4494 = vmatpush.bf16.msrb.mxu3 %v11760_v9  ;;  %4469 = vmatpush.bf16.msrb.mxu1 %v11762_v13  ;;  %v11785_v9 = vld [vmem:[#allocation196_spill] sm:$0xff] }
 0x476   : > { %4482 = vmatpush.bf16.msrb.mxu2 %v11763_v19  ;;  %4457 = vmatpush.bf16.msrb.mxu0 %v11765_v52  ;;  %v4251_v16 = vpop.f32.mrf.mxu0  ;;  %v11788_v19 = vld [vmem:[#allocation199_spill] sm:$0xff]  ;;  %v11790_v52 = vld [vmem:[#allocation201_spill] sm:$0xff] }
 0x477   : > { %v4252_v21 = vadd.f32 %v4251_v16, %v4239_v56  ;;  %v11800_v16 = vld [vmem:[#allocation211_spill] sm:$0xff] }
 0x478   : > { %4495 = vmatpush.bf16.msrb.mxu3 %v11764_v15  ;;  %4470 = vmatpush.bf16.msrb.mxu1 %v11766_v26  ;;  %v4264_v29 = vpop.f32.mrf.mxu1  ;;  %v11789_v15 = vld [vmem:[#allocation200_spill] sm:$0xff]  ;;  %v11791_v26 = vld [vmem:[#allocation202_spill] sm:$0xff] }
 0x479   : > { %4458 = vmatmul.bf16.vlgmr.msrb.gmra.mxu0 %v10057_v53  ;;  %v4265_v44 = vadd.f32 %v4264_v29, %v4252_v21  ;;  %v11802_v21 = vld [vmem:[#allocation213_spill] sm:$0xff]  ;;  %v11803_v29 = vld [vmem:[#allocation214_spill] sm:$0xff] }
 0x47a   : > { %4483 = vmatpush.bf16.msrb.mxu2 %v11767_v10  ;;  %4502 = vmatpush.bf16.msra.mxu0 %v11769_v59  ;;  %v11792_v10 = vld [vmem:[#allocation203_spill] sm:$0xff] }
 0x47b   : > { %4471 = vmatmul.bf16.vlgmr.msrb.gmra.mxu1 %v10063_v30 }
 0x47c   : > { %4496 = vmatpush.bf16.msrb.mxu3 %v11768_v51  ;;  %4515 = vmatpush.bf16.msra.mxu1 %v11770_v0  ;;  %v11793_v0 = vld [vmem:[#allocation204_spill] sm:$0xff] }
 0x47d   : > { %4484 = vmatmul.bf16.vlgmr.msrb.gmra.mxu2 %v10061_v39 }
 0x47e   : > { %4528 = vmatpush.bf16.msra.mxu2 %v11771_v36  ;;  %4503 = vmatpush.bf16.msra.mxu0 %v11773_v3  ;;  %v4253_v56 = vpop.f32.mrf.mxu0  ;;  %v11794_v36 = vld [vmem:[#allocation205_spill] sm:$0xff]  ;;  %v11796_v3 = vld [vmem:[#allocation207_spill] sm:$0xff] }
 0x47f   : > { %4497 = vmatmul.bf16.vlgmr.msrb.gmra.mxu3 %v10067_v61  ;;  %v11812_v56 = vld [vmem:[#allocation222_spill] sm:$0xff] }
 0x480   : > { %4541 = vmatpush.bf16.msra.mxu3 %v11772_v63  ;;  %4516 = vmatpush.bf16.msra.mxu1 %v11774_v7  ;;  %v4277_v58 = vpop.f32.mrf.mxu2  ;;  %v4266_v33 = vpop.f32.mrf.mxu1  ;;  %v11795_v63 = vld [vmem:[#allocation206_spill] sm:$0xff]  ;;  %v11797_v7 = vld [vmem:[#allocation208_spill] sm:$0xff] }
 0x481   : > { %v4278_v62 = vadd.f32 %v4277_v58, %v4265_v44  ;;  %v11807_v44 = vld [vmem:[#allocation218_spill] sm:$0xff] }
 0x482   : > { %4529 = vmatpush.bf16.msra.mxu2 %v11775_v48  ;;  %4504 = vmatpush.bf16.msra.mxu0 %v11777_v17  ;;  %v4290_v5 = vpop.f32.mrf.mxu3  ;;  %v11798_v48 = vld [vmem:[#allocation209_spill] sm:$0xff]  ;;  %v11801_v17 = vld [vmem:[#allocation212_spill] sm:$0xff] }
 0x483   : > { %v10240_v13 = vadd.f32 %v4290_v5, %v4278_v62  ;;  %v11811_v5 = vld [vmem:[#allocation221_spill] sm:$0xff] }
 0x484   : > { %4542 = vmatpush.bf16.msra.mxu3 %v11776_v12  ;;  %4517 = vmatpush.bf16.msra.mxu1 %v11778_v34  ;;  %v11799_v12 = vld [vmem:[#allocation210_spill] sm:$0xff]  ;;  %v11804_v34 = vld [vmem:[#allocation215_spill] sm:$0xff] }
 0x486   : > { %4530 = vmatpush.bf16.msra.mxu2 %v11779_v38  ;;  %4505 = vmatpush.bf16.msra.mxu0 %v11781_v45  ;;  %v11805_v38 = vld [vmem:[#allocation216_spill] sm:$0xff]  ;;  %v11808_v45 = vld [vmem:[#allocation219_spill] sm:$0xff] }
 0x488   : > { %4543 = vmatpush.bf16.msra.mxu3 %v11780_v2  ;;  %4518 = vmatpush.bf16.msra.mxu1 %v11782_v46  ;;  %v4279_v51 = vpop.f32.mrf.mxu2  ;;  %v11806_v2 = vld [vmem:[#allocation217_spill] sm:$0xff] }
 0x48a   : > { %4531 = vmatpush.bf16.msra.mxu2 %v11783_v50  ;;  %4506 = vmatpush.bf16.msra.mxu0 %v11785_v9  ;;  %v4292_v59 = vpop.f32.mrf.mxu3  ;;  %v11809_v50 = vld [vmem:[#allocation220_spill] sm:$0xff]  ;;  %v11813_v9 = vld [vmem:[#allocation223_spill] sm:$0xff] }
 0x48b   : > { %v11818_v59 = vld [vmem:[#allocation228_spill] sm:$0xff] }
 0x48c   : > { %4544 = vmatpush.bf16.msra.mxu3 %v11784_v57  ;;  %4519 = vmatpush.bf16.msra.mxu1 %v11786_v22  ;;  %v11810_v57 = vld [vmem:[#allocation265_spill] sm:$0xff]  ;;  %v11814_v22 = vld [vmem:[#allocation224_spill] sm:$0xff] }
 0x48e   : > { %4532 = vmatpush.bf16.msra.mxu2 %v11787_v42  ;;  %4507 = vmatpush.bf16.msra.mxu0 %v11789_v15  ;;  %v11815_v42 = vld [vmem:[#allocation225_spill] sm:$0xff]  ;;  %v11817_v15 = vld [vmem:[#allocation227_spill] sm:$0xff] }
 0x490   : > { %4545 = vmatpush.bf16.msra.mxu3 %v11788_v19  ;;  %4520 = vmatpush.bf16.msra.mxu1 %v11790_v52  ;;  %v11816_v19 = vld [vmem:[#allocation226_spill] sm:$0xff] }
 0x492   : > { %4533 = vmatpush.bf16.msra.mxu2 %v11791_v26  ;;  %4508 = vmatpush.bf16.msra.mxu0 %v11793_v0 }
 0x494   : > { %4546 = vmatpush.bf16.msra.mxu3 %v11792_v10  ;;  %4521 = vmatpush.bf16.msra.mxu1 %v11794_v36  ;;  %v11819_v36 = vld [vmem:[#allocation229_spill] sm:$0xff] }
 0x496   : > { %4534 = vmatpush.bf16.msra.mxu2 %v11795_v63  ;;  %4509 = vmatpush.bf16.msra.mxu0 %v11797_v7  ;;  %v4303_v46 = vpop.f32.mrf.mxu0  ;;  %v11820_v63 = vld [vmem:[#allocation230_spill] sm:$0xff]  ;;  %v11821_v7 = vld [vmem:[#allocation231_spill] sm:$0xff] }
 0x497   : > { %v4304_v58 = vadd.f32 %v4303_v46, %v11810_v57  ;;  %v11831_v46 = vld [vmem:[#allocation241_spill] sm:$0xff]  ;;  %v11833_v57 = vld [vmem:[#allocation243_spill] sm:$0xff] }
 0x498   : > { %4547 = vmatpush.bf16.msra.mxu3 %v11796_v3  ;;  %4522 = vmatpush.bf16.msra.mxu1 %v11798_v48  ;;  %v4316_v62 = vpop.f32.mrf.mxu1  ;;  %v11822_v48 = vld [vmem:[#allocation232_spill] sm:$0xff] }
 0x499   : > { %4510 = vmatmul.bf16.vlgmr.msra.gmra.mxu0 %v10009_v6  ;;  %v4317_v33 = vadd.f32 %v4316_v62, %v4304_v58  ;;  %v11834_v58 = vld [vmem:[#allocation244_spill] sm:$0xff]  ;;  %v11835_v62 = vld [vmem:[#allocation245_spill] sm:$0xff] }
 0x49a   : > { %4535 = vmatpush.bf16.msra.mxu2 %v11799_v12  ;;  %4554 = vmatpush.bf16.msrb.mxu0 %v11801_v17  ;;  %v11823_v12 = vld [vmem:[#allocation233_spill] sm:$0xff]  ;;  %v11825_v17 = vld [vmem:[#allocation235_spill] sm:$0xff] }
 0x49b   : > { %4523 = vmatmul.bf16.vlgmr.msra.gmra.mxu1 %v10015_v47 }
 0x49c   : > { %4548 = vmatpush.bf16.msra.mxu3 %v11800_v16  ;;  %4567 = vmatpush.bf16.msrb.mxu1 %v11802_v21  ;;  %v11824_v16 = vld [vmem:[#allocation234_spill] sm:$0xff] }
 0x49d   : > { %4536 = vmatmul.bf16.vlgmr.msra.gmra.mxu2 %v10013_v23 }
 0x49e   : > { %4580 = vmatpush.bf16.msrb.mxu2 %v11803_v29  ;;  %4555 = vmatpush.bf16.msrb.mxu0 %v11805_v38  ;;  %v4305_v51 = vpop.f32.mrf.mxu0  ;;  %v11827_v38 = vld [vmem:[#allocation237_spill] sm:$0xff] }
 0x49f   : > { %4549 = vmatmul.bf16.vlgmr.msra.gmra.mxu3 %v10019_v20  ;;  %v11844_v51 = vld [vmem:[#allocation254_spill] sm:$0xff] }
 0x4a0   : > { %4593 = vmatpush.bf16.msrb.mxu3 %v11804_v34  ;;  %4568 = vmatpush.bf16.msrb.mxu1 %v11806_v2  ;;  %v4329_v52 = vpop.f32.mrf.mxu2  ;;  %v4318_v0 = vpop.f32.mrf.mxu1  ;;  %v11826_v34 = vld [vmem:[#allocation236_spill] sm:$0xff]  ;;  %v11828_v2 = vld [vmem:[#allocation238_spill] sm:$0xff] }
 0x4a1   : > { %v4330_v26 = vadd.f32 %v4329_v52, %v4317_v33  ;;  %v11839_v33 = vld [vmem:[#allocation249_spill] sm:$0xff] }
 0x4a2   : > { %4581 = vmatpush.bf16.msrb.mxu2 %v11807_v44  ;;  %4556 = vmatpush.bf16.msrb.mxu0 %v11809_v50  ;;  %v4342_v10 = vpop.f32.mrf.mxu3  ;;  %v11829_v44 = vld [vmem:[#allocation239_spill] sm:$0xff]  ;;  %v11832_v50 = vld [vmem:[#allocation242_spill] sm:$0xff] }
 0x4a3   : > { %v4343_v3 = vadd.f32 %v4342_v10, %v4330_v26  ;;  %v11843_v10 = vld [vmem:[#allocation253_spill] sm:$0xff] }
 0x4a4   : > { %4594 = vmatpush.bf16.msrb.mxu3 %v11808_v45  ;;  %4569 = vmatpush.bf16.msrb.mxu1 %v11811_v5  ;;  %v11830_v45 = vld [vmem:[#allocation240_spill] sm:$0xff]  ;;  %v11836_v5 = vld [vmem:[#allocation246_spill] sm:$0xff] }
 0x4a6   : > { %4582 = vmatpush.bf16.msrb.mxu2 %v11812_v56  ;;  %4557 = vmatpush.bf16.msrb.mxu0 %v11814_v22  ;;  %v11837_v56 = vld [vmem:[#allocation247_spill] sm:$0xff]  ;;  %v11840_v22 = vld [vmem:[#allocation250_spill] sm:$0xff] }
 0x4a8   : > { %4595 = vmatpush.bf16.msrb.mxu3 %v11813_v9  ;;  %4570 = vmatpush.bf16.msrb.mxu1 %v11815_v42  ;;  %v4331_v21 = vpop.f32.mrf.mxu2  ;;  %v11838_v9 = vld [vmem:[#allocation248_spill] sm:$0xff]  ;;  %v11841_v42 = vld [vmem:[#allocation251_spill] sm:$0xff] }
 0x4a9   : > { %v11850_v21 = vld [vmem:[#allocation260_spill] sm:$0xff] }
 0x4aa   : > { %4583 = vmatpush.bf16.msrb.mxu2 %v11816_v19  ;;  %4558 = vmatpush.bf16.msrb.mxu0 %v11818_v59  ;;  %v4344_v29 = vpop.f32.mrf.mxu3  ;;  %v11845_v59 = vld [vmem:[#allocation255_spill] sm:$0xff] }
 0x4ac   : > { %4596 = vmatpush.bf16.msrb.mxu3 %v11817_v15  ;;  %4571 = vmatpush.bf16.msrb.mxu1 %v11819_v36  ;;  %v11842_v15 = vld [vmem:[#allocation252_spill] sm:$0xff] }
 0x4ad   : > { %v11846_v36 = vld [vmem:[#allocation256_spill] sm:$0xff] }
 0x4ae   : > { %4584 = vmatpush.bf16.msrb.mxu2 %v11820_v63  ;;  %4559 = vmatpush.bf16.msrb.mxu0 %v11822_v48  ;;  %v11847_v63 = vld [vmem:[#allocation257_spill] sm:$0xff]  ;;  %v11849_v48 = vld [vmem:[#allocation259_spill] sm:$0xff] }
 0x4b0   : > { %4597 = vmatpush.bf16.msrb.mxu3 %v11821_v7  ;;  %4572 = vmatpush.bf16.msrb.mxu1 %v11823_v12  ;;  %v11848_v7 = vld [vmem:[#allocation258_spill] sm:$0xff] }
 0x4b2   : > { %4585 = vmatpush.bf16.msrb.mxu2 %v11824_v16  ;;  %4560 = vmatpush.bf16.msrb.mxu0 %v11826_v34  ;;  %v11851_v34 = vld [vmem:[#allocation261_spill] sm:$0xff] }
 0x4b4   : > { %4598 = vmatpush.bf16.msrb.mxu3 %v11825_v17  ;;  %4573 = vmatpush.bf16.msrb.mxu1 %v11827_v38  ;;  %v11852_v38 = vld [vmem:[#allocation262_spill] sm:$0xff] }
 0x4b6   : > { %4586 = vmatpush.bf16.msrb.mxu2 %v11828_v2  ;;  %4561 = vmatpush.bf16.msrb.mxu0 %v11830_v45  ;;  %v4355_v19 = vpop.f32.mrf.mxu0  ;;  %v11854_v45 = vld [vmem:[#allocation264_spill] sm:$0xff] }
 0x4b7   : > { %v4356_v52 = vadd.f32 %v4355_v19, %v4343_v3  ;;  %v11864_v19 = vld [vmem:[#allocation275_spill] sm:$0xff] }
 0x4b8   : > { %4599 = vmatpush.bf16.msrb.mxu3 %v11829_v44  ;;  %4574 = vmatpush.bf16.msrb.mxu1 %v11831_v46  ;;  %v4368_v26 = vpop.f32.mrf.mxu1  ;;  %v11853_v44 = vld [vmem:[#allocation263_spill] sm:$0xff]  ;;  %v11855_v46 = vld [vmem:[#allocation266_spill] sm:$0xff] }
 0x4b9   : > { %4562 = vmatmul.bf16.vlgmr.msrb.gmra.mxu0 %v10057_v53  ;;  %v4369_v0 = vadd.f32 %v4368_v26, %v4356_v52  ;;  %v11866_v52 = vld [vmem:[#allocation277_spill] sm:$0xff]  ;;  %v11867_v26 = vld [vmem:[#allocation278_spill] sm:$0xff] }
 0x4ba   : > { %4587 = vmatpush.bf16.msrb.mxu2 %v11832_v50  ;;  %4606 = vmatpush.bf16.msra.mxu0 %v11834_v58  ;;  %v11856_v50 = vld [vmem:[#allocation267_spill] sm:$0xff] }
 0x4bb   : > { %4575 = vmatmul.bf16.vlgmr.msrb.gmra.mxu1 %v10063_v30 }
 0x4bc   : > { %4600 = vmatpush.bf16.msrb.mxu3 %v11833_v57  ;;  %4619 = vmatpush.bf16.msra.mxu1 %v11835_v62  ;;  %v11857_v57 = vld [vmem:[#allocation268_spill] sm:$0xff] }
 0x4bd   : > { %4588 = vmatmul.bf16.vlgmr.msrb.gmra.mxu2 %v10061_v39 }
 0x4be   : > { %4632 = vmatpush.bf16.msra.mxu2 %v11836_v5  ;;  %4607 = vmatpush.bf16.msra.mxu0 %v11838_v9  ;;  %v4357_v3 = vpop.f32.mrf.mxu0  ;;  %v11858_v5 = vld [vmem:[#allocation269_spill] sm:$0xff]  ;;  %v11860_v9 = vld [vmem:[#allocation271_spill] sm:$0xff] }
 0x4bf   : > { %4601 = vmatmul.bf16.vlgmr.msrb.gmra.mxu3 %v10067_v61  ;;  %v11877_v3 = vld [vmem:[#allocation288_spill] sm:$0xff] }
 0x4c0   : > { %4645 = vmatpush.bf16.msra.mxu3 %v11837_v56  ;;  %4620 = vmatpush.bf16.msra.mxu1 %v11839_v33  ;;  %v4381_v12 = vpop.f32.mrf.mxu2  ;;  %v4370_v29 = vpop.f32.mrf.mxu1  ;;  %v11859_v56 = vld [vmem:[#allocation270_spill] sm:$0xff]  ;;  %v11861_v33 = vld [vmem:[#allocation272_spill] sm:$0xff] }
 0x4c1   : > { %v4382_v16 = vadd.f32 %v4381_v12, %v4369_v0  ;;  %v11871_v0 = vld [vmem:[#allocation282_spill] sm:$0xff] }
 0x4c2   : > { %4633 = vmatpush.bf16.msra.mxu2 %v11840_v22  ;;  %4608 = vmatpush.bf16.msra.mxu0 %v11842_v15  ;;  %v4394_v17 = vpop.f32.mrf.mxu3  ;;  %v11862_v22 = vld [vmem:[#allocation273_spill] sm:$0xff]  ;;  %v11865_v15 = vld [vmem:[#allocation276_spill] sm:$0xff]  ;;  %v11879_v29 = vld [vmem:[#allocation290_spill] sm:$0xff] }
 0x4c3   : > { %v10315_v2 = vadd.f32 %v4394_v17, %v4382_v16  ;;  %v11875_v16 = vld [vmem:[#allocation286_spill] sm:$0xff]  ;;  %v11876_v17 = vld [vmem:[#allocation287_spill] sm:$0xff] }
 0x4c4   : > { %4646 = vmatpush.bf16.msra.mxu3 %v11841_v42  ;;  %4621 = vmatpush.bf16.msra.mxu1 %v11843_v10  ;;  %v11863_v42 = vld [vmem:[#allocation274_spill] sm:$0xff]  ;;  %v11868_v10 = vld [vmem:[#allocation279_spill] sm:$0xff] }
 0x4c6   : > { %4634 = vmatpush.bf16.msra.mxu2 %v11844_v51  ;;  %4609 = vmatpush.bf16.msra.mxu0 %v11846_v36  ;;  %v11869_v51 = vld [vmem:[#allocation280_spill] sm:$0xff]  ;;  %v11872_v36 = vld [vmem:[#allocation283_spill] sm:$0xff] }
 0x4c8   : > { %4647 = vmatpush.bf16.msra.mxu3 %v11845_v59  ;;  %4622 = vmatpush.bf16.msra.mxu1 %v11847_v63  ;;  %v4383_v58 = vpop.f32.mrf.mxu2  ;;  %v11870_v59 = vld [vmem:[#allocation281_spill] sm:$0xff]  ;;  %v11873_v63 = vld [vmem:[#allocation284_spill] sm:$0xff] }
 0x4c9   : > { %v11883_v58 = vld [vmem:[#allocation294_spill] sm:$0xff] }
 0x4ca   : > { %4635 = vmatpush.bf16.msra.mxu2 %v11848_v7  ;;  %4610 = vmatpush.bf16.msra.mxu0 %v11850_v21  ;;  %v4396_v62 = vpop.f32.mrf.mxu3  ;;  %v11878_v21 = vld [vmem:[#allocation289_spill] sm:$0xff] }
 0x4cb   : > { %v11884_v62 = vld [vmem:[#allocation295_spill] sm:$0xff] }
 0x4cc   : > { %4648 = vmatpush.bf16.msra.mxu3 %v11849_v48  ;;  %4623 = vmatpush.bf16.msra.mxu1 %v11851_v34  ;;  %v11874_v48 = vld [vmem:[#allocation285_spill] sm:$0xff]  ;;  %v11880_v34 = vld [vmem:[#allocation291_spill] sm:$0xff] }
 0x4ce   : > { %4636 = vmatpush.bf16.msra.mxu2 %v11852_v38  ;;  %4611 = vmatpush.bf16.msra.mxu0 %v11854_v45  ;;  %v11881_v38 = vld [vmem:[#allocation292_spill] sm:$0xff] }
 0x4d0   : > { %4649 = vmatpush.bf16.msra.mxu3 %v11853_v44  ;;  %4624 = vmatpush.bf16.msra.mxu1 %v11855_v46 }
 0x4d2   : > { %4637 = vmatpush.bf16.msra.mxu2 %v11856_v50  ;;  %4612 = vmatpush.bf16.msra.mxu0 %v11858_v5  ;;  %v11882_v50 = vld [vmem:[#allocation293_spill] sm:$0xff]  ;;  %v11885_v5 = vld [vmem:[#allocation296_spill] sm:$0xff] }
 0x4d4   : > { %4650 = vmatpush.bf16.msra.mxu3 %v11857_v57  ;;  %4625 = vmatpush.bf16.msra.mxu1 %v11859_v56  ;;  %v11886_v56 = vld [vmem:[#allocation297_spill] sm:$0xff] }
 0x4d6   : > { %4638 = vmatpush.bf16.msra.mxu2 %v11860_v9  ;;  %4613 = vmatpush.bf16.msra.mxu0 %v11862_v22  ;;  %v4407_v7 = vpop.f32.mrf.mxu0  ;;  %v11887_v9 = vld [vmem:[#allocation298_spill] sm:$0xff]  ;;  %v11889_v22 = vld [vmem:[#allocation300_spill] sm:$0xff] }
 0x4d8   : > { %4651 = vmatpush.bf16.msra.mxu3 %v11861_v33  ;;  %4626 = vmatpush.bf16.msra.mxu1 %v11863_v42  ;;  %v4420_v12 = vpop.f32.mrf.mxu1  ;;  %v11888_v33 = vld [vmem:[#allocation299_spill] sm:$0xff] }
 0x4d9   : > { %4614 = vmatmul.bf16.vlgmr.msra.gmra.mxu0 %v10009_v6 }
 0x4da   : > { %4639 = vmatpush.bf16.msra.mxu2 %v11864_v19  ;;  %4658 = vmatpush.bf16.msrb.mxu0 %v11866_v52  ;;  %v11891_v52 = vld [vmem:[#allocation302_spill] sm:$0xff] }
 0x4db   : > { %4627 = vmatmul.bf16.vlgmr.msra.gmra.mxu1 %v10015_v47 }
 0x4dc   : > { %4652 = vmatpush.bf16.msra.mxu3 %v11865_v15  ;;  %4671 = vmatpush.bf16.msrb.mxu1 %v11867_v26  ;;  %v11890_v15 = vld [vmem:[#allocation301_spill] sm:$0xff]  ;;  %v11892_v26 = vld [vmem:[#allocation303_spill] sm:$0xff] }
 0x4dd   : > { %4640 = vmatmul.bf16.vlgmr.msra.gmra.mxu2 %v10013_v23 }
 0x4de   : > { %4684 = vmatpush.bf16.msrb.mxu2 %v11868_v10  ;;  %4659 = vmatpush.bf16.msrb.mxu0 %v11870_v59  ;;  %v4409_v46 = vpop.f32.mrf.mxu0  ;;  %v11893_v10 = vld [vmem:[#allocation330_spill] sm:$0xff]  ;;  %v11894_v59 = vld [vmem:[#allocation304_spill] sm:$0xff] }
 0x4df   : > { %4653 = vmatmul.bf16.vlgmr.msra.gmra.mxu3 %v10019_v20 }
 0x4e0   : > { %4697 = vmatpush.bf16.msrb.mxu3 %v11869_v51  ;;  %4672 = vmatpush.bf16.msrb.mxu1 %v11871_v0  ;;  %v4433_v44 = vpop.f32.mrf.mxu2  ;;  %v4422_v57 = vpop.f32.mrf.mxu1  ;;  %v4408_v51 = vadd.f32 %v4407_v7, %v11893_v10  ;;  %v11895_v0 = vld [vmem:[#allocation305_spill] sm:$0xff] }
 0x4e1   : > { %v11903_v7 = vld [vmem:[#allocation313_spill] sm:$0xff] }
 0x4e2   : > { %4685 = vmatpush.bf16.msrb.mxu2 %v11872_v36  ;;  %4660 = vmatpush.bf16.msrb.mxu0 %v11874_v48  ;;  %v4446_v45 = vpop.f32.mrf.mxu3  ;;  %v11896_v36 = vld [vmem:[#allocation306_spill] sm:$0xff]  ;;  %v4421_v48 = vadd.f32 %v4420_v12, %v4408_v51  ;;  %v11907_v57 = vld [vmem:[#allocation317_spill] sm:$0xff] }
 0x4e3   : > { %v11904_v12 = vld [vmem:[#allocation314_spill] sm:$0xff]  ;;  %v11915_v51 = vld [vmem:[#allocation325_spill] sm:$0xff] }
 0x4e4   : > { %4698 = vmatpush.bf16.msrb.mxu3 %v11873_v63  ;;  %4673 = vmatpush.bf16.msrb.mxu1 %v11875_v16  ;;  %v11897_v63 = vld [vmem:[#allocation307_spill] sm:$0xff]  ;;  %v11898_v16 = vld [vmem:[#allocation308_spill] sm:$0xff] }
 0x4e6   : > { %4686 = vmatpush.bf16.msrb.mxu2 %v11876_v17  ;;  %4661 = vmatpush.bf16.msrb.mxu0 %v11878_v21  ;;  %v11899_v17 = vld [vmem:[#allocation309_spill] sm:$0xff]  ;;  %v11901_v21 = vld [vmem:[#allocation311_spill] sm:$0xff] }
 0x4e8   : > { %4699 = vmatpush.bf16.msrb.mxu3 %v11877_v3  ;;  %4674 = vmatpush.bf16.msrb.mxu1 %v11879_v29  ;;  %v4435_v42 = vpop.f32.mrf.mxu2  ;;  %v11900_v3 = vld [vmem:[#allocation310_spill] sm:$0xff]  ;;  %v4434_v29 = vadd.f32 %v4433_v44, %v4421_v48  ;;  %v11918_v48 = vld [vmem:[#allocation328_spill] sm:$0xff] }
 0x4e9   : > { %v11912_v42 = vld [vmem:[#allocation322_spill] sm:$0xff] }
 0x4ea   : > { %4687 = vmatpush.bf16.msrb.mxu2 %v11880_v34  ;;  %4662 = vmatpush.bf16.msrb.mxu0 %v11882_v50  ;;  %v4448_v19 = vpop.f32.mrf.mxu3  ;;  %v11902_v34 = vld [vmem:[#allocation312_spill] sm:$0xff]  ;;  %v4447_v46 = vadd.f32 %v4446_v45, %v4434_v29 }
 0x4eb   : > { %v11906_v50 = vld [vmem:[#allocation316_spill] sm:$0xff]  ;;  %v11913_v19 = vld [vmem:[#allocation323_spill] sm:$0xff] }
 0x4ec   : > { %4700 = vmatpush.bf16.msrb.mxu3 %v11881_v38  ;;  %4675 = vmatpush.bf16.msrb.mxu1 %v11883_v58  ;;  %v11905_v38 = vld [vmem:[#allocation315_spill] sm:$0xff]  ;;  %v11914_v45 = vld [vmem:[#allocation324_spill] sm:$0xff] }
 0x4ee   : > { %4688 = vmatpush.bf16.msrb.mxu2 %v11884_v62  ;;  %4663 = vmatpush.bf16.msrb.mxu0 %v11886_v56  ;;  %v11909_v56 = vld [vmem:[#allocation319_spill] sm:$0xff] }
 0x4f0   : > { %4701 = vmatpush.bf16.msrb.mxu3 %v11885_v5  ;;  %4676 = vmatpush.bf16.msrb.mxu1 %v11887_v9  ;;  %v11908_v5 = vld [vmem:[#allocation318_spill] sm:$0xff]  ;;  %v11910_v9 = vld [vmem:[#allocation320_spill] sm:$0xff] }
 0x4f2   : > { %4689 = vmatpush.bf16.msrb.mxu2 %v11888_v33  ;;  %4664 = vmatpush.bf16.msrb.mxu0 %v11890_v15 }
 0x4f4   : > { %4702 = vmatpush.bf16.msrb.mxu3 %v11889_v22  ;;  %4677 = vmatpush.bf16.msrb.mxu1 %v11891_v52  ;;  %v11911_v22 = vld [vmem:[#allocation321_spill] sm:$0xff] }
 0x4f6   : > { %4690 = vmatpush.bf16.msrb.mxu2 %v11892_v26  ;;  %4665 = vmatpush.bf16.msrb.mxu0 %v11895_v0  ;;  %v4459_v44 = vpop.f32.mrf.mxu0  ;;  %v11916_v0 = vld [vmem:[#allocation326_spill] sm:$0xff] }
 0x4f7   : > { %v4460_v58 = vadd.f32 %v4459_v44, %v4447_v46  ;;  %v11926_v46 = vld [vmem:[#allocation337_spill] sm:$0xff]  ;;  %v11928_v44 = vld [vmem:[#allocation339_spill] sm:$0xff] }
 0x4f8   : > { %4703 = vmatpush.bf16.msrb.mxu3 %v11894_v59  ;;  %4678 = vmatpush.bf16.msrb.mxu1 %v11896_v36  ;;  %v4472_v62 = vpop.f32.mrf.mxu1  ;;  %v11917_v36 = vld [vmem:[#allocation327_spill] sm:$0xff] }
 0x4f9   : > { %4666 = vmatmul.bf16.vlgmr.msrb.gmra.mxu0 %v10057_v53  ;;  %v4473_v33 = vadd.f32 %v4472_v62, %v4460_v58  ;;  %v11930_v58 = vld [vmem:[#allocation341_spill] sm:$0xff]  ;;  %v11931_v62 = vld [vmem:[#allocation342_spill] sm:$0xff] }
 0x4fa   : > { %4691 = vmatpush.bf16.msrb.mxu2 %v11897_v63  ;;  %4710 = vmatpush.bf16.msra.mxu0 %v11899_v17  ;;  %v11920_v17 = vld [vmem:[#allocation331_spill] sm:$0xff] }
 0x4fb   : > { %4679 = vmatmul.bf16.vlgmr.msrb.gmra.mxu1 %v10063_v30 }
 0x4fc   : > { %4704 = vmatpush.bf16.msrb.mxu3 %v11898_v16  ;;  %4723 = vmatpush.bf16.msra.mxu1 %v11900_v3  ;;  %v11919_v16 = vld [vmem:[#allocation329_spill] sm:$0xff]  ;;  %v11921_v3 = vld [vmem:[#allocation332_spill] sm:$0xff] }
 0x4fd   : > { %4692 = vmatmul.bf16.vlgmr.msrb.gmra.mxu2 %v10061_v39 }
 0x4fe   : > { %4736 = vmatpush.bf16.msra.mxu2 %v11901_v21  ;;  %4711 = vmatpush.bf16.msra.mxu0 %v11903_v7  ;;  %v4461_v10 = vpop.f32.mrf.mxu0  ;;  %v11922_v21 = vld [vmem:[#allocation333_spill] sm:$0xff]  ;;  %v11923_v7 = vld [vmem:[#allocation334_spill] sm:$0xff] }
 0x4ff   : > { %4705 = vmatmul.bf16.vlgmr.msrb.gmra.mxu3 %v10067_v61 }
 0x500   : > { %4749 = vmatpush.bf16.msra.mxu3 %v11902_v34  ;;  %4724 = vmatpush.bf16.msra.mxu1 %v11904_v12  ;;  %v4485_v15 = vpop.f32.mrf.mxu2  ;;  %v4474_v59 = vpop.f32.mrf.mxu1  ;;  %v11924_v12 = vld [vmem:[#allocation335_spill] sm:$0xff] }
 0x501   : > { %v4486_v52 = vadd.f32 %v4485_v15, %v4473_v33  ;;  %v11935_v33 = vld [vmem:[#allocation346_spill] sm:$0xff]  ;;  %v11942_v59 = vld [vmem:[#allocation352_spill] sm:$0xff] }
 0x502   : > { %4737 = vmatpush.bf16.msra.mxu2 %v11905_v38  ;;  %4712 = vmatpush.bf16.msra.mxu0 %v11907_v57  ;;  %v4498_v26 = vpop.f32.mrf.mxu3  ;;  %v11925_v38 = vld [vmem:[#allocation336_spill] sm:$0xff]  ;;  %v11939_v15 = vld [vmem:[#allocation350_spill] sm:$0xff] }
 0x503   : > { %v10390_v63 = vadd.f32 %v4498_v26, %v4486_v52  ;;  %v11929_v57 = vld [vmem:[#allocation340_spill] sm:$0xff]  ;;  %v11940_v52 = vld [vmem:[#allocation395_spill] sm:$0xff] }
 0x504   : > { %4750 = vmatpush.bf16.msra.mxu3 %v11906_v50  ;;  %4725 = vmatpush.bf16.msra.mxu1 %v11908_v5  ;;  %v11927_v50 = vld [vmem:[#allocation338_spill] sm:$0xff]  ;;  %v11932_v5 = vld [vmem:[#allocation343_spill] sm:$0xff] }
 0x506   : > { %4738 = vmatpush.bf16.msra.mxu2 %v11909_v56  ;;  %4713 = vmatpush.bf16.msra.mxu0 %v11911_v22  ;;  %v11933_v56 = vld [vmem:[#allocation344_spill] sm:$0xff]  ;;  %v11936_v22 = vld [vmem:[#allocation347_spill] sm:$0xff] }
 0x508   : > { %4751 = vmatpush.bf16.msra.mxu3 %v11910_v9  ;;  %4726 = vmatpush.bf16.msra.mxu1 %v11912_v42  ;;  %v4487_v29 = vpop.f32.mrf.mxu2  ;;  %v11934_v9 = vld [vmem:[#allocation345_spill] sm:$0xff]  ;;  %v11937_v42 = vld [vmem:[#allocation348_spill] sm:$0xff] }
 0x50a   : > { %4739 = vmatpush.bf16.msra.mxu2 %v11913_v19  ;;  %4714 = vmatpush.bf16.msra.mxu0 %v11915_v51  ;;  %v4500_v34 = vpop.f32.mrf.mxu3  ;;  %v11938_v19 = vld [vmem:[#allocation349_spill] sm:$0xff]  ;;  %v11941_v51 = vld [vmem:[#allocation351_spill] sm:$0xff] }
 0x50c   : > { %4752 = vmatpush.bf16.msra.mxu3 %v11914_v45  ;;  %4727 = vmatpush.bf16.msra.mxu1 %v11916_v0  ;;  %v11943_v0 = vld [vmem:[#allocation353_spill] sm:$0xff] }
 0x50e   : > { %4740 = vmatpush.bf16.msra.mxu2 %v11917_v36  ;;  %4715 = vmatpush.bf16.msra.mxu0 %v11919_v16  ;;  %v11945_v16 = vld [vmem:[#allocation355_spill] sm:$0xff] }
 0x510   : > { %4753 = vmatpush.bf16.msra.mxu3 %v11918_v48  ;;  %4728 = vmatpush.bf16.msra.mxu1 %v11920_v17  ;;  %v11944_v48 = vld [vmem:[#allocation354_spill] sm:$0xff]  ;;  %v11946_v17 = vld [vmem:[#allocation356_spill] sm:$0xff] }
 0x512   : > { %4741 = vmatpush.bf16.msra.mxu2 %v11921_v3  ;;  %4716 = vmatpush.bf16.msra.mxu0 %v11923_v7  ;;  %v11947_v3 = vld [vmem:[#allocation357_spill] sm:$0xff] }
 0x514   : > { %4754 = vmatpush.bf16.msra.mxu3 %v11922_v21  ;;  %4729 = vmatpush.bf16.msra.mxu1 %v11924_v12  ;;  %v11948_v12 = vld [vmem:[#allocation358_spill] sm:$0xff] }
 0x516   : > { %4742 = vmatpush.bf16.msra.mxu2 %v11925_v38  ;;  %4717 = vmatpush.bf16.msra.mxu0 %v11927_v50  ;;  %v4511_v45 = vpop.f32.mrf.mxu0  ;;  %v11950_v50 = vld [vmem:[#allocation360_spill] sm:$0xff] }
 0x517   : > { %v4512_v26 = vadd.f32 %v4511_v45, %v11940_v52  ;;  %v11959_v45 = vld [vmem:[#allocation369_spill] sm:$0xff]  ;;  %v11961_v52 = vld [vmem:[#allocation371_spill] sm:$0xff] }
 0x518   : > { %4755 = vmatpush.bf16.msra.mxu3 %v11926_v46  ;;  %4730 = vmatpush.bf16.msra.mxu1 %v11928_v44  ;;  %v4524_v10 = vpop.f32.mrf.mxu1  ;;  %v11949_v46 = vld [vmem:[#allocation359_spill] sm:$0xff] }
 0x519   : > { %4718 = vmatmul.bf16.vlgmr.msra.gmra.mxu0 %v10009_v6  ;;  %v4525_v36 = vadd.f32 %v4524_v10, %v4512_v26  ;;  %v11962_v26 = vld [vmem:[#allocation372_spill] sm:$0xff]  ;;  %v11963_v10 = vld [vmem:[#allocation373_spill] sm:$0xff] }
 0x51a   : > { %4743 = vmatpush.bf16.msra.mxu2 %v11929_v57  ;;  %4762 = vmatpush.bf16.msrb.mxu0 %v11931_v62  ;;  %v11951_v57 = vld [vmem:[#allocation361_spill] sm:$0xff]  ;;  %v11953_v62 = vld [vmem:[#allocation363_spill] sm:$0xff] }
 0x51b   : > { %4731 = vmatmul.bf16.vlgmr.msra.gmra.mxu1 %v10015_v47 }
 0x51c   : > { %4756 = vmatpush.bf16.msra.mxu3 %v11930_v58  ;;  %4775 = vmatpush.bf16.msrb.mxu1 %v11932_v5  ;;  %v11952_v58 = vld [vmem:[#allocation362_spill] sm:$0xff]  ;;  %v11954_v5 = vld [vmem:[#allocation364_spill] sm:$0xff] }
 0x51d   : > { %4744 = vmatmul.bf16.vlgmr.msra.gmra.mxu2 %v10013_v23 }
 0x51e   : > { %4788 = vmatpush.bf16.msrb.mxu2 %v11933_v56  ;;  %4763 = vmatpush.bf16.msrb.mxu0 %v11935_v33  ;;  %v4513_v7 = vpop.f32.mrf.mxu0  ;;  %v11955_v56 = vld [vmem:[#allocation365_spill] sm:$0xff] }
 0x51f   : > { %4757 = vmatmul.bf16.vlgmr.msra.gmra.mxu3 %v10019_v20 }
 0x520   : > { %4801 = vmatpush.bf16.msrb.mxu3 %v11934_v9  ;;  %4776 = vmatpush.bf16.msrb.mxu1 %v11936_v22  ;;  %v4537_v21 = vpop.f32.mrf.mxu2  ;;  %v4526_v38 = vpop.f32.mrf.mxu1  ;;  %v11956_v22 = vld [vmem:[#allocation366_spill] sm:$0xff] }
 0x521   : > { %v4538_v29 = vadd.f32 %v4537_v21, %v4525_v36  ;;  %v11967_v36 = vld [vmem:[#allocation377_spill] sm:$0xff]  ;;  %v11974_v38 = vld [vmem:[#allocation384_spill] sm:$0xff] }
 0x522   : > { %4789 = vmatpush.bf16.msrb.mxu2 %v11937_v42  ;;  %4764 = vmatpush.bf16.msrb.mxu0 %v11939_v15  ;;  %v4550_v34 = vpop.f32.mrf.mxu3  ;;  %v11957_v42 = vld [vmem:[#allocation367_spill] sm:$0xff]  ;;  %v11960_v15 = vld [vmem:[#allocation370_spill] sm:$0xff] }
 0x523   : > { %v4551_v44 = vadd.f32 %v4550_v34, %v4538_v29  ;;  %v11972_v29 = vld [vmem:[#allocation382_spill] sm:$0xff] }
 0x524   : > { %4802 = vmatpush.bf16.msrb.mxu3 %v11938_v19  ;;  %4777 = vmatpush.bf16.msrb.mxu1 %v11941_v51  ;;  %v11958_v19 = vld [vmem:[#allocation368_spill] sm:$0xff]  ;;  %v11964_v51 = vld [vmem:[#allocation374_spill] sm:$0xff] }
 0x526   : > { %4790 = vmatpush.bf16.msrb.mxu2 %v11942_v59  ;;  %4765 = vmatpush.bf16.msrb.mxu0 %v11944_v48  ;;  %v11965_v59 = vld [vmem:[#allocation375_spill] sm:$0xff]  ;;  %v11968_v48 = vld [vmem:[#allocation378_spill] sm:$0xff] }
 0x528   : > { %4803 = vmatpush.bf16.msrb.mxu3 %v11943_v0  ;;  %4778 = vmatpush.bf16.msrb.mxu1 %v11945_v16  ;;  %v4539_v9 = vpop.f32.mrf.mxu2  ;;  %v11966_v0 = vld [vmem:[#allocation376_spill] sm:$0xff]  ;;  %v11969_v16 = vld [vmem:[#allocation379_spill] sm:$0xff] }
 0x52a   : > { %4791 = vmatpush.bf16.msrb.mxu2 %v11946_v17  ;;  %4766 = vmatpush.bf16.msrb.mxu0 %v11948_v12  ;;  %v4552_v33 = vpop.f32.mrf.mxu3  ;;  %v11970_v17 = vld [vmem:[#allocation380_spill] sm:$0xff]  ;;  %v11973_v12 = vld [vmem:[#allocation383_spill] sm:$0xff] }
 0x52c   : > { %4804 = vmatpush.bf16.msrb.mxu3 %v11947_v3  ;;  %4779 = vmatpush.bf16.msrb.mxu1 %v11949_v46  ;;  %v11971_v3 = vld [vmem:[#allocation381_spill] sm:$0xff] }
 0x52d   : > { %v11975_v46 = vld [vmem:[#allocation385_spill] sm:$0xff] }
 0x52e   : > { %4792 = vmatpush.bf16.msrb.mxu2 %v11950_v50  ;;  %4767 = vmatpush.bf16.msrb.mxu0 %v11952_v58  ;;  %v11977_v58 = vld [vmem:[#allocation387_spill] sm:$0xff] }
 0x530   : > { %4805 = vmatpush.bf16.msrb.mxu3 %v11951_v57  ;;  %4780 = vmatpush.bf16.msrb.mxu1 %v11953_v62  ;;  %v11976_v57 = vld [vmem:[#allocation386_spill] sm:$0xff]  ;;  %v11978_v62 = vld [vmem:[#allocation388_spill] sm:$0xff] }
 0x532   : > { %4793 = vmatpush.bf16.msrb.mxu2 %v11954_v5  ;;  %4768 = vmatpush.bf16.msrb.mxu0 %v11956_v22  ;;  %v11979_v5 = vld [vmem:[#allocation389_spill] sm:$0xff]  ;;  %v11980_v22 = vld [vmem:[#allocation390_spill] sm:$0xff] }
 0x534   : > { %4806 = vmatpush.bf16.msrb.mxu3 %v11955_v56  ;;  %4781 = vmatpush.bf16.msrb.mxu1 %v11957_v42 }
 0x536   : > { %4794 = vmatpush.bf16.msrb.mxu2 %v11958_v19  ;;  %4769 = vmatpush.bf16.msrb.mxu0 %v11960_v15  ;;  %v4563_v21 = vpop.f32.mrf.mxu0  ;;  %v11981_v19 = vld [vmem:[#allocation391_spill] sm:$0xff] }
 0x537   : > { %v4564_v34 = vadd.f32 %v4563_v21, %v4551_v44  ;;  %v11992_v21 = vld [vmem:[#allocation403_spill] sm:$0xff] }
 0x538   : > { %4807 = vmatpush.bf16.msrb.mxu3 %v11959_v45  ;;  %4782 = vmatpush.bf16.msrb.mxu1 %v11961_v52  ;;  %v4576_v7 = vpop.f32.mrf.mxu1  ;;  %v11982_v45 = vld [vmem:[#allocation392_spill] sm:$0xff]  ;;  %v11983_v52 = vld [vmem:[#allocation393_spill] sm:$0xff] }
 0x539   : > { %4770 = vmatmul.bf16.vlgmr.msrb.gmra.mxu0 %v10057_v53  ;;  %v4577_v50 = vadd.f32 %v4576_v7, %v4564_v34  ;;  %v11994_v34 = vld [vmem:[#allocation405_spill] sm:$0xff]  ;;  %v11995_v7 = vld [vmem:[#allocation406_spill] sm:$0xff] }
 0x53a   : > { %4795 = vmatpush.bf16.msrb.mxu2 %v11962_v26  ;;  %4814 = vmatpush.bf16.msra.mxu0 %v11964_v51  ;;  %v11984_v26 = vld [vmem:[#allocation394_spill] sm:$0xff]  ;;  %v11986_v51 = vld [vmem:[#allocation397_spill] sm:$0xff] }
 0x53b   : > { %4783 = vmatmul.bf16.vlgmr.msrb.gmra.mxu1 %v10063_v30 }
 0x53c   : > { %4808 = vmatpush.bf16.msrb.mxu3 %v11963_v10  ;;  %4827 = vmatpush.bf16.msra.mxu1 %v11965_v59  ;;  %v11985_v10 = vld [vmem:[#allocation396_spill] sm:$0xff]  ;;  %v11987_v59 = vld [vmem:[#allocation398_spill] sm:$0xff] }
 0x53d   : > { %4796 = vmatmul.bf16.vlgmr.msrb.gmra.mxu2 %v10061_v39 }
 0x53e   : > { %4840 = vmatpush.bf16.msra.mxu2 %v11966_v0  ;;  %4815 = vmatpush.bf16.msra.mxu0 %v11968_v48  ;;  %v4565_v44 = vpop.f32.mrf.mxu0  ;;  %v11988_v48 = vld [vmem:[#allocation399_spill] sm:$0xff] }
 0x53f   : > { %4809 = vmatmul.bf16.vlgmr.msrb.gmra.mxu3 %v10067_v61 }
 0x540   : > { %4853 = vmatpush.bf16.msra.mxu3 %v11967_v36  ;;  %4828 = vmatpush.bf16.msra.mxu1 %v11969_v16  ;;  %v4589_v56 = vpop.f32.mrf.mxu2  ;;  %v4578_v42 = vpop.f32.mrf.mxu1  ;;  %v11989_v16 = vld [vmem:[#allocation400_spill] sm:$0xff] }
 0x541   : > { %v4590_v9 = vadd.f32 %v4589_v56, %v4577_v50  ;;  %v11999_v50 = vld [vmem:[#allocation410_spill] sm:$0xff]  ;;  %v12006_v42 = vld [vmem:[#allocation417_spill] sm:$0xff] }
 0x542   : > { %4841 = vmatpush.bf16.msra.mxu2 %v11970_v17  ;;  %4816 = vmatpush.bf16.msra.mxu0 %v11972_v29  ;;  %v4602_v33 = vpop.f32.mrf.mxu3  ;;  %v11990_v17 = vld [vmem:[#allocation401_spill] sm:$0xff]  ;;  %v11993_v29 = vld [vmem:[#allocation404_spill] sm:$0xff] }
 0x543   : > { %v10465_v15 = vadd.f32 %v4602_v33, %v4590_v9  ;;  %v12004_v9 = vld [vmem:[#allocation415_spill] sm:$0xff] }
 0x544   : > { %4854 = vmatpush.bf16.msra.mxu3 %v11971_v3  ;;  %4829 = vmatpush.bf16.msra.mxu1 %v11973_v12  ;;  %v11991_v3 = vld [vmem:[#allocation402_spill] sm:$0xff]  ;;  %v11996_v12 = vld [vmem:[#allocation407_spill] sm:$0xff] }
 0x546   : > { %4842 = vmatpush.bf16.msra.mxu2 %v11974_v38  ;;  %4817 = vmatpush.bf16.msra.mxu0 %v11976_v57  ;;  %v11997_v38 = vld [vmem:[#allocation408_spill] sm:$0xff]  ;;  %v12000_v57 = vld [vmem:[#allocation411_spill] sm:$0xff] }
 0x548   : > { %4855 = vmatpush.bf16.msra.mxu3 %v11975_v46  ;;  %4830 = vmatpush.bf16.msra.mxu1 %v11977_v58  ;;  %v4591_v0 = vpop.f32.mrf.mxu2  ;;  %v11998_v46 = vld [vmem:[#allocation409_spill] sm:$0xff]  ;;  %v12001_v58 = vld [vmem:[#allocation412_spill] sm:$0xff] }
 0x54a   : > { %4843 = vmatpush.bf16.msra.mxu2 %v11978_v62  ;;  %4818 = vmatpush.bf16.msra.mxu0 %v11980_v22  ;;  %v4604_v36 = vpop.f32.mrf.mxu3  ;;  %v12002_v62 = vld [vmem:[#allocation413_spill] sm:$0xff]  ;;  %v12005_v22 = vld [vmem:[#allocation416_spill] sm:$0xff] }
 0x54c   : > { %4856 = vmatpush.bf16.msra.mxu3 %v11979_v5  ;;  %4831 = vmatpush.bf16.msra.mxu1 %v11981_v19  ;;  %v12003_v5 = vld [vmem:[#allocation414_spill] sm:$0xff] }
 0x54d   : > { %v12007_v19 = vld [vmem:[#allocation418_spill] sm:$0xff] }
 0x54e   : > { %4844 = vmatpush.bf16.msra.mxu2 %v11982_v45  ;;  %4819 = vmatpush.bf16.msra.mxu0 %v11984_v26  ;;  %v12009_v26 = vld [vmem:[#allocation420_spill] sm:$0xff] }
 0x550   : > { %4857 = vmatpush.bf16.msra.mxu3 %v11983_v52  ;;  %4832 = vmatpush.bf16.msra.mxu1 %v11985_v10  ;;  %v12008_v52 = vld [vmem:[#allocation419_spill] sm:$0xff]  ;;  %v12010_v10 = vld [vmem:[#allocation421_spill] sm:$0xff] }
 0x552   : > { %4845 = vmatpush.bf16.msra.mxu2 %v11986_v51  ;;  %4820 = vmatpush.bf16.msra.mxu0 %v11988_v48  ;;  %v12011_v51 = vld [vmem:[#allocation422_spill] sm:$0xff]  ;;  %v12012_v48 = vld [vmem:[#allocation423_spill] sm:$0xff] }
 0x554   : > { %4858 = vmatpush.bf16.msra.mxu3 %v11987_v59  ;;  %4833 = vmatpush.bf16.msra.mxu1 %v11989_v16 }
 0x556   : > { %4846 = vmatpush.bf16.msra.mxu2 %v11990_v17  ;;  %4821 = vmatpush.bf16.msra.mxu0 %v11992_v21  ;;  %v4615_v56 = vpop.f32.mrf.mxu0  ;;  %v12013_v17 = vld [vmem:[#allocation424_spill] sm:$0xff] }
 0x557   : > { %v4616_v33 = vadd.f32 %v4615_v56, %v9828_v4  ;;  %v12024_v56 = vld [vmem:[#allocation435_spill] sm:$0xff] }
 0x558   : > { %4859 = vmatpush.bf16.msra.mxu3 %v11991_v3  ;;  %4834 = vmatpush.bf16.msra.mxu1 %v11993_v29  ;;  %v4628_v44 = vpop.f32.mrf.mxu1  ;;  %v12014_v3 = vld [vmem:[#allocation425_spill] sm:$0xff]  ;;  %v12015_v29 = vld [vmem:[#allocation426_spill] sm:$0xff] }
 0x559   : > { %4822 = vmatmul.bf16.vlgmr.msra.gmra.mxu0 %v10009_v6  ;;  %v4629_v45 = vadd.f32 %v4628_v44, %v4616_v33  ;;  %v12026_v33 = vld [vmem:[#allocation437_spill] sm:$0xff]  ;;  %v12027_v44 = vld [vmem:[#allocation438_spill] sm:$0xff] }
 0x55a   : > { %4847 = vmatpush.bf16.msra.mxu2 %v11994_v34  ;;  %4866 = vmatpush.bf16.msrb.mxu0 %v11996_v12  ;;  %v12016_v34 = vld [vmem:[#allocation427_spill] sm:$0xff]  ;;  %v12018_v12 = vld [vmem:[#allocation429_spill] sm:$0xff] }
 0x55b   : > { %4835 = vmatmul.bf16.vlgmr.msra.gmra.mxu1 %v10015_v47 }
 0x55c   : > { %4860 = vmatpush.bf16.msra.mxu3 %v11995_v7  ;;  %4879 = vmatpush.bf16.msrb.mxu1 %v11997_v38  ;;  %v12017_v7 = vld [vmem:[#allocation428_spill] sm:$0xff]  ;;  %v12019_v38 = vld [vmem:[#allocation430_spill] sm:$0xff] }
 0x55d   : > { %4848 = vmatmul.bf16.vlgmr.msra.gmra.mxu2 %v10013_v23 }
 0x55e   : > { %4892 = vmatpush.bf16.msrb.mxu2 %v11998_v46  ;;  %4867 = vmatpush.bf16.msrb.mxu0 %v12000_v57  ;;  %v4617_v4 = vpop.f32.mrf.mxu0  ;;  %v12020_v57 = vld [vmem:[#allocation431_spill] sm:$0xff] }
 0x55f   : > { %4861 = vmatmul.bf16.vlgmr.msra.gmra.mxu3 %v10019_v20 }
 0x560   : > { %4905 = vmatpush.bf16.msrb.mxu3 %v11999_v50  ;;  %4880 = vmatpush.bf16.msrb.mxu1 %v12001_v58  ;;  %v4641_v59 = vpop.f32.mrf.mxu2  ;;  %v4630_v16 = vpop.f32.mrf.mxu1  ;;  %v12021_v58 = vld [vmem:[#allocation432_spill] sm:$0xff] }
 0x561   : > { %v4642_v0 = vadd.f32 %v4641_v59, %v4629_v45  ;;  %v12031_v45 = vld [vmem:[#allocation442_spill] sm:$0xff]  ;;  %v12038_v16 = vld [vmem:[#allocation449_spill] sm:$0xff] }
 0x562   : > { %4893 = vmatpush.bf16.msrb.mxu2 %v12002_v62  ;;  %4868 = vmatpush.bf16.msrb.mxu0 %v12004_v9  ;;  %v4654_v36 = vpop.f32.mrf.mxu3  ;;  %v12022_v62 = vld [vmem:[#allocation433_spill] sm:$0xff]  ;;  %v12025_v9 = vld [vmem:[#allocation436_spill] sm:$0xff] }
 0x563   : > { %v4655_v21 = vadd.f32 %v4654_v36, %v4642_v0  ;;  %v12036_v0 = vld [vmem:[#allocation447_spill] sm:$0xff] }
 0x564   : > { %4906 = vmatpush.bf16.msrb.mxu3 %v12003_v5  ;;  %4881 = vmatpush.bf16.msrb.mxu1 %v12005_v22  ;;  %v12023_v5 = vld [vmem:[#allocation434_spill] sm:$0xff]  ;;  %v12028_v22 = vld [vmem:[#allocation439_spill] sm:$0xff] }
 0x566   : > { %4894 = vmatpush.bf16.msrb.mxu2 %v12006_v42  ;;  %4869 = vmatpush.bf16.msrb.mxu0 %v12008_v52  ;;  %v12029_v42 = vld [vmem:[#allocation440_spill] sm:$0xff]  ;;  %v12032_v52 = vld [vmem:[#allocation443_spill] sm:$0xff] }
 0x568   : > { %4907 = vmatpush.bf16.msrb.mxu3 %v12007_v19  ;;  %4882 = vmatpush.bf16.msrb.mxu1 %v12009_v26  ;;  %v4643_v46 = vpop.f32.mrf.mxu2  ;;  %v12030_v19 = vld [vmem:[#allocation441_spill] sm:$0xff]  ;;  %v12033_v26 = vld [vmem:[#allocation444_spill] sm:$0xff] }
 0x56a   : > { %4895 = vmatpush.bf16.msrb.mxu2 %v12010_v10  ;;  %4870 = vmatpush.bf16.msrb.mxu0 %v12012_v48  ;;  %v4656_v50 = vpop.f32.mrf.mxu3  ;;  %v12034_v10 = vld [vmem:[#allocation445_spill] sm:$0xff]  ;;  %v12037_v48 = vld [vmem:[#allocation448_spill] sm:$0xff] }
 0x56c   : > { %4908 = vmatpush.bf16.msrb.mxu3 %v12011_v51  ;;  %4883 = vmatpush.bf16.msrb.mxu1 %v12013_v17  ;;  %v12035_v51 = vld [vmem:[#allocation446_spill] sm:$0xff] }
 0x56d   : > { %v12039_v17 = vld [vmem:[#allocation450_spill] sm:$0xff] }
 0x56e   : > { %4896 = vmatpush.bf16.msrb.mxu2 %v12014_v3  ;;  %4871 = vmatpush.bf16.msrb.mxu0 %v12016_v34  ;;  %v12041_v34 = vld [vmem:[#allocation452_spill] sm:$0xff] }
 0x570   : > { %4909 = vmatpush.bf16.msrb.mxu3 %v12015_v29  ;;  %4884 = vmatpush.bf16.msrb.mxu1 %v12017_v7  ;;  %v12040_v29 = vld [vmem:[#allocation451_spill] sm:$0xff]  ;;  %v12042_v7 = vld [vmem:[#allocation453_spill] sm:$0xff] }
 0x572   : > { %4897 = vmatpush.bf16.msrb.mxu2 %v12018_v12  ;;  %4872 = vmatpush.bf16.msrb.mxu0 %v12020_v57  ;;  %v12043_v12 = vld [vmem:[#allocation454_spill] sm:$0xff]  ;;  %v12044_v57 = vld [vmem:[#allocation455_spill] sm:$0xff] }
 0x574   : > { %4910 = vmatpush.bf16.msrb.mxu3 %v12019_v38  ;;  %4885 = vmatpush.bf16.msrb.mxu1 %v12021_v58 }
 0x576   : > { %4898 = vmatpush.bf16.msrb.mxu2 %v12022_v62  ;;  %4873 = vmatpush.bf16.msrb.mxu0 %v12024_v56  ;;  %v4667_v59 = vpop.f32.mrf.mxu0  ;;  %v12045_v62 = vld [vmem:[#allocation456_spill] sm:$0xff] }
 0x577   : > { %v4668_v36 = vadd.f32 %v4667_v59, %v4655_v21  ;;  %v12053_v59 = vld [vmem:[#allocation464_spill] sm:$0xff] }
 0x578   : > { %4911 = vmatpush.bf16.msrb.mxu3 %v12023_v5  ;;  %4886 = vmatpush.bf16.msrb.mxu1 %v12025_v9  ;;  %v4680_v4 = vpop.f32.mrf.mxu1  ;;  %v12046_v5 = vld [vmem:[#allocation457_spill] sm:$0xff]  ;;  %v12047_v9 = vld [vmem:[#allocation458_spill] sm:$0xff] }
 0x579   : > { %4874 = vmatmul.bf16.vlgmr.msrb.gmra.mxu0 %v10057_v53  ;;  %v4681_v3 = vadd.f32 %v4680_v4, %v4668_v36  ;;  %v12056_v36 = vld [vmem:[#allocation467_spill] sm:$0xff]  ;;  %v12057_v4 = vld [vmem:[#allocation468_spill] sm:$0xff] }
 0x57a   : > { %4899 = vmatpush.bf16.msrb.mxu2 %v12026_v33  ;;  %4918 = vmatpush.bf16.msra.mxu0 %v12028_v22  ;;  %v5022_v33 = vmul.f32 %v10240_v13, %v10240_v13  ;;  %v12048_v22 = vld [vmem:[#allocation459_spill] sm:$0xff]  ;;  %v12054_v13 = vld [vmem:[#allocation465_spill] sm:$0xff] }
 0x57b   : > { %4887 = vmatmul.bf16.vlgmr.msrb.gmra.mxu1 %v10063_v30 }
 0x57c   : > { %4912 = vmatpush.bf16.msrb.mxu3 %v12027_v44  ;;  %4931 = vmatpush.bf16.msra.mxu1 %v12029_v42 }
 0x57d   : > { %4900 = vmatmul.bf16.vlgmr.msrb.gmra.mxu2 %v10061_v39 }
 0x57e   : > { %4944 = vmatpush.bf16.msra.mxu2 %v12030_v19  ;;  %4919 = vmatpush.bf16.msra.mxu0 %v12032_v52  ;;  %v4669_v21 = vpop.f32.mrf.mxu0  ;;  %v12049_v19 = vld [vmem:[#allocation460_spill] sm:$0xff]  ;;  %v12051_v52 = vld [vmem:[#allocation462_spill] sm:$0xff] }
 0x57f   : > { %4913 = vmatmul.bf16.vlgmr.msrb.gmra.mxu3 %v10067_v61  ;;  %v12073_v21 = vld [vmem:[#allocation484_spill] sm:$0xff] }
 0x580   : > { %4957 = vmatpush.bf16.msra.mxu3 %v12031_v45  ;;  %4932 = vmatpush.bf16.msra.mxu1 %v12033_v26  ;;  %v4693_v38 = vpop.f32.mrf.mxu2  ;;  %v4682_v58 = vpop.f32.mrf.mxu1  ;;  %v12050_v45 = vld [vmem:[#allocation461_spill] sm:$0xff] }
 0x581   : > { %v4694_v46 = vadd.f32 %v4693_v38, %v4681_v3  ;;  %v12070_v38 = vld [vmem:[#allocation481_spill] sm:$0xff] }
 0x582   : > { %4945 = vmatpush.bf16.msra.mxu2 %v12034_v10  ;;  %4920 = vmatpush.bf16.msra.mxu0 %v12036_v0  ;;  %v4706_v50 = vpop.f32.mrf.mxu3  ;;  %v12055_v0 = vld [vmem:[#allocation466_spill] sm:$0xff] }
 0x583   : > { %v4707_v56 = vadd.f32 %v4706_v50, %v4694_v46  ;;  %v12071_v46 = vld [vmem:[#allocation482_spill] sm:$0xff]  ;;  %v12072_v50 = vld [vmem:[#allocation483_spill] sm:$0xff] }
 0x584   : > { %4958 = vmatpush.bf16.msra.mxu3 %v12035_v51  ;;  %4933 = vmatpush.bf16.msra.mxu1 %v12037_v48  ;;  %v12052_v51 = vld [vmem:[#allocation463_spill] sm:$0xff] }
 0x585   : > { %v5026_v44 = vmul.f32 %v4707_v56, %v4707_v56  ;;  %v5065_v56 = vld [vmem:[#allocation7 + $0xf8] sm:$0xff] }
 0x586   : > { %4946 = vmatpush.bf16.msra.mxu2 %v12038_v16  ;;  %4921 = vmatpush.bf16.msra.mxu0 %v12040_v29  ;;  %v12063_v16 = vld [vmem:[#allocation474_spill] sm:$0xff] }
 0x587   : > { %v10544_v42 = vadd.f32 %v5026_v44, %v5022_v33  ;;  %v5059_v44 = vld [vmem:[#allocation7 + $0xc8] sm:$0xff] }
 0x588   : > { %4959 = vmatpush.bf16.msra.mxu3 %v12039_v17  ;;  %4934 = vmatpush.bf16.msra.mxu1 %v12041_v34  ;;  %v4695_v26 = vpop.f32.mrf.mxu2  ;;  %v12068_v17 = vld [vmem:[#allocation479_spill] sm:$0xff] }
 0x58a   : > { %4947 = vmatpush.bf16.msra.mxu2 %v12042_v7  ;;  %4922 = vmatpush.bf16.msra.mxu0 %v12044_v57  ;;  %v4708_v10 = vpop.f32.mrf.mxu3  ;;  %v12069_v7 = vld [vmem:[#allocation480_spill] sm:$0xff]  ;;  %v12074_v57 = vld [vmem:[#allocation485_spill] sm:$0xff] }
 0x58b   : > { %v5057_v10 = vld [vmem:[#allocation7 + $0xb8] sm:$0xff] }
 0x58c   : > { %4960 = vmatpush.bf16.msra.mxu3 %v12043_v12  ;;  %4935 = vmatpush.bf16.msra.mxu1 %v12045_v62 }
 0x58e   : > { %4948 = vmatpush.bf16.msra.mxu2 %v12046_v5  ;;  %4923 = vmatpush.bf16.msra.mxu0 %v12048_v22  ;;  %v5049_v5 = vld [vmem:[#allocation7 + $0x78] sm:$0xff]  ;;  %v5042_v22 = vld [vmem:[#allocation7 + $0x40] sm:$0xff] }
 0x590   : > { %4961 = vmatpush.bf16.msra.mxu3 %v12047_v9  ;;  %4936 = vmatpush.bf16.msra.mxu1 %v12049_v19 }
 0x592   : > { %4949 = vmatpush.bf16.msra.mxu2 %v12050_v45  ;;  %4924 = vmatpush.bf16.msra.mxu0 %v12052_v51  ;;  %v5058_v45 = vld [vmem:[#allocation7 + $0xc0] sm:$0xff] }
 0x594   : > { %4962 = vmatpush.bf16.msra.mxu3 %v12051_v52  ;;  %4937 = vmatpush.bf16.msra.mxu1 %v12053_v59  ;;  %v5041_v52 = vld [vmem:[#allocation7 + $0x38] sm:$0xff] }
 0x596   : > { %4950 = vmatpush.bf16.msra.mxu2 %v9846_v40  ;;  %4925 = vmatpush.bf16.msra.mxu0 %v9852_v32  ;;  %v12059_v40 = vld [vmem:[#allocation470_spill] sm:$0xff]  ;;  %v12060_v32 = vld [vmem:[#allocation471_spill] sm:$0xff] }
 0x598   : > { %4963 = vmatpush.bf16.msra.mxu3 %v9849_v11  ;;  %4938 = vmatpush.bf16.msra.mxu1 %v9856_v54  ;;  %v12058_v11 = vld [vmem:[#allocation469_spill] sm:$0xff]  ;;  %v12061_v54 = vld [vmem:[#allocation472_spill] sm:$0xff]  ;;  %v4732_v48 = vpop.f32.mrf.mxu1 }
 0x599   : > { %4926 = vmatmul.bf16.vlgmr.msra.gmra.mxu0 %v10009_v6  ;;  %v12064_v6 = vld [vmem:[#allocation475_spill] sm:$0xff] }
 0x59a   : > { %4951 = vmatpush.bf16.msra.mxu2 %v9858_v41  ;;  %4970 = vmatpush.bf16.msrb.mxu0 %v12055_v0  ;;  %v4719_v41 = vpop.f32.mrf.mxu0  ;;  %v5081_v0 = vld [vmem:[#allocation7 + $0x178] sm:$0xff] }
 0x59b   : > { %4939 = vmatmul.bf16.vlgmr.msra.gmra.mxu1 %v10015_v47  ;;  %v12066_v47 = vld [vmem:[#allocation477_spill] sm:$0xff]  ;;  %v4720_v62 = vadd.f32 %v4719_v41, %v9991_v25  ;;  %v5039_v41 = vld [vmem:[#allocation7 + $0x28] sm:$0xff] }
 0x59c   : > { %4964 = vmatpush.bf16.msra.mxu3 %v12054_v13  ;;  %4983 = vmatpush.bf16.msrb.mxu1 %v9865_v18  ;;  %v12062_v18 = vld [vmem:[#allocation473_spill] sm:$0xff] }
 0x59d   : > { %4952 = vmatmul.bf16.vlgmr.msra.gmra.mxu2 %v10013_v23  ;;  %v12065_v23 = vld [vmem:[#allocation476_spill] sm:$0xff]  ;;  %v5061_v25 = vld [vmem:[#allocation7 + $0xd8] sm:$0xff] }
 0x59e   : > { %4996 = vmatpush.bf16.msrb.mxu2 %v12056_v36  ;;  %4971 = vmatpush.bf16.msrb.mxu0 %v12058_v11  ;;  %v5080_v36 = vld [vmem:[#allocation7 + $0x170] sm:$0xff] }
 0x59f   : > { %4965 = vmatmul.bf16.vlgmr.msra.gmra.mxu3 %v10019_v20  ;;  %v12067_v20 = vld [vmem:[#allocation478_spill] sm:$0xff] }
 0x5a0   : > { %5009 = vmatpush.bf16.msrb.mxu3 %v12057_v4  ;;  %4984 = vmatpush.bf16.msrb.mxu1 %v12059_v40  ;;  %v4745_v3 = vpop.f32.mrf.mxu2  ;;  %v4734_v12 = vpop.f32.mrf.mxu1  ;;  %v5040_v4 = vld [vmem:[#allocation7 + $0x30] sm:$0xff] }
 0x5a1   : > { %v5056_v40 = vld [vmem:[#allocation7 + $0xb0] sm:$0xff] }
 0x5a2   : > { %4997 = vmatpush.bf16.msrb.mxu2 %v12060_v32  ;;  %4972 = vmatpush.bf16.msrb.mxu0 %v12062_v18  ;;  %v4758_v29 = vpop.f32.mrf.mxu3  ;;  %v4721_v34 = vpop.f32.mrf.mxu0  ;;  %v5023_v18 = vmul.f32 %v10315_v2, %v10315_v2  ;;  %v5076_v12 = vld [vmem:[#allocation7 + $0x150] sm:$0xff] }
 0x5a3   : > { %v5053_v34 = vld [vmem:[#allocation7 + $0x98] sm:$0xff]  ;;  %v5036_v2 = vld [vmem:[#allocation7 + $0x10] sm:$0xff] }
 0x5a4   : > { %5010 = vmatpush.bf16.msrb.mxu3 %v12061_v54  ;;  %4985 = vmatpush.bf16.msrb.mxu1 %v12063_v16  ;;  %v5079_v54 = vld [vmem:[#allocation7 + $0x168] sm:$0xff] }
 0x5a5   : > { %v5055_v16 = vld [vmem:[#allocation7 + $0xa8] sm:$0xff] }
 0x5a6   : > { %4998 = vmatpush.bf16.msrb.mxu2 %v12064_v6  ;;  %4973 = vmatpush.bf16.msrb.mxu0 %v12066_v47  ;;  %v5078_v6 = vld [vmem:[#allocation7 + $0x160] sm:$0xff] }
 0x5a8   : > { %5011 = vmatpush.bf16.msrb.mxu3 %v12065_v23  ;;  %4986 = vmatpush.bf16.msrb.mxu1 %v12067_v20  ;;  %v5038_v23 = vld [vmem:[#allocation7 + $0x20] sm:$0xff] }
 0x5a9   : > { %v5054_v20 = vld [vmem:[#allocation7 + $0xa0] sm:$0xff] }
 0x5aa   : > { %4999 = vmatpush.bf16.msrb.mxu2 %v9910_v28  ;;  %4974 = vmatpush.bf16.msrb.mxu0 %v12069_v7  ;;  %v4747_v28 = vpop.f32.mrf.mxu2  ;;  %v4760_v58 = vpop.f32.mrf.mxu3 }
 0x5ab   : > { %v5034_v28 = vld [vmem:[#allocation7] sm:$0xff] }
 0x5ac   : > { %5012 = vmatpush.bf16.msrb.mxu3 %v12068_v17  ;;  %4987 = vmatpush.bf16.msrb.mxu1 %v12070_v38  ;;  %v5077_v17 = vld [vmem:[#allocation7 + $0x158] sm:$0xff]  ;;  %v5052_v38 = vld [vmem:[#allocation7 + $0x90] sm:$0xff]  ;;  %v5050_v58 = vld [vmem:[#allocation7 + $0x80] sm:$0xff] }
 0x5ae   : > { %5000 = vmatpush.bf16.msrb.mxu2 %v12071_v46  ;;  %4975 = vmatpush.bf16.msrb.mxu0 %v12073_v21  ;;  %v5075_v46 = vld [vmem:[#allocation7 + $0x148] sm:$0xff] }
 0x5af   : > { %v5051_v21 = vld [vmem:[#allocation7 + $0x88] sm:$0xff] }
 0x5b0   : > { %5013 = vmatpush.bf16.msrb.mxu3 %v12072_v50  ;;  %4988 = vmatpush.bf16.msrb.mxu1 %v12074_v57  ;;  %v5035_v50 = vld [vmem:[#allocation7 + $0x8] sm:$0xff]  ;;  %v5074_v57 = vld [vmem:[#allocation7 + $0x140] sm:$0xff] }
 0x5b2   : > { %5001 = vmatpush.bf16.msrb.mxu2 %v9936_v27  ;;  %4976 = vmatpush.bf16.msrb.mxu0 %v9942_v37  ;;  %v4733_v37 = vadd.f32 %v4732_v48, %v4720_v62  ;;  %v5064_v27 = vld [vmem:[#allocation7 + $0xf0] sm:$0xff]  ;;  %v5073_v62 = vld [vmem:[#allocation7 + $0x138] sm:$0xff] }
 0x5b4   : > { %5014 = vmatpush.bf16.msrb.mxu3 %v9939_v60  ;;  %4989 = vmatpush.bf16.msrb.mxu1 %v9946_v43  ;;  %v5048_v60 = vld [vmem:[#allocation7 + $0x70] sm:$0xff]  ;;  %v5047_v43 = vld [vmem:[#allocation7 + $0x68] sm:$0xff] }
 0x5b6   : > { %5002 = vmatpush.bf16.msrb.mxu2 %v9948_v24  ;;  %4977 = vmatpush.bf16.msrb.mxu0 %v9954_v1  ;;  %v4746_v24 = vadd.f32 %v4745_v3, %v4733_v37  ;;  %v5046_v1 = vld [vmem:[#allocation7 + $0x60] sm:$0xff]  ;;  %v5037_v3 = vld [vmem:[#allocation7 + $0x18] sm:$0xff]  ;;  %v5071_v37 = vld [vmem:[#allocation7 + $0x128] sm:$0xff] }
 0x5b8   : > { %5015 = vmatpush.bf16.msrb.mxu3 %v9951_v35  ;;  %4990 = vmatpush.bf16.msrb.mxu1 %v9958_v49  ;;  %v5063_v35 = vld [vmem:[#allocation7 + $0xe8] sm:$0xff]  ;;  %v5062_v49 = vld [vmem:[#allocation7 + $0xe0] sm:$0xff]  ;;  %v4784_v9 = vpop.f32.mrf.mxu1 }
 0x5b9   : > { %4978 = vmatmul.bf16.vlgmr.msrb.gmra.mxu0 %v10057_v53  ;;  %v4771_v53 = vpop.f32.mrf.mxu0 }
 0x5ba   : > { %5003 = vmatpush.bf16.msrb.mxu2 %v9960_v55  ;;  %5098 = vmatpush.msra.mxu0 %v5049_v5  ;;  %v5045_v55 = vld [vmem:[#allocation7 + $0x58] sm:$0xff] }
 0x5bb   : > { %4991 = vmatmul.bf16.vlgmr.msrb.gmra.mxu1 %v10063_v30  ;;  %v5044_v30 = vld [vmem:[#allocation7 + $0x50] sm:$0xff] }
 0x5bc   : > { %5016 = vmatpush.bf16.msrb.mxu3 %v9963_v31  ;;  %5118 = vmatpush.msra.mxu1 %v5065_v56  ;;  %v4759_v31 = vadd.f32 %v4758_v29, %v4746_v24 }
 0x5bd   : > { %5004 = vmatmul.bf16.vlgmr.msrb.gmra.mxu2 %v10061_v39  ;;  %5099 = vmatpush.msra.mxu0 %v5048_v60  ;;  %v5060_v39 = vld [vmem:[#allocation7 + $0xd0] sm:$0xff] }
 0x5be   : > { %5119 = vmatpush.msra.mxu1 %v5064_v27  ;;  %v4772_v33 = vadd.f32 %v4771_v53, %v4759_v31  ;;  %5138 = vmatpush.msra.mxu2 %v5081_v0  ;;  %v5072_v60 = vld [vmem:[#allocation7 + $0x130] sm:$0xff]  ;;  %v5070_v27 = vld [vmem:[#allocation7 + $0x120] sm:$0xff] }
 0x5bf   : > { %5017 = vmatmul.bf16.vlgmr.msrb.gmra.mxu3 %v10067_v61  ;;  %5100 = vmatpush.msra.mxu0 %v5047_v43  ;;  %v5043_v61 = vld [vmem:[#allocation7 + $0x48] sm:$0xff]  ;;  %v5066_v31 = vld [vmem:[#allocation7 + $0x100] sm:$0xff] }
 0x5c0   : > { %5120 = vmatpush.msra.mxu1 %v5063_v35  ;;  %v4785_v19 = vadd.f32 %v4784_v9, %v4772_v33  ;;  %v4797_v26 = vpop.f32.mrf.mxu2  ;;  %v4786_v11 = vpop.f32.mrf.mxu1  ;;  %5139 = vmatpush.msra.mxu2 %v5080_v36  ;;  %v5095_v36 = vld [vmem:[#allocation7 + $0x1e8] sm:$0xff] }
 0x5c1   : > { %5101 = vmatpush.msra.mxu0 %v5046_v1  ;;  %v4773_v13 = vpop.f32.mrf.mxu0  ;;  %v5094_v11 = vld [vmem:[#allocation7 + $0x1e0] sm:$0xff] }
 0x5c2   : > { %5121 = vmatpush.msra.mxu1 %v5062_v49  ;;  %v4798_v51 = vadd.f32 %v4797_v26, %v4785_v19  ;;  %v4810_v59 = vpop.f32.mrf.mxu3  ;;  %5140 = vmatpush.msra.mxu2 %v5079_v54  ;;  %v5069_v49 = vld [vmem:[#allocation7 + $0x118] sm:$0xff] }
 0x5c3   : > { %5102 = vmatpush.msra.mxu0 %v5045_v55  ;;  %v5068_v55 = vld [vmem:[#allocation7 + $0x110] sm:$0xff] }
 0x5c4   : > { %5122 = vmatpush.msra.mxu1 %v5061_v25  ;;  %v4811_v32 = vadd.f32 %v4810_v59, %v4798_v51  ;;  %5141 = vmatpush.msra.mxu2 %v5078_v6  ;;  %v5097_v51 = vld [vmem:[#allocation7 + $0x1f8] sm:$0xff]  ;;  %v5096_v59 = vld [vmem:[#allocation7 + $0x1f0] sm:$0xff] }
 0x5c5   : > { %5103 = vmatpush.msra.mxu0 %v5044_v30  ;;  %5158 = vmatpush.msra.mxu3 %v5097_v51  ;;  %v5089_v6 = vld [vmem:[#allocation7 + $0x1b8] sm:$0xff] }
 0x5c6   : > { %5123 = vmatpush.msra.mxu1 %v5060_v39  ;;  %v5027_v48 = vmul.f32 %v4811_v32, %v4811_v32  ;;  %5142 = vmatpush.msra.mxu2 %v5077_v17  ;;  %v5093_v32 = vld [vmem:[#allocation7 + $0x1d8] sm:$0xff]  ;;  %v5086_v17 = vld [vmem:[#allocation7 + $0x1a0] sm:$0xff] }
 0x5c7   : > { %5104 = vmatpush.msra.mxu0 %v5043_v61  ;;  %5159 = vmatpush.msra.mxu3 %v5096_v59 }
 0x5c8   : > { %5124 = vmatpush.msra.mxu1 %v5059_v44  ;;  %v5031_v47 = vadd.f32 %v5027_v48, %v5023_v18  ;;  %v4799_v29 = vpop.f32.mrf.mxu2  ;;  %5143 = vmatpush.msra.mxu2 %v5076_v12  ;;  %v5092_v18 = vld [vmem:[#allocation7 + $0x1d0] sm:$0xff]  ;;  %v5091_v48 = vld [vmem:[#allocation7 + $0x1c8] sm:$0xff] }
 0x5c9   : > { %5105 = vmatpush.msra.mxu0 %v5042_v22  ;;  %5160 = vmatpush.msra.mxu3 %v5095_v36  ;;  %v5085_v29 = vld [vmem:[#allocation7 + $0x198] sm:$0xff] }
 0x5ca   : > { %5125 = vmatpush.msra.mxu1 %v5058_v45  ;;  %v4812_v7 = vpop.f32.mrf.mxu3  ;;  %5144 = vmatpush.msra.mxu2 %v5075_v46  ;;  %v5082_v46 = vld [vmem:[#allocation7 + $0x180] sm:$0xff] }
 0x5cb   : > { %5106 = vmatpush.msra.mxu0 %v5041_v52  ;;  %5161 = vmatpush.msra.mxu3 %v5094_v11 }
 0x5cc   : > { %5126 = vmatpush.msra.mxu1 %v5057_v10  ;;  %5145 = vmatpush.msra.mxu2 %v5074_v57 }
 0x5cd   : > { %5107 = vmatpush.msra.mxu0 %v5040_v4  ;;  %5162 = vmatpush.msra.mxu3 %v5093_v32 }
 0x5ce   : > { %5127 = vmatpush.msra.mxu1 %v5056_v40  ;;  %5146 = vmatpush.msra.mxu2 %v5073_v62 }
 0x5cf   : > { %5108 = vmatpush.msra.mxu0 %v5039_v41  ;;  %5163 = vmatpush.msra.mxu3 %v5092_v18 }
 0x5d0   : > { %5128 = vmatpush.msra.mxu1 %v5055_v16  ;;  %5147 = vmatpush.msra.mxu2 %v5072_v60  ;;  %v5090_v16 = vld [vmem:[#allocation7 + $0x1c0] sm:$0xff] }
 0x5d1   : > { %5109 = vmatpush.msra.mxu0 %v5038_v23  ;;  %5164 = vmatpush.msra.mxu3 %v5091_v48 }
 0x5d2   : > { %5129 = vmatpush.msra.mxu1 %v5054_v20  ;;  %5148 = vmatpush.msra.mxu2 %v5071_v37  ;;  %v5087_v20 = vld [vmem:[#allocation7 + $0x1a8] sm:$0xff] }
 0x5d3   : > { %5110 = vmatpush.msra.mxu0 %v5037_v3  ;;  %5165 = vmatpush.msra.mxu3 %v5090_v16 }
 0x5d4   : > { %5130 = vmatpush.msra.mxu1 %v5053_v34  ;;  %5149 = vmatpush.msra.mxu2 %v5070_v27 }
 0x5d5   : > { %5111 = vmatpush.msra.mxu0 %v5036_v2  ;;  %5166 = vmatpush.msra.mxu3 %v5089_v6  ;;  %v5084_v2 = vld [vmem:[#allocation7 + $0x190] sm:$0xff] }
 0x5d6   : > { %5131 = vmatpush.msra.mxu1 %v5052_v38  ;;  %v4823_v5 = vpop.f32.mrf.mxu0  ;;  %5150 = vmatpush.msra.mxu2 %v5069_v49  ;;  %v5083_v38 = vld [vmem:[#allocation7 + $0x188] sm:$0xff] }
 0x5d7   : > { %5112 = vmatpush.msra.mxu0 %v5035_v50  ;;  %v4824_v30 = vadd.f32 %v4823_v5, %v10089_v14  ;;  %v5024_v14 = vmul.f32 %v10390_v63, %v10390_v63  ;;  %v5088_v63 = vld [vmem:[#allocation7 + $0x1b0] sm:$0xff] }
 0x5d8   : > { %5132 = vmatpush.msra.mxu1 %v5051_v21  ;;  %v4836_v56 = vpop.f32.mrf.mxu1  ;;  %5151 = vmatpush.msra.mxu2 %v5068_v55  ;;  %v5025_v55 = vmul.f32 %v10465_v15, %v10465_v15 }
 0x5d9   : > { %5113 = vmatpush.msra.mxu0 %v5034_v28  ;;  %v4837_v9 = vadd.f32 %v4836_v56, %v4824_v30  ;;  %5167 = vmatpush.msra.mxu3 %v5088_v63 }
 0x5da   : > { %5133 = vmatpush.msra.mxu1 %v5050_v58  ;;  %5114 = vmatmul.f32.vlgmr.msra.gmra.mxu0 %v10544_v42  ;;  %v5067_v42 = vld [vmem:[#allocation7 + $0x108] sm:$0xff] }
 0x5db   : > { %5134 = vmatmul.f32.vlgmr.msra.gmra.mxu1 %v5031_v47  ;;  %5152 = vmatpush.msra.mxu2 %v5067_v42 }
 0x5dc   : > { %5168 = vmatpush.msra.mxu3 %v5087_v20 }
 0x5dd   : > { %5153 = vmatpush.msra.mxu2 %v5066_v31 }
 0x5de   : > { %v4825_v35 = vpop.f32.mrf.mxu0  ;;  %5169 = vmatpush.msra.mxu3 %v5086_v17 }
 0x5e0   : > { %v4849_v43 = vpop.f32.mrf.mxu2  ;;  %v4838_v1 = vpop.f32.mrf.mxu1  ;;  %5170 = vmatpush.msra.mxu3 %v5085_v29 }
 0x5e1   : > { %v4850_v39 = vadd.f32 %v4849_v43, %v4837_v9 }
 0x5e2   : > { %v4862_v24 = vpop.f32.mrf.mxu3  ;;  %5171 = vmatpush.msra.mxu3 %v5084_v2 }
 0x5e3   : > { %v4863_v33 = vadd.f32 %v4862_v24, %v4850_v39 }
 0x5e4   : > { %5172 = vmatpush.msra.mxu3 %v5083_v38 }
 0x5e6   : > { %5173 = vmatpush.msra.mxu3 %v5082_v46 }
 0x5e8   : > { %v4851_v25 = vpop.f32.mrf.mxu2 }
 0x5ea   : > { %v4864_v53 = vpop.f32.mrf.mxu3 }
 0x5f6   : > { %v4875_v61 = vpop.f32.mrf.mxu0 }
 0x5f7   : > { %v4876_v22 = vadd.f32 %v4875_v61, %v4863_v33 }
 0x5f8   : > { %v4888_v44 = vpop.f32.mrf.mxu1 }
 0x5f9   : > { %v4889_v19 = vadd.f32 %v4888_v44, %v4876_v22 }
 0x5fe   : > { %v4877_v10 = vpop.f32.mrf.mxu0 }
 0x5ff   : > { %v8170_v10 = vmov 40.0  }
 0x600   : > { %v4901_v45 = vpop.f32.mrf.mxu2  ;;  %v4890_v13 = vpop.f32.mrf.mxu1 }
 0x601   : > { %v4902_v52 = vadd.f32 %v4901_v45, %v4889_v19  ;;  %v5180_v19 = vlaneseq }
 0x602   : > { %v4914_v26 = vpop.f32.mrf.mxu3 }
 0x603   : > { %v4915_v0 = vadd.f32 %v4914_v26, %v4902_v52  ;;  %v5181_v45 = vand.u32 127, %v5180_v19 }
 0x605   : > { %v5028_v4 = vmul.f32 %v4915_v0, %v4915_v0  ;;  %vm5182_vm0 = vcmp.lt.s32.totalorder %v5181_v45, 40 }
 0x607   : > { %v5032_v40 = vadd.f32 %v5028_v4, %v5024_v14 }
 0x608   : > { %v4903_v54 = vpop.f32.mrf.mxu2 }
 0x609   : > { %5154 = vmatmul.f32.vlgmr.msra.gmra.mxu2 %v5032_v40 }
 0x60a   : > { %v4916_v41 = vpop.f32.mrf.mxu3 }
 0x60b   : > { %v8171_v41 = vmov 39.0  }
 0x616   : > { %v4927_v23 = vpop.f32.mrf.mxu0 }
 0x617   : > { %v4928_v57 = vadd.f32 %v4927_v23, %v10163_v8 }
 0x618   : > { %v4940_v47 = vpop.f32.mrf.mxu1 }
 0x619   : > { %v4941_v28 = vadd.f32 %v4940_v47, %v4928_v57 }
 0x61e   : > { %v4929_v7 = vpop.f32.mrf.mxu0 }
 0x620   : > { %v4953_v3 = vpop.f32.mrf.mxu2  ;;  %v4942_v12 = vpop.f32.mrf.mxu1 }
 0x621   : > { %v4954_v58 = vadd.f32 %v4953_v3, %v4941_v28 }
 0x622   : > { %v4966_v34 = vpop.f32.mrf.mxu3 }
 0x623   : > { %v4967_v62 = vadd.f32 %v4966_v34, %v4954_v58 }
 0x628   : > { %v4955_v50 = vpop.f32.mrf.mxu2 }
 0x62a   : > { %v4968_v21 = vpop.f32.mrf.mxu3 }
 0x636   : > { %v4979_v5 = vpop.f32.mrf.mxu0 }
 0x637   : > { %v4980_v60 = vadd.f32 %v4979_v5, %v4967_v62 }
 0x638   : > { %v4992_v56 = vpop.f32.mrf.mxu1 }
 0x639   : > { %v4993_v37 = vadd.f32 %v4992_v56, %v4980_v60 }
 0x63e   : > { %v4981_v35 = vpop.f32.mrf.mxu0 }
 0x640   : > { %v5005_v27 = vpop.f32.mrf.mxu2  ;;  %v4994_v1 = vpop.f32.mrf.mxu1 }
 0x641   : > { %v5006_v43 = vadd.f32 %v5005_v27, %v4993_v37 }
 0x642   : > { %v5018_v24 = vpop.f32.mrf.mxu3 }
 0x643   : > { %v5019_v49 = vadd.f32 %v5018_v24, %v5006_v43 }
 0x645   : > { %v5029_v42 = vmul.f32 %v5019_v49, %v5019_v49 }
 0x647   : > { %v5033_v31 = vadd.f32 %v5029_v42, %v5025_v55 }
 0x648   : > { %v5007_v25 = vpop.f32.mrf.mxu2 }
 0x649   : > { %5174 = vmatmul.f32.vlgmr.msra.gmra.mxu3 %v5033_v31 }
 0x64a   : > { %v5020_v8 = vpop.f32.mrf.mxu3 }
 0x657   : > { %v5115_v53 = vpop.f32.mrf.mxu0 }
 0x658   : > { %v5116_v30 = vadd.f32 1e-09, %v5115_v53  ;;  %v5135_v9 = vpop.f32.mrf.mxu1 }
 0x65a   : > { %v5136_v33 = vadd.f32 %v5135_v9, %v5116_v30 }
 0x68c   : > { %v5155_v39 = vpop.f32.mrf.mxu2 }
 0x68d   : > { %v5156_v61 = vadd.f32 %v5155_v39, %v5136_v33 }
 0x6cc   : > { %v5175_v44 = vpop.f32.mrf.mxu3 }
 0x6cd   : > { %v5176_v22 = vadd.f32 %v5175_v44, %v5156_v61 }
 0x6cf   : > { %7992 = vlog2.f32 %v5176_v22 }
 0x6d0   : > { %7994 = vrcp.f32 %v8170_v10 }
 0x6d1   : > { %7996 = vrcp.f32 %v8171_v41 }
 0x6d5   : > { %v7993_v52 = vpop.eup %7992 }
 0x6d6   : > { %v5179_v26 = vmul.f32 0.6931472, %v7993_v52  ;;  %v7995_v51 = vpop.eup %7994 }
 0x6d7   : > { %v5187_v59 = vmul.f32 40.0, %v7995_v51  ;;  %vm5191_vm1 = vweird.f32 %v7995_v51  ;;  %v7997_v18 = vpop.eup %7996 }
 0x6d8   : > { %v5183_v15 = vsel %vm5182_vm0, %v5179_v26, 0.0  ;;  %v5200_v48 = vmul.f32 39.0, %v7997_v18  ;;  %vm5204_vm2 = vweird.f32 %v7997_v18 }
 0x6d9   : > { %5184 = vadd.xlane.f32.xlu0 %v5183_v15  ;;  %v5188_v13 = vsub.f32 1.0, %v5187_v59 }
 0x6da   : > { %v5201_v16 = vsub.f32 1.0, %v5200_v48 }
 0x6db   : > { %v5189_v0 = vmul.f32 %v7995_v51, %v5188_v13 }
 0x6dc   : > { %v5202_v6 = vmul.f32 %v7997_v18, %v5201_v16 }
 0x6dd   : > { %v5190_v36 = vadd.f32 %v7995_v51, %v5189_v0 }
 0x6de   : > { %v5203_v23 = vadd.f32 %v7997_v18, %v5202_v6 }
 0x6df   : > { %v5192_v14 = vsel %vm5191_vm1, %v7995_v51, %v5190_v36 }
 0x6e0   : > { %v5205_v63 = vsel %vm5204_vm2, %v7997_v18, %v5203_v23 }
 0x74c   : > { %v5185_v4 = vpop.xlane.xlu0 %5184 }
 0x74d   : > { %v5193_v11 = vmul.f32 %v5192_v14, %v5185_v4 }
 0x74f   : > { %v5194_v40 = vsub.f32 %v5179_v26, %v5193_v11 }
 0x751   : > { %v5195_v32 = vsel %vm5182_vm0, %v5194_v40, 0.0 }
 0x752   : > { %v5196_v54 = vmul.f32 %v5195_v32, %v5195_v32 }
 0x754   : > { %5197 = vadd.xlane.f32.xlu0 %v5196_v54 }
 0x7c7   : > { %v5198_v47 = vpop.xlane.xlu0 %5197 }
 0x7c8   : > { %v5206_v20 = vmul.f32 %v5205_v63, %v5198_v47 }
 0x7ca   : > { %7998 = vrsqrt.f32 %v5206_v20  ;;  %vm5214_vm3 = vcmp.eq.f32.partialorder %v5206_v20, inf  ;;  %v5217_v38 = vand.u32 2147483648, %v5206_v20  ;;  %vm5216_vm4 = vcmp.eq.f32.partialorder %v5206_v20, 0.0 }
 0x7d0   : > { %v7999_v17 = vpop.eup %7998 }
 0x7d1   : > { %v5208_v3 = vmul.f32 %v7999_v17, %v5206_v20 }
 0x7d3   : > { %v5209_v29 = vmul.f32 %v7999_v17, %v5208_v3 }
 0x7d5   : > { %v5210_v34 = vmul.f32 0.5, %v5209_v29 }
 0x7d7   : > { %v5211_v7 = vsub.f32 1.5, %v5210_v34 }
 0x7d9   : > { %v5212_v12 = vmul.f32 %v7999_v17, %v5211_v7 }
 0x7db   : > { %v5213_v2 = vmul.f32 %v5212_v12, %v5206_v20 }
 0x7dd   : > { %v5215_v46 = vsel %vm5214_vm3, %v5206_v20, %v5213_v2 }
 0x7de   : > { %v5218_v50 = vsel %vm5216_vm4, %v5217_v38, %v5215_v46 }
 0x7df   : > { %v5219_v21 = vadd.f32 1e-09, %v5218_v50 }
 0x7e1   : > { %8000 = vrcp.f32 %v5219_v21  ;;  %v5231_v62 = vand.u32 2147483648, %v5219_v21  ;;  %v5229_v56 = vand.u32 2147483647, %v5219_v21  ;;  %vm5225_vm6 = vweird.f32 %v5219_v21 }
 0x7e3   : > { %v5232_v37 = vor.u32 1.1754944e-38, %v5231_v62  ;;  %vm5230_vm8 = vcmp.eq.f32.partialorder %v5229_v56, 8.507059e+37 }
 0x7e7   : > { %v8001_v57 = vpop.eup %8000 }
 0x7e8   : > { %v5221_v28 = vmul.f32 %v8001_v57, %v5219_v21  ;;  %vm5226_vm5 = vweird.f32 %v8001_v57 }
 0x7e9   : > { %vm5227_vm7 = vmor %vm5225_vm6, %vm5226_vm5 }
 0x7ea   : > { %v5222_v58 = vsub.f32 1.0, %v5221_v28 }
 0x7ec   : > { %v5223_v5 = vmul.f32 %v8001_v57, %v5222_v58 }
 0x7ee   : > { %v5224_v60 = vadd.f32 %v8001_v57, %v5223_v5 }
 0x7f0   : > { %v5228_v27 = vsel %vm5227_vm7, %v8001_v57, %v5224_v60 }
 0x7f1   : > { %v5233_v43 = vsel %vm5230_vm8, %v5232_v37, %v5228_v27 }
 0x7f2   : > { %v5234_v24 = vmul.f32 %v5233_v43, %v5194_v40 }
 0x7f4   : > { %5235 = vst [vmem:[%s221_s29] sm:$0xff] %v5234_v24 }
 0x7f5   : > { %8119 = shalt.err (!%p8116_p9)
}
 0x7f6   : > { %7929 = dma.vmem_to_hbm [thread:$0]  (%p8261_p4), %s5250_s30, 128, %s5252_s4, %s5237_s19  }
 0x7f7 PF: > { %s5263_s16 = sand.u32 1, %s8150_s12   ;;  %p12075_p10 = scmp.ge.s32.totalorder %s8162_s15, 2 }
 0x7f8   : > { %s5264_s24 = scalar_lea.sflag [#allocation4], %s5263_s16 }
 0x7f9   : > { %p7943_p13 = pnand %p12075_p10, %p8265_p6 }
 0x7fb   : > { %p7944_p11 = pneg %p7943_p13 }
 0x7fd   : > { %8145 = dma.done.wait (%p7944_p11), %s5264_s24, 128  }
 0x7fe   : > { %8147 = vsyncadd (%p7944_p11), %s5264_s24, 4294967168  ;;  %p17_p0 = scmp.ge.s32.totalorder %s8235_s6, 4   ;;  %s12076_s12 = smov %s8154_s13 }
 0x7ff   : > { %s12077_s13 = smov %s8158_s14  ;;  %s12078_s14 = smov %s8246_s9 }
 0x800   : > { %s12079_s15 = smov %s8235_s6  ;;  %19 = sbr.rel (!%p17_p0) target bundleno = 6 (0x6), region = 85 }
 0x805   :  { %5270 = vsyncpa [#allocation3], 1 }
 0x806   :  { %5272 = vsyncpa [#allocation3 + $0x1], 1 }
 0x807   :  { %5273 = vsyncpa [#allocation6], 1 }
 0x808   :  { %5274 = vsyncpa [#allocation4], 1 }
 0x809   :  { %5276 = vsyncpa [#allocation4 + $0x1], 1 }

</bundles_post_ra>
